<compile_context>
chip_gen: v7x
topology: tpu7x:2x2x1
jax: 0.10.0
libtpu: 0.0.40
codegen_flags: <defaults>
</compile_context>

<pallas_src>
import jax
import jax.numpy as jnp
from jax.experimental import pallas as pl
from jax.experimental.pallas import tpu as pltpu


def _leaky(x, slope=0.2):
    return jnp.where(x > 0, x, slope * x)


def disc_fea_kernel(x_ref,
                    w1_ref, w2_ref, w3_ref, w4_ref, w5_ref,
                    sh2_ref, sh3_ref, sh4_ref,
                    o_ref):
    # x_ref : (1, C, tm) bf16 (or f32) pixel tile (channels on sublanes, pixels on lanes)
    # w1..w4: (out_c, in_c) bf16 conv weights (BN scale already folded in)
    # w5    : (64, 1) f32 column of the final 1x1 conv (VPU/XLU path, no MXU)
    # shN   : (out_c, 1) f32 BN shifts
    # o_ref : (1, 1, tm) f32 lane-dense output tile
    x = x_ref[0]
    if x.dtype != jnp.bfloat16:          # static dtype branch; no-op for bf16 input
        x = x.astype(jnp.bfloat16)

    h = jnp.dot(w1_ref[...], x, preferred_element_type=jnp.float32)      # (512, tm)
    h = _leaky(h)

    h = jnp.dot(w2_ref[...], h.astype(jnp.bfloat16),
                preferred_element_type=jnp.float32)                      # (256, tm)
    h = _leaky(h + sh2_ref[...])

    h = jnp.dot(w3_ref[...], h.astype(jnp.bfloat16),
                preferred_element_type=jnp.float32)                      # (128, tm)
    h = _leaky(h + sh3_ref[...])

    h = jnp.dot(w4_ref[...], h.astype(jnp.bfloat16),
                preferred_element_type=jnp.float32)                      # (64, tm)
    h = _leaky(h + sh4_ref[...])

    # Final 64->1 "conv": M=1 matmul would waste the MXU, so do a VPU multiply
    # and an XLU sublane reduce in f32 (also slightly more accurate).
    logit = jnp.sum(w5_ref[...] * h, axis=0, keepdims=True)              # (1, tm)

    # sigmoid via EUP exp + approx reciprocal (free slot vs VALU divide)
    o_ref[0] = pl.reciprocal(1.0 + jnp.exp(-logit), approx=True)


def _fold_params(raw, eps=1e-5):
    """Fold eval-mode BN into the preceding conv weights; cast MXU weights to bf16."""
    def fold(w, bn):
        gamma, beta, mean, var = bn
        scale = gamma / jnp.sqrt(var + eps)
        shift = beta - mean * scale
        return (scale[:, None] * w), shift[:, None]

    w2, sh2 = fold(raw["w2"], raw["bn2"])
    w3, sh3 = fold(raw["w3"], raw["bn3"])
    w4, sh4 = fold(raw["w4"], raw["bn4"])
    return (raw["w1"].astype(jnp.bfloat16),
            w2.astype(jnp.bfloat16),
            w3.astype(jnp.bfloat16),
            w4.astype(jnp.bfloat16),
            jnp.transpose(raw["w5"]).astype(jnp.float32),  # (64, 1) f32 column
            sh2.astype(jnp.float32),
            sh3.astype(jnp.float32),
            sh4.astype(jnp.float32))


def discriminator_fea_forward(x_nchw, raw_params, *, tm=2048):
    """x_nchw: (N, nc, H, W) bfloat16 (preferred) or float32.

    Returns (N, 1, H, W) float32.
    """
    N, C, H, W = x_nchw.shape
    HW = H * W

    # Small-HW regime: fold batch into the lane axis so each tile presents
    # lane-dense pixels (>=128) instead of masked sub-128-lane stores.
    fold_batch = (HW < 128) and (N > 1)
    if fold_batch:
        x3d = jnp.transpose(x_nchw, (1, 0, 2, 3)).reshape(1, C, N * HW)
        b_eff, pix = 1, N * HW
    else:
        x3d = x_nchw.reshape(N, C, HW)          # free reshape, NO transpose
        b_eff, pix = N, HW

    # Pixel-tile size: full extent if small, else a lane-aligned multiple of 128.
    if pix <= tm:
        tm = pix
    else:
        tm = max(128, (tm // 128) * 128)
    n_tiles = pl.cdiv(pix, tm)
    pix_pad = n_tiles * tm
    if pix_pad != pix:
        x3d = jnp.pad(x3d, ((0, 0), (0, 0), (0, pix_pad - pix)))

    (w1, w2, w3, w4, w5, sh2, sh3, sh4) = _fold_params(raw_params)

    def run(weight_mode):
        def resident(arr):
            nd = arr.ndim
            kwargs = {} if weight_mode is None else {"pipeline_mode": weight_mode}
            return pl.BlockSpec(arr.shape, lambda n, i, _nd=nd: (0,) * _nd, **kwargs)

        return pl.pallas_call(
            disc_fea_kernel,
            out_shape=jax.ShapeDtypeStruct((b_eff, 1, pix_pad), jnp.float32),
            grid_spec=pltpu.PrefetchScalarGridSpec(
                num_scalar_prefetch=0,
                grid=(b_eff, n_tiles),
                in_specs=[
                    pl.BlockSpec((1, C, tm), lambda n, i: (n, 0, i)),   # x tile
                    resident(w1), resident(w2), resident(w3),
                    resident(w4), resident(w5),
                    resident(sh2), resident(sh3), resident(sh4),
                ],
                out_specs=pl.BlockSpec((1, 1, tm), lambda n, i: (n, 0, i)),
            ),
            compiler_params=pltpu.CompilerParams(
                dimension_semantics=("parallel", "parallel"),
                vmem_limit_bytes=48 * 1024 * 1024),   # safe under v7x's 64 MiB/TC
        )(x3d, w1, w2, w3, w4, w5, sh2, sh3, sh4)

    try:
        # Constant index_map -> weights fetched once; one buffer is enough.
        out3d = run(pl.Buffered(1))
    except Exception:
        # pipeline_mode / Buffered(1) not supported on this JAX version/path:
        # fall back to default double-buffered resident weights (still correct).
        out3d = run(None)

    return out3d[:, :, :pix].reshape(N, 1, H, W)


def make_params(key, nc=512, ndf=64):
    """Deterministic synthetic parameters matching the PyTorch module."""
    c1, c2, c3, c4, c5 = nc, ndf * 8, ndf * 4, ndf * 2, ndf
    ks = jax.random.split(key, 17)

    def conv_w(k, out_c, in_c):
        # PyTorch Conv2d weight (out_c, in_c, 1, 1) squeezed to (out_c, in_c).
        return jax.random.normal(k, (out_c, in_c), jnp.float32) * 0.02

    def bn(kg, kb, km, kv, ch):
        gamma = 1.0 + 0.1 * jax.random.normal(kg, (ch,), jnp.float32)
        beta = 0.1 * jax.random.normal(kb, (ch,), jnp.float32)
        mean = 0.1 * jax.random.normal(km, (ch,), jnp.float32)
        var = 1.0 + 0.1 * jax.random.uniform(kv, (ch,), jnp.float32)
        return (gamma, beta, mean, var)

    return {
        "w1": conv_w(ks[0], c2, c1),   # 512 -> 512
        "w2": conv_w(ks[1], c3, c2),   # 512 -> 256
        "w3": conv_w(ks[2], c4, c3),   # 256 -> 128
        "w4": conv_w(ks[3], c5, c4),   # 128 -> 64
        "w5": conv_w(ks[4], 1, c5),    # 64  -> 1
        "bn2": bn(ks[5], ks[6], ks[7], ks[8], c3),
        "bn3": bn(ks[9], ks[10], ks[11], ks[12], c4),
        "bn4": bn(ks[13], ks[14], ks[15], ks[16], c5),
    }


def reference_forward(x_nchw, raw, eps=1e-5):
    """Pure-JAX f32 reference matching the PyTorch module (eval-mode BN)."""
    N, C, H, W = x_nchw.shape
    h = x_nchw.reshape(N, C, H * W)

    def conv(h, w):
        return jnp.einsum('oi,nim->nom', w, h)

    def bnorm(h, bn):
        gamma, beta, mean, var = (p[None, :, None] for p in bn)
        return (h - mean) / jnp.sqrt(var + eps) * gamma + beta

    h = _leaky(conv(h, raw["w1"]))
    h = _leaky(bnorm(conv(h, raw["w2"]), raw["bn2"]))
    h = _leaky(bnorm(conv(h, raw["w3"]), raw["bn3"]))
    h = _leaky(bnorm(conv(h, raw["w4"]), raw["bn4"]))
    h = jax.nn.sigmoid(conv(h, raw["w5"]))
    return h.reshape(N, 1, H, W)


if __name__ == "__main__":
    key = jax.random.PRNGKey(0)
    k_x, k_p = jax.random.split(key)

    nc, ndf = 512, 64
    N, H, W = 2, 16, 16            # HW = 256 -> one lane-dense pixel tile per batch

    x_f32 = jax.random.normal(k_x, (N, nc, H, W), jnp.float32)
    # Feed the kernel bf16 at the boundary (halves the HBM read, per review);
    # the f32 reference runs on the identically-rounded values for a fair check.
    x_bf16 = x_f32.astype(jnp.bfloat16)
    raw = make_params(k_p, nc=nc, ndf=ndf)

    out = discriminator_fea_forward(x_bf16, raw)
    out = jax.block_until_ready(out)

    ref = reference_forward(x_bf16.astype(jnp.float32), raw)
    assert out.shape == (N, 1, H, W)
    # bf16 MXU inputs vs f32 reference -> loosened tolerance.
    assert jnp.allclose(out, ref, atol=2e-2, rtol=2e-2), float(
        jnp.max(jnp.abs(out - ref)))

    print("KERNEL_OK")
</pallas_src>

<mosaic_0001>
module attributes {stable_mosaic.version = 11 : i64} {
  func.func @disc_fea_kernel(%arg0: i32, %arg1: i32, %arg2: memref<1x512x256xbf16, #tpu.memory_space<vmem>>, %arg3: memref<512x512xbf16, #tpu.memory_space<vmem>>, %arg4: memref<256x512xbf16, #tpu.memory_space<vmem>>, %arg5: memref<128x256xbf16, #tpu.memory_space<vmem>>, %arg6: memref<64x128xbf16, #tpu.memory_space<vmem>>, %arg7: memref<64x1xf32, #tpu.memory_space<vmem>>, %arg8: memref<256x1xf32, #tpu.memory_space<vmem>>, %arg9: memref<128x1xf32, #tpu.memory_space<vmem>>, %arg10: memref<64x1xf32, #tpu.memory_space<vmem>>, %arg11: memref<1x1x256xf32, #tpu.memory_space<vmem>>) attributes {dimension_semantics = [#tpu.dimension_semantics<parallel>, #tpu.dimension_semantics<parallel>], iteration_bounds = array<i64: 2, 1>, scalar_prefetch = 0 : i64, scratch_operands = 0 : i64, tpu.core_type = #tpu.core_type<tc>, window_params = [{transform_indices = @transform_0, window_bounds = array<i64: 1, 512, 256>}, {pipeline_mode = #tpu.pipeline_mode<synchronous>, transform_indices = @transform_1, window_bounds = array<i64: 512, 512>}, {pipeline_mode = #tpu.pipeline_mode<synchronous>, transform_indices = @transform_2, window_bounds = array<i64: 256, 512>}, {pipeline_mode = #tpu.pipeline_mode<synchronous>, transform_indices = @transform_3, window_bounds = array<i64: 128, 256>}, {pipeline_mode = #tpu.pipeline_mode<synchronous>, transform_indices = @transform_4, window_bounds = array<i64: 64, 128>}, {pipeline_mode = #tpu.pipeline_mode<synchronous>, transform_indices = @transform_5, window_bounds = array<i64: 64, 1>}, {pipeline_mode = #tpu.pipeline_mode<synchronous>, transform_indices = @transform_6, window_bounds = array<i64: 256, 1>}, {pipeline_mode = #tpu.pipeline_mode<synchronous>, transform_indices = @transform_7, window_bounds = array<i64: 128, 1>}, {pipeline_mode = #tpu.pipeline_mode<synchronous>, transform_indices = @transform_8, window_bounds = array<i64: 64, 1>}, {transform_indices = @transform_9, window_bounds = array<i64: 1, 1, 256>}]} {
    %c0 = arith.constant 0 : index
    %c0_0 = arith.constant 0 : index
    %c0_1 = arith.constant 0 : index
    %0 = vector.load %arg2[%c0, %c0_0, %c0_1] : memref<1x512x256xbf16, #tpu.memory_space<vmem>>, vector<1x512x256xbf16>
    %1 = vector.shape_cast %0 : vector<1x512x256xbf16> to vector<512x256xbf16>
    %c0_2 = arith.constant 0 : index
    %c0_3 = arith.constant 0 : index
    %2 = vector.load %arg3[%c0_2, %c0_3] : memref<512x512xbf16, #tpu.memory_space<vmem>>, vector<512x512xbf16>
    %cst = arith.constant dense<0.000000e+00> : vector<512x256xf32>
    %3 = tpu.matmul %2, %1, %cst {dimension_numbers = #tpu.dot_dimension_numbers<[1], [0], [0], [1], [0, 0, 1, 1], [], []>} : vector<512x512xbf16>, vector<512x256xbf16>, vector<512x256xf32> -> vector<512x256xf32>
    %cst_4 = arith.constant 0.000000e+00 : f32
    %4 = vector.broadcast %cst_4 : f32 to vector<512x256xf32>
    %5 = arith.cmpf ogt, %3, %4 : vector<512x256xf32>
    %cst_5 = arith.constant 2.000000e-01 : f32
    %6 = vector.broadcast %cst_5 : f32 to vector<512x256xf32>
    %7 = arith.mulf %6, %3 : vector<512x256xf32>
    %8 = arith.select %5, %3, %7 : vector<512x256xi1>, vector<512x256xf32>
    %c0_6 = arith.constant 0 : index
    %c0_7 = arith.constant 0 : index
    %9 = vector.load %arg4[%c0_6, %c0_7] : memref<256x512xbf16, #tpu.memory_space<vmem>>, vector<256x512xbf16>
    %10 = arith.truncf %8 : vector<512x256xf32> to vector<512x256xbf16>
    %cst_8 = arith.constant dense<0.000000e+00> : vector<256x256xf32>
    %11 = tpu.matmul %9, %10, %cst_8 {dimension_numbers = #tpu.dot_dimension_numbers<[1], [0], [0], [1], [0, 0, 1, 1], [], []>} : vector<256x512xbf16>, vector<512x256xbf16>, vector<256x256xf32> -> vector<256x256xf32>
    %c0_9 = arith.constant 0 : index
    %c0_10 = arith.constant 0 : index
    %12 = vector.load %arg8[%c0_9, %c0_10] : memref<256x1xf32, #tpu.memory_space<vmem>>, vector<256x1xf32>
    %13 = vector.broadcast %12 : vector<256x1xf32> to vector<256x256xf32>
    %14 = arith.addf %11, %13 : vector<256x256xf32>
    %cst_11 = arith.constant 0.000000e+00 : f32
    %15 = vector.broadcast %cst_11 : f32 to vector<256x256xf32>
    %16 = arith.cmpf ogt, %14, %15 : vector<256x256xf32>
    %cst_12 = arith.constant 2.000000e-01 : f32
    %17 = vector.broadcast %cst_12 : f32 to vector<256x256xf32>
    %18 = arith.mulf %17, %14 : vector<256x256xf32>
    %19 = arith.select %16, %14, %18 : vector<256x256xi1>, vector<256x256xf32>
    %c0_13 = arith.constant 0 : index
    %c0_14 = arith.constant 0 : index
    %20 = vector.load %arg5[%c0_13, %c0_14] : memref<128x256xbf16, #tpu.memory_space<vmem>>, vector<128x256xbf16>
    %21 = arith.truncf %19 : vector<256x256xf32> to vector<256x256xbf16>
    %cst_15 = arith.constant dense<0.000000e+00> : vector<128x256xf32>
    %22 = tpu.matmul %20, %21, %cst_15 {dimension_numbers = #tpu.dot_dimension_numbers<[1], [0], [0], [1], [0, 0, 1, 1], [], []>} : vector<128x256xbf16>, vector<256x256xbf16>, vector<128x256xf32> -> vector<128x256xf32>
    %c0_16 = arith.constant 0 : index
    %c0_17 = arith.constant 0 : index
    %23 = vector.load %arg9[%c0_16, %c0_17] : memref<128x1xf32, #tpu.memory_space<vmem>>, vector<128x1xf32>
    %24 = vector.broadcast %23 : vector<128x1xf32> to vector<128x256xf32>
    %25 = arith.addf %22, %24 : vector<128x256xf32>
    %cst_18 = arith.constant 0.000000e+00 : f32
    %26 = vector.broadcast %cst_18 : f32 to vector<128x256xf32>
    %27 = arith.cmpf ogt, %25, %26 : vector<128x256xf32>
    %cst_19 = arith.constant 2.000000e-01 : f32
    %28 = vector.broadcast %cst_19 : f32 to vector<128x256xf32>
    %29 = arith.mulf %28, %25 : vector<128x256xf32>
    %30 = arith.select %27, %25, %29 : vector<128x256xi1>, vector<128x256xf32>
    %c0_20 = arith.constant 0 : index
    %c0_21 = arith.constant 0 : index
    %31 = vector.load %arg6[%c0_20, %c0_21] : memref<64x128xbf16, #tpu.memory_space<vmem>>, vector<64x128xbf16>
    %32 = arith.truncf %30 : vector<128x256xf32> to vector<128x256xbf16>
    %cst_22 = arith.constant dense<0.000000e+00> : vector<64x256xf32>
    %33 = tpu.matmul %31, %32, %cst_22 {dimension_numbers = #tpu.dot_dimension_numbers<[1], [0], [0], [1], [0, 0, 1, 1], [], []>} : vector<64x128xbf16>, vector<128x256xbf16>, vector<64x256xf32> -> vector<64x256xf32>
    %c0_23 = arith.constant 0 : index
    %c0_24 = arith.constant 0 : index
    %34 = vector.load %arg10[%c0_23, %c0_24] : memref<64x1xf32, #tpu.memory_space<vmem>>, vector<64x1xf32>
    %35 = vector.broadcast %34 : vector<64x1xf32> to vector<64x256xf32>
    %36 = arith.addf %33, %35 : vector<64x256xf32>
    %cst_25 = arith.constant 0.000000e+00 : f32
    %37 = vector.broadcast %cst_25 : f32 to vector<64x256xf32>
    %38 = arith.cmpf ogt, %36, %37 : vector<64x256xf32>
    %cst_26 = arith.constant 2.000000e-01 : f32
    %39 = vector.broadcast %cst_26 : f32 to vector<64x256xf32>
    %40 = arith.mulf %39, %36 : vector<64x256xf32>
    %41 = arith.select %38, %36, %40 : vector<64x256xi1>, vector<64x256xf32>
    %c0_27 = arith.constant 0 : index
    %c0_28 = arith.constant 0 : index
    %42 = vector.load %arg7[%c0_27, %c0_28] : memref<64x1xf32, #tpu.memory_space<vmem>>, vector<64x1xf32>
    %43 = vector.broadcast %42 : vector<64x1xf32> to vector<64x256xf32>
    %44 = arith.mulf %43, %41 : vector<64x256xf32>
    %cst_29 = arith.constant dense<0.000000e+00> : vector<256xf32>
    %45 = vector.multi_reduction <add>, %44, %cst_29 [0] : vector<64x256xf32> to vector<256xf32>
    %46 = vector.shape_cast %45 : vector<256xf32> to vector<1x256xf32>
    %cst_30 = arith.constant 0.000000e+00 : f32
    %47 = vector.broadcast %cst_30 : f32 to vector<1x256xf32>
    %48 = arith.subf %47, %46 : vector<1x256xf32>
    %49 = math.exp %48 : vector<1x256xf32>
    %cst_31 = arith.constant 1.000000e+00 : f32
    %50 = vector.broadcast %cst_31 : f32 to vector<1x256xf32>
    %51 = arith.addf %50, %49 : vector<1x256xf32>
    %52 = tpu.reciprocal %51 {approx = true} : vector<1x256xf32> -> vector<1x256xf32>
    %c0_32 = arith.constant 0 : index
    %c0_33 = arith.constant 0 : index
    %c0_34 = arith.constant 0 : index
    %53 = vector.load %arg11[%c0_32, %c0_33, %c0_34] : memref<1x1x256xf32, #tpu.memory_space<vmem>>, vector<1x1x256xf32>
    %54 = vector.shape_cast %53 : vector<1x1x256xf32> to vector<1x256xf32>
    %55 = vector.shape_cast %52 : vector<1x256xf32> to vector<1x1x256xf32>
    tpu.vector_store %arg11[%c0_32, %c0_33, %c0_34], %55 {strides = array<i32>} : memref<1x1x256xf32, #tpu.memory_space<vmem>>, vector<1x1x256xf32>,
    return
  }
  func.func @transform_0(%arg0: i32, %arg1: i32) -> (i32, i32, i32) {
    %c0_i32 = arith.constant 0 : i32
    %c0_i32_0 = arith.constant 0 : i32
    return %arg0, %c0_i32, %arg1 : i32, i32, i32
  }
  func.func @transform_1(%arg0: i32, %arg1: i32) -> (i32, i32) {
    %c0_i32 = arith.constant 0 : i32
    %c0_i32_0 = arith.constant 0 : i32
    %c0_i32_1 = arith.constant 0 : i32
    return %c0_i32, %c0_i32_0 : i32, i32
  }
  func.func @transform_2(%arg0: i32, %arg1: i32) -> (i32, i32) {
    %c0_i32 = arith.constant 0 : i32
    %c0_i32_0 = arith.constant 0 : i32
    %c0_i32_1 = arith.constant 0 : i32
    return %c0_i32, %c0_i32_0 : i32, i32
  }
  func.func @transform_3(%arg0: i32, %arg1: i32) -> (i32, i32) {
    %c0_i32 = arith.constant 0 : i32
    %c0_i32_0 = arith.constant 0 : i32
    %c0_i32_1 = arith.constant 0 : i32
    return %c0_i32, %c0_i32_0 : i32, i32
  }
  func.func @transform_4(%arg0: i32, %arg1: i32) -> (i32, i32) {
    %c0_i32 = arith.constant 0 : i32
    %c0_i32_0 = arith.constant 0 : i32
    %c0_i32_1 = arith.constant 0 : i32
    return %c0_i32, %c0_i32_0 : i32, i32
  }
  func.func @transform_5(%arg0: i32, %arg1: i32) -> (i32, i32) {
    %c0_i32 = arith.constant 0 : i32
    %c0_i32_0 = arith.constant 0 : i32
    %c0_i32_1 = arith.constant 0 : i32
    return %c0_i32, %c0_i32_0 : i32, i32
  }
  func.func @transform_6(%arg0: i32, %arg1: i32) -> (i32, i32) {
    %c0_i32 = arith.constant 0 : i32
    %c0_i32_0 = arith.constant 0 : i32
    %c0_i32_1 = arith.constant 0 : i32
    return %c0_i32, %c0_i32_0 : i32, i32
  }
  func.func @transform_7(%arg0: i32, %arg1: i32) -> (i32, i32) {
    %c0_i32 = arith.constant 0 : i32
    %c0_i32_0 = arith.constant 0 : i32
    %c0_i32_1 = arith.constant 0 : i32
    return %c0_i32, %c0_i32_0 : i32, i32
  }
  func.func @transform_8(%arg0: i32, %arg1: i32) -> (i32, i32) {
    %c0_i32 = arith.constant 0 : i32
    %c0_i32_0 = arith.constant 0 : i32
    %c0_i32_1 = arith.constant 0 : i32
    return %c0_i32, %c0_i32_0 : i32, i32
  }
  func.func @transform_9(%arg0: i32, %arg1: i32) -> (i32, i32, i32) {
    %c0_i32 = arith.constant 0 : i32
    %c0_i32_0 = arith.constant 0 : i32
    return %arg0, %c0_i32, %arg1 : i32, i32, i32
  }
}

module attributes {stable_mosaic.version = 11 : i64} {
  func.func @disc_fea_kernel(%arg0: i32, %arg1: i32, %arg2: memref<1x512x256xbf16, #tpu.memory_space<vmem>>, %arg3: memref<512x512xbf16, #tpu.memory_space<vmem>>, %arg4: memref<256x512xbf16, #tpu.memory_space<vmem>>, %arg5: memref<128x256xbf16, #tpu.memory_space<vmem>>, %arg6: memref<64x128xbf16, #tpu.memory_space<vmem>>, %arg7: memref<64x1xf32, #tpu.memory_space<vmem>>, %arg8: memref<256x1xf32, #tpu.memory_space<vmem>>, %arg9: memref<128x1xf32, #tpu.memory_space<vmem>>, %arg10: memref<64x1xf32, #tpu.memory_space<vmem>>, %arg11: memref<1x1x256xf32, #tpu.memory_space<vmem>>) attributes {dimension_semantics = [#tpu.dimension_semantics<parallel>, #tpu.dimension_semantics<parallel>], iteration_bounds = array<i64: 2, 1>, scalar_prefetch = 0 : i64, scratch_operands = 0 : i64, tpu.core_type = #tpu.core_type<tc>, window_params = [{transform_indices = @transform_0, window_bounds = array<i64: 1, 512, 256>}, {pipeline_mode = #tpu.pipeline_mode<synchronous>, transform_indices = @transform_1, window_bounds = array<i64: 512, 512>}, {pipeline_mode = #tpu.pipeline_mode<synchronous>, transform_indices = @transform_2, window_bounds = array<i64: 256, 512>}, {pipeline_mode = #tpu.pipeline_mode<synchronous>, transform_indices = @transform_3, window_bounds = array<i64: 128, 256>}, {pipeline_mode = #tpu.pipeline_mode<synchronous>, transform_indices = @transform_4, window_bounds = array<i64: 64, 128>}, {pipeline_mode = #tpu.pipeline_mode<synchronous>, transform_indices = @transform_5, window_bounds = array<i64: 64, 1>}, {pipeline_mode = #tpu.pipeline_mode<synchronous>, transform_indices = @transform_6, window_bounds = array<i64: 256, 1>}, {pipeline_mode = #tpu.pipeline_mode<synchronous>, transform_indices = @transform_7, window_bounds = array<i64: 128, 1>}, {pipeline_mode = #tpu.pipeline_mode<synchronous>, transform_indices = @transform_8, window_bounds = array<i64: 64, 1>}, {transform_indices = @transform_9, window_bounds = array<i64: 1, 1, 256>}]} {
    %c0 = arith.constant 0 : index
    %c0_0 = arith.constant 0 : index
    %c0_1 = arith.constant 0 : index
    %0 = vector.load %arg2[%c0, %c0_0, %c0_1] : memref<1x512x256xbf16, #tpu.memory_space<vmem>>, vector<1x512x256xbf16>
    %1 = vector.shape_cast %0 : vector<1x512x256xbf16> to vector<512x256xbf16>
    %c0_2 = arith.constant 0 : index
    %c0_3 = arith.constant 0 : index
    %2 = vector.load %arg3[%c0_2, %c0_3] : memref<512x512xbf16, #tpu.memory_space<vmem>>, vector<512x512xbf16>
    %cst = arith.constant dense<0.000000e+00> : vector<512x256xf32>
    %3 = tpu.matmul %2, %1, %cst {dimension_numbers = #tpu.dot_dimension_numbers<[1], [0], [0], [1], [0, 0, 1, 1], [], []>} : vector<512x512xbf16>, vector<512x256xbf16>, vector<512x256xf32> -> vector<512x256xf32>
    %cst_4 = arith.constant 0.000000e+00 : f32
    %4 = vector.broadcast %cst_4 : f32 to vector<512x256xf32>
    %5 = arith.cmpf ogt, %3, %4 : vector<512x256xf32>
    %cst_5 = arith.constant 2.000000e-01 : f32
    %6 = vector.broadcast %cst_5 : f32 to vector<512x256xf32>
    %7 = arith.mulf %6, %3 : vector<512x256xf32>
    %8 = arith.select %5, %3, %7 : vector<512x256xi1>, vector<512x256xf32>
    %c0_6 = arith.constant 0 : index
    %c0_7 = arith.constant 0 : index
    %9 = vector.load %arg4[%c0_6, %c0_7] : memref<256x512xbf16, #tpu.memory_space<vmem>>, vector<256x512xbf16>
    %10 = arith.truncf %8 : vector<512x256xf32> to vector<512x256xbf16>
    %cst_8 = arith.constant dense<0.000000e+00> : vector<256x256xf32>
    %11 = tpu.matmul %9, %10, %cst_8 {dimension_numbers = #tpu.dot_dimension_numbers<[1], [0], [0], [1], [0, 0, 1, 1], [], []>} : vector<256x512xbf16>, vector<512x256xbf16>, vector<256x256xf32> -> vector<256x256xf32>
    %c0_9 = arith.constant 0 : index
    %c0_10 = arith.constant 0 : index
    %12 = vector.load %arg8[%c0_9, %c0_10] : memref<256x1xf32, #tpu.memory_space<vmem>>, vector<256x1xf32>
    %13 = vector.broadcast %12 : vector<256x1xf32> to vector<256x256xf32>
    %14 = arith.addf %11, %13 : vector<256x256xf32>
    %cst_11 = arith.constant 0.000000e+00 : f32
    %15 = vector.broadcast %cst_11 : f32 to vector<256x256xf32>
    %16 = arith.cmpf ogt, %14, %15 : vector<256x256xf32>
    %cst_12 = arith.constant 2.000000e-01 : f32
    %17 = vector.broadcast %cst_12 : f32 to vector<256x256xf32>
    %18 = arith.mulf %17, %14 : vector<256x256xf32>
    %19 = arith.select %16, %14, %18 : vector<256x256xi1>, vector<256x256xf32>
    %c0_13 = arith.constant 0 : index
    %c0_14 = arith.constant 0 : index
    %20 = vector.load %arg5[%c0_13, %c0_14] : memref<128x256xbf16, #tpu.memory_space<vmem>>, vector<128x256xbf16>
    %21 = arith.truncf %19 : vector<256x256xf32> to vector<256x256xbf16>
    %cst_15 = arith.constant dense<0.000000e+00> : vector<128x256xf32>
    %22 = tpu.matmul %20, %21, %cst_15 {dimension_numbers = #tpu.dot_dimension_numbers<[1], [0], [0], [1], [0, 0, 1, 1], [], []>} : vector<128x256xbf16>, vector<256x256xbf16>, vector<128x256xf32> -> vector<128x256xf32>
    %c0_16 = arith.constant 0 : index
    %c0_17 = arith.constant 0 : index
    %23 = vector.load %arg9[%c0_16, %c0_17] : memref<128x1xf32, #tpu.memory_space<vmem>>, vector<128x1xf32>
    %24 = vector.broadcast %23 : vector<128x1xf32> to vector<128x256xf32>
    %25 = arith.addf %22, %24 : vector<128x256xf32>
    %cst_18 = arith.constant 0.000000e+00 : f32
    %26 = vector.broadcast %cst_18 : f32 to vector<128x256xf32>
    %27 = arith.cmpf ogt, %25, %26 : vector<128x256xf32>
    %cst_19 = arith.constant 2.000000e-01 : f32
    %28 = vector.broadcast %cst_19 : f32 to vector<128x256xf32>
    %29 = arith.mulf %28, %25 : vector<128x256xf32>
    %30 = arith.select %27, %25, %29 : vector<128x256xi1>, vector<128x256xf32>
    %c0_20 = arith.constant 0 : index
    %c0_21 = arith.constant 0 : index
    %31 = vector.load %arg6[%c0_20, %c0_21] : memref<64x128xbf16, #tpu.memory_space<vmem>>, vector<64x128xbf16>
    %32 = arith.truncf %30 : vector<128x256xf32> to vector<128x256xbf16>
    %cst_22 = arith.constant dense<0.000000e+00> : vector<64x256xf32>
    %33 = tpu.matmul %31, %32, %cst_22 {dimension_numbers = #tpu.dot_dimension_numbers<[1], [0], [0], [1], [0, 0, 1, 1], [], []>} : vector<64x128xbf16>, vector<128x256xbf16>, vector<64x256xf32> -> vector<64x256xf32>
    %c0_23 = arith.constant 0 : index
    %c0_24 = arith.constant 0 : index
    %34 = vector.load %arg10[%c0_23, %c0_24] : memref<64x1xf32, #tpu.memory_space<vmem>>, vector<64x1xf32>
    %35 = vector.broadcast %34 : vector<64x1xf32> to vector<64x256xf32>
    %36 = arith.addf %33, %35 : vector<64x256xf32>
    %cst_25 = arith.constant 0.000000e+00 : f32
    %37 = vector.broadcast %cst_25 : f32 to vector<64x256xf32>
    %38 = arith.cmpf ogt, %36, %37 : vector<64x256xf32>
    %cst_26 = arith.constant 2.000000e-01 : f32
    %39 = vector.broadcast %cst_26 : f32 to vector<64x256xf32>
    %40 = arith.mulf %39, %36 : vector<64x256xf32>
    %41 = arith.select %38, %36, %40 : vector<64x256xi1>, vector<64x256xf32>
    %c0_27 = arith.constant 0 : index
    %c0_28 = arith.constant 0 : index
    %42 = vector.load %arg7[%c0_27, %c0_28] : memref<64x1xf32, #tpu.memory_space<vmem>>, vector<64x1xf32>
    %43 = vector.broadcast %42 : vector<64x1xf32> to vector<64x256xf32>
    %44 = arith.mulf %43, %41 : vector<64x256xf32>
    %cst_29 = arith.constant dense<0.000000e+00> : vector<256xf32>
    %45 = vector.multi_reduction <add>, %44, %cst_29 [0] : vector<64x256xf32> to vector<256xf32>
    %46 = vector.shape_cast %45 : vector<256xf32> to vector<1x256xf32>
    %cst_30 = arith.constant 0.000000e+00 : f32
    %47 = vector.broadcast %cst_30 : f32 to vector<1x256xf32>
    %48 = arith.subf %47, %46 : vector<1x256xf32>
    %49 = math.exp %48 : vector<1x256xf32>
    %cst_31 = arith.constant 1.000000e+00 : f32
    %50 = vector.broadcast %cst_31 : f32 to vector<1x256xf32>
    %51 = arith.addf %50, %49 : vector<1x256xf32>
    %52 = tpu.reciprocal %51 {approx = true} : vector<1x256xf32> -> vector<1x256xf32>
    %c0_32 = arith.constant 0 : index
    %c0_33 = arith.constant 0 : index
    %c0_34 = arith.constant 0 : index
    %53 = vector.load %arg11[%c0_32, %c0_33, %c0_34] : memref<1x1x256xf32, #tpu.memory_space<vmem>>, vector<1x1x256xf32>
    %54 = vector.shape_cast %53 : vector<1x1x256xf32> to vector<1x256xf32>
    %55 = vector.shape_cast %52 : vector<1x256xf32> to vector<1x1x256xf32>
    tpu.vector_store %arg11[%c0_32, %c0_33, %c0_34], %55 {strides = array<i32>} : memref<1x1x256xf32, #tpu.memory_space<vmem>>, vector<1x1x256xf32>,
    return
  }
  func.func @transform_0(%arg0: i32, %arg1: i32) -> (i32, i32, i32) {
    %c0_i32 = arith.constant 0 : i32
    %c0_i32_0 = arith.constant 0 : i32
    return %arg0, %c0_i32, %arg1 : i32, i32, i32
  }
  func.func @transform_1(%arg0: i32, %arg1: i32) -> (i32, i32) {
    %c0_i32 = arith.constant 0 : i32
    %c0_i32_0 = arith.constant 0 : i32
    %c0_i32_1 = arith.constant 0 : i32
    return %c0_i32, %c0_i32_0 : i32, i32
  }
  func.func @transform_2(%arg0: i32, %arg1: i32) -> (i32, i32) {
    %c0_i32 = arith.constant 0 : i32
    %c0_i32_0 = arith.constant 0 : i32
    %c0_i32_1 = arith.constant 0 : i32
    return %c0_i32, %c0_i32_0 : i32, i32
  }
  func.func @transform_3(%arg0: i32, %arg1: i32) -> (i32, i32) {
    %c0_i32 = arith.constant 0 : i32
    %c0_i32_0 = arith.constant 0 : i32
    %c0_i32_1 = arith.constant 0 : i32
    return %c0_i32, %c0_i32_0 : i32, i32
  }
  func.func @transform_4(%arg0: i32, %arg1: i32) -> (i32, i32) {
    %c0_i32 = arith.constant 0 : i32
    %c0_i32_0 = arith.constant 0 : i32
    %c0_i32_1 = arith.constant 0 : i32
    return %c0_i32, %c0_i32_0 : i32, i32
  }
  func.func @transform_5(%arg0: i32, %arg1: i32) -> (i32, i32) {
    %c0_i32 = arith.constant 0 : i32
    %c0_i32_0 = arith.constant 0 : i32
    %c0_i32_1 = arith.constant 0 : i32
    return %c0_i32, %c0_i32_0 : i32, i32
  }
  func.func @transform_6(%arg0: i32, %arg1: i32) -> (i32, i32) {
    %c0_i32 = arith.constant 0 : i32
    %c0_i32_0 = arith.constant 0 : i32
    %c0_i32_1 = arith.constant 0 : i32
    return %c0_i32, %c0_i32_0 : i32, i32
  }
  func.func @transform_7(%arg0: i32, %arg1: i32) -> (i32, i32) {
    %c0_i32 = arith.constant 0 : i32
    %c0_i32_0 = arith.constant 0 : i32
    %c0_i32_1 = arith.constant 0 : i32
    return %c0_i32, %c0_i32_0 : i32, i32
  }
  func.func @transform_8(%arg0: i32, %arg1: i32) -> (i32, i32) {
    %c0_i32 = arith.constant 0 : i32
    %c0_i32_0 = arith.constant 0 : i32
    %c0_i32_1 = arith.constant 0 : i32
    return %c0_i32, %c0_i32_0 : i32, i32
  }
  func.func @transform_9(%arg0: i32, %arg1: i32) -> (i32, i32, i32) {
    %c0_i32 = arith.constant 0 : i32
    %c0_i32_0 = arith.constant 0 : i32
    return %arg0, %c0_i32, %arg1 : i32, i32, i32
  }
}

</mosaic_0001>

<bundles_post_ra>
// kernel: tpu_custom_call.1
= control target key start
LH: loop header
LB: loop body
LE: loop exit
PB: predicated region body
PF: predicated region fallthrough
CT: control target
= control target key end

     0   :  { %s7016_s0 = inlined_call_operand.hbm [shape: bf16[2,512,256], index: 0, kind: input, shape index: {}]   ;;  %s7017_s1 = inlined_call_operand.hbm [shape: bf16[512,512], index: 1, kind: input, shape index: {}]   ;;  %s7018_s2 = inlined_call_operand.vmem [shape: bf16[256,512], index: 2, kind: input, shape index: {}]   ;;  %s7019_s3 = inlined_call_operand.hbm [shape: bf16[128,256], index: 3, kind: input, shape index: {}]   ;;  %s7020_s4 = inlined_call_operand.hbm [shape: bf16[64,128], index: 4, kind: input, shape index: {}]   ;;  %s7021_s5 = inlined_call_operand.vmem [shape: f32[64,1], index: 5, kind: input, shape index: {}]   ;;  %s7022_s6 = inlined_call_operand.vmem [shape: f32[256,1], index: 6, kind: input, shape index: {}]   ;;  %s7023_s7 = inlined_call_operand.vmem [shape: f32[128,1], index: 7, kind: input, shape index: {}]   ;;  %s7024_s8 = inlined_call_operand.vmem [shape: f32[64,1], index: 8, kind: input, shape index: {}]   ;;  %s7025_s9 = inlined_call_operand.hbm [shape: f32[2,1,256], index: 9, kind: output, shape index: {}]  }
   0x1   :  { %7034 = sst [smem:[#allocation18_spill]] %s7017_s1 }
   0x2   :  { %7035 = sst [smem:[#allocation19_spill]] %s7021_s5 }
   0x3   :  { %7036 = sst [smem:[#allocation20_spill]] %s7025_s9 }
   0x4   :  { %14 = vsyncpa [#allocation3], 0 }
   0x5   :  { %16 = vsyncpa [#allocation3 + $0x1], 0 }
   0x6   :  { %17 = vsyncpa [#allocation6], 0 }
   0x7   :  { %18 = vsyncpa [#allocation9], 0 }
   0x8   :  { %19 = vsyncpa [#allocation4], 0 }
   0x9   :  { %21 = vsyncpa [#allocation4 + $0x1], 0  ;;  %s6158_s30 = smov 0   ;;  %s6160_s10 = smov 0  }
   0xa   :  { %s6162_s11 = smov 0   ;;  %s6164_s12 = smov 0  }
   0xb   :  { %s6166_s13 = smov 0   ;;  %s6168_s14 = smov 0  }
   0xc LB: > { %7037 = sst [smem:[#allocation15_spill]] %s6073_s30  ;;  %s4779_s15 = sadd.s32 4294967295, %s6093_s14   ;;  %s6093_s14 = sphi %s6168_s14, %s27_s14   ;;  %s6089_s13 = sphi %s6166_s13, %s7065_s13   ;;  %s6085_s12 = sphi %s6164_s12, %s7064_s12   ;;  %s6081_s11 = sphi %s6162_s11, %s7063_s11   ;;  %s6077_s10 = sphi %s6160_s10, %s7062_s10   ;;  %s6073_s30 = sphi %s6158_s30, %s7061_s30  }
   0xd   : > { %7038 = sst [smem:[#allocation16_spill]] %s6085_s12  ;;  %s4780_s16 = sadd.s32 4294967294, %s6093_s14  }
   0xe   : > { %p61_p0 = scmp.ne.s32.totalorder %s6077_s10, %s6073_s30  ;;  %p6192_p1 = scmp.eq.s32.totalorder %s4779_s15, 0 }
   0xf   : > { %p6196_p2 = scmp.eq.s32.totalorder %s4779_s15, 1  ;;  %p261_p3 = scmp.eq.s32.totalorder %s4780_s16, 1 }
  0x10   : > { %s7039_s17 = scalar_select %p6192_p1, 1, 0 }
  0x11   : > { %s7040_s18 = scalar_select %p6196_p2, 1, 0 }
  0x12   : > { %p6202_p4 = por %p6192_p1, %p61_p0  ;;  %p4781_p5 = scmp.ge.s32.totalorder %s6093_s14, 1 }
  0x13   : > { %p6207_p6 = por %p261_p3, %p61_p0  ;;  %p268_p7 = scmp.lt.s32.totalorder %s6093_s14, 3 }
  0x14   : > { %s7041_s19 = scalar_select %p6202_p4, 1, 0 }
  0x15   : > { %s7042_s20 = scalar_select %p6207_p6, 1, 0 }
  0x16   : > { %p6212_p8 = pnand %p4781_p5, %p268_p7  ;;  %s6095_s22 = smov [#allocation5]  }
  0x17   : > { %7043 = sst [smem:[#allocation17_spill]] %s7042_s20  ;;  %s280_s23 = sshll.u32 %s6095_s22, 4  ;;  %s6216_s23 = int_to_ptr.vmem [resolvable:$true] %s280_s23 }
  0x18   : > { %s7044_s21 = scalar_select %p6212_p8, 1, 0 }
  0x19   : > { %p5382_p9 = pneg %p6212_p8  ;;  %s6096_s25 = smov [#allocation7]  }
  0x1a   : > { %s296_s26 = sshll.u32 %s6096_s25, 4  ;;  %s7046_s1 = sld [smem:[#allocation18_spill]]  ;;  %s6227_s26 = int_to_ptr.vmem [resolvable:$true] %s296_s26 }
  0x1b   : > { %p6223_p11 = pnand %p5382_p9, %p6192_p1 }
  0x1d   : > { %p6237_p13 = pneg %p6223_p11 }
  0x20   : > { %s5889_s29 = scalar_lea.hbm %s7046_s1, 16384 }
  0x21   : > { %p5890_p12 = scmp.ne.s32.totalorder %s7046_s1, %s5889_s29  ;;  %p5896_p5 = scmp.lt.u32.totalorder %s5889_s29, %s7046_s1 }
  0x23   : > { %p5892_p0 = pnand %p6237_p13, %p5890_p12 }
  0x25   : > { %p5893_p3 = pneg %p5892_p0 }
  0x27   : > { %p5898_p7 = pnand %p5896_p5, %p5893_p3 }
  0x29   : > { %5901 = shalt.err (!%p5898_p7)
}
  0x2a   : > { %s5902_s27 = scalar_lea.vmem %s6216_s23, 16384  ;;  %p5910_p1 = scmp.lt.s32.totalorder %s6216_s23, %s6216_s23 }
  0x2b   : > { %p5903_p9 = scmp.ne.s32.totalorder %s6216_s23, %s5902_s27  ;;  %p5911_p4 = scmp.lt.s32.totalorder %s5902_s27, %s5902_s27 }
  0x2d   : > { %p5905_p10 = pnand %p5903_p9, %p6237_p13  ;;  %p5912_p12 = por %p5911_p4, %p5910_p1 }
  0x2f   : > { %p5906_p6 = pneg %p5905_p10 }
  0x31   : > { %p5913_p0 = pnand %p5912_p12, %p5906_p6 }
  0x33   : > { %5916 = shalt.err (!%p5913_p0)
}
  0x34   : > { %s6097_s28 = smov 256   ;;  %s6098_s20 = smov 16  }
  0x35   : > { %5385 = dma.hbm_to_vmem [thread:$0]  (!%p6223_p11), %s7046_s1, 16384, %s6216_s23, [#allocation6], %s6097_s28, %s6097_s28, %s6098_s20  }
  0x36   : > { %s5917_s30 = scalar_lea.hbm %s7019_s3, 2048 }
  0x37   : > { %p5918_p1 = scmp.ne.s32.totalorder %s7019_s3, %s5917_s30  ;;  %p5924_p10 = scmp.lt.u32.totalorder %s5917_s30, %s7019_s3 }
  0x39   : > { %p5920_p4 = pnand %p5918_p1, %p6237_p13 }
  0x3b   : > { %p5921_p6 = pneg %p5920_p4 }
  0x3d   : > { %p5926_p3 = pnand %p5924_p10, %p5921_p6 }
  0x3f   : > { %5929 = shalt.err (!%p5926_p3)
}
  0x40   : > { %s5930_s23 = scalar_lea.vmem %s6227_s26, 2048  ;;  %p5938_p12 = scmp.lt.s32.totalorder %s6227_s26, %s6227_s26 }
  0x41   : > { %p5931_p5 = scmp.ne.s32.totalorder %s6227_s26, %s5930_s23  ;;  %p5939_p0 = scmp.lt.s32.totalorder %s5930_s23, %s5930_s23 }
  0x43   : > { %p5933_p7 = pnand %p5931_p5, %p6237_p13  ;;  %p5940_p1 = por %p5939_p0, %p5938_p12 }
  0x45   : > { %p5934_p9 = pneg %p5933_p7 }
  0x47   : > { %p5941_p4 = pnand %p5940_p1, %p5934_p9 }
  0x49   : > { %5944 = shalt.err (!%p5941_p4)
}
  0x4a   : > { %s6099_s9 = smov 128   ;;  %s6100_s5 = smov 8  }
  0x4b   : > { %5388 = dma.hbm_to_vmem [thread:$0]  (!%p6223_p11), %s7019_s3, 2048, %s6227_s26, [#allocation6], %s6099_s9, %s6099_s9, %s6100_s5  }
  0x4c   : > { %s6101_s28 = smov [#allocation8]   ;;  %s5945_s16 = scalar_lea.hbm %s7020_s4, 512 }
  0x4d   : > { %s309_s20 = sshll.u32 %s6101_s28, 4  ;;  %p5946_p6 = scmp.ne.s32.totalorder %s7020_s4, %s5945_s16  ;;  %s310_s20 = int_to_ptr.vmem [resolvable:$true] %s309_s20 }
  0x4e   : > { %p5952_p5 = scmp.lt.u32.totalorder %s5945_s16, %s7020_s4 }
  0x4f   : > { %p5948_p10 = pnand %p5946_p6, %p6237_p13 }
  0x51   : > { %p5949_p3 = pneg %p5948_p10 }
  0x53   : > { %p5954_p7 = pnand %p5952_p5, %p5949_p3 }
  0x55   : > { %5957 = shalt.err (!%p5954_p7)
}
  0x56   : > { %s5958_s26 = scalar_lea.vmem %s310_s20, 512  ;;  %p5966_p1 = scmp.lt.s32.totalorder %s310_s20, %s310_s20 }
  0x57   : > { %p5959_p9 = scmp.ne.s32.totalorder %s310_s20, %s5958_s26  ;;  %p5967_p4 = scmp.lt.s32.totalorder %s5958_s26, %s5958_s26 }
  0x59   : > { %p5961_p12 = pnand %p5959_p9, %p6237_p13  ;;  %p5968_p8 = por %p5967_p4, %p5966_p1 }
  0x5b   : > { %p5962_p0 = pneg %p5961_p12 }
  0x5d   : > { %p5969_p2 = pnand %p5968_p8, %p5962_p0 }
  0x5f   : > { %5972 = shalt.err (!%p5969_p2)
}
  0x60   : > { %s6102_s30 = smov 64   ;;  %s6103_s1 = smov 4  }
  0x61   : > { %5391 = dma.hbm_to_vmem [thread:$0]  (!%p6223_p11), %s7020_s4, 512, %s310_s20, [#allocation9], %s6102_s30, %s6102_s30, %s6103_s1  }
  0x62   : > { %s48_s28 = sadd.s32 1, %s6081_s11  ;;  %s39_s29 = sadd.s32 1, %s6089_s13 }
  0x63   : > { %p55_p2 = scmp.ne.s32.totalorder %s6081_s11, %s6077_s10  ;;  %p41_p8 = scmp.ge.s32.totalorder %s39_s29, 2 }
  0x64   : > { %p56_p13 = scmp.eq.s32.totalorder %s6093_s14, 0  ;;  %p7048_p6 = scmp.ne.s32.totalorder %s7040_s18, 0 }
  0x65   : > { %p5403_p3 = scmp.lt.s32.totalorder %s6093_s14, 2  ;;  %s7067_s29 = smov (%p41_p8, %s39_s29), 0 }
  0x66   : > { %p6309_p10 = por %p7048_p6, %p55_p2  ;;  %p57_p5 = por %p56_p13, %p55_p2 }
  0x67   : > { %s335_s24 = sand.u32 1, %s6081_s11   ;;  %s43_s16 = ssub.s32 %s6089_s13, %s7067_s29 }
  0x68   : > { %p46_p7 = scmp.eq.s32.totalorder %s43_s16, 0  ;;  %s4786_s20 = sshll.u32 %s335_s24, 9 }
  0x69   : > { %s5076_s25 = sshll.u32 %s6089_s13, 13  ;;  %s339_s30 = scalar_lea.vmem [#allocation2], %s4786_s20 }
  0x6a   : > { %s6321_s27 = scalar_select %p46_p7, %s6081_s11, %s48_s28  }
  0x6b   : > { %s6326_s18 = scalar_lea.hbm %s7016_s0, %s5076_s25  ;;  %s348_s1 = sshll.u32 %s339_s30, 4  ;;  %s6328_s1 = int_to_ptr.vmem [resolvable:$true] %s348_s1 }
  0x6c   : > { %p6332_p11 = pnand %p5403_p3, %p57_p5  ;;  %s6336_s12 = scalar_lea.sflag [#allocation3], %s335_s24 }
  0x6d   : > { %s5973_s28 = scalar_lea.hbm %s6326_s18, 8192  ;;  %s5978_s25 = scalar_lea.hbm %s7016_s0, 16384 }
  0x6e   : > { %p5974_p9 = scmp.ne.s32.totalorder %s6326_s18, %s5973_s28  ;;  %p5975_p12 = pneg %p6332_p11 }
  0x6f   : > { %p5979_p4 = scmp.lt.u32.totalorder %s6326_s18, %s7016_s0  ;;  %p5980_p2 = scmp.lt.u32.totalorder %s5978_s25, %s5973_s28 }
  0x70   : > { %p5976_p0 = pnand %p5975_p12, %p5974_p9  ;;  %p5982_p13 = scmp.lt.u32.totalorder %s5973_s28, %s6326_s18 }
  0x71   : > { %p5981_p8 = por %p5980_p2, %p5979_p4 }
  0x72   : > { %p5977_p1 = pneg %p5976_p0 }
  0x73   : > { %p5983_p6 = por %p5982_p13, %p5981_p8 }
  0x75   : > { %p5984_p3 = pnand %p5983_p6, %p5977_p1 }
  0x77   : > { %5987 = shalt.err (!%p5984_p3)
}
  0x78   : > { %s5988_s24 = scalar_lea.vmem %s6328_s1, 8192  ;;  %s6104_s30 = smov [#allocation2]  }
  0x79   : > { %p5989_p5 = scmp.ne.s32.totalorder %s6328_s1, %s5988_s24  ;;  %s5993_s16 = sshll.u32 %s6104_s30, 4  ;;  %s5994_s16 = int_to_ptr.vmem [resolvable:$false] %s5993_s16 }
  0x7a   : > { %s5995_s20 = scalar_lea.vmem %s5994_s16, 16384  ;;  %p5996_p0 = scmp.lt.s32.totalorder %s6328_s1, %s5994_s16 }
  0x7b   : > { %p5991_p7 = pnand %p5989_p5, %p5975_p12  ;;  %p5997_p4 = scmp.lt.s32.totalorder %s5995_s20, %s5988_s24 }
  0x7d   : > { %p5992_p9 = pneg %p5991_p7  ;;  %p5998_p2 = por %p5997_p4, %p5996_p0 }
  0x7f   : > { %p5999_p8 = pnand %p5998_p2, %p5992_p9 }
  0x81   : > { %6002 = shalt.err (!%p5999_p8)
}
  0x82   : > { %5395 = dma.hbm_to_vmem [thread:$0]  (!%p6332_p11), %s6326_s18, 8192, %s6328_s1, %s6336_s12, %s6099_s9, %s6099_s9, %s6100_s5  }
  0x83   : > { %p7051_p12 = scmp.ne.s32.totalorder %s7044_s21, 0 }
  0x84   : > { %s6370_s28 = sand.u32 (!%p7051_p12), 1, %s6077_s10   ;;  %p7052_p1 = scmp.ne.s32.totalorder (!%p7051_p12), %s7041_s19, 0 }
  0x85   : > { %360 = sbr.rel (%p7051_p12) target bundleno = 1797 (0x705), region = 56  ;;  %s4790_s25 = sshll.u32 (!%p7051_p12), %s6370_s28, 9 }
  0x86   : > { %s363_s23 = scalar_lea.sflag (!%p7051_p12), [#allocation3], %s6370_s28  ;;  %s6374_s26 = scalar_lea.vmem (!%p7051_p12), [#allocation2], %s4790_s25 }
  0x8c   : > { %6056 = dma.done.wait (%p7052_p1), %s363_s23, 8192  }
  0x8d   : > { %6058 = vsyncadd (%p7052_p1), %s363_s23, 4294959104  ;;  %p7053_p11 = scmp.ne.s32.totalorder %s7039_s17, 0 }
  0x8f   : > { %6060 = dma.done.wait (%p7053_p11), [#allocation6], 18432  }
  0x90   : > { %6062 = vsyncadd (%p7053_p11), [#allocation6], 4294948864 }
  0x91   : > { %6064 = dma.done.wait (%p7053_p11), [#allocation9], 512  }
  0x92   : > { %6066 = vsyncadd (%p7053_p11), [#allocation9], 4294966784  ;;  %v5469_v0 = vld [vmem:[%s6374_s26 + $0x4] ss:$8 sps:$4 sm:$0xff]   ;;  %v5471_v1 = vld [vmem:[%s6374_s26] ss:$8 sps:$4 sm:$0xff]  }
  0x93   : > { %1568 = vmatprep.subr.bf16.mxu0 %v5469_v0  ;;  %v5472_v2 = vld [vmem:[%s6374_s26 + $0x14] ss:$8 sps:$4 sm:$0xff]   ;;  %5078 = vmatprep.subr.bf16.mxu1 %v5469_v0  ;;  %v5474_v3 = vld [vmem:[%s6374_s26 + $0x10] ss:$8 sps:$4 sm:$0xff]   ;;  %v5475_v4 = vld [vmem:[%s6374_s26 + $0x24] ss:$8 sps:$4 sm:$0xff]  }
  0x94   : > { %1569 = vmatpush1.bf16.msra.mxu0 %v5471_v1  ;;  %5094 = vmatpush1.bf16.msra.mxu1 %v5471_v1  ;;  %v5477_v5 = vld [vmem:[%s6374_s26 + $0x20] ss:$8 sps:$4 sm:$0xff]   ;;  %v5478_v6 = vld [vmem:[%s6374_s26 + $0x34] ss:$8 sps:$4 sm:$0xff]   ;;  %v5480_v7 = vld [vmem:[%s6374_s26 + $0x30] ss:$8 sps:$4 sm:$0xff]  }
  0x95   : > { %1570 = vmatprep.subr.bf16.mxu0 %v5472_v2  ;;  %5079 = vmatprep.subr.bf16.mxu1 %v5472_v2  ;;  %v5481_v8 = vld [vmem:[%s6374_s26 + $0x44] ss:$8 sps:$4 sm:$0xff]   ;;  %v5483_v9 = vld [vmem:[%s6374_s26 + $0x40] ss:$8 sps:$4 sm:$0xff]   ;;  %v5484_v10 = vld [vmem:[%s6374_s26 + $0x54] ss:$8 sps:$4 sm:$0xff]  }
  0x96   : > { %v5486_v11 = vld [vmem:[%s6374_s26 + $0x50] ss:$8 sps:$4 sm:$0xff]   ;;  %v5487_v12 = vld [vmem:[%s6374_s26 + $0x64] ss:$8 sps:$4 sm:$0xff]   ;;  %v5489_v14 = vld [vmem:[%s6374_s26 + $0x60] ss:$8 sps:$4 sm:$0xff]  }
  0x97   : > { %v5519_v13 = vld [vmem:[#allocation5 + $0x4] ss:$16 sps:$4 sm:$0xff]   ;;  %v5492_v16 = vld [vmem:[%s6374_s26 + $0x70] ss:$8 sps:$4 sm:$0xff]   ;;  %v5495_v18 = vld [vmem:[%s6374_s26 + $0x80] ss:$8 sps:$4 sm:$0xff]  }
  0x98   : > { %1571 = vmatpush1.bf16.msra.mxu0 %v5474_v3  ;;  %5095 = vmatpush1.bf16.msra.mxu1 %v5474_v3  ;;  %v5490_v15 = vld [vmem:[%s6374_s26 + $0x74] ss:$8 sps:$4 sm:$0xff]   ;;  %v5493_v17 = vld [vmem:[%s6374_s26 + $0x84] ss:$8 sps:$4 sm:$0xff]   ;;  %v5498_v20 = vld [vmem:[%s6374_s26 + $0x90] ss:$8 sps:$4 sm:$0xff]  }
  0x99   : > { %1572 = vmatprep.subr.bf16.mxu0 %v5475_v4  ;;  %5080 = vmatprep.subr.bf16.mxu1 %v5475_v4  ;;  %v5496_v19 = vld [vmem:[%s6374_s26 + $0x94] ss:$8 sps:$4 sm:$0xff]   ;;  %v5499_v21 = vld [vmem:[%s6374_s26 + $0xa4] ss:$8 sps:$4 sm:$0xff]   ;;  %v5501_v22 = vld [vmem:[%s6374_s26 + $0xa0] ss:$8 sps:$4 sm:$0xff]  }
  0x9a   : > { %1600 = vmatprep.mubr.bf16.mxu0 %v5519_v13  ;;  %v5502_v23 = vld [vmem:[%s6374_s26 + $0xb4] ss:$8 sps:$4 sm:$0xff]   ;;  %v5504_v24 = vld [vmem:[%s6374_s26 + $0xb0] ss:$8 sps:$4 sm:$0xff]   ;;  %v5505_v25 = vld [vmem:[%s6374_s26 + $0xc4] ss:$8 sps:$4 sm:$0xff]  }
  0x9b   : > { %v5507_v26 = vld [vmem:[%s6374_s26 + $0xc0] ss:$8 sps:$4 sm:$0xff]   ;;  %v5508_v27 = vld [vmem:[%s6374_s26 + $0xd4] ss:$8 sps:$4 sm:$0xff]   ;;  %v5510_v28 = vld [vmem:[%s6374_s26 + $0xd0] ss:$8 sps:$4 sm:$0xff]  }
  0x9c   : > { %1573 = vmatpush1.bf16.msra.mxu0 %v5477_v5  ;;  %5096 = vmatpush1.bf16.msra.mxu1 %v5477_v5  ;;  %v5511_v29 = vld [vmem:[%s6374_s26 + $0xe4] ss:$8 sps:$4 sm:$0xff]   ;;  %v5513_v30 = vld [vmem:[%s6374_s26 + $0xe0] ss:$8 sps:$4 sm:$0xff]   ;;  %v5514_v31 = vld [vmem:[%s6374_s26 + $0xf4] ss:$8 sps:$4 sm:$0xff]  }
  0x9d   : > { %1574 = vmatprep.subr.bf16.mxu0 %v5478_v6  ;;  %5081 = vmatprep.subr.bf16.mxu1 %v5478_v6  ;;  %v5516_v32 = vld [vmem:[%s6374_s26 + $0xf0] ss:$8 sps:$4 sm:$0xff]   ;;  %v5522_v33 = vld [vmem:[%s6374_s26 + $0x104] ss:$8 sps:$4 sm:$0xff]   ;;  %v5520_v35 = vld [vmem:[%s6374_s26 + $0x100] ss:$8 sps:$4 sm:$0xff]  }
  0x9e   : > { %v5517_v34 = vld [vmem:[#allocation5] ss:$16 sps:$4 sm:$0xff]   ;;  %v5523_v36 = vld [vmem:[#allocation5 + $0x24] ss:$16 sps:$4 sm:$0xff]   ;;  %s7054_s23 = sld [smem:[#allocation19_spill]]  ;;  %s7055_s12 = sld [smem:[#allocation16_spill]] }
  0x9f   : > { %v5530_v37 = vld [vmem:[%s6374_s26 + $0x114] ss:$8 sps:$4 sm:$0xff]   ;;  %v5528_v38 = vld [vmem:[%s6374_s26 + $0x110] ss:$8 sps:$4 sm:$0xff]   ;;  %v5537_v39 = vld [vmem:[%s6374_s26 + $0x124] ss:$8 sps:$4 sm:$0xff]  }
  0xa0   : > { %1575 = vmatpush1.bf16.msra.mxu0 %v5480_v7  ;;  %5097 = vmatpush1.bf16.msra.mxu1 %v5480_v7  ;;  %v5525_v40 = vld [vmem:[#allocation5 + $0x20] ss:$16 sps:$4 sm:$0xff]   ;;  %v5526_v41 = vld [vmem:[#allocation5 + $0x44] ss:$16 sps:$4 sm:$0xff]   ;;  %s4794_s24 = sshll.u32 %s6370_s28, 1  ;;  %s7056_s17 = sld [smem:[#allocation20_spill]] }
  0xa1   : > { %1576 = vmatprep.subr.bf16.mxu0 %v5481_v8  ;;  %5082 = vmatprep.subr.bf16.mxu1 %v5481_v8  ;;  %v5535_v42 = vld [vmem:[%s6374_s26 + $0x120] ss:$8 sps:$4 sm:$0xff]   ;;  %v5543_v43 = vld [vmem:[%s6374_s26 + $0x134] ss:$8 sps:$4 sm:$0xff]   ;;  %v5541_v44 = vld [vmem:[%s6374_s26 + $0x130] ss:$8 sps:$4 sm:$0xff]  }
  0xa2   : > { %v5552_v45 = vld [vmem:[%s6374_s26 + $0x144] ss:$8 sps:$4 sm:$0xff]   ;;  %v5531_v46 = vld [vmem:[#allocation5 + $0x40] ss:$16 sps:$4 sm:$0xff]   ;;  %v5558_v49 = vld [vmem:[%s6374_s26 + $0x154] ss:$8 sps:$4 sm:$0xff]  }
  0xa3   : > { %v5532_v47 = vld [vmem:[#allocation5 + $0x64] ss:$16 sps:$4 sm:$0xff]   ;;  %v5550_v48 = vld [vmem:[%s6374_s26 + $0x140] ss:$8 sps:$4 sm:$0xff]   ;;  %v5556_v50 = vld [vmem:[%s6374_s26 + $0x150] ss:$8 sps:$4 sm:$0xff]  }
  0xa4   : > { %1577 = vmatpush1.bf16.msra.mxu0 %v5483_v9  ;;  %5098 = vmatpush1.bf16.msra.mxu1 %v5483_v9  ;;  %v5564_v51 = vld [vmem:[%s6374_s26 + $0x164] ss:$8 sps:$4 sm:$0xff]   ;;  %v5534_v52 = vld [vmem:[#allocation5 + $0x60] ss:$16 sps:$4 sm:$0xff]   ;;  %v5573_v55 = vld [vmem:[%s6374_s26 + $0x174] ss:$8 sps:$4 sm:$0xff]  }
  0xa5   : > { %1578 = vmatprep.subr.bf16.mxu0 %v5484_v10  ;;  %5083 = vmatprep.subr.bf16.mxu1 %v5484_v10  ;;  %v5538_v53 = vld [vmem:[#allocation5 + $0x84] ss:$16 sps:$4 sm:$0xff]   ;;  %v5562_v54 = vld [vmem:[%s6374_s26 + $0x160] ss:$8 sps:$4 sm:$0xff]   ;;  %v5571_v56 = vld [vmem:[%s6374_s26 + $0x170] ss:$8 sps:$4 sm:$0xff]  }
  0xa6   : > { %v5579_v57 = vld [vmem:[%s6374_s26 + $0x184] ss:$8 sps:$4 sm:$0xff]   ;;  %v5540_v58 = vld [vmem:[#allocation5 + $0x80] ss:$16 sps:$4 sm:$0xff]   ;;  %v5587_v61 = vld [vmem:[%s6374_s26 + $0x194] ss:$8 sps:$4 sm:$0xff]  }
  0xa7   : > { %v5544_v59 = vld [vmem:[#allocation5 + $0xa4] ss:$16 sps:$4 sm:$0xff]   ;;  %v5577_v60 = vld [vmem:[%s6374_s26 + $0x180] ss:$8 sps:$4 sm:$0xff]   ;;  %v5585_v62 = vld [vmem:[%s6374_s26 + $0x190] ss:$8 sps:$4 sm:$0xff]  }
  0xa8   : > { %1579 = vmatpush1.bf16.msra.mxu0 %v5486_v11  ;;  %5099 = vmatpush1.bf16.msra.mxu1 %v5486_v11  ;;  %v5594_v63 = vld [vmem:[%s6374_s26 + $0x1a4] ss:$8 sps:$4 sm:$0xff]   ;;  %v5546_v0 = vld [vmem:[#allocation5 + $0xa0] ss:$16 sps:$4 sm:$0xff]   ;;  %v5600_v3 = vld [vmem:[%s6374_s26 + $0x1b4] ss:$8 sps:$4 sm:$0xff]  }
  0xa9   : > { %1580 = vmatprep.subr.bf16.mxu0 %v5487_v12  ;;  %5084 = vmatprep.subr.bf16.mxu1 %v5487_v12  ;;  %v5547_v1 = vld [vmem:[#allocation5 + $0xc4] ss:$16 sps:$4 sm:$0xff]   ;;  %v5592_v2 = vld [vmem:[%s6374_s26 + $0x1a0] ss:$8 sps:$4 sm:$0xff]   ;;  %v5598_v4 = vld [vmem:[%s6374_s26 + $0x1b0] ss:$8 sps:$4 sm:$0xff]  }
  0xaa   : > { %v5609_v5 = vld [vmem:[%s6374_s26 + $0x1c4] ss:$8 sps:$4 sm:$0xff]   ;;  %v5549_v6 = vld [vmem:[#allocation5 + $0xc0] ss:$16 sps:$4 sm:$0xff]   ;;  %v5615_v9 = vld [vmem:[%s6374_s26 + $0x1d4] ss:$8 sps:$4 sm:$0xff]  }
  0xab   : > { %v5553_v7 = vld [vmem:[#allocation5 + $0xe4] ss:$16 sps:$4 sm:$0xff]   ;;  %v5607_v8 = vld [vmem:[%s6374_s26 + $0x1c0] ss:$8 sps:$4 sm:$0xff]   ;;  %v5613_v10 = vld [vmem:[%s6374_s26 + $0x1d0] ss:$8 sps:$4 sm:$0xff]  }
  0xac   : > { %1581 = vmatpush1.bf16.msra.mxu0 %v5489_v14  ;;  %5100 = vmatpush1.bf16.msra.mxu1 %v5489_v14  ;;  %v5621_v11 = vld [vmem:[%s6374_s26 + $0x1e4] ss:$8 sps:$4 sm:$0xff]   ;;  %v5555_v12 = vld [vmem:[#allocation5 + $0xe0] ss:$16 sps:$4 sm:$0xff]   ;;  %s5077_s30 = sshll.u32 %s7055_s12, 5  ;;  %s412_s16 = scalar_lea.vmem [#allocation10], %s4794_s24 }
  0xad   : > { %1582 = vmatprep.subr.bf16.mxu0 %v5490_v15  ;;  %5085 = vmatprep.subr.bf16.mxu1 %v5490_v15  ;;  %v5559_v13 = vld [vmem:[#allocation5 + $0x104] ss:$16 sps:$4 sm:$0xff]   ;;  %v5619_v14 = vld [vmem:[%s6374_s26 + $0x1e0] ss:$8 sps:$4 sm:$0xff]   ;;  %s4666_s20 = sshll.u32 %s412_s16, 4  ;;  %s6967_s19 = scalar_lea.hbm %s7056_s17, %s5077_s30  ;;  %s6969_s20 = int_to_ptr.vmem [resolvable:$true] %s4666_s20 }
  0xae   : > { %v5630_v15 = vld [vmem:[%s6374_s26 + $0x1f4] ss:$8 sps:$4 sm:$0xff]   ;;  %s4650_s21 = scalar_lea.sflag [#allocation4], %s6370_s28  ;;  %s6003_s9 = scalar_lea.vmem %s6969_s20, 32 }
  0xaf   : > { %p6004_p13 = scmp.ne.s32.totalorder %s6969_s20, %s6003_s9  ;;  %s6107_s5 = smov [#allocation10]  }
  0xb0   : > { %1583 = vmatpush1.bf16.msra.mxu0 %v5492_v16  ;;  %5101 = vmatpush1.bf16.msra.mxu1 %v5492_v16  ;;  %v5628_v16 = vld [vmem:[%s6374_s26 + $0x1f0] ss:$8 sps:$4 sm:$0xff]   ;;  %s6007_s18 = sshll.u32 %s6107_s5, 4  ;;  %s6008_s18 = int_to_ptr.vmem [resolvable:$false] %s6007_s18 }
  0xb1   : > { %1584 = vmatprep.subr.bf16.mxu0 %v5493_v17  ;;  %5086 = vmatprep.subr.bf16.mxu1 %v5493_v17  ;;  %v5561_v17 = vld [vmem:[#allocation5 + $0x100] ss:$16 sps:$4 sm:$0xff]   ;;  %p6005_p6 = pnand %p6004_p13, %p6309_p10  ;;  %s6009_s1 = scalar_lea.vmem %s6008_s18, 64 }
  0xb2   : > { %p6010_p5 = scmp.lt.s32.totalorder %s6969_s20, %s6008_s18  ;;  %p6011_p7 = scmp.lt.s32.totalorder %s6009_s1, %s6003_s9 }
  0xb3   : > { %p6006_p3 = pneg %p6005_p6 }
  0xb4   : > { %1585 = vmatpush1.bf16.msra.mxu0 %v5495_v18  ;;  %5102 = vmatpush1.bf16.msra.mxu1 %v5495_v18  ;;  %v5565_v18 = vld [vmem:[#allocation5 + $0x124] ss:$16 sps:$4 sm:$0xff]   ;;  %p6012_p9 = por %p6011_p7, %p6010_p5 }
  0xb5   : > { %1586 = vmatprep.subr.bf16.mxu0 %v5496_v19  ;;  %5087 = vmatprep.subr.bf16.mxu1 %v5496_v19  ;;  %v5567_v19 = vld [vmem:[#allocation5 + $0x120] ss:$16 sps:$4 sm:$0xff]  }
  0xb6   : > { %p6013_p0 = pnand %p6012_p9, %p6006_p3 }
  0xb8   : > { %1587 = vmatpush1.bf16.msra.mxu0 %v5498_v20  ;;  %5103 = vmatpush1.bf16.msra.mxu1 %v5498_v20  ;;  %v5568_v20 = vld [vmem:[#allocation5 + $0x144] ss:$16 sps:$4 sm:$0xff]  }
  0xb9   : > { %1588 = vmatprep.subr.bf16.mxu0 %v5499_v21  ;;  %5088 = vmatprep.subr.bf16.mxu1 %v5499_v21  ;;  %v5570_v21 = vld [vmem:[#allocation5 + $0x140] ss:$16 sps:$4 sm:$0xff]  }
  0xbc   : > { %1589 = vmatpush1.bf16.msra.mxu0 %v5501_v22  ;;  %5104 = vmatpush1.bf16.msra.mxu1 %v5501_v22  ;;  %v5574_v22 = vld [vmem:[#allocation5 + $0x164] ss:$16 sps:$4 sm:$0xff]  }
  0xbd   : > { %1590 = vmatprep.subr.bf16.mxu0 %v5502_v23  ;;  %5089 = vmatprep.subr.bf16.mxu1 %v5502_v23  ;;  %v5576_v23 = vld [vmem:[#allocation5 + $0x160] ss:$16 sps:$4 sm:$0xff]  }
  0xc0   : > { %1591 = vmatpush1.bf16.msra.mxu0 %v5504_v24  ;;  %5105 = vmatpush1.bf16.msra.mxu1 %v5504_v24  ;;  %v5580_v24 = vld [vmem:[#allocation5 + $0x184] ss:$16 sps:$4 sm:$0xff]  }
  0xc1   : > { %1592 = vmatprep.subr.bf16.mxu0 %v5505_v25  ;;  %5090 = vmatprep.subr.bf16.mxu1 %v5505_v25  ;;  %v5582_v25 = vld [vmem:[#allocation5 + $0x180] ss:$16 sps:$4 sm:$0xff]  }
  0xc4   : > { %1593 = vmatpush1.bf16.msra.mxu0 %v5507_v26  ;;  %5106 = vmatpush1.bf16.msra.mxu1 %v5507_v26  ;;  %v5583_v26 = vld [vmem:[#allocation5 + $0x1a4] ss:$16 sps:$4 sm:$0xff]  }
  0xc5   : > { %1594 = vmatprep.subr.bf16.mxu0 %v5508_v27  ;;  %5091 = vmatprep.subr.bf16.mxu1 %v5508_v27  ;;  %v5588_v27 = vld [vmem:[#allocation5 + $0x1a0] ss:$16 sps:$4 sm:$0xff]  }
  0xc8   : > { %1595 = vmatpush1.bf16.msra.mxu0 %v5510_v28  ;;  %5107 = vmatpush1.bf16.msra.mxu1 %v5510_v28  ;;  %v5589_v28 = vld [vmem:[#allocation5 + $0x1c4] ss:$16 sps:$4 sm:$0xff]  }
  0xc9   : > { %1596 = vmatprep.subr.bf16.mxu0 %v5511_v29  ;;  %5092 = vmatprep.subr.bf16.mxu1 %v5511_v29  ;;  %v5591_v29 = vld [vmem:[#allocation5 + $0x1c0] ss:$16 sps:$4 sm:$0xff]  }
  0xcc   : > { %1597 = vmatpush1.bf16.msra.mxu0 %v5513_v30  ;;  %5108 = vmatpush1.bf16.msra.mxu1 %v5513_v30  ;;  %v5595_v30 = vld [vmem:[#allocation5 + $0x1e4] ss:$16 sps:$4 sm:$0xff]  }
  0xcd   : > { %1598 = vmatprep.subr.bf16.mxu0 %v5514_v31  ;;  %5093 = vmatprep.subr.bf16.mxu1 %v5514_v31  ;;  %v5597_v31 = vld [vmem:[#allocation5 + $0x1e0] ss:$16 sps:$4 sm:$0xff]  }
  0xd0   : > { %1599 = vmatpush1.bf16.msra.mxu0 %v5516_v32  ;;  %5109 = vmatpush1.bf16.msra.mxu1 %v5516_v32  ;;  %v5601_v32 = vld [vmem:[#allocation5 + $0x204] ss:$16 sps:$4 sm:$0xff]  }
  0xd1   : > { %1921 = vmatprep.subr.bf16.mxu0 %v5522_v33  ;;  %v5603_v33 = vld [vmem:[#allocation5 + $0x200] ss:$16 sps:$4 sm:$0xff]  }
  0xd3   : > { %1601 = vmatmul.mubr.bf16.vlgmr.msra.gmra.mrb[0].mxu0 %v5517_v34  ;;  %v5604_v34 = vld [vmem:[#allocation5 + $0x224] ss:$16 sps:$4 sm:$0xff]  }
  0xd4   : > { %1922 = vmatpush1.bf16.msra.mxu0 %v5520_v35  ;;  %1610 = vmatprep.mubr.bf16.mxu0 %v5523_v36  ;;  %v5606_v35 = vld [vmem:[#allocation5 + $0x220] ss:$16 sps:$4 sm:$0xff]   ;;  %v5610_v36 = vld [vmem:[#allocation5 + $0x244] ss:$16 sps:$4 sm:$0xff]  }
  0xd5   : > { %1923 = vmatprep.subr.bf16.mxu0 %v5530_v37  ;;  %v5612_v37 = vld [vmem:[#allocation5 + $0x240] ss:$16 sps:$4 sm:$0xff]  }
  0xd8   : > { %1924 = vmatpush1.bf16.msra.mxu0 %v5528_v38  ;;  %v5616_v38 = vld [vmem:[#allocation5 + $0x264] ss:$16 sps:$4 sm:$0xff]  }
  0xd9   : > { %1925 = vmatprep.subr.bf16.mxu0 %v5537_v39  ;;  %v5618_v39 = vld [vmem:[#allocation5 + $0x260] ss:$16 sps:$4 sm:$0xff]  }
  0xdb   : > { %1611 = vmatmul.mubr.bf16.gmra.mrb[4].mxu0 %v5525_v40  ;;  %v5622_v40 = vld [vmem:[#allocation5 + $0x284] ss:$16 sps:$4 sm:$0xff]  }
  0xdc   : > { %1620 = vmatprep.mubr.bf16.mxu0 %v5526_v41  ;;  %1926 = vmatpush1.bf16.msra.mxu0 %v5535_v42  ;;  %v5624_v41 = vld [vmem:[#allocation5 + $0x280] ss:$16 sps:$4 sm:$0xff]   ;;  %v5625_v42 = vld [vmem:[#allocation5 + $0x2a4] ss:$16 sps:$4 sm:$0xff]  }
  0xdd   : > { %1927 = vmatprep.subr.bf16.mxu0 %v5543_v43  ;;  %v5627_v43 = vld [vmem:[#allocation5 + $0x2a0] ss:$16 sps:$4 sm:$0xff]  }
  0xe0   : > { %1928 = vmatpush1.bf16.msra.mxu0 %v5541_v44  ;;  %v5633_v44 = vld [vmem:[#allocation5 + $0xc] ss:$16 sps:$4 sm:$0xff]  }
  0xe1   : > { %1929 = vmatprep.subr.bf16.mxu0 %v5552_v45  ;;  %v5631_v45 = vld [vmem:[#allocation5 + $0x8] ss:$16 sps:$4 sm:$0xff]  }
  0xe3   : > { %1621 = vmatmul.mubr.bf16.gmra.mrb[8].mxu0 %v5531_v46  ;;  %v5634_v46 = vld [vmem:[#allocation5 + $0x2c] ss:$16 sps:$4 sm:$0xff]  }
  0xe4   : > { %1630 = vmatprep.mubr.bf16.mxu0 %v5532_v47  ;;  %1930 = vmatpush1.bf16.msra.mxu0 %v5550_v48  ;;  %v5636_v47 = vld [vmem:[#allocation5 + $0x28] ss:$16 sps:$4 sm:$0xff]   ;;  %v5637_v48 = vld [vmem:[#allocation5 + $0x4c] ss:$16 sps:$4 sm:$0xff]  }
  0xe5   : > { %1931 = vmatprep.subr.bf16.mxu0 %v5558_v49  ;;  %v5639_v49 = vld [vmem:[#allocation5 + $0x48] ss:$16 sps:$4 sm:$0xff]  }
  0xe8   : > { %1932 = vmatpush1.bf16.msra.mxu0 %v5556_v50  ;;  %v5640_v50 = vld [vmem:[#allocation5 + $0x6c] ss:$16 sps:$4 sm:$0xff]  }
  0xe9   : > { %1933 = vmatprep.subr.bf16.mxu0 %v5564_v51  ;;  %v5642_v51 = vld [vmem:[#allocation5 + $0x68] ss:$16 sps:$4 sm:$0xff]  }
  0xeb   : > { %1631 = vmatmul.mubr.bf16.gmra.mrb[12].mxu0 %v5534_v52  ;;  %v5643_v52 = vld [vmem:[#allocation5 + $0x8c] ss:$16 sps:$4 sm:$0xff]  }
  0xec   : > { %1640 = vmatprep.mubr.bf16.mxu0 %v5538_v53  ;;  %1934 = vmatpush1.bf16.msra.mxu0 %v5562_v54  ;;  %v5645_v53 = vld [vmem:[#allocation5 + $0x88] ss:$16 sps:$4 sm:$0xff]   ;;  %v5646_v54 = vld [vmem:[#allocation5 + $0xac] ss:$16 sps:$4 sm:$0xff]  }
  0xed   : > { %1935 = vmatprep.subr.bf16.mxu0 %v5573_v55  ;;  %v5648_v55 = vld [vmem:[#allocation5 + $0xa8] ss:$16 sps:$4 sm:$0xff]  }
  0xf0   : > { %1936 = vmatpush1.bf16.msra.mxu0 %v5571_v56  ;;  %v5649_v56 = vld [vmem:[#allocation5 + $0xcc] ss:$16 sps:$4 sm:$0xff]  }
  0xf1   : > { %1937 = vmatprep.subr.bf16.mxu0 %v5579_v57  ;;  %v5697_v57 = vld [vmem:[#allocation5 + $0x2c0] ss:$16 sps:$4 sm:$0xff]  }
  0xf3   : > { %1641 = vmatmul.mubr.bf16.gmra.mrb[16].mxu0 %v5540_v58  ;;  %v5699_v58 = vld [vmem:[#allocation5 + $0x2c4] ss:$16 sps:$4 sm:$0xff]  }
  0xf4   : > { %1650 = vmatprep.mubr.bf16.mxu0 %v5544_v59  ;;  %1938 = vmatpush1.bf16.msra.mxu0 %v5577_v60  ;;  %v5651_v59 = vld [vmem:[#allocation5 + $0xc8] ss:$16 sps:$4 sm:$0xff]   ;;  %v5652_v60 = vld [vmem:[#allocation5 + $0xec] ss:$16 sps:$4 sm:$0xff]  }
  0xf5   : > { %1939 = vmatprep.subr.bf16.mxu0 %v5587_v61  ;;  %1820 = vmatprep.mubr.bf16.mxu1 %v5699_v58  ;;  %v5703_v61 = vld [vmem:[#allocation5 + $0x2e4] ss:$16 sps:$4 sm:$0xff]   ;;  %v5732_v58 = vld [vmem:[#allocation5 + $0x368] ss:$16 sps:$4 sm:$0xff]  }
  0xf6   : > { %1821 = vmatmul.mubr.bf16.vlgmr.msra.gmra.mrb[0].mxu1 %v5697_v57 }
  0xf7   : > { %1830 = vmatprep.mubr.bf16.mxu1 %v5703_v61  ;;  %v5736_v61 = vld [vmem:[#allocation5 + $0x38c] ss:$16 sps:$4 sm:$0xff]  }
  0xf8   : > { %1940 = vmatpush1.bf16.msra.mxu0 %v5585_v62  ;;  %v5705_v62 = vld [vmem:[#allocation5 + $0x2e0] ss:$16 sps:$4 sm:$0xff]  }
  0xf9   : > { %1941 = vmatprep.subr.bf16.mxu0 %v5594_v63  ;;  %v5654_v63 = vld [vmem:[#allocation5 + $0xe8] ss:$16 sps:$4 sm:$0xff]  }
  0xfb   : > { %1651 = vmatmul.mubr.bf16.gmra.mrb[20].mxu0 %v5546_v0  ;;  %v5655_v0 = vld [vmem:[#allocation5 + $0x10c] ss:$16 sps:$4 sm:$0xff]  }
  0xfc   : > { %1660 = vmatprep.mubr.bf16.mxu0 %v5547_v1  ;;  %1942 = vmatpush1.bf16.msra.mxu0 %v5592_v2  ;;  %v5709_v1 = vld [vmem:[#allocation5 + $0x304] ss:$16 sps:$4 sm:$0xff]   ;;  %v5711_v2 = vld [vmem:[#allocation5 + $0x300] ss:$16 sps:$4 sm:$0xff]  }
  0xfd   : > { %1943 = vmatprep.subr.bf16.mxu0 %v5600_v3  ;;  %v5657_v3 = vld [vmem:[#allocation5 + $0x108] ss:$16 sps:$4 sm:$0xff]  }
  0xfe   : > { %1831 = vmatmul.mubr.bf16.gmra.mrb[4].mxu1 %v5705_v62 }
  0xff   : > { %1840 = vmatprep.mubr.bf16.mxu1 %v5709_v1  ;;  %v5759_v1 = vld [vmem:[%s7018_s2 + $0x4] ss:$16 sps:$4 sm:$0xff]  }
 0x100   : > { %1944 = vmatpush1.bf16.msra.mxu0 %v5598_v4  ;;  %v5658_v4 = vld [vmem:[#allocation5 + $0x12c] ss:$16 sps:$4 sm:$0xff]  }
 0x101   : > { %1945 = vmatprep.subr.bf16.mxu0 %v5609_v5  ;;  %v5715_v5 = vld [vmem:[#allocation5 + $0x324] ss:$16 sps:$4 sm:$0xff]  }
 0x103   : > { %1661 = vmatmul.mubr.bf16.gmra.mrb[24].mxu0 %v5549_v6  ;;  %v5717_v6 = vld [vmem:[#allocation5 + $0x320] ss:$16 sps:$4 sm:$0xff]  }
 0x104   : > { %1670 = vmatprep.mubr.bf16.mxu0 %v5553_v7  ;;  %1946 = vmatpush1.bf16.msra.mxu0 %v5607_v8  ;;  %v5660_v7 = vld [vmem:[#allocation5 + $0x128] ss:$16 sps:$4 sm:$0xff]   ;;  %v5661_v8 = vld [vmem:[#allocation5 + $0x14c] ss:$16 sps:$4 sm:$0xff]  }
 0x105   : > { %1947 = vmatprep.subr.bf16.mxu0 %v5615_v9  ;;  %v5721_v9 = vld [vmem:[#allocation5 + $0x344] ss:$16 sps:$4 sm:$0xff]  }
 0x106   : > { %1841 = vmatmul.mubr.bf16.gmra.mrb[8].mxu1 %v5711_v2 }
 0x107   : > { %1850 = vmatprep.mubr.bf16.mxu1 %v5715_v5 }
 0x108   : > { %1948 = vmatpush1.bf16.msra.mxu0 %v5613_v10  ;;  %v5723_v10 = vld [vmem:[#allocation5 + $0x340] ss:$16 sps:$4 sm:$0xff]  }
 0x109   : > { %1949 = vmatprep.subr.bf16.mxu0 %v5621_v11  ;;  %v5663_v11 = vld [vmem:[#allocation5 + $0x148] ss:$16 sps:$4 sm:$0xff]  }
 0x10b   : > { %1671 = vmatmul.mubr.bf16.gmra.mrb[28].mxu0 %v5555_v12  ;;  %v5664_v12 = vld [vmem:[#allocation5 + $0x16c] ss:$16 sps:$4 sm:$0xff]  }
 0x10c   : > { %1680 = vmatprep.mubr.bf16.mxu0 %v5559_v13  ;;  %1950 = vmatpush1.bf16.msra.mxu0 %v5619_v14  ;;  %v5727_v13 = vld [vmem:[#allocation5 + $0x364] ss:$16 sps:$4 sm:$0xff]   ;;  %v5729_v14 = vld [vmem:[#allocation5 + $0x360] ss:$16 sps:$4 sm:$0xff]  }
 0x10d   : > { %1951 = vmatprep.subr.bf16.mxu0 %v5630_v15  ;;  %v5666_v15 = vld [vmem:[#allocation5 + $0x168] ss:$16 sps:$4 sm:$0xff]  }
 0x10e   : > { %1851 = vmatmul.mubr.bf16.gmra.mrb[12].mxu1 %v5717_v6 }
 0x10f   : > { %1860 = vmatprep.mubr.bf16.mxu1 %v5721_v9 }
 0x110   : > { %1952 = vmatpush1.bf16.msra.mxu0 %v5628_v16  ;;  %v5667_v16 = vld [vmem:[#allocation5 + $0x18c] ss:$16 sps:$4 sm:$0xff]  }
 0x113   : > { %1681 = vmatmul.mubr.bf16.gmra.mrb[32].mxu0 %v5561_v17  ;;  %v5733_v17 = vld [vmem:[#allocation5 + $0x384] ss:$16 sps:$4 sm:$0xff]  }
 0x114   : > { %1690 = vmatprep.mubr.bf16.mxu0 %v5565_v18  ;;  %v5735_v18 = vld [vmem:[#allocation5 + $0x380] ss:$16 sps:$4 sm:$0xff]  }
 0x116   : > { %1861 = vmatmul.mubr.bf16.gmra.mrb[16].mxu1 %v5723_v10 }
 0x117   : > { %1870 = vmatprep.mubr.bf16.mxu1 %v5727_v13 }
 0x11b   : > { %1691 = vmatmul.mubr.bf16.gmra.mrb[36].mxu0 %v5567_v19  ;;  %v5669_v19 = vld [vmem:[#allocation5 + $0x188] ss:$16 sps:$4 sm:$0xff]  }
 0x11c   : > { %1700 = vmatprep.mubr.bf16.mxu0 %v5568_v20  ;;  %v5670_v20 = vld [vmem:[#allocation5 + $0x1ac] ss:$16 sps:$4 sm:$0xff]  }
 0x11e   : > { %1871 = vmatmul.mubr.bf16.gmra.mrb[20].mxu1 %v5729_v14  ;;  %v5742_v14 = vld [vmem:[#allocation5 + $0x3ac] ss:$16 sps:$4 sm:$0xff]  }
 0x11f   : > { %1880 = vmatprep.mubr.bf16.mxu1 %v5733_v17 }
 0x123   : > { %1701 = vmatmul.mubr.bf16.gmra.mrb[40].mxu0 %v5570_v21  ;;  %v5739_v21 = vld [vmem:[#allocation5 + $0x3a4] ss:$16 sps:$4 sm:$0xff]  }
 0x124   : > { %1710 = vmatprep.mubr.bf16.mxu0 %v5574_v22  ;;  %v5741_v22 = vld [vmem:[#allocation5 + $0x3a0] ss:$16 sps:$4 sm:$0xff]  }
 0x126   : > { %1881 = vmatmul.mubr.bf16.gmra.mrb[24].mxu1 %v5735_v18 }
 0x127   : > { %1890 = vmatprep.mubr.bf16.mxu1 %v5739_v21 }
 0x12b   : > { %1711 = vmatmul.mubr.bf16.gmra.mrb[44].mxu0 %v5576_v23  ;;  %v5672_v23 = vld [vmem:[#allocation5 + $0x1a8] ss:$16 sps:$4 sm:$0xff]  }
 0x12c   : > { %1720 = vmatprep.mubr.bf16.mxu0 %v5580_v24  ;;  %v5673_v24 = vld [vmem:[#allocation5 + $0x1cc] ss:$16 sps:$4 sm:$0xff]  }
 0x12e   : > { %1891 = vmatmul.mubr.bf16.gmra.mrb[28].mxu1 %v5741_v22 }
 0x133   : > { %1721 = vmatmul.mubr.bf16.gmra.mrb[48].mxu0 %v5582_v25  ;;  %v5745_v25 = vld [vmem:[#allocation5 + $0x3c4] ss:$16 sps:$4 sm:$0xff]  }
 0x134   : > { %1730 = vmatprep.mubr.bf16.mxu0 %v5583_v26  ;;  %v5747_v26 = vld [vmem:[#allocation5 + $0x3c0] ss:$16 sps:$4 sm:$0xff]   ;;  %1900 = vmatprep.mubr.bf16.mxu1 %v5745_v25 }
 0x136   : > { %1901 = vmatmul.mubr.bf16.gmra.mrb[32].mxu1 %v5747_v26 }
 0x13b   : > { %1731 = vmatmul.mubr.bf16.gmra.mrb[52].mxu0 %v5588_v27  ;;  %v5675_v27 = vld [vmem:[#allocation5 + $0x1c8] ss:$16 sps:$4 sm:$0xff]  }
 0x13c   : > { %1740 = vmatprep.mubr.bf16.mxu0 %v5589_v28  ;;  %v5676_v28 = vld [vmem:[#allocation5 + $0x1ec] ss:$16 sps:$4 sm:$0xff]  }
 0x143   : > { %1741 = vmatmul.mubr.bf16.gmra.mrb[56].mxu0 %v5591_v29  ;;  %v5751_v29 = vld [vmem:[#allocation5 + $0x3e4] ss:$16 sps:$4 sm:$0xff]  }
 0x144   : > { %1750 = vmatprep.mubr.bf16.mxu0 %v5595_v30  ;;  %v5753_v30 = vld [vmem:[#allocation5 + $0x3e0] ss:$16 sps:$4 sm:$0xff]   ;;  %1910 = vmatprep.mubr.bf16.mxu1 %v5751_v29 }
 0x145   : > { %1911 = vmatmul.mubr.bf16.gmra.mrb[36].mxu1 %v5753_v30  ;;  %v5748_v30 = vld [vmem:[#allocation5 + $0x3cc] ss:$16 sps:$4 sm:$0xff]  }
 0x146   : > { %3330 = vmatprep.mubr.bf16.mxu1 %v5759_v1 }
 0x14b   : > { %1751 = vmatmul.mubr.bf16.gmra.mrb[60].mxu0 %v5597_v31  ;;  %v5678_v31 = vld [vmem:[#allocation5 + $0x1e8] ss:$16 sps:$4 sm:$0xff]  }
 0x14c   : > { %1760 = vmatprep.mubr.bf16.mxu0 %v5601_v32  ;;  %v5679_v32 = vld [vmem:[#allocation5 + $0x20c] ss:$16 sps:$4 sm:$0xff]  }
 0x153   : > { %1761 = vmatmul.mubr.bf16.gmra.mrb[64].mxu0 %v5603_v33  ;;  %v5681_v33 = vld [vmem:[#allocation5 + $0x208] ss:$16 sps:$4 sm:$0xff]  }
 0x154   : > { %1770 = vmatprep.mubr.bf16.mxu0 %v5604_v34  ;;  %v5682_v34 = vld [vmem:[#allocation5 + $0x22c] ss:$16 sps:$4 sm:$0xff]  }
 0x15b   : > { %1771 = vmatmul.mubr.bf16.gmra.mrb[68].mxu0 %v5606_v35  ;;  %v5684_v35 = vld [vmem:[#allocation5 + $0x228] ss:$16 sps:$4 sm:$0xff]  }
 0x15c   : > { %1780 = vmatprep.mubr.bf16.mxu0 %v5610_v36  ;;  %v5685_v36 = vld [vmem:[#allocation5 + $0x24c] ss:$16 sps:$4 sm:$0xff]  }
 0x163   : > { %1781 = vmatmul.mubr.bf16.gmra.mrb[72].mxu0 %v5612_v37  ;;  %v5687_v37 = vld [vmem:[#allocation5 + $0x248] ss:$16 sps:$4 sm:$0xff]  }
 0x164   : > { %1790 = vmatprep.mubr.bf16.mxu0 %v5616_v38  ;;  %v5688_v38 = vld [vmem:[#allocation5 + $0x26c] ss:$16 sps:$4 sm:$0xff]  }
 0x16b   : > { %1791 = vmatmul.mubr.bf16.gmra.mrb[76].mxu0 %v5618_v39  ;;  %v5690_v39 = vld [vmem:[#allocation5 + $0x268] ss:$16 sps:$4 sm:$0xff]  }
 0x16c   : > { %1800 = vmatprep.mubr.bf16.mxu0 %v5622_v40  ;;  %v5691_v40 = vld [vmem:[#allocation5 + $0x28c] ss:$16 sps:$4 sm:$0xff]  }
 0x173   : > { %1801 = vmatmul.mubr.bf16.gmra.mrb[80].mxu0 %v5624_v41  ;;  %v5693_v41 = vld [vmem:[#allocation5 + $0x288] ss:$16 sps:$4 sm:$0xff]  }
 0x174   : > { %1810 = vmatprep.mubr.bf16.mxu0 %v5625_v42  ;;  %v5694_v42 = vld [vmem:[#allocation5 + $0x2ac] ss:$16 sps:$4 sm:$0xff]  }
 0x17b   : > { %1811 = vmatmul.mubr.bf16.gmra.mrb[84].mxu0 %v5627_v43  ;;  %v5696_v43 = vld [vmem:[#allocation5 + $0x2a8] ss:$16 sps:$4 sm:$0xff]  }
 0x17c   : > { %1953 = vmatprep.mubr.bf16.mxu0 %v5633_v44  ;;  %v5700_v44 = vld [vmem:[#allocation5 + $0x2cc] ss:$16 sps:$4 sm:$0xff]  }
 0x183   : > { %1954 = vmatmul.mubr.bf16.vlgmr.msra.gmra.mrb[0].mxu0 %v5631_v45  ;;  %v5702_v45 = vld [vmem:[#allocation5 + $0x2c8] ss:$16 sps:$4 sm:$0xff]  }
 0x184   : > { %1963 = vmatprep.mubr.bf16.mxu0 %v5634_v46  ;;  %v5706_v46 = vld [vmem:[#allocation5 + $0x2ec] ss:$16 sps:$4 sm:$0xff]  }
 0x18b   : > { %1964 = vmatmul.mubr.bf16.gmra.mrb[4].mxu0 %v5636_v47  ;;  %v5708_v47 = vld [vmem:[#allocation5 + $0x2e8] ss:$16 sps:$4 sm:$0xff]  }
 0x18c   : > { %1973 = vmatprep.mubr.bf16.mxu0 %v5637_v48  ;;  %v5712_v48 = vld [vmem:[#allocation5 + $0x30c] ss:$16 sps:$4 sm:$0xff]  }
 0x193   : > { %1974 = vmatmul.mubr.bf16.gmra.mrb[8].mxu0 %v5639_v49  ;;  %v5714_v49 = vld [vmem:[#allocation5 + $0x308] ss:$16 sps:$4 sm:$0xff]  }
 0x194   : > { %1983 = vmatprep.mubr.bf16.mxu0 %v5640_v50  ;;  %v5718_v50 = vld [vmem:[#allocation5 + $0x32c] ss:$16 sps:$4 sm:$0xff]  }
 0x19b   : > { %1984 = vmatmul.mubr.bf16.gmra.mrb[12].mxu0 %v5642_v51  ;;  %v5720_v51 = vld [vmem:[#allocation5 + $0x328] ss:$16 sps:$4 sm:$0xff]  }
 0x19c   : > { %1993 = vmatprep.mubr.bf16.mxu0 %v5643_v52  ;;  %v5724_v52 = vld [vmem:[#allocation5 + $0x34c] ss:$16 sps:$4 sm:$0xff]  }
 0x1a3   : > { %1994 = vmatmul.mubr.bf16.gmra.mrb[16].mxu0 %v5645_v53  ;;  %v5726_v53 = vld [vmem:[#allocation5 + $0x348] ss:$16 sps:$4 sm:$0xff]  }
 0x1a4   : > { %2003 = vmatprep.mubr.bf16.mxu0 %v5646_v54  ;;  %v5730_v54 = vld [vmem:[#allocation5 + $0x36c] ss:$16 sps:$4 sm:$0xff]  }
 0x1ab   : > { %2004 = vmatmul.mubr.bf16.gmra.mrb[20].mxu0 %v5648_v55 }
 0x1ac   : > { %2013 = vmatprep.mubr.bf16.mxu0 %v5649_v56 }
 0x1b3   : > { %2014 = vmatmul.mubr.bf16.gmra.mrb[24].mxu0 %v5651_v59 }
 0x1b4   : > { %2023 = vmatprep.mubr.bf16.mxu0 %v5652_v60 }
 0x1bb   : > { %2024 = vmatmul.mubr.bf16.gmra.mrb[28].mxu0 %v5654_v63 }
 0x1bc   : > { %2033 = vmatprep.mubr.bf16.mxu0 %v5655_v0 }
 0x1c3   : > { %2034 = vmatmul.mubr.bf16.gmra.mrb[32].mxu0 %v5657_v3 }
 0x1c4   : > { %2043 = vmatprep.mubr.bf16.mxu0 %v5658_v4 }
 0x1cb   : > { %2044 = vmatmul.mubr.bf16.gmra.mrb[36].mxu0 %v5660_v7 }
 0x1cc   : > { %2053 = vmatprep.mubr.bf16.mxu0 %v5661_v8 }
 0x1d3   : > { %2054 = vmatmul.mubr.bf16.gmra.mrb[40].mxu0 %v5663_v11  ;;  %v5738_v11 = vld [vmem:[#allocation5 + $0x388] ss:$16 sps:$4 sm:$0xff]  }
 0x1d4   : > { %2063 = vmatprep.mubr.bf16.mxu0 %v5664_v12 }
 0x1db   : > { %2064 = vmatmul.mubr.bf16.gmra.mrb[44].mxu0 %v5666_v15 }
 0x1dc   : > { %2073 = vmatprep.mubr.bf16.mxu0 %v5667_v16 }
 0x1e3   : > { %2074 = vmatmul.mubr.bf16.gmra.mrb[48].mxu0 %v5669_v19 }
 0x1e4   : > { %2083 = vmatprep.mubr.bf16.mxu0 %v5670_v20 }
 0x1eb   : > { %2084 = vmatmul.mubr.bf16.gmra.mrb[52].mxu0 %v5672_v23 }
 0x1ec   : > { %2093 = vmatprep.mubr.bf16.mxu0 %v5673_v24 }
 0x1f3   : > { %2094 = vmatmul.mubr.bf16.gmra.mrb[56].mxu0 %v5675_v27  ;;  %v5744_v27 = vld [vmem:[#allocation5 + $0x3a8] ss:$16 sps:$4 sm:$0xff]  }
 0x1f4   : > { %2103 = vmatprep.mubr.bf16.mxu0 %v5676_v28 }
 0x1fb   : > { %2104 = vmatmul.mubr.bf16.gmra.mrb[60].mxu0 %v5678_v31 }
 0x1fc   : > { %2113 = vmatprep.mubr.bf16.mxu0 %v5679_v32 }
 0x203   : > { %2114 = vmatmul.mubr.bf16.gmra.mrb[64].mxu0 %v5681_v33 }
 0x204   : > { %2123 = vmatprep.mubr.bf16.mxu0 %v5682_v34 }
 0x20b   : > { %2124 = vmatmul.mubr.bf16.gmra.mrb[68].mxu0 %v5684_v35 }
 0x20c   : > { %2133 = vmatprep.mubr.bf16.mxu0 %v5685_v36 }
 0x213   : > { %2134 = vmatmul.mubr.bf16.gmra.mrb[72].mxu0 %v5687_v37 }
 0x214   : > { %2143 = vmatprep.mubr.bf16.mxu0 %v5688_v38 }
 0x21b   : > { %2144 = vmatmul.mubr.bf16.gmra.mrb[76].mxu0 %v5690_v39 }
 0x21c   : > { %2153 = vmatprep.mubr.bf16.mxu0 %v5691_v40 }
 0x223   : > { %2154 = vmatmul.mubr.bf16.gmra.mrb[80].mxu0 %v5693_v41 }
 0x224   : > { %2163 = vmatprep.mubr.bf16.mxu0 %v5694_v42 }
 0x22b   : > { %2164 = vmatmul.mubr.bf16.gmra.mrb[84].mxu0 %v5696_v43  ;;  %v5750_v43 = vld [vmem:[#allocation5 + $0x3c8] ss:$16 sps:$4 sm:$0xff]  }
 0x22c   : > { %2173 = vmatprep.mubr.bf16.mxu0 %v5700_v44 }
 0x233   : > { %2174 = vmatmul.mubr.bf16.gmra.mrb[88].mxu0 %v5702_v45 }
 0x234   : > { %2183 = vmatprep.mubr.bf16.mxu0 %v5706_v46  ;;  %v5754_v46 = vld [vmem:[#allocation5 + $0x3ec] ss:$16 sps:$4 sm:$0xff]  }
 0x23b   : > { %2184 = vmatmul.mubr.bf16.gmra.mrb[92].mxu0 %v5708_v47 }
 0x23c   : > { %2193 = vmatprep.mubr.bf16.mxu0 %v5712_v48 }
 0x243   : > { %2194 = vmatmul.mubr.bf16.gmra.mrb[96].mxu0 %v5714_v49 }
 0x244   : > { %2203 = vmatprep.mubr.bf16.mxu0 %v5718_v50 }
 0x24b   : > { %2204 = vmatmul.mubr.bf16.gmra.mrb[100].mxu0 %v5720_v51 }
 0x24c   : > { %2213 = vmatprep.mubr.bf16.mxu0 %v5724_v52 }
 0x253   : > { %2214 = vmatmul.mubr.bf16.gmra.mrb[104].mxu0 %v5726_v53 }
 0x254   : > { %2223 = vmatprep.mubr.bf16.mxu0 %v5730_v54 }
 0x256   : > { %v1955_v55 = vpop.f32.mrb[0].mxu0 }
 0x257   : > { %v2402_v56 = vmul.f32 0.2, %v1955_v55  ;;  %v1957_v57 = vpop.f32.mrb[1].mxu0  ;;  %vm2274_vm0 = vcmp.gt.f32.partialorder %v1955_v55, 0.0 }
 0x258   : > { %v2403_v59 = vmul.f32 0.2, %v1957_v57  ;;  %v1959_v60 = vpop.f32.mrb[2].mxu0  ;;  %vm2275_vm1 = vcmp.gt.f32.partialorder %v1957_v57, 0.0 }
 0x259   : > { %vm2276_vm2 = vcmp.gt.f32.partialorder %v1959_v60, 0.0  ;;  %v2404_v62 = vmul.f32 0.2, %v1959_v60  ;;  %v1961_v63 = vpop.f32.mrb[3].mxu0  ;;  %v2530_v2 = vsel %vm2274_vm0, %v1955_v55, %v2402_v56 }
 0x25a   : > { %vm2277_vm3 = vcmp.gt.f32.partialorder %v1961_v63, 0.0  ;;  %v2405_v0 = vmul.f32 0.2, %v1961_v63  ;;  %v2531_v4 = vsel %vm2275_vm1, %v1957_v57, %v2403_v59  ;;  %v5756_v59 = vld [vmem:[#allocation5 + $0x3e8] ss:$16 sps:$4 sm:$0xff]  }
 0x25b   : > { %v2532_v3 = vsel %vm2276_vm2, %v1959_v60, %v2404_v62  ;;  %2224 = vmatmul.mubr.bf16.gmra.mrb[108].mxu0 %v5732_v58 }
 0x25c   : > { %v2722_v5 = vpack.c.bf16 %v2532_v3, %v2530_v2  ;;  %v2533_v6 = vsel %vm2277_vm3, %v1961_v63, %v2405_v0  ;;  %2233 = vmatprep.mubr.bf16.mxu0 %v5736_v61 }
 0x25d   : > { %v2723_v7 = vpack.c.bf16 %v2533_v6, %v2531_v4 }
 0x25e   : > { %v1965_v8 = vpop.f32.mrb[4].mxu0 }
 0x25f   : > { %v2406_v9 = vmul.f32 0.2, %v1965_v8  ;;  %v1967_v10 = vpop.f32.mrb[5].mxu0  ;;  %3298 = vmatprep.subr.bf16.mxu1 %v2723_v7  ;;  %vm2278_vm4 = vcmp.gt.f32.partialorder %v1965_v8, 0.0 }
 0x260   : > { %v2407_v12 = vmul.f32 0.2, %v1967_v10  ;;  %v1969_v13 = vpop.f32.mrb[6].mxu0  ;;  %3299 = vmatpush1.bf16.msra.mxu1 %v2722_v5  ;;  %vm2279_vm5 = vcmp.gt.f32.partialorder %v1967_v10, 0.0 }
 0x261   : > { %vm2280_vm6 = vcmp.gt.f32.partialorder %v1969_v13, 0.0  ;;  %v2408_v15 = vmul.f32 0.2, %v1969_v13  ;;  %v1971_v16 = vpop.f32.mrb[7].mxu0  ;;  %v2534_v18 = vsel %vm2278_vm4, %v1965_v8, %v2406_v9 }
 0x262   : > { %vm2281_vm7 = vcmp.gt.f32.partialorder %v1971_v16, 0.0  ;;  %v2409_v17 = vmul.f32 0.2, %v1971_v16  ;;  %v2535_v20 = vsel %vm2279_vm5, %v1967_v10, %v2407_v12 }
 0x263   : > { %v2536_v19 = vsel %vm2280_vm6, %v1969_v13, %v2408_v15  ;;  %2234 = vmatmul.mubr.bf16.gmra.mrb[112].mxu0 %v5738_v11 }
 0x264   : > { %v2724_v21 = vpack.c.bf16 %v2536_v19, %v2534_v18  ;;  %v2537_v22 = vsel %vm2281_vm7, %v1971_v16, %v2409_v17  ;;  %2243 = vmatprep.mubr.bf16.mxu0 %v5742_v14  ;;  %v6455_v17 = vpop.f32.mrb[0].mxu1 }
 0x265   : > { %v2725_v23 = vpack.c.bf16 %v2537_v22, %v2535_v20 }
 0x266   : > { %v1975_v24 = vpop.f32.mrb[8].mxu0 }
 0x267   : > { %v2410_v25 = vmul.f32 0.2, %v1975_v24  ;;  %v1977_v26 = vpop.f32.mrb[9].mxu0  ;;  %3300 = vmatprep.subr.bf16.mxu1 %v2725_v23  ;;  %vm2282_vm8 = vcmp.gt.f32.partialorder %v1975_v24, 0.0 }
 0x268   : > { %v2411_v28 = vmul.f32 0.2, %v1977_v26  ;;  %v1979_v29 = vpop.f32.mrb[10].mxu0  ;;  %3301 = vmatpush1.bf16.msra.mxu1 %v2724_v21  ;;  %vm2283_vm9 = vcmp.gt.f32.partialorder %v1977_v26, 0.0  ;;  %v6457_v21 = vpop.f32.mrb[1].mxu1 }
 0x269   : > { %vm2284_vm10 = vcmp.gt.f32.partialorder %v1979_v29, 0.0  ;;  %v2412_v31 = vmul.f32 0.2, %v1979_v29  ;;  %v1981_v32 = vpop.f32.mrb[11].mxu0  ;;  %v2538_v34 = vsel %vm2282_vm8, %v1975_v24, %v2410_v25  ;;  %v6459_v23 = vpop.f32.mrb[2].mxu1 }
 0x26a   : > { %vm2285_vm11 = vcmp.gt.f32.partialorder %v1981_v32, 0.0  ;;  %v2413_v33 = vmul.f32 0.2, %v1981_v32  ;;  %v2539_v36 = vsel %vm2283_vm9, %v1977_v26, %v2411_v28  ;;  %v6461_v25 = vpop.f32.mrb[3].mxu1 }
 0x26b   : > { %v2540_v35 = vsel %vm2284_vm10, %v1979_v29, %v2412_v31  ;;  %2244 = vmatmul.mubr.bf16.gmra.mrb[116].mxu0 %v5744_v27 }
 0x26c   : > { %v2726_v37 = vpack.c.bf16 %v2540_v35, %v2538_v34  ;;  %v2541_v38 = vsel %vm2285_vm11, %v1981_v32, %v2413_v33  ;;  %2253 = vmatprep.mubr.bf16.mxu0 %v5748_v30  ;;  %v6463_v35 = vpop.f32.mrb[4].mxu1 }
 0x26d   : > { %v2727_v39 = vpack.c.bf16 %v2541_v38, %v2539_v36 }
 0x26e   : > { %v1985_v40 = vpop.f32.mrb[12].mxu0 }
 0x26f   : > { %v2414_v41 = vmul.f32 0.2, %v1985_v40  ;;  %v1987_v42 = vpop.f32.mrb[13].mxu0  ;;  %3302 = vmatprep.subr.bf16.mxu1 %v2727_v39  ;;  %vm2286_vm12 = vcmp.gt.f32.partialorder %v1985_v40, 0.0  ;;  %v6465_v39 = vpop.f32.mrb[5].mxu1 }
 0x270   : > { %v2415_v44 = vmul.f32 0.2, %v1987_v42  ;;  %v1989_v45 = vpop.f32.mrb[14].mxu0  ;;  %3303 = vmatpush1.bf16.msra.mxu1 %v2726_v37  ;;  %vm2287_vm13 = vcmp.gt.f32.partialorder %v1987_v42, 0.0 }
 0x271   : > { %vm2288_vm14 = vcmp.gt.f32.partialorder %v1989_v45, 0.0  ;;  %v2416_v47 = vmul.f32 0.2, %v1989_v45  ;;  %v1991_v48 = vpop.f32.mrb[15].mxu0  ;;  %v2542_v50 = vsel %vm2286_vm12, %v1985_v40, %v2414_v41  ;;  %v6467_v41 = vpop.f32.mrb[6].mxu1 }
 0x272   : > { %vm2289_vm15 = vcmp.gt.f32.partialorder %v1991_v48, 0.0  ;;  %v2417_v49 = vmul.f32 0.2, %v1991_v48  ;;  %v2543_v52 = vsel %vm2287_vm13, %v1987_v42, %v2415_v44 }
 0x273   : > { %v2544_v51 = vsel %vm2288_vm14, %v1989_v45, %v2416_v47  ;;  %2254 = vmatmul.mubr.bf16.gmra.mrb[120].mxu0 %v5750_v43  ;;  %v6469_v43 = vpop.f32.mrb[7].mxu1 }
 0x274   : > { %v2728_v53 = vpack.c.bf16 %v2544_v51, %v2542_v50  ;;  %v2545_v54 = vsel %vm2289_vm15, %v1991_v48, %v2417_v49  ;;  %2263 = vmatprep.mubr.bf16.mxu0 %v5754_v46 }
 0x275   : > { %v2729_v55 = vpack.c.bf16 %v2545_v54, %v2543_v52 }
 0x276   : > { %v1995_v56 = vpop.f32.mrb[16].mxu0 }
 0x277   : > { %v2418_v57 = vmul.f32 0.2, %v1995_v56  ;;  %v1997_v58 = vpop.f32.mrb[17].mxu0  ;;  %3304 = vmatprep.subr.bf16.mxu1 %v2729_v55  ;;  %vm2290_vm0 = vcmp.gt.f32.partialorder %v1995_v56, 0.0 }
 0x278   : > { %v2419_v60 = vmul.f32 0.2, %v1997_v58  ;;  %v1999_v61 = vpop.f32.mrb[18].mxu0  ;;  %3305 = vmatpush1.bf16.msra.mxu1 %v2728_v53  ;;  %vm2291_vm1 = vcmp.gt.f32.partialorder %v1997_v58, 0.0  ;;  %v6471_v53 = vpop.f32.mrb[8].mxu1 }
 0x279   : > { %vm2292_vm2 = vcmp.gt.f32.partialorder %v1999_v61, 0.0  ;;  %v2420_v62 = vmul.f32 0.2, %v1999_v61  ;;  %v2001_v63 = vpop.f32.mrb[19].mxu0  ;;  %v2546_v1 = vsel %vm2290_vm0, %v1995_v56, %v2418_v57  ;;  %v6473_v57 = vpop.f32.mrb[9].mxu1 }
 0x27a   : > { %vm2293_vm3 = vcmp.gt.f32.partialorder %v2001_v63, 0.0  ;;  %v2421_v0 = vmul.f32 0.2, %v2001_v63  ;;  %v2547_v3 = vsel %vm2291_vm1, %v1997_v58, %v2419_v60 }
 0x27b   : > { %v2548_v2 = vsel %vm2292_vm2, %v1999_v61, %v2420_v62  ;;  %2264 = vmatmul.mubr.bf16.gmra.mrb[124].mxu0 %v5756_v59  ;;  %v6475_v59 = vpop.f32.mrb[10].mxu1 }
 0x27c   : > { %v2730_v4 = vpack.c.bf16 %v2548_v2, %v2546_v1  ;;  %v2549_v5 = vsel %vm2293_vm3, %v2001_v63, %v2421_v0  ;;  %v6477_v61 = vpop.f32.mrb[11].mxu1 }
 0x27d   : > { %v2731_v6 = vpack.c.bf16 %v2549_v5, %v2547_v3 }
 0x27e   : > { %v2005_v7 = vpop.f32.mrb[20].mxu0 }
 0x27f   : > { %v2422_v8 = vmul.f32 0.2, %v2005_v7  ;;  %v2007_v9 = vpop.f32.mrb[21].mxu0  ;;  %3306 = vmatprep.subr.bf16.mxu1 %v2731_v6  ;;  %vm2294_vm4 = vcmp.gt.f32.partialorder %v2005_v7, 0.0 }
 0x280   : > { %v2423_v10 = vmul.f32 0.2, %v2007_v9  ;;  %v2009_v11 = vpop.f32.mrb[22].mxu0  ;;  %3307 = vmatpush1.bf16.msra.mxu1 %v2730_v4  ;;  %vm2295_vm5 = vcmp.gt.f32.partialorder %v2007_v9, 0.0 }
 0x281   : > { %vm2296_vm6 = vcmp.gt.f32.partialorder %v2009_v11, 0.0  ;;  %v2424_v12 = vmul.f32 0.2, %v2009_v11  ;;  %v2011_v13 = vpop.f32.mrb[23].mxu0  ;;  %v2550_v15 = vsel %vm2294_vm4, %v2005_v7, %v2422_v8  ;;  %v6479_v7 = vpop.f32.mrb[12].mxu1 }
 0x282   : > { %vm2297_vm7 = vcmp.gt.f32.partialorder %v2011_v13, 0.0  ;;  %v2425_v14 = vmul.f32 0.2, %v2011_v13  ;;  %v2551_v18 = vsel %vm2295_vm5, %v2007_v9, %v2423_v10 }
 0x283   : > { %v2552_v16 = vsel %vm2296_vm6, %v2009_v11, %v2424_v12  ;;  %v6481_v11 = vpop.f32.mrb[13].mxu1 }
 0x284   : > { %v2732_v19 = vpack.c.bf16 %v2552_v16, %v2550_v15  ;;  %v2553_v20 = vsel %vm2297_vm7, %v2011_v13, %v2425_v14  ;;  %v6483_v13 = vpop.f32.mrb[14].mxu1 }
 0x285   : > { %v2733_v22 = vpack.c.bf16 %v2553_v20, %v2551_v18  ;;  %v6485_v15 = vpop.f32.mrb[15].mxu1 }
 0x286   : > { %v2015_v24 = vpop.f32.mrb[24].mxu0 }
 0x287   : > { %v2426_v26 = vmul.f32 0.2, %v2015_v24  ;;  %v2017_v27 = vpop.f32.mrb[25].mxu0  ;;  %3308 = vmatprep.subr.bf16.mxu1 %v2733_v22  ;;  %vm2298_vm8 = vcmp.gt.f32.partialorder %v2015_v24, 0.0 }
 0x288   : > { %v2427_v28 = vmul.f32 0.2, %v2017_v27  ;;  %v2019_v29 = vpop.f32.mrb[26].mxu0  ;;  %3309 = vmatpush1.bf16.msra.mxu1 %v2732_v19  ;;  %vm2299_vm9 = vcmp.gt.f32.partialorder %v2017_v27, 0.0 }
 0x289   : > { %vm2300_vm10 = vcmp.gt.f32.partialorder %v2019_v29, 0.0  ;;  %v2428_v30 = vmul.f32 0.2, %v2019_v29  ;;  %v2021_v31 = vpop.f32.mrb[27].mxu0  ;;  %v2554_v33 = vsel %vm2298_vm8, %v2015_v24, %v2426_v26 }
 0x28a   : > { %vm2301_vm11 = vcmp.gt.f32.partialorder %v2021_v31, 0.0  ;;  %v2429_v32 = vmul.f32 0.2, %v2021_v31  ;;  %v2555_v36 = vsel %vm2299_vm9, %v2017_v27, %v2427_v28 }
 0x28b   : > { %v2556_v34 = vsel %vm2300_vm10, %v2019_v29, %v2428_v30  ;;  %v6487_v29 = vpop.f32.mrb[16].mxu1 }
 0x28c   : > { %v2734_v37 = vpack.c.bf16 %v2556_v34, %v2554_v33  ;;  %v2557_v38 = vsel %vm2301_vm11, %v2021_v31, %v2429_v32  ;;  %v6489_v33 = vpop.f32.mrb[17].mxu1 }
 0x28d   : > { %v2735_v40 = vpack.c.bf16 %v2557_v38, %v2555_v36  ;;  %v6491_v36 = vpop.f32.mrb[18].mxu1 }
 0x28e   : > { %v2025_v42 = vpop.f32.mrb[28].mxu0  ;;  %v6493_v38 = vpop.f32.mrb[19].mxu1 }
 0x28f   : > { %v2430_v44 = vmul.f32 0.2, %v2025_v42  ;;  %v2027_v45 = vpop.f32.mrb[29].mxu0  ;;  %3310 = vmatprep.subr.bf16.mxu1 %v2735_v40  ;;  %vm2302_vm12 = vcmp.gt.f32.partialorder %v2025_v42, 0.0 }
 0x290   : > { %v2431_v46 = vmul.f32 0.2, %v2027_v45  ;;  %v2029_v47 = vpop.f32.mrb[30].mxu0  ;;  %3311 = vmatpush1.bf16.msra.mxu1 %v2734_v37  ;;  %vm2303_vm13 = vcmp.gt.f32.partialorder %v2027_v45, 0.0 }
 0x291   : > { %vm2304_vm14 = vcmp.gt.f32.partialorder %v2029_v47, 0.0  ;;  %v2432_v48 = vmul.f32 0.2, %v2029_v47  ;;  %v2031_v49 = vpop.f32.mrb[31].mxu0  ;;  %v2558_v51 = vsel %vm2302_vm12, %v2025_v42, %v2430_v44 }
 0x292   : > { %vm2305_vm15 = vcmp.gt.f32.partialorder %v2031_v49, 0.0  ;;  %v2433_v50 = vmul.f32 0.2, %v2031_v49  ;;  %v2559_v54 = vsel %vm2303_vm13, %v2027_v45, %v2431_v46 }
 0x293   : > { %v2560_v52 = vsel %vm2304_vm14, %v2029_v47, %v2432_v48 }
 0x294   : > { %v2736_v55 = vpack.c.bf16 %v2560_v52, %v2558_v51  ;;  %v2561_v56 = vsel %vm2305_vm15, %v2031_v49, %v2433_v50  ;;  %v6495_v51 = vpop.f32.mrb[20].mxu1 }
 0x295   : > { %v2737_v58 = vpack.c.bf16 %v2561_v56, %v2559_v54  ;;  %v6497_v56 = vpop.f32.mrb[21].mxu1 }
 0x296   : > { %v2035_v60 = vpop.f32.mrb[32].mxu0 }
 0x297   : > { %v2434_v62 = vmul.f32 0.2, %v2035_v60  ;;  %v2037_v63 = vpop.f32.mrb[33].mxu0  ;;  %3312 = vmatprep.subr.bf16.mxu1 %v2737_v58  ;;  %vm2306_vm0 = vcmp.gt.f32.partialorder %v2035_v60, 0.0 }
 0x298   : > { %v2435_v0 = vmul.f32 0.2, %v2037_v63  ;;  %v2039_v1 = vpop.f32.mrb[34].mxu0  ;;  %3313 = vmatpush1.bf16.msra.mxu1 %v2736_v55  ;;  %vm2307_vm1 = vcmp.gt.f32.partialorder %v2037_v63, 0.0 }
 0x299   : > { %vm2308_vm2 = vcmp.gt.f32.partialorder %v2039_v1, 0.0  ;;  %v2436_v2 = vmul.f32 0.2, %v2039_v1  ;;  %v2041_v3 = vpop.f32.mrb[35].mxu0  ;;  %v2562_v5 = vsel %vm2306_vm0, %v2035_v60, %v2434_v62  ;;  %v6499_v60 = vpop.f32.mrb[22].mxu1 }
 0x29a   : > { %vm2309_vm3 = vcmp.gt.f32.partialorder %v2041_v3, 0.0  ;;  %v2437_v4 = vmul.f32 0.2, %v2041_v3  ;;  %v2563_v8 = vsel %vm2307_vm1, %v2037_v63, %v2435_v0  ;;  %v6501_v63 = vpop.f32.mrb[23].mxu1 }
 0x29b   : > { %v2564_v6 = vsel %vm2308_vm2, %v2039_v1, %v2436_v2 }
 0x29c   : > { %v2738_v9 = vpack.c.bf16 %v2564_v6, %v2562_v5  ;;  %v2565_v10 = vsel %vm2309_vm3, %v2041_v3, %v2437_v4 }
 0x29d   : > { %v2739_v12 = vpack.c.bf16 %v2565_v10, %v2563_v8  ;;  %v6503_v10 = vpop.f32.mrb[24].mxu1 }
 0x29e   : > { %v2045_v14 = vpop.f32.mrb[36].mxu0 }
 0x29f   : > { %v2438_v16 = vmul.f32 0.2, %v2045_v14  ;;  %v2047_v18 = vpop.f32.mrb[37].mxu0  ;;  %3314 = vmatprep.subr.bf16.mxu1 %v2739_v12  ;;  %vm2310_vm4 = vcmp.gt.f32.partialorder %v2045_v14, 0.0 }
 0x2a0   : > { %v2439_v19 = vmul.f32 0.2, %v2047_v18  ;;  %v2049_v20 = vpop.f32.mrb[38].mxu0  ;;  %3315 = vmatpush1.bf16.msra.mxu1 %v2738_v9  ;;  %vm2311_vm5 = vcmp.gt.f32.partialorder %v2047_v18, 0.0 }
 0x2a1   : > { %vm2312_vm6 = vcmp.gt.f32.partialorder %v2049_v20, 0.0  ;;  %v2440_v22 = vmul.f32 0.2, %v2049_v20  ;;  %v2051_v24 = vpop.f32.mrb[39].mxu0  ;;  %v2566_v27 = vsel %vm2310_vm4, %v2045_v14, %v2438_v16 }
 0x2a2   : > { %vm2313_vm7 = vcmp.gt.f32.partialorder %v2051_v24, 0.0  ;;  %v2441_v26 = vmul.f32 0.2, %v2051_v24  ;;  %v2567_v30 = vsel %vm2311_vm5, %v2047_v18, %v2439_v19  ;;  %v6505_v18 = vpop.f32.mrb[25].mxu1 }
 0x2a3   : > { %v2568_v28 = vsel %vm2312_vm6, %v2049_v20, %v2440_v22  ;;  %v6507_v20 = vpop.f32.mrb[26].mxu1 }
 0x2a4   : > { %v2740_v31 = vpack.c.bf16 %v2568_v28, %v2566_v27  ;;  %v2569_v32 = vsel %vm2313_vm7, %v2051_v24, %v2441_v26  ;;  %v2786_v24 = vld [vmem:[%s7022_s6] sm:$0xff]  ;;  %v6512_v26 = vpop.f32.mrb[27].mxu1 }
 0x2a5   : > { %v2741_v34 = vpack.c.bf16 %v2569_v32, %v2567_v30  ;;  %v6105_v30 = vmov 0  }
 0x2a6   : > { %v2055_v37 = vpop.f32.mrb[40].mxu0  ;;  %5467 = vset.pattern.permute.xlu0 %v6105_v30  ;;  %5468 = vset.pattern.permute.xlu1 %v6105_v30 }
 0x2a7   : > { %v2442_v40 = vmul.f32 0.2, %v2055_v37  ;;  %v2057_v42 = vpop.f32.mrb[41].mxu0  ;;  %3316 = vmatprep.subr.bf16.mxu1 %v2741_v34  ;;  %vm2314_vm8 = vcmp.gt.f32.partialorder %v2055_v37, 0.0  ;;  %2820 = vperm.xlu0 %5467, %v2786_v24  }
 0x2a8   : > { %v2443_v44 = vmul.f32 0.2, %v2057_v42  ;;  %v2059_v45 = vpop.f32.mrb[42].mxu0  ;;  %3317 = vmatpush1.bf16.msra.mxu1 %v2740_v31  ;;  %vm2315_vm9 = vcmp.gt.f32.partialorder %v2057_v42, 0.0 }
 0x2a9   : > { %vm2316_vm10 = vcmp.gt.f32.partialorder %v2059_v45, 0.0  ;;  %v2444_v46 = vmul.f32 0.2, %v2059_v45  ;;  %v2061_v47 = vpop.f32.mrb[43].mxu0  ;;  %v2570_v49 = vsel %vm2314_vm8, %v2055_v37, %v2442_v40 }
 0x2aa   : > { %vm2317_vm11 = vcmp.gt.f32.partialorder %v2061_v47, 0.0  ;;  %v2445_v48 = vmul.f32 0.2, %v2061_v47  ;;  %v2571_v52 = vsel %vm2315_vm9, %v2057_v42, %v2443_v44 }
 0x2ab   : > { %v2572_v50 = vsel %vm2316_vm10, %v2059_v45, %v2444_v46  ;;  %v2787_v45 = vld [vmem:[%s7022_s6 + $0x8] sm:$0xff]  ;;  %v6519_v46 = vpop.f32.mrb[28].mxu1 }
 0x2ac   : > { %v2742_v54 = vpack.c.bf16 %v2572_v50, %v2570_v49  ;;  %v2573_v55 = vsel %vm2317_vm11, %v2061_v47, %v2445_v48  ;;  %2825 = vperm.xlu0 %5467, %v2787_v45   ;;  %v6521_v50 = vpop.f32.mrb[29].mxu1 }
 0x2ad   : > { %v2743_v58 = vpack.c.bf16 %v2573_v55, %v2571_v52 }
 0x2ae   : > { %v2065_v62 = vpop.f32.mrb[44].mxu0 }
 0x2af   : > { %v2446_v0 = vmul.f32 0.2, %v2065_v62  ;;  %v2067_v1 = vpop.f32.mrb[45].mxu0  ;;  %3318 = vmatprep.subr.bf16.mxu1 %v2743_v58  ;;  %vm2318_vm12 = vcmp.gt.f32.partialorder %v2065_v62, 0.0  ;;  %v2788_v58 = vld [vmem:[%s7022_s6 + $0x10] sm:$0xff] }
 0x2b0   : > { %v2447_v2 = vmul.f32 0.2, %v2067_v1  ;;  %v2069_v3 = vpop.f32.mrb[46].mxu0  ;;  %3319 = vmatpush1.bf16.msra.mxu1 %v2742_v54  ;;  %vm2319_vm13 = vcmp.gt.f32.partialorder %v2067_v1, 0.0  ;;  %v6523_v54 = vpop.f32.mrb[30].mxu1  ;;  %2830 = vperm.xlu1 %5468, %v2788_v58  }
 0x2b1   : > { %vm2320_vm14 = vcmp.gt.f32.partialorder %v2069_v3, 0.0  ;;  %v2448_v4 = vmul.f32 0.2, %v2069_v3  ;;  %v2071_v5 = vpop.f32.mrb[47].mxu0  ;;  %v2574_v8 = vsel %vm2318_vm12, %v2065_v62, %v2446_v0  ;;  %v2790_v62 = vld [vmem:[%s7022_s6 + $0x20] sm:$0xff]  ;;  %v6531_v0 = vpop.f32.mrb[31].mxu1 }
 0x2b2   : > { %vm2321_vm15 = vcmp.gt.f32.partialorder %v2071_v5, 0.0  ;;  %v2449_v6 = vmul.f32 0.2, %v2071_v5  ;;  %v2575_v12 = vsel %vm2319_vm13, %v2067_v1, %v2447_v2  ;;  %2840 = vperm.xlu0 %5467, %v2790_v62  }
 0x2b3   : > { %v2576_v9 = vsel %vm2320_vm14, %v2069_v3, %v2448_v4 }
 0x2b4   : > { %v2744_v14 = vpack.c.bf16 %v2576_v9, %v2574_v8  ;;  %v2577_v16 = vsel %vm2321_vm15, %v2071_v5, %v2449_v6 }
 0x2b5   : > { %v2745_v19 = vpack.c.bf16 %v2577_v16, %v2575_v12  ;;  %v2792_v16 = vld [vmem:[%s7022_s6 + $0x30] sm:$0xff] }
 0x2b6   : > { %v2075_v22 = vpop.f32.mrb[48].mxu0  ;;  %2850 = vperm.xlu0 %5467, %v2792_v16   ;;  %v2795_v16 = vld [vmem:[%s7022_s6 + $0x48] sm:$0xff] }
 0x2b7   : > { %v2450_v27 = vmul.f32 0.2, %v2075_v22  ;;  %v2077_v28 = vpop.f32.mrb[49].mxu0  ;;  %3320 = vmatprep.subr.bf16.mxu1 %v2745_v19  ;;  %vm2322_vm0 = vcmp.gt.f32.partialorder %v2075_v22, 0.0  ;;  %v6539_v19 = vpop.f32.mrb[32].mxu1 }
 0x2b8   : > { %v2451_v31 = vmul.f32 0.2, %v2077_v28  ;;  %v2079_v32 = vpop.f32.mrb[50].mxu0  ;;  %3321 = vmatpush1.bf16.msra.mxu1 %v2744_v14  ;;  %vm2323_vm1 = vcmp.gt.f32.partialorder %v2077_v28, 0.0  ;;  %v2789_v14 = vld [vmem:[%s7022_s6 + $0x18] sm:$0xff] }
 0x2b9   : > { %vm2324_vm2 = vcmp.gt.f32.partialorder %v2079_v32, 0.0  ;;  %v2452_v34 = vmul.f32 0.2, %v2079_v32  ;;  %v2081_v37 = vpop.f32.mrb[51].mxu0  ;;  %v2578_v42 = vsel %vm2322_vm0, %v2075_v22, %v2450_v27  ;;  %2835 = vperm.xlu1 %5468, %v2789_v14  }
 0x2ba   : > { %vm2325_vm3 = vcmp.gt.f32.partialorder %v2081_v37, 0.0  ;;  %v2453_v40 = vmul.f32 0.2, %v2081_v37  ;;  %v2579_v47 = vsel %vm2323_vm1, %v2077_v28, %v2451_v31  ;;  %v6541_v28 = vpop.f32.mrb[33].mxu1 }
 0x2bb   : > { %v2580_v44 = vsel %vm2324_vm2, %v2079_v32, %v2452_v34  ;;  %v6543_v32 = vpop.f32.mrb[34].mxu1 }
 0x2bc   : > { %v2746_v48 = vpack.c.bf16 %v2580_v44, %v2578_v42  ;;  %v2581_v49 = vsel %vm2325_vm3, %v2081_v37, %v2453_v40  ;;  %v2791_v37 = vld [vmem:[%s7022_s6 + $0x28] sm:$0xff]  ;;  %v2794_v40 = vld [vmem:[%s7022_s6 + $0x40] sm:$0xff]  ;;  %v6551_v42 = vpop.f32.mrb[35].mxu1 }
 0x2bd   : > { %v2747_v52 = vpack.c.bf16 %v2581_v49, %v2579_v47  ;;  %2845 = vperm.xlu1 %5468, %v2791_v37   ;;  %2860 = vperm.xlu0 %5467, %v2794_v40  }
 0x2be   : > { %v2085_v55 = vpop.f32.mrb[52].mxu0 }
 0x2bf   : > { %v2454_v1 = vmul.f32 0.2, %v2085_v55  ;;  %v2087_v2 = vpop.f32.mrb[53].mxu0  ;;  %3322 = vmatprep.subr.bf16.mxu1 %v2747_v52  ;;  %vm2326_vm4 = vcmp.gt.f32.partialorder %v2085_v55, 0.0 }
 0x2c0   : > { %v2455_v3 = vmul.f32 0.2, %v2087_v2  ;;  %v2089_v4 = vpop.f32.mrb[54].mxu0  ;;  %3323 = vmatpush1.bf16.msra.mxu1 %v2746_v48  ;;  %vm2327_vm5 = vcmp.gt.f32.partialorder %v2087_v2, 0.0 }
 0x2c1   : > { %vm2328_vm6 = vcmp.gt.f32.partialorder %v2089_v4, 0.0  ;;  %v2456_v5 = vmul.f32 0.2, %v2089_v4  ;;  %v2091_v6 = vpop.f32.mrb[55].mxu0  ;;  %v2582_v9 = vsel %vm2326_vm4, %v2085_v55, %v2454_v1  ;;  %v2793_v1 = vld [vmem:[%s7022_s6 + $0x38] sm:$0xff] }
 0x2c2   : > { %vm2329_vm7 = vcmp.gt.f32.partialorder %v2091_v6, 0.0  ;;  %v2457_v8 = vmul.f32 0.2, %v2091_v6  ;;  %v2583_v22 = vsel %vm2327_vm5, %v2087_v2, %v2455_v3  ;;  %v2796_v2 = vld [vmem:[%s7022_s6 + $0x50] sm:$0xff]  ;;  %v6559_v3 = vpop.f32.mrb[36].mxu1  ;;  %2855 = vperm.xlu1 %5468, %v2793_v1  }
 0x2c3   : > { %v2584_v12 = vsel %vm2328_vm6, %v2089_v4, %v2456_v5  ;;  %2870 = vperm.xlu0 %5467, %v2796_v2  }
 0x2c4   : > { %v2748_v24 = vpack.c.bf16 %v2584_v12, %v2582_v9  ;;  %v2585_v27 = vsel %vm2329_vm7, %v2091_v6, %v2457_v8  ;;  %v6561_v8 = vpop.f32.mrb[37].mxu1 }
 0x2c5   : > { %v2749_v31 = vpack.c.bf16 %v2585_v27, %v2583_v22  ;;  %v6563_v12 = vpop.f32.mrb[38].mxu1  ;;  %v2798_v22 = vld [vmem:[%s7022_s6 + $0x60] sm:$0xff] }
 0x2c6   : > { %v2095_v34 = vpop.f32.mrb[56].mxu0  ;;  %2865 = vperm.xlu1 %5468, %v2795_v16  }
 0x2c7   : > { %v2458_v44 = vmul.f32 0.2, %v2095_v34  ;;  %v2097_v45 = vpop.f32.mrb[57].mxu0  ;;  %3324 = vmatprep.subr.bf16.mxu1 %v2749_v31  ;;  %vm2330_vm8 = vcmp.gt.f32.partialorder %v2095_v34, 0.0  ;;  %2880 = vperm.xlu0 %5467, %v2798_v22  }
 0x2c8   : > { %v2459_v47 = vmul.f32 0.2, %v2097_v45  ;;  %v2099_v48 = vpop.f32.mrb[58].mxu0  ;;  %3325 = vmatpush1.bf16.msra.mxu1 %v2748_v24  ;;  %vm2331_vm9 = vcmp.gt.f32.partialorder %v2097_v45, 0.0  ;;  %v6571_v24 = vpop.f32.mrb[39].mxu1 }
 0x2c9   : > { %vm2332_vm10 = vcmp.gt.f32.partialorder %v2099_v48, 0.0  ;;  %v2460_v49 = vmul.f32 0.2, %v2099_v48  ;;  %v2101_v52 = vpop.f32.mrb[59].mxu0  ;;  %v2586_v58 = vsel %vm2330_vm8, %v2095_v34, %v2458_v44 }
 0x2ca   : > { %vm2333_vm11 = vcmp.gt.f32.partialorder %v2101_v52, 0.0  ;;  %v2461_v55 = vmul.f32 0.2, %v2101_v52  ;;  %v2587_v4 = vsel %vm2331_vm9, %v2097_v45, %v2459_v47 }
 0x2cb   : > { %v2588_v62 = vsel %vm2332_vm10, %v2099_v48, %v2460_v49  ;;  %v2797_v49 = vld [vmem:[%s7022_s6 + $0x58] sm:$0xff] }
 0x2cc   : > { %v2750_v5 = vpack.c.bf16 %v2588_v62, %v2586_v58  ;;  %v2589_v6 = vsel %vm2333_vm11, %v2101_v52, %v2461_v55  ;;  %v2800_v52 = vld [vmem:[%s7022_s6 + $0x70] sm:$0xff]  ;;  %2875 = vperm.xlu1 %5468, %v2797_v49  }
 0x2cd   : > { %v2751_v9 = vpack.c.bf16 %v2589_v6, %v2587_v4  ;;  %2890 = vperm.xlu0 %5467, %v2800_v52   ;;  %v2799_v4 = vld [vmem:[%s7022_s6 + $0x68] sm:$0xff] }
 0x2ce   : > { %v2105_v14 = vpop.f32.mrb[60].mxu0 }
 0x2cf   : > { %v2462_v27 = vmul.f32 0.2, %v2105_v14  ;;  %v2107_v31 = vpop.f32.mrb[61].mxu0  ;;  %3326 = vmatprep.subr.bf16.mxu1 %v2751_v9  ;;  %vm2334_vm12 = vcmp.gt.f32.partialorder %v2105_v14, 0.0 }
 0x2d0   : > { %v2463_v34 = vmul.f32 0.2, %v2107_v31  ;;  %v2109_v37 = vpop.f32.mrb[62].mxu0  ;;  %3327 = vmatpush1.bf16.msra.mxu1 %v2750_v5  ;;  %vm2335_vm13 = vcmp.gt.f32.partialorder %v2107_v31, 0.0  ;;  %v2802_v5 = vld [vmem:[%s7022_s6 + $0x80] sm:$0xff]  ;;  %2885 = vperm.xlu1 %5468, %v2799_v4  }
 0x2d1   : > { %vm2336_vm14 = vcmp.gt.f32.partialorder %v2109_v37, 0.0  ;;  %v2464_v40 = vmul.f32 0.2, %v2109_v37  ;;  %v2111_v44 = vpop.f32.mrb[63].mxu0  ;;  %v2590_v47 = vsel %vm2334_vm12, %v2105_v14, %v2462_v27  ;;  %v5757_v14 = vld [vmem:[%s7018_s2] ss:$16 sps:$4 sm:$0xff]   ;;  %2900 = vperm.xlu0 %5467, %v2802_v5  }
 0x2d2   : > { %vm2337_vm15 = vcmp.gt.f32.partialorder %v2111_v44, 0.0  ;;  %v2465_v45 = vmul.f32 0.2, %v2111_v44  ;;  %v2591_v55 = vsel %vm2335_vm13, %v2107_v31, %v2463_v34  ;;  %v5760_v27 = vld [vmem:[%s7018_s2 + $0x24] ss:$16 sps:$4 sm:$0xff]  }
 0x2d3   : > { %v2592_v48 = vsel %vm2336_vm14, %v2109_v37, %v2464_v40  ;;  %v2801_v37 = vld [vmem:[%s7022_s6 + $0x78] sm:$0xff]  ;;  %v5762_v5 = vld [vmem:[%s7018_s2 + $0x20] ss:$16 sps:$4 sm:$0xff]  }
 0x2d4   : > { %v2752_v58 = vpack.c.bf16 %v2592_v48, %v2590_v47  ;;  %v2593_v62 = vsel %vm2337_vm15, %v2111_v44, %v2465_v45  ;;  %v2804_v44 = vld [vmem:[%s7022_s6 + $0x90] sm:$0xff]  ;;  %2895 = vperm.xlu1 %5468, %v2801_v37  }
 0x2d5   : > { %v2753_v1 = vpack.c.bf16 %v2593_v62, %v2591_v55  ;;  %2910 = vperm.xlu0 %5467, %v2804_v44  }
 0x2d6   : > { %v2115_v2 = vpop.f32.mrb[64].mxu0 }
 0x2d7   : > { %v2466_v6 = vmul.f32 0.2, %v2115_v2  ;;  %v2117_v9 = vpop.f32.mrb[65].mxu0  ;;  %3328 = vmatprep.subr.bf16.mxu1 %v2753_v1  ;;  %vm2338_vm0 = vcmp.gt.f32.partialorder %v2115_v2, 0.0  ;;  %v2806_v1 = vld [vmem:[%s7022_s6 + $0xa0] sm:$0xff] }
 0x2d8   : > { %v2467_v16 = vmul.f32 0.2, %v2117_v9  ;;  %v2119_v22 = vpop.f32.mrb[66].mxu0  ;;  %3329 = vmatpush1.bf16.msra.mxu1 %v2752_v58  ;;  %vm2339_vm1 = vcmp.gt.f32.partialorder %v2117_v9, 0.0  ;;  %v2803_v58 = vld [vmem:[%s7022_s6 + $0x88] sm:$0xff] }
 0x2d9   : > { %vm2340_vm2 = vcmp.gt.f32.partialorder %v2119_v22, 0.0  ;;  %v2468_v31 = vmul.f32 0.2, %v2119_v22  ;;  %v2121_v34 = vpop.f32.mrb[67].mxu0  ;;  %v2594_v45 = vsel %vm2338_vm0, %v2115_v2, %v2466_v6  ;;  %2905 = vperm.xlu1 %5468, %v2803_v58   ;;  %2920 = vperm.xlu0 %5467, %v2806_v1   ;;  %v5765_v1 = vld [vmem:[%s7018_s2 + $0x40] ss:$16 sps:$4 sm:$0xff]  }
 0x2da   : > { %vm2341_vm3 = vcmp.gt.f32.partialorder %v2121_v34, 0.0  ;;  %v2469_v40 = vmul.f32 0.2, %v2121_v34  ;;  %v2595_v48 = vsel %vm2339_vm1, %v2117_v9, %v2467_v16 }
 0x2db   : > { %v2596_v47 = vsel %vm2340_vm2, %v2119_v22, %v2468_v31  ;;  %3331 = vmatmul.mubr.bf16.vlgmr.msra.gmra.mrb[40].mxu1 %v5757_v14  ;;  %v5763_v14 = vld [vmem:[%s7018_s2 + $0x44] ss:$16 sps:$4 sm:$0xff]  }
 0x2dc   : > { %v2754_v49 = vpack.c.bf16 %v2596_v47, %v2594_v45  ;;  %v2597_v52 = vsel %vm2341_vm3, %v2121_v34, %v2469_v40  ;;  %3340 = vmatprep.mubr.bf16.mxu1 %v5760_v27  ;;  %v2805_v27 = vld [vmem:[%s7022_s6 + $0x98] sm:$0xff]  ;;  %v2808_v34 = vld [vmem:[%s7022_s6 + $0xb0] sm:$0xff] }
 0x2dd   : > { %v2755_v55 = vpack.c.bf16 %v2597_v52, %v2595_v48  ;;  %2915 = vperm.xlu1 %5468, %v2805_v27   ;;  %2930 = vperm.xlu0 %5467, %v2808_v34  }
 0x2de   : > { %v2125_v62 = vpop.f32.mrb[68].mxu0 }
 0x2df   : > { %v2470_v4 = vmul.f32 0.2, %v2125_v62  ;;  %v2127_v2 = vpop.f32.mrb[69].mxu0  ;;  %3491 = vmatprep.subr.bf16.mxu1 %v2755_v55  ;;  %vm2342_vm4 = vcmp.gt.f32.partialorder %v2125_v62, 0.0  ;;  %v2810_v55 = vld [vmem:[%s7022_s6 + $0xc0] sm:$0xff] }
 0x2e0   : > { %v2471_v6 = vmul.f32 0.2, %v2127_v2  ;;  %v2129_v9 = vpop.f32.mrb[70].mxu0  ;;  %3492 = vmatpush1.bf16.msra.mxu1 %v2754_v49  ;;  %vm2343_vm5 = vcmp.gt.f32.partialorder %v2127_v2, 0.0  ;;  %v2807_v49 = vld [vmem:[%s7022_s6 + $0xa8] sm:$0xff] }
 0x2e1   : > { %vm2344_vm6 = vcmp.gt.f32.partialorder %v2129_v9, 0.0  ;;  %v2472_v16 = vmul.f32 0.2, %v2129_v9  ;;  %v2131_v22 = vpop.f32.mrb[71].mxu0  ;;  %v2598_v37 = vsel %vm2342_vm4, %v2125_v62, %v2470_v4  ;;  %2925 = vperm.xlu1 %5468, %v2807_v49   ;;  %2940 = vperm.xlu0 %5467, %v2810_v55   ;;  %v5768_v55 = vld [vmem:[%s7018_s2 + $0x60] ss:$16 sps:$4 sm:$0xff]  }
 0x2e2   : > { %vm2345_vm7 = vcmp.gt.f32.partialorder %v2131_v22, 0.0  ;;  %v2473_v31 = vmul.f32 0.2, %v2131_v22  ;;  %v2599_v44 = vsel %vm2343_vm5, %v2127_v2, %v2471_v6 }
 0x2e3   : > { %v2600_v40 = vsel %vm2344_vm6, %v2129_v9, %v2472_v16  ;;  %3341 = vmatmul.mubr.bf16.gmra.mrb[44].mxu1 %v5762_v5  ;;  %v5766_v5 = vld [vmem:[%s7018_s2 + $0x64] ss:$16 sps:$4 sm:$0xff]  }
 0x2e4   : > { %v2756_v45 = vpack.c.bf16 %v2600_v40, %v2598_v37  ;;  %v2601_v47 = vsel %vm2345_vm7, %v2131_v22, %v2473_v31  ;;  %3350 = vmatprep.mubr.bf16.mxu1 %v5763_v14  ;;  %v2809_v14 = vld [vmem:[%s7022_s6 + $0xb8] sm:$0xff]  ;;  %v2812_v22 = vld [vmem:[%s7022_s6 + $0xd0] sm:$0xff] }
 0x2e5   : > { %v2757_v48 = vpack.c.bf16 %v2601_v47, %v2599_v44  ;;  %2935 = vperm.xlu1 %5468, %v2809_v14   ;;  %2950 = vperm.xlu0 %5467, %v2812_v22  }
 0x2e6   : > { %v2135_v52 = vpop.f32.mrb[72].mxu0 }
 0x2e7   : > { %v2474_v58 = vmul.f32 0.2, %v2135_v52  ;;  %v2137_v62 = vpop.f32.mrb[73].mxu0  ;;  %3493 = vmatprep.subr.bf16.mxu1 %v2757_v48  ;;  %vm2346_vm8 = vcmp.gt.f32.partialorder %v2135_v52, 0.0  ;;  %v2814_v48 = vld [vmem:[%s7022_s6 + $0xe0] sm:$0xff] }
 0x2e8   : > { %v2475_v4 = vmul.f32 0.2, %v2137_v62  ;;  %v2139_v2 = vpop.f32.mrb[74].mxu0  ;;  %3494 = vmatpush1.bf16.msra.mxu1 %v2756_v45  ;;  %vm2347_vm9 = vcmp.gt.f32.partialorder %v2137_v62, 0.0  ;;  %v2811_v45 = vld [vmem:[%s7022_s6 + $0xc8] sm:$0xff] }
 0x2e9   : > { %vm2348_vm10 = vcmp.gt.f32.partialorder %v2139_v2, 0.0  ;;  %v2476_v6 = vmul.f32 0.2, %v2139_v2  ;;  %v2141_v9 = vpop.f32.mrb[75].mxu0  ;;  %v2602_v27 = vsel %vm2346_vm8, %v2135_v52, %v2474_v58  ;;  %2945 = vperm.xlu1 %5468, %v2811_v45   ;;  %2960 = vperm.xlu0 %5467, %v2814_v48   ;;  %v5771_v48 = vld [vmem:[%s7018_s2 + $0x80] ss:$16 sps:$4 sm:$0xff]  }
 0x2ea   : > { %vm2349_vm11 = vcmp.gt.f32.partialorder %v2141_v9, 0.0  ;;  %v2477_v16 = vmul.f32 0.2, %v2141_v9  ;;  %v2603_v34 = vsel %vm2347_vm9, %v2137_v62, %v2475_v4 }
 0x2eb   : > { %v2604_v31 = vsel %vm2348_vm10, %v2139_v2, %v2476_v6  ;;  %3351 = vmatmul.mubr.bf16.gmra.mrb[48].mxu1 %v5765_v1  ;;  %v5769_v1 = vld [vmem:[%s7018_s2 + $0x84] ss:$16 sps:$4 sm:$0xff]  }
 0x2ec   : > { %v2758_v37 = vpack.c.bf16 %v2604_v31, %v2602_v27  ;;  %v2605_v40 = vsel %vm2349_vm11, %v2141_v9, %v2477_v16  ;;  %3360 = vmatprep.mubr.bf16.mxu1 %v5766_v5  ;;  %v2813_v5 = vld [vmem:[%s7022_s6 + $0xd8] sm:$0xff]  ;;  %v2816_v9 = vld [vmem:[%s7022_s6 + $0xf0] sm:$0xff] }
 0x2ed   : > { %v2759_v44 = vpack.c.bf16 %v2605_v40, %v2603_v34  ;;  %2955 = vperm.xlu1 %5468, %v2813_v5   ;;  %2970 = vperm.xlu0 %5467, %v2816_v9  }
 0x2ee   : > { %v2145_v47 = vpop.f32.mrb[76].mxu0 }
 0x2ef   : > { %v2478_v49 = vmul.f32 0.2, %v2145_v47  ;;  %v2147_v52 = vpop.f32.mrb[77].mxu0  ;;  %3495 = vmatprep.subr.bf16.mxu1 %v2759_v44  ;;  %vm2350_vm12 = vcmp.gt.f32.partialorder %v2145_v47, 0.0  ;;  %v3924_v44 = vld [vmem:[%s7023_s7] sm:$0xff] }
 0x2f0   : > { %v2479_v58 = vmul.f32 0.2, %v2147_v52  ;;  %v2149_v62 = vpop.f32.mrb[78].mxu0  ;;  %3496 = vmatpush1.bf16.msra.mxu1 %v2758_v37  ;;  %vm2351_vm13 = vcmp.gt.f32.partialorder %v2147_v52, 0.0  ;;  %v2815_v37 = vld [vmem:[%s7022_s6 + $0xe8] sm:$0xff] }
 0x2f1   : > { %vm2352_vm14 = vcmp.gt.f32.partialorder %v2149_v62, 0.0  ;;  %v2480_v4 = vmul.f32 0.2, %v2149_v62  ;;  %v2151_v2 = vpop.f32.mrb[79].mxu0  ;;  %v2606_v14 = vsel %vm2350_vm12, %v2145_v47, %v2478_v49  ;;  %2965 = vperm.xlu1 %5468, %v2815_v37   ;;  %3942 = vperm.xlu0 %5467, %v3924_v44   ;;  %v5774_v44 = vld [vmem:[%s7018_s2 + $0xa0] ss:$16 sps:$4 sm:$0xff]  }
 0x2f2   : > { %vm2353_vm15 = vcmp.gt.f32.partialorder %v2151_v2, 0.0  ;;  %v2481_v6 = vmul.f32 0.2, %v2151_v2  ;;  %v2607_v22 = vsel %vm2351_vm13, %v2147_v52, %v2479_v58 }
 0x2f3   : > { %v2608_v16 = vsel %vm2352_vm14, %v2149_v62, %v2480_v4  ;;  %3361 = vmatmul.mubr.bf16.gmra.mrb[52].mxu1 %v5768_v55  ;;  %v5772_v55 = vld [vmem:[%s7018_s2 + $0xa4] ss:$16 sps:$4 sm:$0xff]  }
 0x2f4   : > { %v2760_v27 = vpack.c.bf16 %v2608_v16, %v2606_v14  ;;  %v2609_v31 = vsel %vm2353_vm15, %v2151_v2, %v2481_v6  ;;  %3370 = vmatprep.mubr.bf16.mxu1 %v5769_v1  ;;  %v2817_v1 = vld [vmem:[%s7022_s6 + $0xf8] sm:$0xff]  ;;  %v3926_v2 = vld [vmem:[%s7023_s7 + $0x10] sm:$0xff] }
 0x2f5   : > { %v2761_v34 = vpack.c.bf16 %v2609_v31, %v2607_v22  ;;  %2975 = vperm.xlu1 %5468, %v2817_v1   ;;  %3952 = vperm.xlu0 %5467, %v3926_v2  }
 0x2f6   : > { %v2155_v40 = vpop.f32.mrb[80].mxu0 }
 0x2f7   : > { %v2482_v45 = vmul.f32 0.2, %v2155_v40  ;;  %v2157_v47 = vpop.f32.mrb[81].mxu0  ;;  %3497 = vmatprep.subr.bf16.mxu1 %v2761_v34  ;;  %vm2354_vm0 = vcmp.gt.f32.partialorder %v2155_v40, 0.0  ;;  %v3928_v34 = vld [vmem:[%s7023_s7 + $0x20] sm:$0xff] }
 0x2f8   : > { %v2483_v49 = vmul.f32 0.2, %v2157_v47  ;;  %v2159_v52 = vpop.f32.mrb[82].mxu0  ;;  %3498 = vmatpush1.bf16.msra.mxu1 %v2760_v27  ;;  %vm2355_vm1 = vcmp.gt.f32.partialorder %v2157_v47, 0.0  ;;  %v3925_v27 = vld [vmem:[%s7023_s7 + $0x8] sm:$0xff] }
 0x2f9   : > { %vm2356_vm2 = vcmp.gt.f32.partialorder %v2159_v52, 0.0  ;;  %v2484_v58 = vmul.f32 0.2, %v2159_v52  ;;  %v2161_v62 = vpop.f32.mrb[83].mxu0  ;;  %v2610_v5 = vsel %vm2354_vm0, %v2155_v40, %v2482_v45  ;;  %3947 = vperm.xlu1 %5468, %v3925_v27   ;;  %3962 = vperm.xlu0 %5467, %v3928_v34   ;;  %v5777_v34 = vld [vmem:[%s7018_s2 + $0xc0] ss:$16 sps:$4 sm:$0xff]  }
 0x2fa   : > { %vm2357_vm3 = vcmp.gt.f32.partialorder %v2161_v62, 0.0  ;;  %v2485_v4 = vmul.f32 0.2, %v2161_v62  ;;  %v2611_v9 = vsel %vm2355_vm1, %v2157_v47, %v2483_v49 }
 0x2fb   : > { %v2612_v6 = vsel %vm2356_vm2, %v2159_v52, %v2484_v58  ;;  %3371 = vmatmul.mubr.bf16.gmra.mrb[56].mxu1 %v5771_v48  ;;  %v5775_v48 = vld [vmem:[%s7018_s2 + $0xc4] ss:$16 sps:$4 sm:$0xff]  }
 0x2fc   : > { %v2762_v14 = vpack.c.bf16 %v2612_v6, %v2610_v5  ;;  %v2613_v16 = vsel %vm2357_vm3, %v2161_v62, %v2485_v4  ;;  %3380 = vmatprep.mubr.bf16.mxu1 %v5772_v55  ;;  %v3927_v55 = vld [vmem:[%s7023_s7 + $0x18] sm:$0xff]  ;;  %v3930_v62 = vld [vmem:[%s7023_s7 + $0x30] sm:$0xff] }
 0x2fd   : > { %v2763_v22 = vpack.c.bf16 %v2613_v16, %v2611_v9  ;;  %3957 = vperm.xlu1 %5468, %v3927_v55   ;;  %3972 = vperm.xlu0 %5467, %v3930_v62  }
 0x2fe   : > { %v2165_v31 = vpop.f32.mrb[84].mxu0 }
 0x2ff   : > { %v2486_v37 = vmul.f32 0.2, %v2165_v31  ;;  %v2167_v40 = vpop.f32.mrb[85].mxu0  ;;  %3499 = vmatprep.subr.bf16.mxu1 %v2763_v22  ;;  %vm2358_vm4 = vcmp.gt.f32.partialorder %v2165_v31, 0.0  ;;  %v3932_v22 = vld [vmem:[%s7023_s7 + $0x40] sm:$0xff] }
 0x300   : > { %v2487_v45 = vmul.f32 0.2, %v2167_v40  ;;  %v2169_v47 = vpop.f32.mrb[86].mxu0  ;;  %3500 = vmatpush1.bf16.msra.mxu1 %v2762_v14  ;;  %vm2359_vm5 = vcmp.gt.f32.partialorder %v2167_v40, 0.0  ;;  %v3929_v14 = vld [vmem:[%s7023_s7 + $0x28] sm:$0xff] }
 0x301   : > { %vm2360_vm6 = vcmp.gt.f32.partialorder %v2169_v47, 0.0  ;;  %v2488_v49 = vmul.f32 0.2, %v2169_v47  ;;  %v2171_v52 = vpop.f32.mrb[87].mxu0  ;;  %v2614_v1 = vsel %vm2358_vm4, %v2165_v31, %v2486_v37  ;;  %3967 = vperm.xlu1 %5468, %v3929_v14   ;;  %3982 = vperm.xlu0 %5467, %v3932_v22   ;;  %v5780_v22 = vld [vmem:[%s7018_s2 + $0xe0] ss:$16 sps:$4 sm:$0xff]  }
 0x302   : > { %vm2361_vm7 = vcmp.gt.f32.partialorder %v2171_v52, 0.0  ;;  %v2489_v58 = vmul.f32 0.2, %v2171_v52  ;;  %v2615_v2 = vsel %vm2359_vm5, %v2167_v40, %v2487_v45 }
 0x303   : > { %v2616_v4 = vsel %vm2360_vm6, %v2169_v47, %v2488_v49  ;;  %3381 = vmatmul.mubr.bf16.gmra.mrb[60].mxu1 %v5774_v44  ;;  %v5778_v44 = vld [vmem:[%s7018_s2 + $0xe4] ss:$16 sps:$4 sm:$0xff]  }
 0x304   : > { %v2764_v5 = vpack.c.bf16 %v2616_v4, %v2614_v1  ;;  %v2617_v6 = vsel %vm2361_vm7, %v2171_v52, %v2489_v58  ;;  %3390 = vmatprep.mubr.bf16.mxu1 %v5775_v48  ;;  %v3934_v52 = vld [vmem:[%s7023_s7 + $0x50] sm:$0xff]  ;;  %v3933_v1 = vld [vmem:[%s7023_s7 + $0x48] sm:$0xff] }
 0x305   : > { %v2765_v9 = vpack.c.bf16 %v2617_v6, %v2615_v2  ;;  %3992 = vperm.xlu0 %5467, %v3934_v52   ;;  %v3936_v6 = vld [vmem:[%s7023_s7 + $0x60] sm:$0xff] }
 0x306   : > { %v2175_v16 = vpop.f32.mrb[88].mxu0 }
 0x307   : > { %v2176_v27 = vadd.f32 %v2175_v16, %v6455_v17  ;;  %v2177_v31 = vpop.f32.mrb[89].mxu0  ;;  %3501 = vmatprep.subr.bf16.mxu1 %v2765_v9  ;;  %v3931_v17 = vld [vmem:[%s7023_s7 + $0x38] sm:$0xff] }
 0x308   : > { %v2178_v37 = vadd.f32 %v2177_v31, %v6457_v21  ;;  %v2179_v40 = vpop.f32.mrb[90].mxu0  ;;  %3502 = vmatpush1.bf16.msra.mxu1 %v2764_v5  ;;  %3977 = vperm.xlu1 %5468, %v3931_v17  }
 0x309   : > { %v2490_v45 = vmul.f32 0.2, %v2176_v27  ;;  %v2180_v47 = vadd.f32 %v2179_v40, %v6459_v23  ;;  %v2181_v48 = vpop.f32.mrb[91].mxu0  ;;  %vm2362_vm8 = vcmp.gt.f32.partialorder %v2176_v27, 0.0  ;;  %4002 = vperm.xlu0 %5467, %v3936_v6   ;;  %v5784_v6 = vld [vmem:[%s7018_s2 + $0x124] ss:$16 sps:$4 sm:$0xff]  }
 0x30a   : > { %v2491_v49 = vmul.f32 0.2, %v2178_v37  ;;  %v2182_v21 = vadd.f32 %v2181_v48, %v6461_v25  ;;  %vm2363_vm9 = vcmp.gt.f32.partialorder %v2178_v37, 0.0 }
 0x30b   : > { %vm2364_vm10 = vcmp.gt.f32.partialorder %v2180_v47, 0.0  ;;  %v2492_v55 = vmul.f32 0.2, %v2180_v47  ;;  %3391 = vmatmul.mubr.bf16.gmra.mrb[64].mxu1 %v5777_v34  ;;  %v2618_v58 = vsel %vm2362_vm8, %v2176_v27, %v2490_v45  ;;  %v5781_v34 = vld [vmem:[%s7018_s2 + $0x104] ss:$16 sps:$4 sm:$0xff]  }
 0x30c   : > { %vm2365_vm11 = vcmp.gt.f32.partialorder %v2182_v21, 0.0  ;;  %v2493_v23 = vmul.f32 0.2, %v2182_v21  ;;  %3400 = vmatprep.mubr.bf16.mxu1 %v5778_v44  ;;  %v2619_v2 = vsel %vm2363_vm9, %v2178_v37, %v2491_v49  ;;  %3987 = vperm.xlu1 %5468, %v3933_v1  }
 0x30d   : > { %v2620_v62 = vsel %vm2364_vm10, %v2180_v47, %v2492_v55  ;;  %v3938_v47 = vld [vmem:[%s7023_s7 + $0x70] sm:$0xff] }
 0x30e   : > { %v2766_v25 = vpack.c.bf16 %v2620_v62, %v2618_v58  ;;  %v2185_v4 = vpop.f32.mrb[92].mxu0  ;;  %v2621_v5 = vsel %vm2365_vm11, %v2182_v21, %v2493_v23  ;;  %4012 = vperm.xlu0 %5467, %v3938_v47   ;;  %v4333_v58 = vld [vmem:[%s7024_s8] sm:$0xff] }
 0x30f   : > { %v2186_v9 = vadd.f32 %v2185_v4, %v6463_v35  ;;  %v2187_v14 = vpop.f32.mrb[93].mxu0  ;;  %v2767_v16 = vpack.c.bf16 %v2621_v5, %v2619_v2  ;;  %v3935_v35 = vld [vmem:[%s7023_s7 + $0x58] sm:$0xff]  ;;  %v5783_v4 = vld [vmem:[%s7018_s2 + $0x100] ss:$16 sps:$4 sm:$0xff]  }
 0x310   : > { %v2188_v27 = vadd.f32 %v2187_v14, %v6465_v39  ;;  %v2189_v31 = vpop.f32.mrb[94].mxu0  ;;  %3997 = vperm.xlu1 %5468, %v3935_v35  }
 0x311   : > { %v2494_v37 = vmul.f32 0.2, %v2186_v9  ;;  %v2190_v40 = vadd.f32 %v2189_v31, %v6467_v41  ;;  %v2191_v44 = vpop.f32.mrb[95].mxu0  ;;  %3503 = vmatprep.subr.bf16.mxu1 %v2767_v16  ;;  %vm2366_vm12 = vcmp.gt.f32.partialorder %v2186_v9, 0.0 }
 0x312   : > { %v2495_v45 = vmul.f32 0.2, %v2188_v27  ;;  %v2192_v39 = vadd.f32 %v2191_v44, %v6469_v43  ;;  %3504 = vmatpush1.bf16.msra.mxu1 %v2766_v25  ;;  %vm2367_vm13 = vcmp.gt.f32.partialorder %v2188_v27, 0.0  ;;  %v3937_v43 = vld [vmem:[%s7023_s7 + $0x68] sm:$0xff]  ;;  %4343 = vperm.xlu0 %5467, %v4333_v58  }
 0x313   : > { %vm2368_vm14 = vcmp.gt.f32.partialorder %v2190_v40, 0.0  ;;  %v2496_v48 = vmul.f32 0.2, %v2190_v40  ;;  %3401 = vmatmul.mubr.bf16.gmra.mrb[68].mxu1 %v5780_v22  ;;  %v2622_v17 = vsel %vm2366_vm12, %v2186_v9, %v2494_v37 }
 0x314   : > { %vm2369_vm15 = vcmp.gt.f32.partialorder %v2192_v39, 0.0  ;;  %v2497_v41 = vmul.f32 0.2, %v2192_v39  ;;  %3410 = vmatprep.mubr.bf16.mxu1 %v5781_v34  ;;  %v2623_v55 = vsel %vm2367_vm13, %v2188_v27, %v2495_v45  ;;  %4007 = vperm.xlu1 %5468, %v3937_v43   ;;  %v4335_v27 = vld [vmem:[%s7024_s8 + $0x10] sm:$0xff] }
 0x315   : > { %v2624_v49 = vsel %vm2368_vm14, %v2190_v40, %v2496_v48 }
 0x316   : > { %v2768_v21 = vpack.c.bf16 %v2624_v49, %v2622_v17  ;;  %v2195_v52 = vpop.f32.mrb[96].mxu0  ;;  %v2625_v23 = vsel %vm2369_vm15, %v2192_v39, %v2497_v41  ;;  %4353 = vperm.xlu0 %5467, %v4335_v27   ;;  %v4526_v39 = vld [vmem:[%s7054_s23] sm:$0xff] }
 0x317   : > { %v2196_v62 = vadd.f32 %v2195_v52, %v6471_v53  ;;  %v2197_v1 = vpop.f32.mrb[97].mxu0  ;;  %v2769_v25 = vpack.c.bf16 %v2625_v23, %v2623_v55  ;;  %v3939_v53 = vld [vmem:[%s7023_s7 + $0x78] sm:$0xff]  ;;  %v5786_v17 = vld [vmem:[%s7018_s2 + $0x120] ss:$16 sps:$4 sm:$0xff]  }
 0x318   : > { %v2198_v2 = vadd.f32 %v2197_v1, %v6473_v57  ;;  %v2199_v5 = vpop.f32.mrb[98].mxu0  ;;  %4017 = vperm.xlu1 %5468, %v3939_v53  }
 0x319   : > { %v2498_v9 = vmul.f32 0.2, %v2196_v62  ;;  %v2200_v14 = vadd.f32 %v2199_v5, %v6475_v59  ;;  %v2201_v16 = vpop.f32.mrb[99].mxu0  ;;  %3505 = vmatprep.subr.bf16.mxu1 %v2769_v25  ;;  %vm2370_vm0 = vcmp.gt.f32.partialorder %v2196_v62, 0.0 }
 0x31a   : > { %v2499_v22 = vmul.f32 0.2, %v2198_v2  ;;  %v2202_v57 = vadd.f32 %v2201_v16, %v6477_v61  ;;  %3506 = vmatpush1.bf16.msra.mxu1 %v2768_v21  ;;  %vm2371_vm1 = vcmp.gt.f32.partialorder %v2198_v2, 0.0  ;;  %v4334_v61 = vld [vmem:[%s7024_s8 + $0x8] sm:$0xff]  ;;  %v5787_v21 = vld [vmem:[%s7018_s2 + $0x144] ss:$16 sps:$4 sm:$0xff]   ;;  %4536 = vperm.xlu0 %5467, %v4526_v39  }
 0x31b   : > { %vm2372_vm2 = vcmp.gt.f32.partialorder %v2200_v14, 0.0  ;;  %v2500_v31 = vmul.f32 0.2, %v2200_v14  ;;  %3411 = vmatmul.mubr.bf16.gmra.mrb[72].mxu1 %v5783_v4  ;;  %v2626_v34 = vsel %vm2370_vm0, %v2196_v62, %v2498_v9  ;;  %v4337_v62 = vld [vmem:[%s7024_s8 + $0x20] sm:$0xff] }
 0x31c   : > { %vm2373_vm3 = vcmp.gt.f32.partialorder %v2202_v57, 0.0  ;;  %v2501_v59 = vmul.f32 0.2, %v2202_v57  ;;  %3420 = vmatprep.mubr.bf16.mxu1 %v5784_v6  ;;  %v2627_v35 = vsel %vm2371_vm1, %v2198_v2, %v2499_v22  ;;  %4348 = vperm.xlu1 %5468, %v4334_v61  }
 0x31d   : > { %v2628_v37 = vsel %vm2372_vm2, %v2200_v14, %v2500_v31  ;;  %v4338_v14 = vld [vmem:[%s7024_s8 + $0x28] sm:$0xff] }
 0x31e   : > { %v2770_v40 = vpack.c.bf16 %v2628_v37, %v2626_v34  ;;  %v2205_v44 = vpop.f32.mrb[100].mxu0  ;;  %v2629_v45 = vsel %vm2373_vm3, %v2202_v57, %v2501_v59  ;;  %4363 = vperm.xlu0 %5467, %v4337_v62   ;;  %v5789_v57 = vld [vmem:[%s7018_s2 + $0x140] ss:$16 sps:$4 sm:$0xff]   ;;  %v5790_v59 = vld [vmem:[%s7018_s2 + $0x164] ss:$16 sps:$4 sm:$0xff]  }
 0x31f   : > { %v2206_v47 = vadd.f32 %v2205_v44, %v6479_v7  ;;  %v2207_v48 = vpop.f32.mrb[101].mxu0  ;;  %v2771_v41 = vpack.c.bf16 %v2629_v45, %v2627_v35  ;;  %v4336_v7 = vld [vmem:[%s7024_s8 + $0x18] sm:$0xff]  ;;  %v4339_v44 = vld [vmem:[%s7024_s8 + $0x30] sm:$0xff] }
 0x320   : > { %v2208_v49 = vadd.f32 %v2207_v48, %v6481_v11  ;;  %v2209_v43 = vpop.f32.mrb[102].mxu0  ;;  %4358 = vperm.xlu1 %5468, %v4336_v7  }
 0x321   : > { %v2502_v52 = vmul.f32 0.2, %v2206_v47  ;;  %v2210_v55 = vadd.f32 %v2209_v43, %v6483_v13  ;;  %v2211_v23 = vpop.f32.mrb[103].mxu0  ;;  %3507 = vmatprep.subr.bf16.mxu1 %v2771_v41  ;;  %vm2374_vm4 = vcmp.gt.f32.partialorder %v2206_v47, 0.0 }
 0x322   : > { %v2503_v58 = vmul.f32 0.2, %v2208_v49  ;;  %v2212_v11 = vadd.f32 %v2211_v23, %v6485_v15  ;;  %3508 = vmatpush1.bf16.msra.mxu1 %v2770_v40  ;;  %vm2375_vm5 = vcmp.gt.f32.partialorder %v2208_v49, 0.0  ;;  %v4527_v15 = vld [vmem:[%s7054_s23 + $0x8] sm:$0xff]  ;;  %4368 = vperm.xlu0 %5467, %v4338_v14  }
 0x323   : > { %vm2376_vm6 = vcmp.gt.f32.partialorder %v2210_v55, 0.0  ;;  %v2504_v1 = vmul.f32 0.2, %v2210_v55  ;;  %3421 = vmatmul.mubr.bf16.gmra.mrb[76].mxu1 %v5786_v17  ;;  %v2630_v25 = vsel %vm2374_vm4, %v2206_v47, %v2502_v52 }
 0x324   : > { %vm2377_vm7 = vcmp.gt.f32.partialorder %v2212_v11, 0.0  ;;  %v2505_v13 = vmul.f32 0.2, %v2212_v11  ;;  %3430 = vmatprep.mubr.bf16.mxu1 %v5787_v21  ;;  %v2631_v6 = vsel %vm2375_vm5, %v2208_v49, %v2503_v58  ;;  %4541 = vperm.xlu1 %5468, %v4527_v15   ;;  %v4340_v49 = vld [vmem:[%s7024_s8 + $0x38] sm:$0xff]  ;;  %v5793_v58 = vld [vmem:[%s7018_s2 + $0x184] ss:$16 sps:$4 sm:$0xff]  }
 0x325   : > { %v2632_v4 = vsel %vm2376_vm6, %v2210_v55, %v2504_v1  ;;  %v5792_v55 = vld [vmem:[%s7018_s2 + $0x160] ss:$16 sps:$4 sm:$0xff]  }
 0x326   : > { %v2772_v2 = vpack.c.bf16 %v2632_v4, %v2630_v25  ;;  %v2215_v5 = vpop.f32.mrb[104].mxu0  ;;  %v2633_v9 = vsel %vm2377_vm7, %v2212_v11, %v2505_v13  ;;  %4373 = vperm.xlu0 %5467, %v4339_v44   ;;  %v4532_v25 = vld [vmem:[%s7054_s23 + $0x30] sm:$0xff] }
 0x327   : > { %v2216_v16 = vadd.f32 %v2215_v5, %v6487_v29  ;;  %v2217_v53 = vpop.f32.mrb[105].mxu0  ;;  %v2773_v22 = vpack.c.bf16 %v2633_v9, %v2631_v6  ;;  %v4528_v29 = vld [vmem:[%s7054_s23 + $0x10] sm:$0xff] }
 0x328   : > { %v2218_v27 = vadd.f32 %v2217_v53, %v6489_v33  ;;  %v2219_v31 = vpop.f32.mrb[106].mxu0  ;;  %4546 = vperm.xlu1 %5468, %v4528_v29  }
 0x329   : > { %v2506_v34 = vmul.f32 0.2, %v2216_v16  ;;  %v2220_v37 = vadd.f32 %v2219_v31, %v6491_v36  ;;  %v2221_v61 = vpop.f32.mrb[107].mxu0  ;;  %3509 = vmatprep.subr.bf16.mxu1 %v2773_v22  ;;  %vm2378_vm8 = vcmp.gt.f32.partialorder %v2216_v16, 0.0 }
 0x32a   : > { %v2507_v40 = vmul.f32 0.2, %v2218_v27  ;;  %v2222_v33 = vadd.f32 %v2221_v61, %v6493_v38  ;;  %3510 = vmatpush1.bf16.msra.mxu1 %v2772_v2  ;;  %vm2379_vm9 = vcmp.gt.f32.partialorder %v2218_v27, 0.0  ;;  %v4529_v38 = vld [vmem:[%s7054_s23 + $0x18] sm:$0xff]  ;;  %4378 = vperm.xlu0 %5467, %v4340_v49   ;;  %v5799_v49 = vld [vmem:[%s7018_s2 + $0x1c4] ss:$16 sps:$4 sm:$0xff]  }
 0x32b   : > { %vm2380_vm10 = vcmp.gt.f32.partialorder %v2220_v37, 0.0  ;;  %v2508_v35 = vmul.f32 0.2, %v2220_v37  ;;  %3431 = vmatmul.mubr.bf16.gmra.mrb[80].mxu1 %v5789_v57  ;;  %v2634_v45 = vsel %vm2378_vm8, %v2216_v16, %v2506_v34  ;;  %v5795_v57 = vld [vmem:[%s7018_s2 + $0x180] ss:$16 sps:$4 sm:$0xff]  }
 0x32c   : > { %vm2381_vm11 = vcmp.gt.f32.partialorder %v2222_v33, 0.0  ;;  %v2509_v36 = vmul.f32 0.2, %v2222_v33  ;;  %3440 = vmatprep.mubr.bf16.mxu1 %v5790_v59  ;;  %v2635_v41 = vsel %vm2379_vm9, %v2218_v27, %v2507_v40  ;;  %4551 = vperm.xlu1 %5468, %v4529_v38   ;;  %v5796_v59 = vld [vmem:[%s7018_s2 + $0x1a4] ss:$16 sps:$4 sm:$0xff]  }
 0x32d   : > { %v2636_v39 = vsel %vm2380_vm10, %v2220_v37, %v2508_v35 }
 0x32e   : > { %v2774_v47 = vpack.c.bf16 %v2636_v39, %v2634_v45  ;;  %v2225_v48 = vpop.f32.mrb[108].mxu0  ;;  %v2637_v17 = vsel %vm2381_vm11, %v2222_v33, %v2509_v36  ;;  %4566 = vperm.xlu0 %5467, %v4532_v25  }
 0x32f   : > { %v2226_v43 = vadd.f32 %v2225_v48, %v6495_v51  ;;  %v2227_v21 = vpop.f32.mrb[109].mxu0  ;;  %v2775_v52 = vpack.c.bf16 %v2637_v17, %v2635_v41  ;;  %v4530_v51 = vld [vmem:[%s7054_s23 + $0x20] sm:$0xff] }
 0x330   : > { %v2228_v23 = vadd.f32 %v2227_v21, %v6497_v56  ;;  %v2229_v7 = vpop.f32.mrb[110].mxu0  ;;  %4556 = vperm.xlu1 %5468, %v4530_v51  }
 0x331   : > { %v2510_v11 = vmul.f32 0.2, %v2226_v43  ;;  %v2230_v62 = vadd.f32 %v2229_v7, %v6499_v60  ;;  %v2231_v1 = vpop.f32.mrb[111].mxu0  ;;  %3511 = vmatprep.subr.bf16.mxu1 %v2775_v52  ;;  %vm2382_vm12 = vcmp.gt.f32.partialorder %v2226_v43, 0.0 }
 0x332   : > { %v2511_v13 = vmul.f32 0.2, %v2228_v23  ;;  %v2232_v56 = vadd.f32 %v2231_v1, %v6501_v63  ;;  %3512 = vmatpush1.bf16.msra.mxu1 %v2774_v47  ;;  %vm2383_vm13 = vcmp.gt.f32.partialorder %v2228_v23, 0.0  ;;  %v4531_v63 = vld [vmem:[%s7054_s23 + $0x28] sm:$0xff] }
 0x333   : > { %vm2384_vm14 = vcmp.gt.f32.partialorder %v2230_v62, 0.0  ;;  %v2512_v4 = vmul.f32 0.2, %v2230_v62  ;;  %3441 = vmatmul.mubr.bf16.gmra.mrb[84].mxu1 %v5792_v55  ;;  %v2638_v15 = vsel %vm2382_vm12, %v2226_v43, %v2510_v11 }
 0x334   : > { %vm2385_vm15 = vcmp.gt.f32.partialorder %v2232_v56, 0.0  ;;  %v2513_v60 = vmul.f32 0.2, %v2232_v56  ;;  %3450 = vmatprep.mubr.bf16.mxu1 %v5793_v58  ;;  %v2639_v9 = vsel %vm2383_vm13, %v2228_v23, %v2511_v13  ;;  %4561 = vperm.xlu1 %5468, %v4531_v63  }
 0x335   : > { %v2640_v2 = vsel %vm2384_vm14, %v2230_v62, %v2512_v4 }
 0x336   : > { %v2776_v5 = vpack.c.bf16 %v2640_v2, %v2638_v15  ;;  %v2235_v6 = vpop.f32.mrb[112].mxu0  ;;  %v2641_v14 = vsel %vm2385_vm15, %v2232_v56, %v2513_v60  ;;  %v5802_v60 = vld [vmem:[%s7018_s2 + $0x1e4] ss:$16 sps:$4 sm:$0xff]  }
 0x337   : > { %v2236_v16 = vadd.f32 %v2235_v6, %v6503_v10  ;;  %v2237_v53 = vpop.f32.mrb[113].mxu0  ;;  %v2777_v22 = vpack.c.bf16 %v2641_v14, %v2639_v9  ;;  %v4533_v10 = vld [vmem:[%s7054_s23 + $0x38] sm:$0xff] }
 0x338   : > { %v2238_v27 = vadd.f32 %v2237_v53, %v6505_v18  ;;  %v2239_v31 = vpop.f32.mrb[114].mxu0  ;;  %4571 = vperm.xlu1 %5468, %v4533_v10  }
 0x339   : > { %v2514_v34 = vmul.f32 0.2, %v2236_v16  ;;  %v2240_v37 = vadd.f32 %v2239_v31, %v6507_v20  ;;  %v2241_v61 = vpop.f32.mrb[115].mxu0  ;;  %3513 = vmatprep.subr.bf16.mxu1 %v2777_v22  ;;  %vm2386_vm0 = vcmp.gt.f32.partialorder %v2236_v16, 0.0 }
 0x33a   : > { %v2515_v29 = vmul.f32 0.2, %v2238_v27  ;;  %v2242_v40 = vadd.f32 %v2241_v61, %v6512_v26  ;;  %3514 = vmatpush1.bf16.msra.mxu1 %v2776_v5  ;;  %vm2387_vm1 = vcmp.gt.f32.partialorder %v2238_v27, 0.0  ;;  %v5798_v26 = vld [vmem:[%s7018_s2 + $0x1a0] ss:$16 sps:$4 sm:$0xff]  }
 0x33b   : > { %vm2388_vm2 = vcmp.gt.f32.partialorder %v2240_v37, 0.0  ;;  %v2516_v18 = vmul.f32 0.2, %v2240_v37  ;;  %3451 = vmatmul.mubr.bf16.gmra.mrb[88].mxu1 %v5795_v57  ;;  %v2642_v20 = vsel %vm2386_vm0, %v2236_v16, %v2514_v34 }
 0x33c   : > { %vm2389_vm3 = vcmp.gt.f32.partialorder %v2242_v40, 0.0  ;;  %v2517_v33 = vmul.f32 0.2, %v2242_v40  ;;  %3460 = vmatprep.mubr.bf16.mxu1 %v5796_v59  ;;  %v2643_v45 = vsel %vm2387_vm1, %v2238_v27, %v2515_v29 }
 0x33d   : > { %v2644_v44 = vsel %vm2388_vm2, %v2240_v37, %v2516_v18  ;;  %v5807_v37 = vld [vmem:[%s7018_s2 + $0xc] ss:$16 sps:$4 sm:$0xff]  }
 0x33e   : > { %v2778_v35 = vpack.c.bf16 %v2644_v44, %v2642_v20  ;;  %v2245_v36 = vpop.f32.mrb[116].mxu0  ;;  %v2645_v39 = vsel %vm2389_vm3, %v2242_v40, %v2517_v33 }
 0x33f   : > { %v2246_v38 = vadd.f32 %v2245_v36, %v6519_v46  ;;  %v2247_v47 = vpop.f32.mrb[117].mxu0  ;;  %v2779_v48 = vpack.c.bf16 %v2645_v39, %v2643_v45  ;;  %v5805_v45 = vld [vmem:[%s7018_s2 + $0x8] ss:$16 sps:$4 sm:$0xff]  }
 0x340   : > { %v2248_v41 = vadd.f32 %v2247_v47, %v6521_v50  ;;  %v2249_v17 = vpop.f32.mrb[118].mxu0  ;;  %v5810_v39 = vld [vmem:[%s7018_s2 + $0x28] ss:$16 sps:$4 sm:$0xff]  }
 0x341   : > { %v2518_v43 = vmul.f32 0.2, %v2246_v38  ;;  %v2250_v21 = vadd.f32 %v2249_v17, %v6523_v54  ;;  %v2251_v52 = vpop.f32.mrb[119].mxu0  ;;  %3515 = vmatprep.subr.bf16.mxu1 %v2779_v48  ;;  %vm2390_vm4 = vcmp.gt.f32.partialorder %v2246_v38, 0.0  ;;  %v5813_v47 = vld [vmem:[%s7018_s2 + $0x48] ss:$16 sps:$4 sm:$0xff]  }
 0x342   : > { %v2519_v46 = vmul.f32 0.2, %v2248_v41  ;;  %v2252_v55 = vadd.f32 %v2251_v52, %v6531_v0  ;;  %3516 = vmatpush1.bf16.msra.mxu1 %v2778_v35  ;;  %vm2391_vm5 = vcmp.gt.f32.partialorder %v2248_v41, 0.0  ;;  %v5801_v0 = vld [vmem:[%s7018_s2 + $0x1c0] ss:$16 sps:$4 sm:$0xff]  }
 0x343   : > { %vm2392_vm6 = vcmp.gt.f32.partialorder %v2250_v21, 0.0  ;;  %v2520_v23 = vmul.f32 0.2, %v2250_v21  ;;  %3461 = vmatmul.mubr.bf16.gmra.mrb[92].mxu1 %v5798_v26  ;;  %v2646_v7 = vsel %vm2390_vm4, %v2246_v38, %v2518_v43  ;;  %v5811_v38 = vld [vmem:[%s7018_s2 + $0x4c] ss:$16 sps:$4 sm:$0xff]  }
 0x344   : > { %vm2393_vm7 = vcmp.gt.f32.partialorder %v2252_v55, 0.0  ;;  %v2521_v50 = vmul.f32 0.2, %v2252_v55  ;;  %3470 = vmatprep.mubr.bf16.mxu1 %v5799_v49  ;;  %v2647_v1 = vsel %vm2391_vm5, %v2248_v41, %v2519_v46  ;;  %v5814_v48 = vld [vmem:[%s7018_s2 + $0x6c] ss:$16 sps:$4 sm:$0xff]  }
 0x345   : > { %v2648_v58 = vsel %vm2392_vm6, %v2250_v21, %v2520_v23  ;;  %v5816_v26 = vld [vmem:[%s7018_s2 + $0x68] ss:$16 sps:$4 sm:$0xff]   ;;  %v5817_v41 = vld [vmem:[%s7018_s2 + $0x8c] ss:$16 sps:$4 sm:$0xff]  }
 0x346   : > { %v2780_v11 = vpack.c.bf16 %v2648_v58, %v2646_v7  ;;  %v2255_v62 = vpop.f32.mrb[120].mxu0  ;;  %v2649_v54 = vsel %vm2393_vm7, %v2252_v55, %v2521_v50  ;;  %v5819_v17 = vld [vmem:[%s7018_s2 + $0x88] ss:$16 sps:$4 sm:$0xff]   ;;  %v5820_v49 = vld [vmem:[%s7018_s2 + $0xac] ss:$16 sps:$4 sm:$0xff]  }
 0x347   : > { %v2256_v51 = vadd.f32 %v2255_v62, %v6539_v19  ;;  %v2257_v13 = vpop.f32.mrb[121].mxu0  ;;  %v2781_v56 = vpack.c.bf16 %v2649_v54, %v2647_v1  ;;  %v5822_v43 = vld [vmem:[%s7018_s2 + $0xa8] ss:$16 sps:$4 sm:$0xff]   ;;  %v5823_v21 = vld [vmem:[%s7018_s2 + $0xcc] ss:$16 sps:$4 sm:$0xff]  }
 0x348   : > { %v2258_v25 = vadd.f32 %v2257_v13, %v6541_v28  ;;  %v2259_v4 = vpop.f32.mrb[122].mxu0  ;;  %v5825_v52 = vld [vmem:[%s7018_s2 + $0xc8] ss:$16 sps:$4 sm:$0xff]   ;;  %v5826_v46 = vld [vmem:[%s7018_s2 + $0xec] ss:$16 sps:$4 sm:$0xff]  }
 0x349   : > { %v2522_v15 = vmul.f32 0.2, %v2256_v51  ;;  %v2260_v2 = vadd.f32 %v2259_v4, %v6543_v32  ;;  %v2261_v63 = vpop.f32.mrb[123].mxu0  ;;  %3517 = vmatprep.subr.bf16.mxu1 %v2781_v56  ;;  %vm2394_vm8 = vcmp.gt.f32.partialorder %v2256_v51, 0.0  ;;  %v5828_v55 = vld [vmem:[%s7018_s2 + $0xe8] ss:$16 sps:$4 sm:$0xff]  }
 0x34a   : > { %v2523_v19 = vmul.f32 0.2, %v2258_v25  ;;  %v2262_v5 = vadd.f32 %v2261_v63, %v6551_v42  ;;  %3518 = vmatpush1.bf16.msra.mxu1 %v2780_v11  ;;  %vm2395_vm9 = vcmp.gt.f32.partialorder %v2258_v25, 0.0  ;;  %v5804_v42 = vld [vmem:[%s7018_s2 + $0x1e0] ss:$16 sps:$4 sm:$0xff]  }
 0x34b   : > { %vm2396_vm10 = vcmp.gt.f32.partialorder %v2260_v2, 0.0  ;;  %v2524_v6 = vmul.f32 0.2, %v2260_v2  ;;  %3471 = vmatmul.mubr.bf16.gmra.mrb[96].mxu1 %v5801_v0  ;;  %v2650_v9 = vsel %vm2394_vm8, %v2256_v51, %v2522_v15  ;;  %v5829_v23 = vld [vmem:[%s7018_s2 + $0x10c] ss:$16 sps:$4 sm:$0xff]  }
 0x34c   : > { %vm2397_vm11 = vcmp.gt.f32.partialorder %v2262_v5, 0.0  ;;  %v2525_v28 = vmul.f32 0.2, %v2262_v5  ;;  %3480 = vmatprep.mubr.bf16.mxu1 %v5802_v60  ;;  %v2651_v22 = vsel %vm2395_vm9, %v2258_v25, %v2523_v19  ;;  %v5831_v50 = vld [vmem:[%s7018_s2 + $0x108] ss:$16 sps:$4 sm:$0xff]  }
 0x34d   : > { %v2652_v14 = vsel %vm2396_vm10, %v2260_v2, %v2524_v6  ;;  %v5832_v7 = vld [vmem:[%s7018_s2 + $0x12c] ss:$16 sps:$4 sm:$0xff]   ;;  %v5834_v58 = vld [vmem:[%s7018_s2 + $0x128] ss:$16 sps:$4 sm:$0xff]   ;;  %v2821_v2 = vpop.permute.xlu0 %2820 }
 0x34e   : > { %v2782_v16 = vpack.c.bf16 %v2652_v14, %v2650_v9  ;;  %v2265_v53 = vpop.f32.mrb[124].mxu0  ;;  %v2653_v32 = vsel %vm2397_vm11, %v2262_v5, %v2525_v28  ;;  %v5835_v11 = vld [vmem:[%s7018_s2 + $0x14c] ss:$16 sps:$4 sm:$0xff]   ;;  %v5837_v62 = vld [vmem:[%s7018_s2 + $0x148] ss:$16 sps:$4 sm:$0xff]  }
 0x34f   : > { %v2266_v57 = vadd.f32 %v2265_v53, %v6559_v3  ;;  %v2267_v27 = vpop.f32.mrb[125].mxu0  ;;  %v2783_v31 = vpack.c.bf16 %v2653_v32, %v2651_v22  ;;  %v5838_v1 = vld [vmem:[%s7018_s2 + $0x16c] ss:$16 sps:$4 sm:$0xff]   ;;  %v5840_v54 = vld [vmem:[%s7018_s2 + $0x168] ss:$16 sps:$4 sm:$0xff]   ;;  %v2831_v22 = vpop.permute.xlu1 %2830 }
 0x350   : > { %v2268_v59 = vadd.f32 %v2267_v27, %v6561_v8  ;;  %v2269_v34 = vpop.f32.mrb[126].mxu0  ;;  %v5841_v51 = vld [vmem:[%s7018_s2 + $0x18c] ss:$16 sps:$4 sm:$0xff]   ;;  %v5843_v13 = vld [vmem:[%s7018_s2 + $0x188] ss:$16 sps:$4 sm:$0xff]  }
 0x351   : > { %v2526_v61 = vmul.f32 0.2, %v2266_v57  ;;  %v2270_v10 = vadd.f32 %v2269_v34, %v6563_v12  ;;  %v2271_v29 = vpop.f32.mrb[127].mxu0  ;;  %3519 = vmatprep.subr.bf16.mxu1 %v2783_v31  ;;  %vm2398_vm12 = vcmp.gt.f32.partialorder %v2266_v57, 0.0  ;;  %v5844_v56 = vld [vmem:[%s7018_s2 + $0x1ac] ss:$16 sps:$4 sm:$0xff]   ;;  %v2826_v6 = vpop.permute.xlu0 %2825 }
 0x352   : > { %v2527_v3 = vmul.f32 0.2, %v2268_v59  ;;  %v2272_v40 = vadd.f32 %v2271_v29, %v6571_v24  ;;  %3520 = vmatpush1.bf16.msra.mxu1 %v2782_v16  ;;  %vm2399_vm13 = vcmp.gt.f32.partialorder %v2268_v59, 0.0  ;;  %v5808_v24 = vld [vmem:[%s7018_s2 + $0x2c] ss:$16 sps:$4 sm:$0xff]  }
 0x353   : > { %vm2400_vm14 = vcmp.gt.f32.partialorder %v2270_v10, 0.0  ;;  %v2528_v18 = vmul.f32 0.2, %v2270_v10  ;;  %3481 = vmatmul.mubr.bf16.gmra.mrb[100].mxu1 %v5804_v42  ;;  %v2654_v33 = vsel %vm2398_vm12, %v2266_v57, %v2526_v61  ;;  %v5846_v0 = vld [vmem:[%s7018_s2 + $0x1a8] ss:$16 sps:$4 sm:$0xff]  }
 0x354   : > { %vm2401_vm15 = vcmp.gt.f32.partialorder %v2272_v40, 0.0  ;;  %v2529_v8 = vmul.f32 0.2, %v2272_v40  ;;  %3523 = vmatprep.mubr.bf16.mxu1 %v5807_v37  ;;  %v2655_v35 = vsel %vm2399_vm13, %v2268_v59, %v2527_v3  ;;  %v5847_v25 = vld [vmem:[%s7018_s2 + $0x1cc] ss:$16 sps:$4 sm:$0xff]  }
 0x355   : > { %v2656_v20 = vsel %vm2400_vm14, %v2270_v10, %v2528_v18  ;;  %v5849_v4 = vld [vmem:[%s7018_s2 + $0x1c8] ss:$16 sps:$4 sm:$0xff]   ;;  %v5850_v60 = vld [vmem:[%s7018_s2 + $0x1ec] ss:$16 sps:$4 sm:$0xff]  }
 0x356   : > { %v2784_v44 = vpack.c.bf16 %v2656_v20, %v2654_v33  ;;  %v2657_v36 = vsel %vm2401_vm15, %v2272_v40, %v2529_v8  ;;  %v5852_v15 = vld [vmem:[%s7018_s2 + $0x1e8] ss:$16 sps:$4 sm:$0xff]   ;;  %v5855_v31 = vld [vmem:[#allocation7 + $0x4] ss:$8 sps:$4 sm:$0xff]   ;;  %v2836_v8 = vpop.permute.xlu1 %2835 }
 0x357   : > { %v2785_v12 = vpack.c.bf16 %v2657_v36, %v2655_v35 }
 0x359   : > { %3521 = vmatprep.subr.bf16.mxu1 %v2785_v12 }
 0x35a   : > { %3522 = vmatpush1.bf16.msra.mxu1 %v2784_v44 }
 0x35d   : > { %3524 = vmatmul.mubr.bf16.vlgmr.msra.gmra.mrb[40].mxu1 %v5805_v45 }
 0x35e   : > { %3533 = vmatprep.mubr.bf16.mxu1 %v5808_v24 }
 0x365   : > { %3534 = vmatmul.mubr.bf16.gmra.mrb[44].mxu1 %v5810_v39 }
 0x366   : > { %3543 = vmatprep.mubr.bf16.mxu1 %v5811_v38 }
 0x36d   : > { %3544 = vmatmul.mubr.bf16.gmra.mrb[48].mxu1 %v5813_v47 }
 0x36e   : > { %3553 = vmatprep.mubr.bf16.mxu1 %v5814_v48  ;;  %v2841_v48 = vpop.permute.xlu0 %2840 }
 0x375   : > { %3554 = vmatmul.mubr.bf16.gmra.mrb[52].mxu1 %v5816_v26 }
 0x376   : > { %3563 = vmatprep.mubr.bf16.mxu1 %v5817_v41 }
 0x37d   : > { %3564 = vmatmul.mubr.bf16.gmra.mrb[56].mxu1 %v5819_v17 }
 0x37e   : > { %3573 = vmatprep.mubr.bf16.mxu1 %v5820_v49 }
 0x385   : > { %3574 = vmatmul.mubr.bf16.gmra.mrb[60].mxu1 %v5822_v43 }
 0x386   : > { %3583 = vmatprep.mubr.bf16.mxu1 %v5823_v21 }
 0x38d   : > { %3584 = vmatmul.mubr.bf16.gmra.mrb[64].mxu1 %v5825_v52 }
 0x38e   : > { %3593 = vmatprep.mubr.bf16.mxu1 %v5826_v46  ;;  %v2846_v46 = vpop.permute.xlu1 %2845 }
 0x395   : > { %3594 = vmatmul.mubr.bf16.gmra.mrb[68].mxu1 %v5828_v55 }
 0x396   : > { %3603 = vmatprep.mubr.bf16.mxu1 %v5829_v23 }
 0x39d   : > { %3604 = vmatmul.mubr.bf16.gmra.mrb[72].mxu1 %v5831_v50 }
 0x39e   : > { %3613 = vmatprep.mubr.bf16.mxu1 %v5832_v7 }
 0x3a5   : > { %3614 = vmatmul.mubr.bf16.gmra.mrb[76].mxu1 %v5834_v58 }
 0x3a6   : > { %3623 = vmatprep.mubr.bf16.mxu1 %v5835_v11 }
 0x3ad   : > { %3624 = vmatmul.mubr.bf16.gmra.mrb[80].mxu1 %v5837_v62 }
 0x3ae   : > { %3633 = vmatprep.mubr.bf16.mxu1 %v5838_v1 }
 0x3b5   : > { %3634 = vmatmul.mubr.bf16.gmra.mrb[84].mxu1 %v5840_v54 }
 0x3b6   : > { %3643 = vmatprep.mubr.bf16.mxu1 %v5841_v51 }
 0x3bd   : > { %3644 = vmatmul.mubr.bf16.gmra.mrb[88].mxu1 %v5843_v13 }
 0x3be   : > { %3653 = vmatprep.mubr.bf16.mxu1 %v5844_v56  ;;  %v2851_v56 = vpop.permute.xlu0 %2850 }
 0x3c5   : > { %3654 = vmatmul.mubr.bf16.gmra.mrb[92].mxu1 %v5846_v0 }
 0x3c6   : > { %3663 = vmatprep.mubr.bf16.mxu1 %v5847_v25 }
 0x3cd   : > { %3664 = vmatmul.mubr.bf16.gmra.mrb[96].mxu1 %v5849_v4 }
 0x3ce   : > { %3673 = vmatprep.mubr.bf16.mxu1 %v5850_v60 }
 0x3d5   : > { %3674 = vmatmul.mubr.bf16.gmra.mrb[100].mxu1 %v5852_v15 }
 0x3d6   : > { %4132 = vmatprep.mubr.bf16.mxu1 %v5855_v31  ;;  %v2861_v31 = vpop.permute.xlu0 %2860 }
 0x430   : > { %v3525_v63 = vpop.f32.mrb[40].mxu1 }
 0x431   : > { %v5150_v19 = vadd.f32 %v3525_v63, %v2821_v2  ;;  %v3527_v5 = vpop.f32.mrb[41].mxu1 }
 0x432   : > { %v5151_v28 = vadd.f32 %v3527_v5, %v2821_v2  ;;  %v3529_v9 = vpop.f32.mrb[42].mxu1 }
 0x433   : > { %v3748_v14 = vmul.f32 0.2, %v5150_v19  ;;  %v5152_v16 = vadd.f32 %v3529_v9, %v2826_v6  ;;  %v3531_v53 = vpop.f32.mrb[43].mxu1  ;;  %vm3684_vm0 = vcmp.gt.f32.partialorder %v5150_v19, 0.0 }
 0x434   : > { %v3749_v32 = vmul.f32 0.2, %v5151_v28  ;;  %v5153_v57 = vadd.f32 %v3531_v53, %v2826_v6  ;;  %vm3685_vm1 = vcmp.gt.f32.partialorder %v5151_v28, 0.0 }
 0x435   : > { %vm3686_vm2 = vcmp.gt.f32.partialorder %v5152_v16, 0.0  ;;  %v3750_v27 = vmul.f32 0.2, %v5152_v16  ;;  %v3812_v59 = vsel %vm3684_vm0, %v5150_v19, %v3748_v14  ;;  %v2856_v19 = vpop.permute.xlu1 %2855 }
 0x436   : > { %vm3687_vm3 = vcmp.gt.f32.partialorder %v5153_v57, 0.0  ;;  %v3751_v42 = vmul.f32 0.2, %v5153_v57  ;;  %v3813_v10 = vsel %vm3685_vm1, %v5151_v28, %v3749_v32 }
 0x437   : > { %v3814_v34 = vsel %vm3686_vm2, %v5152_v16, %v3750_v27 }
 0x438   : > { %v3892_v37 = vpack.c.bf16 %v3814_v34, %v3812_v59  ;;  %v3535_v61 = vpop.f32.mrb[44].mxu1  ;;  %v3815_v29 = vsel %vm3687_vm3, %v5153_v57, %v3751_v42 }
 0x439   : > { %v5154_v3 = vadd.f32 %v3535_v61, %v2831_v22  ;;  %v3537_v40 = vpop.f32.mrb[45].mxu1  ;;  %v3893_v18 = vpack.c.bf16 %v3815_v29, %v3813_v10 }
 0x43a   : > { %v5155_v33 = vadd.f32 %v3537_v40, %v2831_v22  ;;  %v3539_v20 = vpop.f32.mrb[46].mxu1 }
 0x43b   : > { %v3752_v44 = vmul.f32 0.2, %v5154_v3  ;;  %v5156_v35 = vadd.f32 %v3539_v20, %v2836_v8  ;;  %v3541_v36 = vpop.f32.mrb[47].mxu1  ;;  %4100 = vmatprep.subr.bf16.mxu1 %v3893_v18  ;;  %vm3688_vm4 = vcmp.gt.f32.partialorder %v5154_v3, 0.0 }
 0x43c   : > { %v3753_v12 = vmul.f32 0.2, %v5155_v33  ;;  %v5157_v45 = vadd.f32 %v3541_v36, %v2836_v8  ;;  %4101 = vmatpush1.bf16.msra.mxu1 %v3892_v37  ;;  %vm3689_vm5 = vcmp.gt.f32.partialorder %v5155_v33, 0.0 }
 0x43d   : > { %vm3690_vm6 = vcmp.gt.f32.partialorder %v5156_v35, 0.0  ;;  %v3754_v24 = vmul.f32 0.2, %v5156_v35  ;;  %v3816_v38 = vsel %vm3688_vm4, %v5154_v3, %v3752_v44  ;;  %v2866_v3 = vpop.permute.xlu1 %2865 }
 0x43e   : > { %vm3691_vm7 = vcmp.gt.f32.partialorder %v5157_v45, 0.0  ;;  %v3755_v39 = vmul.f32 0.2, %v5157_v45  ;;  %v3817_v17 = vsel %vm3689_vm5, %v5155_v33, %v3753_v12 }
 0x43f   : > { %v3818_v47 = vsel %vm3690_vm6, %v5156_v35, %v3754_v24 }
 0x440   : > { %v3894_v26 = vpack.c.bf16 %v3818_v47, %v3816_v38  ;;  %v3545_v41 = vpop.f32.mrb[48].mxu1  ;;  %v3819_v49 = vsel %vm3691_vm7, %v5157_v45, %v3755_v39  ;;  %v2871_v39 = vpop.permute.xlu0 %2870 }
 0x441   : > { %v5158_v43 = vadd.f32 %v3545_v41, %v2841_v48  ;;  %v3547_v21 = vpop.f32.mrb[49].mxu1  ;;  %v3895_v52 = vpack.c.bf16 %v3819_v49, %v3817_v17 }
 0x442   : > { %v5159_v55 = vadd.f32 %v3547_v21, %v2841_v48  ;;  %v3549_v23 = vpop.f32.mrb[50].mxu1 }
 0x443   : > { %v3756_v50 = vmul.f32 0.2, %v5158_v43  ;;  %v5160_v7 = vadd.f32 %v3549_v23, %v2846_v46  ;;  %v3551_v58 = vpop.f32.mrb[51].mxu1  ;;  %4102 = vmatprep.subr.bf16.mxu1 %v3895_v52  ;;  %vm3692_vm8 = vcmp.gt.f32.partialorder %v5158_v43, 0.0 }
 0x444   : > { %v3757_v11 = vmul.f32 0.2, %v5159_v55  ;;  %v5161_v62 = vadd.f32 %v3551_v58, %v2846_v46  ;;  %4103 = vmatpush1.bf16.msra.mxu1 %v3894_v26  ;;  %vm3693_vm9 = vcmp.gt.f32.partialorder %v5159_v55, 0.0 }
 0x445   : > { %vm3694_vm10 = vcmp.gt.f32.partialorder %v5160_v7, 0.0  ;;  %v3758_v1 = vmul.f32 0.2, %v5160_v7  ;;  %v3820_v51 = vsel %vm3692_vm8, %v5158_v43, %v3756_v50  ;;  %v2876_v43 = vpop.permute.xlu1 %2875 }
 0x446   : > { %vm3695_vm11 = vcmp.gt.f32.partialorder %v5161_v62, 0.0  ;;  %v3759_v54 = vmul.f32 0.2, %v5161_v62  ;;  %v3821_v4 = vsel %vm3693_vm9, %v5159_v55, %v3757_v11 }
 0x447   : > { %v3822_v13 = vsel %vm3694_vm10, %v5160_v7, %v3758_v1 }
 0x448   : > { %v3896_v0 = vpack.c.bf16 %v3822_v13, %v3820_v51  ;;  %v3555_v25 = vpop.f32.mrb[52].mxu1  ;;  %v3823_v60 = vsel %vm3695_vm11, %v5161_v62, %v3759_v54  ;;  %v2881_v54 = vpop.permute.xlu0 %2880 }
 0x449   : > { %v5162_v15 = vadd.f32 %v3555_v25, %v2851_v56  ;;  %v3557_v2 = vpop.f32.mrb[53].mxu1  ;;  %v3897_v63 = vpack.c.bf16 %v3823_v60, %v3821_v4 }
 0x44a   : > { %v5163_v5 = vadd.f32 %v3557_v2, %v2851_v56  ;;  %v3559_v6 = vpop.f32.mrb[54].mxu1 }
 0x44b   : > { %v3760_v28 = vmul.f32 0.2, %v5162_v15  ;;  %v5164_v9 = vadd.f32 %v3559_v6, %v2856_v19  ;;  %v3561_v14 = vpop.f32.mrb[55].mxu1  ;;  %4104 = vmatprep.subr.bf16.mxu1 %v3897_v63  ;;  %vm3696_vm12 = vcmp.gt.f32.partialorder %v5162_v15, 0.0 }
 0x44c   : > { %v3761_v16 = vmul.f32 0.2, %v5163_v5  ;;  %v5165_v53 = vadd.f32 %v3561_v14, %v2856_v19  ;;  %4105 = vmatpush1.bf16.msra.mxu1 %v3896_v0  ;;  %vm3697_vm13 = vcmp.gt.f32.partialorder %v5163_v5, 0.0 }
 0x44d   : > { %vm3698_vm14 = vcmp.gt.f32.partialorder %v5164_v9, 0.0  ;;  %v3762_v22 = vmul.f32 0.2, %v5164_v9  ;;  %v3824_v57 = vsel %vm3696_vm12, %v5162_v15, %v3760_v28  ;;  %v2886_v15 = vpop.permute.xlu1 %2885 }
 0x44e   : > { %vm3699_vm15 = vcmp.gt.f32.partialorder %v5165_v53, 0.0  ;;  %v3763_v32 = vmul.f32 0.2, %v5165_v53  ;;  %v3825_v34 = vsel %vm3697_vm13, %v5163_v5, %v3761_v16 }
 0x44f   : > { %v3826_v27 = vsel %vm3698_vm14, %v5164_v9, %v3762_v22 }
 0x450   : > { %v3898_v42 = vpack.c.bf16 %v3826_v27, %v3824_v57  ;;  %v3565_v59 = vpop.f32.mrb[56].mxu1  ;;  %v3827_v37 = vsel %vm3699_vm15, %v5165_v53, %v3763_v32  ;;  %v2891_v32 = vpop.permute.xlu0 %2890 }
 0x451   : > { %v5166_v61 = vadd.f32 %v3565_v59, %v2861_v31  ;;  %v3567_v10 = vpop.f32.mrb[57].mxu1  ;;  %v3899_v29 = vpack.c.bf16 %v3827_v37, %v3825_v34 }
 0x452   : > { %v5167_v40 = vadd.f32 %v3567_v10, %v2861_v31  ;;  %v3569_v18 = vpop.f32.mrb[58].mxu1 }
 0x453   : > { %v3764_v8 = vmul.f32 0.2, %v5166_v61  ;;  %v5168_v33 = vadd.f32 %v3569_v18, %v2866_v3  ;;  %v3571_v20 = vpop.f32.mrb[59].mxu1  ;;  %4106 = vmatprep.subr.bf16.mxu1 %v3899_v29  ;;  %vm3700_vm0 = vcmp.gt.f32.partialorder %v5166_v61, 0.0 }
 0x454   : > { %v3765_v44 = vmul.f32 0.2, %v5167_v40  ;;  %v5169_v35 = vadd.f32 %v3571_v20, %v2866_v3  ;;  %4107 = vmatpush1.bf16.msra.mxu1 %v3898_v42  ;;  %vm3701_vm1 = vcmp.gt.f32.partialorder %v5167_v40, 0.0 }
 0x455   : > { %vm3702_vm2 = vcmp.gt.f32.partialorder %v5168_v33, 0.0  ;;  %v3766_v36 = vmul.f32 0.2, %v5168_v33  ;;  %v3828_v45 = vsel %vm3700_vm0, %v5166_v61, %v3764_v8  ;;  %v2896_v61 = vpop.permute.xlu1 %2895 }
 0x456   : > { %vm3703_vm3 = vcmp.gt.f32.partialorder %v5169_v35, 0.0  ;;  %v3767_v12 = vmul.f32 0.2, %v5169_v35  ;;  %v3829_v48 = vsel %vm3701_vm1, %v5167_v40, %v3765_v44 }
 0x457   : > { %v3830_v24 = vsel %vm3702_vm2, %v5168_v33, %v3766_v36 }
 0x458   : > { %v3900_v38 = vpack.c.bf16 %v3830_v24, %v3828_v45  ;;  %v3575_v47 = vpop.f32.mrb[60].mxu1  ;;  %v3831_v26 = vsel %vm3703_vm3, %v5169_v35, %v3767_v12  ;;  %v2901_v12 = vpop.permute.xlu0 %2900 }
 0x459   : > { %v5170_v41 = vadd.f32 %v3575_v47, %v2871_v39  ;;  %v3577_v17 = vpop.f32.mrb[61].mxu1  ;;  %v3901_v49 = vpack.c.bf16 %v3831_v26, %v3829_v48 }
 0x45a   : > { %v5171_v21 = vadd.f32 %v3577_v17, %v2871_v39  ;;  %v3579_v52 = vpop.f32.mrb[62].mxu1 }
 0x45b   : > { %v3768_v46 = vmul.f32 0.2, %v5170_v41  ;;  %v5172_v55 = vadd.f32 %v3579_v52, %v2876_v43  ;;  %v3581_v23 = vpop.f32.mrb[63].mxu1  ;;  %4108 = vmatprep.subr.bf16.mxu1 %v3901_v49  ;;  %vm3704_vm4 = vcmp.gt.f32.partialorder %v5170_v41, 0.0 }
 0x45c   : > { %v3769_v50 = vmul.f32 0.2, %v5171_v21  ;;  %v5173_v7 = vadd.f32 %v3581_v23, %v2876_v43  ;;  %4109 = vmatpush1.bf16.msra.mxu1 %v3900_v38  ;;  %vm3705_vm5 = vcmp.gt.f32.partialorder %v5171_v21, 0.0 }
 0x45d   : > { %vm3706_vm6 = vcmp.gt.f32.partialorder %v5172_v55, 0.0  ;;  %v3770_v58 = vmul.f32 0.2, %v5172_v55  ;;  %v3832_v62 = vsel %vm3704_vm4, %v5170_v41, %v3768_v46  ;;  %v2906_v41 = vpop.permute.xlu1 %2905 }
 0x45e   : > { %vm3707_vm7 = vcmp.gt.f32.partialorder %v5173_v7, 0.0  ;;  %v3771_v11 = vmul.f32 0.2, %v5173_v7  ;;  %v3833_v56 = vsel %vm3705_vm5, %v5171_v21, %v3769_v50 }
 0x45f   : > { %v3834_v1 = vsel %vm3706_vm6, %v5172_v55, %v3770_v58 }
 0x460   : > { %v3902_v51 = vpack.c.bf16 %v3834_v1, %v3832_v62  ;;  %v3585_v13 = vpop.f32.mrb[64].mxu1  ;;  %v3835_v0 = vsel %vm3707_vm7, %v5173_v7, %v3771_v11  ;;  %v2911_v11 = vpop.permute.xlu0 %2910 }
 0x461   : > { %v5174_v25 = vadd.f32 %v3585_v13, %v2881_v54  ;;  %v3587_v4 = vpop.f32.mrb[65].mxu1  ;;  %v3903_v60 = vpack.c.bf16 %v3835_v0, %v3833_v56 }
 0x462   : > { %v5175_v2 = vadd.f32 %v3587_v4, %v2881_v54  ;;  %v3589_v63 = vpop.f32.mrb[66].mxu1 }
 0x463   : > { %v3772_v19 = vmul.f32 0.2, %v5174_v25  ;;  %v5176_v5 = vadd.f32 %v3589_v63, %v2886_v15  ;;  %v3591_v6 = vpop.f32.mrb[67].mxu1  ;;  %4110 = vmatprep.subr.bf16.mxu1 %v3903_v60  ;;  %vm3708_vm8 = vcmp.gt.f32.partialorder %v5174_v25, 0.0 }
 0x464   : > { %v3773_v28 = vmul.f32 0.2, %v5175_v2  ;;  %v5177_v9 = vadd.f32 %v3591_v6, %v2886_v15  ;;  %4111 = vmatpush1.bf16.msra.mxu1 %v3902_v51  ;;  %vm3709_vm9 = vcmp.gt.f32.partialorder %v5175_v2, 0.0 }
 0x465   : > { %vm3710_vm10 = vcmp.gt.f32.partialorder %v5176_v5, 0.0  ;;  %v3774_v14 = vmul.f32 0.2, %v5176_v5  ;;  %v3836_v53 = vsel %vm3708_vm8, %v5174_v25, %v3772_v19  ;;  %v2916_v25 = vpop.permute.xlu1 %2915 }
 0x466   : > { %vm3711_vm11 = vcmp.gt.f32.partialorder %v5177_v9, 0.0  ;;  %v3775_v16 = vmul.f32 0.2, %v5177_v9  ;;  %v3837_v31 = vsel %vm3709_vm9, %v5175_v2, %v3773_v28 }
 0x467   : > { %v3838_v22 = vsel %vm3710_vm10, %v5176_v5, %v3774_v14 }
 0x468   : > { %v3904_v57 = vpack.c.bf16 %v3838_v22, %v3836_v53  ;;  %v3595_v27 = vpop.f32.mrb[68].mxu1  ;;  %v3839_v42 = vsel %vm3711_vm11, %v5177_v9, %v3775_v16  ;;  %v2921_v16 = vpop.permute.xlu0 %2920 }
 0x469   : > { %v5178_v59 = vadd.f32 %v3595_v27, %v2891_v32  ;;  %v3597_v34 = vpop.f32.mrb[69].mxu1  ;;  %v3905_v37 = vpack.c.bf16 %v3839_v42, %v3837_v31 }
 0x46a   : > { %v5179_v10 = vadd.f32 %v3597_v34, %v2891_v32  ;;  %v3599_v29 = vpop.f32.mrb[70].mxu1 }
 0x46b   : > { %v3776_v3 = vmul.f32 0.2, %v5178_v59  ;;  %v5180_v40 = vadd.f32 %v3599_v29, %v2896_v61  ;;  %v3601_v18 = vpop.f32.mrb[71].mxu1  ;;  %4112 = vmatprep.subr.bf16.mxu1 %v3905_v37  ;;  %vm3712_vm12 = vcmp.gt.f32.partialorder %v5178_v59, 0.0 }
 0x46c   : > { %v3777_v8 = vmul.f32 0.2, %v5179_v10  ;;  %v5181_v33 = vadd.f32 %v3601_v18, %v2896_v61  ;;  %4113 = vmatpush1.bf16.msra.mxu1 %v3904_v57  ;;  %vm3713_vm13 = vcmp.gt.f32.partialorder %v5179_v10, 0.0 }
 0x46d   : > { %vm3714_vm14 = vcmp.gt.f32.partialorder %v5180_v40, 0.0  ;;  %v3778_v20 = vmul.f32 0.2, %v5180_v40  ;;  %v3840_v35 = vsel %vm3712_vm12, %v5178_v59, %v3776_v3  ;;  %v2926_v59 = vpop.permute.xlu1 %2925 }
 0x46e   : > { %vm3715_vm15 = vcmp.gt.f32.partialorder %v5181_v33, 0.0  ;;  %v3779_v44 = vmul.f32 0.2, %v5181_v33  ;;  %v3841_v39 = vsel %vm3713_vm13, %v5179_v10, %v3777_v8 }
 0x46f   : > { %v3842_v36 = vsel %vm3714_vm14, %v5180_v40, %v3778_v20 }
 0x470   : > { %v3906_v45 = vpack.c.bf16 %v3842_v36, %v3840_v35  ;;  %v3605_v24 = vpop.f32.mrb[72].mxu1  ;;  %v3843_v38 = vsel %vm3715_vm15, %v5181_v33, %v3779_v44  ;;  %v2931_v44 = vpop.permute.xlu0 %2930 }
 0x471   : > { %v5182_v47 = vadd.f32 %v3605_v24, %v2901_v12  ;;  %v3607_v48 = vpop.f32.mrb[73].mxu1  ;;  %v3907_v26 = vpack.c.bf16 %v3843_v38, %v3841_v39 }
 0x472   : > { %v5183_v17 = vadd.f32 %v3607_v48, %v2901_v12  ;;  %v3609_v49 = vpop.f32.mrb[74].mxu1 }
 0x473   : > { %v3780_v43 = vmul.f32 0.2, %v5182_v47  ;;  %v5184_v21 = vadd.f32 %v3609_v49, %v2906_v41  ;;  %v3611_v52 = vpop.f32.mrb[75].mxu1  ;;  %4114 = vmatprep.subr.bf16.mxu1 %v3907_v26  ;;  %vm3716_vm0 = vcmp.gt.f32.partialorder %v5182_v47, 0.0 }
 0x474   : > { %v3781_v46 = vmul.f32 0.2, %v5183_v17  ;;  %v5185_v55 = vadd.f32 %v3611_v52, %v2906_v41  ;;  %4115 = vmatpush1.bf16.msra.mxu1 %v3906_v45  ;;  %vm3717_vm1 = vcmp.gt.f32.partialorder %v5183_v17, 0.0 }
 0x475   : > { %vm3718_vm2 = vcmp.gt.f32.partialorder %v5184_v21, 0.0  ;;  %v3782_v23 = vmul.f32 0.2, %v5184_v21  ;;  %v3844_v7 = vsel %vm3716_vm0, %v5182_v47, %v3780_v43  ;;  %v2936_v47 = vpop.permute.xlu1 %2935 }
 0x476   : > { %vm3719_vm3 = vcmp.gt.f32.partialorder %v5185_v55, 0.0  ;;  %v3783_v50 = vmul.f32 0.2, %v5185_v55  ;;  %v3845_v54 = vsel %vm3717_vm1, %v5183_v17, %v3781_v46 }
 0x477   : > { %v3846_v58 = vsel %vm3718_vm2, %v5184_v21, %v3782_v23 }
 0x478   : > { %v3908_v62 = vpack.c.bf16 %v3846_v58, %v3844_v7  ;;  %v3615_v1 = vpop.f32.mrb[76].mxu1  ;;  %v3847_v51 = vsel %vm3719_vm3, %v5185_v55, %v3783_v50  ;;  %v2941_v50 = vpop.permute.xlu0 %2940 }
 0x479   : > { %v5186_v13 = vadd.f32 %v3615_v1, %v2911_v11  ;;  %v3617_v56 = vpop.f32.mrb[77].mxu1  ;;  %v3909_v0 = vpack.c.bf16 %v3847_v51, %v3845_v54 }
 0x47a   : > { %v5187_v4 = vadd.f32 %v3617_v56, %v2911_v11  ;;  %v3619_v60 = vpop.f32.mrb[78].mxu1 }
 0x47b   : > { %v3784_v15 = vmul.f32 0.2, %v5186_v13  ;;  %v5188_v2 = vadd.f32 %v3619_v60, %v2916_v25  ;;  %v3621_v63 = vpop.f32.mrb[79].mxu1  ;;  %4116 = vmatprep.subr.bf16.mxu1 %v3909_v0  ;;  %vm3720_vm4 = vcmp.gt.f32.partialorder %v5186_v13, 0.0 }
 0x47c   : > { %v3785_v19 = vmul.f32 0.2, %v5187_v4  ;;  %v5189_v5 = vadd.f32 %v3621_v63, %v2916_v25  ;;  %4117 = vmatpush1.bf16.msra.mxu1 %v3908_v62  ;;  %vm3721_vm5 = vcmp.gt.f32.partialorder %v5187_v4, 0.0 }
 0x47d   : > { %vm3722_vm6 = vcmp.gt.f32.partialorder %v5188_v2, 0.0  ;;  %v3786_v6 = vmul.f32 0.2, %v5188_v2  ;;  %v3848_v9 = vsel %vm3720_vm4, %v5186_v13, %v3784_v15  ;;  %v2946_v13 = vpop.permute.xlu1 %2945 }
 0x47e   : > { %vm3723_vm7 = vcmp.gt.f32.partialorder %v5189_v5, 0.0  ;;  %v3787_v28 = vmul.f32 0.2, %v5189_v5  ;;  %v3849_v32 = vsel %vm3721_vm5, %v5187_v4, %v3785_v19 }
 0x47f   : > { %v3850_v14 = vsel %vm3722_vm6, %v5188_v2, %v3786_v6 }
 0x480   : > { %v3910_v53 = vpack.c.bf16 %v3850_v14, %v3848_v9  ;;  %v3625_v22 = vpop.f32.mrb[80].mxu1  ;;  %v3851_v57 = vsel %vm3723_vm7, %v5189_v5, %v3787_v28  ;;  %v2951_v28 = vpop.permute.xlu0 %2950 }
 0x481   : > { %v5190_v27 = vadd.f32 %v3625_v22, %v2921_v16  ;;  %v3627_v31 = vpop.f32.mrb[81].mxu1  ;;  %v3911_v42 = vpack.c.bf16 %v3851_v57, %v3849_v32 }
 0x482   : > { %v5191_v34 = vadd.f32 %v3627_v31, %v2921_v16  ;;  %v3629_v37 = vpop.f32.mrb[82].mxu1 }
 0x483   : > { %v3788_v61 = vmul.f32 0.2, %v5190_v27  ;;  %v5192_v10 = vadd.f32 %v3629_v37, %v2926_v59  ;;  %v3631_v29 = vpop.f32.mrb[83].mxu1  ;;  %4118 = vmatprep.subr.bf16.mxu1 %v3911_v42  ;;  %vm3724_vm8 = vcmp.gt.f32.partialorder %v5190_v27, 0.0 }
 0x484   : > { %v3789_v3 = vmul.f32 0.2, %v5191_v34  ;;  %v5193_v40 = vadd.f32 %v3631_v29, %v2926_v59  ;;  %4119 = vmatpush1.bf16.msra.mxu1 %v3910_v53  ;;  %vm3725_vm9 = vcmp.gt.f32.partialorder %v5191_v34, 0.0 }
 0x485   : > { %vm3726_vm10 = vcmp.gt.f32.partialorder %v5192_v10, 0.0  ;;  %v3790_v18 = vmul.f32 0.2, %v5192_v10  ;;  %v3852_v33 = vsel %vm3724_vm8, %v5190_v27, %v3788_v61  ;;  %v2956_v27 = vpop.permute.xlu1 %2955 }
 0x486   : > { %vm3727_vm11 = vcmp.gt.f32.partialorder %v5193_v40, 0.0  ;;  %v3791_v8 = vmul.f32 0.2, %v5193_v40  ;;  %v3853_v12 = vsel %vm3725_vm9, %v5191_v34, %v3789_v3 }
 0x487   : > { %v3854_v20 = vsel %vm3726_vm10, %v5192_v10, %v3790_v18 }
 0x488   : > { %v3912_v35 = vpack.c.bf16 %v3854_v20, %v3852_v33  ;;  %v3635_v36 = vpop.f32.mrb[84].mxu1  ;;  %v3855_v45 = vsel %vm3727_vm11, %v5193_v40, %v3791_v8  ;;  %v2961_v8 = vpop.permute.xlu0 %2960 }
 0x489   : > { %v5194_v24 = vadd.f32 %v3635_v36, %v2931_v44  ;;  %v3637_v39 = vpop.f32.mrb[85].mxu1  ;;  %v3913_v38 = vpack.c.bf16 %v3855_v45, %v3853_v12 }
 0x48a   : > { %v5195_v48 = vadd.f32 %v3637_v39, %v2931_v44  ;;  %v3639_v26 = vpop.f32.mrb[86].mxu1 }
 0x48b   : > { %v3792_v41 = vmul.f32 0.2, %v5194_v24  ;;  %v5196_v17 = vadd.f32 %v3639_v26, %v2936_v47  ;;  %v3641_v49 = vpop.f32.mrb[87].mxu1  ;;  %4120 = vmatprep.subr.bf16.mxu1 %v3913_v38  ;;  %vm3728_vm12 = vcmp.gt.f32.partialorder %v5194_v24, 0.0 }
 0x48c   : > { %v3793_v43 = vmul.f32 0.2, %v5195_v48  ;;  %v5197_v21 = vadd.f32 %v3641_v49, %v2936_v47  ;;  %4121 = vmatpush1.bf16.msra.mxu1 %v3912_v35  ;;  %vm3729_vm13 = vcmp.gt.f32.partialorder %v5195_v48, 0.0 }
 0x48d   : > { %vm3730_vm14 = vcmp.gt.f32.partialorder %v5196_v17, 0.0  ;;  %v3794_v52 = vmul.f32 0.2, %v5196_v17  ;;  %v3856_v55 = vsel %vm3728_vm12, %v5194_v24, %v3792_v41  ;;  %v2966_v24 = vpop.permute.xlu1 %2965 }
 0x48e   : > { %vm3731_vm15 = vcmp.gt.f32.partialorder %v5197_v21, 0.0  ;;  %v3795_v46 = vmul.f32 0.2, %v5197_v21  ;;  %v3857_v11 = vsel %vm3729_vm13, %v5195_v48, %v3793_v43 }
 0x48f   : > { %v3858_v23 = vsel %vm3730_vm14, %v5196_v17, %v3794_v52 }
 0x490   : > { %v3914_v7 = vpack.c.bf16 %v3858_v23, %v3856_v55  ;;  %v3645_v58 = vpop.f32.mrb[88].mxu1  ;;  %v3859_v62 = vsel %vm3731_vm15, %v5197_v21, %v3795_v46  ;;  %v2971_v46 = vpop.permute.xlu0 %2970 }
 0x491   : > { %v5198_v1 = vadd.f32 %v3645_v58, %v2941_v50  ;;  %v3647_v54 = vpop.f32.mrb[89].mxu1  ;;  %v3915_v51 = vpack.c.bf16 %v3859_v62, %v3857_v11 }
 0x492   : > { %v5199_v56 = vadd.f32 %v3647_v54, %v2941_v50  ;;  %v3649_v0 = vpop.f32.mrb[90].mxu1 }
 0x493   : > { %v3796_v25 = vmul.f32 0.2, %v5198_v1  ;;  %v5200_v4 = vadd.f32 %v3649_v0, %v2946_v13  ;;  %v3651_v60 = vpop.f32.mrb[91].mxu1  ;;  %4122 = vmatprep.subr.bf16.mxu1 %v3915_v51  ;;  %vm3732_vm0 = vcmp.gt.f32.partialorder %v5198_v1, 0.0 }
 0x494   : > { %v3797_v15 = vmul.f32 0.2, %v5199_v56  ;;  %v5201_v2 = vadd.f32 %v3651_v60, %v2946_v13  ;;  %4123 = vmatpush1.bf16.msra.mxu1 %v3914_v7  ;;  %vm3733_vm1 = vcmp.gt.f32.partialorder %v5199_v56, 0.0 }
 0x495   : > { %vm3734_vm2 = vcmp.gt.f32.partialorder %v5200_v4, 0.0  ;;  %v3798_v63 = vmul.f32 0.2, %v5200_v4  ;;  %v3860_v5 = vsel %vm3732_vm0, %v5198_v1, %v3796_v25  ;;  %v2976_v1 = vpop.permute.xlu1 %2975 }
 0x496   : > { %vm3735_vm3 = vcmp.gt.f32.partialorder %v5201_v2, 0.0  ;;  %v3799_v19 = vmul.f32 0.2, %v5201_v2  ;;  %v3861_v16 = vsel %vm3733_vm1, %v5199_v56, %v3797_v15 }
 0x497   : > { %v3862_v6 = vsel %vm3734_vm2, %v5200_v4, %v3798_v63 }
 0x498   : > { %v3916_v9 = vpack.c.bf16 %v3862_v6, %v3860_v5  ;;  %v3655_v14 = vpop.f32.mrb[92].mxu1  ;;  %v3863_v53 = vsel %vm3735_vm3, %v5201_v2, %v3799_v19 }
 0x499   : > { %v5202_v22 = vadd.f32 %v3655_v14, %v2951_v28  ;;  %v3657_v32 = vpop.f32.mrb[93].mxu1  ;;  %v3917_v57 = vpack.c.bf16 %v3863_v53, %v3861_v16  ;;  %v5856_v14 = vld [vmem:[#allocation7 + $0x14] ss:$8 sps:$4 sm:$0xff]   ;;  %v5858_v16 = vld [vmem:[#allocation7 + $0x10] ss:$8 sps:$4 sm:$0xff]  }
 0x49a   : > { %v5203_v31 = vadd.f32 %v3657_v32, %v2951_v28  ;;  %v3659_v42 = vpop.f32.mrb[94].mxu1  ;;  %v5859_v53 = vld [vmem:[#allocation7 + $0x24] ss:$8 sps:$4 sm:$0xff]   ;;  %v5862_v32 = vld [vmem:[#allocation7 + $0x34] ss:$8 sps:$4 sm:$0xff]  }
 0x49b   : > { %v3800_v59 = vmul.f32 0.2, %v5202_v22  ;;  %v5204_v34 = vadd.f32 %v3659_v42, %v2956_v27  ;;  %v3661_v37 = vpop.f32.mrb[95].mxu1  ;;  %4124 = vmatprep.subr.bf16.mxu1 %v3917_v57  ;;  %vm3736_vm4 = vcmp.gt.f32.partialorder %v5202_v22, 0.0  ;;  %v5864_v57 = vld [vmem:[#allocation7 + $0x30] ss:$8 sps:$4 sm:$0xff]  }
 0x49c   : > { %v3801_v61 = vmul.f32 0.2, %v5203_v31  ;;  %v5205_v10 = vadd.f32 %v3661_v37, %v2956_v27  ;;  %4125 = vmatpush1.bf16.msra.mxu1 %v3916_v9  ;;  %vm3737_vm5 = vcmp.gt.f32.partialorder %v5203_v31, 0.0  ;;  %v5853_v9 = vld [vmem:[#allocation7] ss:$8 sps:$4 sm:$0xff]  }
 0x49d   : > { %vm3738_vm6 = vcmp.gt.f32.partialorder %v5204_v34, 0.0  ;;  %v3802_v29 = vmul.f32 0.2, %v5204_v34  ;;  %v3864_v40 = vsel %vm3736_vm4, %v5202_v22, %v3800_v59  ;;  %v5861_v22 = vld [vmem:[#allocation7 + $0x20] ss:$8 sps:$4 sm:$0xff]  }
 0x49e   : > { %vm3739_vm7 = vcmp.gt.f32.partialorder %v5205_v10, 0.0  ;;  %v3803_v3 = vmul.f32 0.2, %v5205_v10  ;;  %v3865_v44 = vsel %vm3737_vm5, %v5203_v31, %v3801_v61  ;;  %v5865_v27 = vld [vmem:[#allocation7 + $0x44] ss:$8 sps:$4 sm:$0xff]  }
 0x49f   : > { %v3866_v18 = vsel %vm3738_vm6, %v5204_v34, %v3802_v29  ;;  %v5867_v31 = vld [vmem:[#allocation7 + $0x40] ss:$8 sps:$4 sm:$0xff]   ;;  %v5868_v42 = vld [vmem:[#allocation7 + $0x54] ss:$8 sps:$4 sm:$0xff]   ;;  %v5870_v59 = vld [vmem:[#allocation7 + $0x50] ss:$8 sps:$4 sm:$0xff]   ;;  %v3943_v29 = vpop.permute.xlu0 %3942 }
 0x4a0   : > { %v3918_v33 = vpack.c.bf16 %v3866_v18, %v3864_v40  ;;  %v3665_v20 = vpop.f32.mrb[96].mxu1  ;;  %v3867_v35 = vsel %vm3739_vm7, %v5205_v10, %v3803_v3  ;;  %v5871_v34 = vld [vmem:[#allocation7 + $0x64] ss:$8 sps:$4 sm:$0xff]   ;;  %v5873_v37 = vld [vmem:[#allocation7 + $0x60] ss:$8 sps:$4 sm:$0xff]  }
 0x4a1   : > { %v5206_v36 = vadd.f32 %v3665_v20, %v2961_v8  ;;  %v3667_v12 = vpop.f32.mrb[97].mxu1  ;;  %v3919_v45 = vpack.c.bf16 %v3867_v35, %v3865_v44  ;;  %v5874_v61 = vld [vmem:[#allocation7 + $0x74] ss:$8 sps:$4 sm:$0xff]   ;;  %v5876_v10 = vld [vmem:[#allocation7 + $0x70] ss:$8 sps:$4 sm:$0xff]  }
 0x4a2   : > { %v5207_v39 = vadd.f32 %v3667_v12, %v2961_v8  ;;  %v3669_v38 = vpop.f32.mrb[98].mxu1  ;;  %v3948_v8 = vpop.permute.xlu1 %3947 }
 0x4a3   : > { %v3804_v47 = vmul.f32 0.2, %v5206_v36  ;;  %v5208_v48 = vadd.f32 %v3669_v38, %v2966_v24  ;;  %v3671_v26 = vpop.f32.mrb[99].mxu1  ;;  %4126 = vmatprep.subr.bf16.mxu1 %v3919_v45  ;;  %vm3740_vm8 = vcmp.gt.f32.partialorder %v5206_v36, 0.0 }
 0x4a4   : > { %v3805_v41 = vmul.f32 0.2, %v5207_v39  ;;  %v5209_v17 = vadd.f32 %v3671_v26, %v2966_v24  ;;  %4127 = vmatpush1.bf16.msra.mxu1 %v3918_v33  ;;  %vm3741_vm9 = vcmp.gt.f32.partialorder %v5207_v39, 0.0 }
 0x4a5   : > { %vm3742_vm10 = vcmp.gt.f32.partialorder %v5208_v48, 0.0  ;;  %v3806_v49 = vmul.f32 0.2, %v5208_v48  ;;  %v3868_v21 = vsel %vm3740_vm8, %v5206_v36, %v3804_v47 }
 0x4a6   : > { %vm3743_vm11 = vcmp.gt.f32.partialorder %v5209_v17, 0.0  ;;  %v3807_v43 = vmul.f32 0.2, %v5209_v17  ;;  %v3869_v50 = vsel %vm3741_vm9, %v5207_v39, %v3805_v41 }
 0x4a7   : > { %v3870_v52 = vsel %vm3742_vm10, %v5208_v48, %v3806_v49  ;;  %v3953_v48 = vpop.permute.xlu0 %3952 }
 0x4a8   : > { %v3920_v55 = vpack.c.bf16 %v3870_v52, %v3868_v21  ;;  %v3675_v23 = vpop.f32.mrb[100].mxu1  ;;  %v3871_v7 = vsel %vm3743_vm11, %v5209_v17, %v3807_v43 }
 0x4a9   : > { %v5210_v58 = vadd.f32 %v3675_v23, %v2971_v46  ;;  %v3677_v11 = vpop.f32.mrb[101].mxu1  ;;  %v3921_v62 = vpack.c.bf16 %v3871_v7, %v3869_v50 }
 0x4aa   : > { %v5211_v54 = vadd.f32 %v3677_v11, %v2971_v46  ;;  %v3679_v51 = vpop.f32.mrb[102].mxu1  ;;  %v3958_v46 = vpop.permute.xlu1 %3957 }
 0x4ab   : > { %v3808_v13 = vmul.f32 0.2, %v5210_v58  ;;  %v5212_v56 = vadd.f32 %v3679_v51, %v2976_v1  ;;  %v3681_v0 = vpop.f32.mrb[103].mxu1  ;;  %4128 = vmatprep.subr.bf16.mxu1 %v3921_v62  ;;  %vm3744_vm12 = vcmp.gt.f32.partialorder %v5210_v58, 0.0 }
 0x4ac   : > { %v3809_v25 = vmul.f32 0.2, %v5211_v54  ;;  %v5213_v4 = vadd.f32 %v3681_v0, %v2976_v1  ;;  %4129 = vmatpush1.bf16.msra.mxu1 %v3920_v55  ;;  %vm3745_vm13 = vcmp.gt.f32.partialorder %v5211_v54, 0.0 }
 0x4ad   : > { %vm3746_vm14 = vcmp.gt.f32.partialorder %v5212_v56, 0.0  ;;  %v3810_v60 = vmul.f32 0.2, %v5212_v56  ;;  %v3872_v2 = vsel %vm3744_vm12, %v5210_v58, %v3808_v13 }
 0x4ae   : > { %vm3747_vm15 = vcmp.gt.f32.partialorder %v5213_v4, 0.0  ;;  %v3811_v15 = vmul.f32 0.2, %v5213_v4  ;;  %v3873_v5 = vsel %vm3745_vm13, %v5211_v54, %v3809_v25 }
 0x4af   : > { %v3874_v63 = vsel %vm3746_vm14, %v5212_v56, %v3810_v60  ;;  %v3963_v56 = vpop.permute.xlu0 %3962 }
 0x4b0   : > { %v3922_v19 = vpack.c.bf16 %v3874_v63, %v3872_v2  ;;  %v3875_v6 = vsel %vm3747_vm15, %v5213_v4, %v3811_v15 }
 0x4b1   : > { %v3923_v28 = vpack.c.bf16 %v3875_v6, %v3873_v5 }
 0x4b3   : > { %4130 = vmatprep.subr.bf16.mxu1 %v3923_v28 }
 0x4b4   : > { %4131 = vmatpush1.bf16.msra.mxu1 %v3922_v19  ;;  %v3968_v19 = vpop.permute.xlu1 %3967 }
 0x4b7   : > { %4133 = vmatmul.mubr.bf16.vlgmr.msra.gmra.mrb[104].mxu1 %v5853_v9 }
 0x4b8   : > { %4142 = vmatprep.mubr.bf16.mxu1 %v5856_v14 }
 0x4bf   : > { %4143 = vmatmul.mubr.bf16.gmra.mrb[108].mxu1 %v5858_v16 }
 0x4c0   : > { %4152 = vmatprep.mubr.bf16.mxu1 %v5859_v53 }
 0x4c7   : > { %4153 = vmatmul.mubr.bf16.gmra.mrb[112].mxu1 %v5861_v22 }
 0x4c8   : > { %4162 = vmatprep.mubr.bf16.mxu1 %v5862_v32 }
 0x4cf   : > { %4163 = vmatmul.mubr.bf16.gmra.mrb[116].mxu1 %v5864_v57 }
 0x4d0   : > { %4172 = vmatprep.mubr.bf16.mxu1 %v5865_v27 }
 0x4d7   : > { %4173 = vmatmul.mubr.bf16.gmra.mrb[120].mxu1 %v5867_v31  ;;  %v3973_v31 = vpop.permute.xlu0 %3972 }
 0x4d8   : > { %4182 = vmatprep.mubr.bf16.mxu1 %v5868_v42 }
 0x4df   : > { %4183 = vmatmul.mubr.bf16.gmra.mrb[124].mxu1 %v5870_v59 }
 0x4e0   : > { %4192 = vmatprep.mubr.bf16.mxu1 %v5871_v34 }
 0x4e7   : > { %4193 = vmatmul.mubr.bf16.gmra.mrb[128].mxu1 %v5873_v37 }
 0x4e8   : > { %4202 = vmatprep.mubr.bf16.mxu1 %v5874_v61 }
 0x4ef   : > { %4203 = vmatmul.mubr.bf16.gmra.mrb[132].mxu1 %v5876_v10 }
 0x4f0   : > { %4437 = vmatprep.mubr.bf16.mxu1 %v6105_v30 }
 0x58a   : > { %v4134_v3 = vpop.f32.mrb[104].mxu1 }
 0x58b   : > { %v4135_v40 = vadd.f32 %v4134_v3, %v3943_v29  ;;  %v4136_v18 = vpop.f32.mrb[105].mxu1  ;;  %v3978_v3 = vpop.permute.xlu1 %3977 }
 0x58c   : > { %v4137_v33 = vadd.f32 %v4136_v18, %v3943_v29  ;;  %v4138_v20 = vpop.f32.mrb[106].mxu1 }
 0x58d   : > { %v4245_v44 = vmul.f32 0.2, %v4135_v40  ;;  %v4139_v35 = vadd.f32 %v4138_v20, %v3948_v8  ;;  %v4140_v36 = vpop.f32.mrb[107].mxu1  ;;  %vm4213_vm0 = vcmp.gt.f32.partialorder %v4135_v40, 0.0 }
 0x58e   : > { %v4246_v12 = vmul.f32 0.2, %v4137_v33  ;;  %v4141_v45 = vadd.f32 %v4140_v36, %v3948_v8  ;;  %vm4214_vm1 = vcmp.gt.f32.partialorder %v4137_v33, 0.0 }
 0x58f   : > { %vm4215_vm2 = vcmp.gt.f32.partialorder %v4139_v35, 0.0  ;;  %v4247_v24 = vmul.f32 0.2, %v4139_v35  ;;  %v4277_v38 = vsel %vm4213_vm0, %v4135_v40, %v4245_v44 }
 0x590   : > { %vm4216_vm3 = vcmp.gt.f32.partialorder %v4141_v45, 0.0  ;;  %v4248_v39 = vmul.f32 0.2, %v4141_v45  ;;  %v4278_v17 = vsel %vm4214_vm1, %v4137_v33, %v4246_v12 }
 0x591   : > { %v4279_v47 = vsel %vm4215_vm2, %v4139_v35, %v4247_v24 }
 0x592   : > { %v4317_v26 = vpack.c.bf16 %v4279_v47, %v4277_v38  ;;  %v4144_v41 = vpop.f32.mrb[108].mxu1  ;;  %v4280_v49 = vsel %vm4216_vm3, %v4141_v45, %v4248_v39  ;;  %v3983_v39 = vpop.permute.xlu0 %3982 }
 0x593   : > { %v4145_v43 = vadd.f32 %v4144_v41, %v3953_v48  ;;  %v4146_v21 = vpop.f32.mrb[109].mxu1  ;;  %v4318_v52 = vpack.c.bf16 %v4280_v49, %v4278_v17 }
 0x594   : > { %v4147_v55 = vadd.f32 %v4146_v21, %v3953_v48  ;;  %v4148_v23 = vpop.f32.mrb[110].mxu1 }
 0x595   : > { %v4249_v50 = vmul.f32 0.2, %v4145_v43  ;;  %v4149_v7 = vadd.f32 %v4148_v23, %v3958_v46  ;;  %v4150_v58 = vpop.f32.mrb[111].mxu1  ;;  %4405 = vmatprep.subr.bf16.mxu1 %v4318_v52  ;;  %vm4217_vm4 = vcmp.gt.f32.partialorder %v4145_v43, 0.0 }
 0x596   : > { %v4250_v11 = vmul.f32 0.2, %v4147_v55  ;;  %v4151_v62 = vadd.f32 %v4150_v58, %v3958_v46  ;;  %4406 = vmatpush1.bf16.msra.mxu1 %v4317_v26  ;;  %vm4218_vm5 = vcmp.gt.f32.partialorder %v4147_v55, 0.0 }
 0x597   : > { %vm4219_vm6 = vcmp.gt.f32.partialorder %v4149_v7, 0.0  ;;  %v4251_v1 = vmul.f32 0.2, %v4149_v7  ;;  %v4281_v51 = vsel %vm4217_vm4, %v4145_v43, %v4249_v50  ;;  %v3988_v43 = vpop.permute.xlu1 %3987 }
 0x598   : > { %vm4220_vm7 = vcmp.gt.f32.partialorder %v4151_v62, 0.0  ;;  %v4252_v54 = vmul.f32 0.2, %v4151_v62  ;;  %v4282_v4 = vsel %vm4218_vm5, %v4147_v55, %v4250_v11 }
 0x599   : > { %v4283_v13 = vsel %vm4219_vm6, %v4149_v7, %v4251_v1 }
 0x59a   : > { %v4319_v0 = vpack.c.bf16 %v4283_v13, %v4281_v51  ;;  %v4154_v25 = vpop.f32.mrb[112].mxu1  ;;  %v4284_v60 = vsel %vm4220_vm7, %v4151_v62, %v4252_v54  ;;  %v3993_v54 = vpop.permute.xlu0 %3992 }
 0x59b   : > { %v4155_v15 = vadd.f32 %v4154_v25, %v3963_v56  ;;  %v4156_v2 = vpop.f32.mrb[113].mxu1  ;;  %v4320_v63 = vpack.c.bf16 %v4284_v60, %v4282_v4 }
 0x59c   : > { %v4157_v5 = vadd.f32 %v4156_v2, %v3963_v56  ;;  %v4158_v6 = vpop.f32.mrb[114].mxu1 }
 0x59d   : > { %v4253_v28 = vmul.f32 0.2, %v4155_v15  ;;  %v4159_v9 = vadd.f32 %v4158_v6, %v3968_v19  ;;  %v4160_v14 = vpop.f32.mrb[115].mxu1  ;;  %4407 = vmatprep.subr.bf16.mxu1 %v4320_v63  ;;  %vm4221_vm8 = vcmp.gt.f32.partialorder %v4155_v15, 0.0 }
 0x59e   : > { %v4254_v16 = vmul.f32 0.2, %v4157_v5  ;;  %v4161_v53 = vadd.f32 %v4160_v14, %v3968_v19  ;;  %4408 = vmatpush1.bf16.msra.mxu1 %v4319_v0  ;;  %vm4222_vm9 = vcmp.gt.f32.partialorder %v4157_v5, 0.0 }
 0x59f   : > { %vm4223_vm10 = vcmp.gt.f32.partialorder %v4159_v9, 0.0  ;;  %v4255_v22 = vmul.f32 0.2, %v4159_v9  ;;  %v4285_v57 = vsel %vm4221_vm8, %v4155_v15, %v4253_v28  ;;  %v3998_v15 = vpop.permute.xlu1 %3997 }
 0x5a0   : > { %vm4224_vm11 = vcmp.gt.f32.partialorder %v4161_v53, 0.0  ;;  %v4256_v32 = vmul.f32 0.2, %v4161_v53  ;;  %v4286_v34 = vsel %vm4222_vm9, %v4157_v5, %v4254_v16 }
 0x5a1   : > { %v4287_v27 = vsel %vm4223_vm10, %v4159_v9, %v4255_v22 }
 0x5a2   : > { %v4321_v42 = vpack.c.bf16 %v4287_v27, %v4285_v57  ;;  %v4164_v59 = vpop.f32.mrb[116].mxu1  ;;  %v4288_v37 = vsel %vm4224_vm11, %v4161_v53, %v4256_v32  ;;  %v4003_v32 = vpop.permute.xlu0 %4002 }
 0x5a3   : > { %v4165_v61 = vadd.f32 %v4164_v59, %v3973_v31  ;;  %v4166_v10 = vpop.f32.mrb[117].mxu1  ;;  %v4322_v29 = vpack.c.bf16 %v4288_v37, %v4286_v34 }
 0x5a4   : > { %v4167_v40 = vadd.f32 %v4166_v10, %v3973_v31  ;;  %v4168_v18 = vpop.f32.mrb[118].mxu1 }
 0x5a5   : > { %v4257_v8 = vmul.f32 0.2, %v4165_v61  ;;  %v4169_v33 = vadd.f32 %v4168_v18, %v3978_v3  ;;  %v4170_v20 = vpop.f32.mrb[119].mxu1  ;;  %4409 = vmatprep.subr.bf16.mxu1 %v4322_v29  ;;  %vm4225_vm12 = vcmp.gt.f32.partialorder %v4165_v61, 0.0 }
 0x5a6   : > { %v4258_v44 = vmul.f32 0.2, %v4167_v40  ;;  %v4171_v35 = vadd.f32 %v4170_v20, %v3978_v3  ;;  %4410 = vmatpush1.bf16.msra.mxu1 %v4321_v42  ;;  %vm4226_vm13 = vcmp.gt.f32.partialorder %v4167_v40, 0.0 }
 0x5a7   : > { %vm4227_vm14 = vcmp.gt.f32.partialorder %v4169_v33, 0.0  ;;  %v4259_v36 = vmul.f32 0.2, %v4169_v33  ;;  %v4289_v45 = vsel %vm4225_vm12, %v4165_v61, %v4257_v8  ;;  %v4008_v61 = vpop.permute.xlu1 %4007 }
 0x5a8   : > { %vm4228_vm15 = vcmp.gt.f32.partialorder %v4171_v35, 0.0  ;;  %v4260_v12 = vmul.f32 0.2, %v4171_v35  ;;  %v4290_v48 = vsel %vm4226_vm13, %v4167_v40, %v4258_v44 }
 0x5a9   : > { %v4291_v24 = vsel %vm4227_vm14, %v4169_v33, %v4259_v36 }
 0x5aa   : > { %v4323_v38 = vpack.c.bf16 %v4291_v24, %v4289_v45  ;;  %v4174_v47 = vpop.f32.mrb[120].mxu1  ;;  %v4292_v26 = vsel %vm4228_vm15, %v4171_v35, %v4260_v12  ;;  %v4013_v12 = vpop.permute.xlu0 %4012 }
 0x5ab   : > { %v4175_v41 = vadd.f32 %v4174_v47, %v3983_v39  ;;  %v4176_v17 = vpop.f32.mrb[121].mxu1  ;;  %v4324_v49 = vpack.c.bf16 %v4292_v26, %v4290_v48 }
 0x5ac   : > { %v4177_v21 = vadd.f32 %v4176_v17, %v3983_v39  ;;  %v4178_v52 = vpop.f32.mrb[122].mxu1 }
 0x5ad   : > { %v4261_v46 = vmul.f32 0.2, %v4175_v41  ;;  %v4179_v55 = vadd.f32 %v4178_v52, %v3988_v43  ;;  %v4180_v23 = vpop.f32.mrb[123].mxu1  ;;  %4411 = vmatprep.subr.bf16.mxu1 %v4324_v49  ;;  %vm4229_vm0 = vcmp.gt.f32.partialorder %v4175_v41, 0.0 }
 0x5ae   : > { %v4262_v50 = vmul.f32 0.2, %v4177_v21  ;;  %v4181_v7 = vadd.f32 %v4180_v23, %v3988_v43  ;;  %4412 = vmatpush1.bf16.msra.mxu1 %v4323_v38  ;;  %vm4230_vm1 = vcmp.gt.f32.partialorder %v4177_v21, 0.0 }
 0x5af   : > { %vm4231_vm2 = vcmp.gt.f32.partialorder %v4179_v55, 0.0  ;;  %v4263_v58 = vmul.f32 0.2, %v4179_v55  ;;  %v4293_v62 = vsel %vm4229_vm0, %v4175_v41, %v4261_v46  ;;  %v4018_v41 = vpop.permute.xlu1 %4017 }
 0x5b0   : > { %vm4232_vm3 = vcmp.gt.f32.partialorder %v4181_v7, 0.0  ;;  %v4264_v11 = vmul.f32 0.2, %v4181_v7  ;;  %v4294_v56 = vsel %vm4230_vm1, %v4177_v21, %v4262_v50 }
 0x5b1   : > { %v4295_v1 = vsel %vm4231_vm2, %v4179_v55, %v4263_v58 }
 0x5b2   : > { %v4325_v51 = vpack.c.bf16 %v4295_v1, %v4293_v62  ;;  %v4184_v13 = vpop.f32.mrb[124].mxu1  ;;  %v4296_v0 = vsel %vm4232_vm3, %v4181_v7, %v4264_v11 }
 0x5b3   : > { %v4185_v25 = vadd.f32 %v4184_v13, %v3993_v54  ;;  %v4186_v4 = vpop.f32.mrb[125].mxu1  ;;  %v4326_v60 = vpack.c.bf16 %v4296_v0, %v4294_v56  ;;  %v5878_v13 = vld [vmem:[#allocation8 + $0x8] sm:$0xff]   ;;  %v5879_v56 = vld [vmem:[#allocation8 + $0x10] sm:$0xff]   ;;  %v5880_v0 = vld [vmem:[#allocation8 + $0x18] sm:$0xff]  }
 0x5b4   : > { %v4187_v2 = vadd.f32 %v4186_v4, %v3993_v54  ;;  %v4188_v63 = vpop.f32.mrb[126].mxu1  ;;  %v4349_v4 = vpop.permute.xlu1 %4348 }
 0x5b5   : > { %v4265_v19 = vmul.f32 0.2, %v4185_v25  ;;  %v4189_v5 = vadd.f32 %v4188_v63, %v3998_v15  ;;  %v4190_v6 = vpop.f32.mrb[127].mxu1  ;;  %4413 = vmatprep.subr.bf16.mxu1 %v4326_v60  ;;  %vm4233_vm4 = vcmp.gt.f32.partialorder %v4185_v25, 0.0 }
 0x5b6   : > { %v4266_v28 = vmul.f32 0.2, %v4187_v2  ;;  %v4191_v9 = vadd.f32 %v4190_v6, %v3998_v15  ;;  %4414 = vmatpush1.bf16.msra.mxu1 %v4325_v51  ;;  %vm4234_vm5 = vcmp.gt.f32.partialorder %v4187_v2, 0.0  ;;  %v5877_v51 = vld [vmem:[#allocation8] sm:$0xff]  }
 0x5b7   : > { %vm4235_vm6 = vcmp.gt.f32.partialorder %v4189_v5, 0.0  ;;  %v4267_v14 = vmul.f32 0.2, %v4189_v5  ;;  %v4297_v53 = vsel %vm4233_vm4, %v4185_v25, %v4265_v19  ;;  %v4344_v25 = vpop.permute.xlu0 %4343 }
 0x5b8   : > { %vm4236_vm7 = vcmp.gt.f32.partialorder %v4191_v9, 0.0  ;;  %v4268_v16 = vmul.f32 0.2, %v4191_v9  ;;  %v4298_v31 = vsel %vm4234_vm5, %v4187_v2, %v4266_v28  ;;  %v4359_v15 = vpop.permute.xlu1 %4358 }
 0x5b9   : > { %v4299_v22 = vsel %vm4235_vm6, %v4189_v5, %v4267_v14 }
 0x5ba   : > { %v4327_v57 = vpack.c.bf16 %v4299_v22, %v4297_v53  ;;  %v4194_v27 = vpop.f32.mrb[128].mxu1  ;;  %v4300_v42 = vsel %vm4236_vm7, %v4191_v9, %v4268_v16 }
 0x5bb   : > { %v4195_v59 = vadd.f32 %v4194_v27, %v4003_v32  ;;  %v4196_v34 = vpop.f32.mrb[129].mxu1  ;;  %v4328_v37 = vpack.c.bf16 %v4300_v42, %v4298_v31  ;;  %v4354_v60 = vpop.permute.xlu0 %4353 }
 0x5bc   : > { %v4197_v10 = vadd.f32 %v4196_v34, %v4003_v32  ;;  %v4198_v29 = vpop.f32.mrb[130].mxu1  ;;  %v4542_v63 = vpop.permute.xlu1 %4541 }
 0x5bd   : > { %v4269_v3 = vmul.f32 0.2, %v4195_v59  ;;  %v4199_v40 = vadd.f32 %v4198_v29, %v4008_v61  ;;  %v4200_v18 = vpop.f32.mrb[131].mxu1  ;;  %4415 = vmatprep.subr.bf16.mxu1 %v4328_v37  ;;  %vm4237_vm8 = vcmp.gt.f32.partialorder %v4195_v59, 0.0 }
 0x5be   : > { %v4270_v8 = vmul.f32 0.2, %v4197_v10  ;;  %v4201_v33 = vadd.f32 %v4200_v18, %v4008_v61  ;;  %4416 = vmatpush1.bf16.msra.mxu1 %v4327_v57  ;;  %vm4238_vm9 = vcmp.gt.f32.partialorder %v4197_v10, 0.0 }
 0x5bf   : > { %vm4239_vm10 = vcmp.gt.f32.partialorder %v4199_v40, 0.0  ;;  %v4271_v20 = vmul.f32 0.2, %v4199_v40  ;;  %v4301_v35 = vsel %vm4237_vm8, %v4195_v59, %v4269_v3  ;;  %v4537_v2 = vpop.permute.xlu0 %4536 }
 0x5c0   : > { %vm4240_vm11 = vcmp.gt.f32.partialorder %v4201_v33, 0.0  ;;  %v4272_v44 = vmul.f32 0.2, %v4201_v33  ;;  %v4302_v39 = vsel %vm4238_vm9, %v4197_v10, %v4270_v8  ;;  %v4547_v57 = vpop.permute.xlu1 %4546 }
 0x5c1   : > { %v4303_v36 = vsel %vm4239_vm10, %v4199_v40, %v4271_v20 }
 0x5c2   : > { %v4329_v45 = vpack.c.bf16 %v4303_v36, %v4301_v35  ;;  %v4204_v24 = vpop.f32.mrb[132].mxu1  ;;  %v4304_v38 = vsel %vm4240_vm11, %v4201_v33, %v4272_v44 }
 0x5c3   : > { %v4205_v47 = vadd.f32 %v4204_v24, %v4013_v12  ;;  %v4206_v48 = vpop.f32.mrb[133].mxu1  ;;  %v4330_v26 = vpack.c.bf16 %v4304_v38, %v4302_v39  ;;  %v4364_v22 = vpop.permute.xlu0 %4363 }
 0x5c4   : > { %v4207_v17 = vadd.f32 %v4206_v48, %v4013_v12  ;;  %v4208_v49 = vpop.f32.mrb[134].mxu1  ;;  %v4552_v36 = vpop.permute.xlu1 %4551 }
 0x5c5   : > { %v4273_v43 = vmul.f32 0.2, %v4205_v47  ;;  %v4209_v21 = vadd.f32 %v4208_v49, %v4018_v41  ;;  %v4210_v52 = vpop.f32.mrb[135].mxu1  ;;  %4417 = vmatprep.subr.bf16.mxu1 %v4330_v26  ;;  %vm4241_vm12 = vcmp.gt.f32.partialorder %v4205_v47, 0.0 }
 0x5c6   : > { %v4274_v46 = vmul.f32 0.2, %v4207_v17  ;;  %v4211_v55 = vadd.f32 %v4210_v52, %v4018_v41  ;;  %4418 = vmatpush1.bf16.msra.mxu1 %v4329_v45  ;;  %vm4242_vm13 = vcmp.gt.f32.partialorder %v4207_v17, 0.0 }
 0x5c7   : > { %vm4243_vm14 = vcmp.gt.f32.partialorder %v4209_v21, 0.0  ;;  %v4275_v23 = vmul.f32 0.2, %v4209_v21  ;;  %v4305_v7 = vsel %vm4241_vm12, %v4205_v47, %v4273_v43  ;;  %v4369_v33 = vpop.permute.xlu0 %4368 }
 0x5c8   : > { %vm4244_vm15 = vcmp.gt.f32.partialorder %v4211_v55, 0.0  ;;  %v4276_v50 = vmul.f32 0.2, %v4211_v55  ;;  %v4306_v62 = vsel %vm4242_vm13, %v4207_v17, %v4274_v46 }
 0x5c9   : > { %v4307_v58 = vsel %vm4243_vm14, %v4209_v21, %v4275_v23 }
 0x5ca   : > { %v4331_v11 = vpack.c.bf16 %v4307_v58, %v4305_v7  ;;  %v4308_v1 = vsel %vm4244_vm15, %v4211_v55, %v4276_v50  ;;  %v4557_v7 = vpop.permute.xlu1 %4556 }
 0x5cb   : > { %v4332_v54 = vpack.c.bf16 %v4308_v1, %v4306_v62  ;;  %v4374_v52 = vpop.permute.xlu0 %4373 }
 0x5cd   : > { %4419 = vmatprep.subr.bf16.mxu1 %v4332_v54 }
 0x5ce   : > { %4420 = vmatpush1.bf16.msra.mxu1 %v4331_v11 }
 0x5d1   : > { %4438 = vmatmul.mubr.bf16.vlgmr.msra.gmra.mrb[136].mxu1 %v5877_v51 }
 0x5d2   : > { %4447 = vmatprep.mubr.bf16.mxu1 %v6105_v30 }
 0x5d9   : > { %4448 = vmatmul.mubr.bf16.gmra.mrb[140].mxu1 %v5878_v13 }
 0x5da   : > { %4457 = vmatprep.mubr.bf16.mxu1 %v6105_v30 }
 0x5e1   : > { %4458 = vmatmul.mubr.bf16.gmra.mrb[144].mxu1 %v5879_v56 }
 0x5e2   : > { %4467 = vmatprep.mubr.bf16.mxu1 %v6105_v30 }
 0x5e9   : > { %4468 = vmatmul.mubr.bf16.gmra.mrb[148].mxu1 %v5880_v0 }
 0x6a4   : > { %v4439_v19 = vpop.f32.mrb[136].mxu1 }
 0x6a5   : > { %v4440_v5 = vadd.f32 %v4439_v19, %v4344_v25  ;;  %v4441_v6 = vpop.f32.mrb[137].mxu1 }
 0x6a6   : > { %v4442_v28 = vadd.f32 %v4441_v6, %v4344_v25  ;;  %v4443_v9 = vpop.f32.mrb[138].mxu1 }
 0x6a7   : > { %vm4478_vm0 = vcmp.gt.f32.partialorder %v4440_v5, 0.0  ;;  %v4494_v14 = vmul.f32 0.2, %v4440_v5  ;;  %v4444_v16 = vadd.f32 %v4443_v9, %v4349_v4  ;;  %v4445_v53 = vpop.f32.mrb[139].mxu1  ;;  %v4562_v9 = vpop.permute.xlu1 %4561 }
 0x6a8   : > { %vm4479_vm1 = vcmp.gt.f32.partialorder %v4442_v28, 0.0  ;;  %v4495_v30 = vmul.f32 0.2, %v4442_v28  ;;  %v4446_v32 = vadd.f32 %v4445_v53, %v4349_v4 }
 0x6a9   : > { %v4510_v27 = vsel %vm4478_vm0, %v4440_v5, %v4494_v14  ;;  %vm4480_vm2 = vcmp.gt.f32.partialorder %v4444_v16, 0.0  ;;  %v4496_v31 = vmul.f32 0.2, %v4444_v16 }
 0x6aa   : > { %v4511_v42 = vsel %vm4479_vm1, %v4442_v28, %v4495_v30  ;;  %vm4481_vm3 = vcmp.gt.f32.partialorder %v4446_v32, 0.0  ;;  %v4497_v59 = vmul.f32 0.2, %v4446_v32  ;;  %v4574_v37 = vmul.f32 %v4537_v2, %v4510_v27  ;;  %v4379_v28 = vpop.permute.xlu0 %4378 }
 0x6ab   : > { %v4512_v34 = vsel %vm4480_vm2, %v4444_v16, %v4496_v31  ;;  %v4575_v3 = vmul.f32 %v4537_v2, %v4511_v42 }
 0x6ac   : > { %v4576_v61 = vmul.f32 %v4542_v63, %v4512_v34  ;;  %v4513_v10 = vsel %vm4481_vm3, %v4446_v32, %v4497_v59  ;;  %v4449_v29 = vpop.f32.mrb[140].mxu1 }
 0x6ad   : > { %v4577_v40 = vmul.f32 %v4542_v63, %v4513_v10  ;;  %v4450_v18 = vadd.f32 %v4449_v29, %v4354_v60  ;;  %v4451_v8 = vpop.f32.mrb[141].mxu1 }
 0x6ae   : > { %v4590_v20 = vadd.f32 %v4576_v61, %v4574_v37  ;;  %v4452_v44 = vadd.f32 %v4451_v8, %v4354_v60  ;;  %v4453_v35 = vpop.f32.mrb[142].mxu1  ;;  %v4567_v8 = vpop.permute.xlu0 %4566 }
 0x6af   : > { %v4603_v12 = vadd.f32 %v4577_v40, %v4575_v3  ;;  %vm4482_vm4 = vcmp.gt.f32.partialorder %v4450_v18, 0.0  ;;  %v4498_v45 = vmul.f32 0.2, %v4450_v18  ;;  %v4454_v24 = vadd.f32 %v4453_v35, %v4359_v15  ;;  %v4455_v39 = vpop.f32.mrb[143].mxu1 }
 0x6b0   : > { %vm4483_vm5 = vcmp.gt.f32.partialorder %v4452_v44, 0.0  ;;  %v4499_v38 = vmul.f32 0.2, %v4452_v44  ;;  %v4456_v47 = vadd.f32 %v4455_v39, %v4359_v15 }
 0x6b1   : > { %v4514_v48 = vsel %vm4482_vm4, %v4450_v18, %v4498_v45  ;;  %vm4484_vm6 = vcmp.gt.f32.partialorder %v4454_v24, 0.0  ;;  %v4500_v26 = vmul.f32 0.2, %v4454_v24 }
 0x6b2   : > { %v4578_v41 = vmul.f32 %v4547_v57, %v4514_v48  ;;  %v4515_v17 = vsel %vm4483_vm5, %v4452_v44, %v4499_v38  ;;  %vm4485_vm7 = vcmp.gt.f32.partialorder %v4456_v47, 0.0  ;;  %v4501_v49 = vmul.f32 0.2, %v4456_v47 }
 0x6b3   : > { %v4579_v43 = vmul.f32 %v4547_v57, %v4515_v17  ;;  %v4516_v21 = vsel %vm4484_vm6, %v4454_v24, %v4500_v26 }
 0x6b4   : > { %v4591_v46 = vadd.f32 %v4590_v20, %v4578_v41  ;;  %v4580_v55 = vmul.f32 %v4552_v36, %v4516_v21  ;;  %v4517_v23 = vsel %vm4485_vm7, %v4456_v47, %v4501_v49  ;;  %v4459_v50 = vpop.f32.mrb[144].mxu1 }
 0x6b5   : > { %v4604_v58 = vadd.f32 %v4603_v12, %v4579_v43  ;;  %v4581_v11 = vmul.f32 %v4552_v36, %v4517_v23  ;;  %v4460_v62 = vadd.f32 %v4459_v50, %v4364_v22  ;;  %v4461_v1 = vpop.f32.mrb[145].mxu1  ;;  %v4572_v12 = vpop.permute.xlu1 %4571 }
 0x6b6   : > { %v4592_v54 = vadd.f32 %v4591_v46, %v4580_v55  ;;  %v4462_v51 = vadd.f32 %v4461_v1, %v4364_v22  ;;  %v4463_v13 = vpop.f32.mrb[146].mxu1 }
 0x6b7   : > { %v4605_v56 = vadd.f32 %v4604_v58, %v4581_v11  ;;  %vm4486_vm8 = vcmp.gt.f32.partialorder %v4460_v62, 0.0  ;;  %v4502_v0 = vmul.f32 0.2, %v4460_v62  ;;  %v4464_v25 = vadd.f32 %v4463_v13, %v4369_v33  ;;  %v4465_v4 = vpop.f32.mrb[147].mxu1 }
 0x6b8   : > { %vm4487_vm9 = vcmp.gt.f32.partialorder %v4462_v51, 0.0  ;;  %v4503_v60 = vmul.f32 0.2, %v4462_v51  ;;  %v4466_v15 = vadd.f32 %v4465_v4, %v4369_v33 }
 0x6b9   : > { %v4518_v2 = vsel %vm4486_vm8, %v4460_v62, %v4502_v0  ;;  %vm4488_vm10 = vcmp.gt.f32.partialorder %v4464_v25, 0.0  ;;  %v4504_v63 = vmul.f32 0.2, %v4464_v25 }
 0x6ba   : > { %v4582_v19 = vmul.f32 %v4557_v7, %v4518_v2  ;;  %v4519_v5 = vsel %vm4487_vm9, %v4462_v51, %v4503_v60  ;;  %vm4489_vm11 = vcmp.gt.f32.partialorder %v4466_v15, 0.0  ;;  %v4505_v6 = vmul.f32 0.2, %v4466_v15 }
 0x6bb   : > { %v4583_v14 = vmul.f32 %v4557_v7, %v4519_v5  ;;  %v4520_v16 = vsel %vm4488_vm10, %v4464_v25, %v4504_v63  ;;  %v6106_v60 = vmov 1966171168   ;;  %v4632_v2 = vlaneseq }
 0x6bc   : > { %v4593_v53 = vadd.f32 %v4592_v54, %v4582_v19  ;;  %v4584_v22 = vmul.f32 %v4562_v9, %v4520_v16  ;;  %v4521_v30 = vsel %vm4489_vm11, %v4466_v15, %v4505_v6  ;;  %v4469_v32 = vpop.f32.mrb[148].mxu1  ;;  %v4630_v15 = vunpack.c.l.s4 %v6106_v60 }
 0x6bd   : > { %v4606_v57 = vadd.f32 %v4605_v56, %v4583_v14  ;;  %v4585_v27 = vmul.f32 %v4562_v9, %v4521_v30  ;;  %v4470_v31 = vadd.f32 %v4469_v32, %v4374_v52  ;;  %v4471_v42 = vpop.f32.mrb[149].mxu1  ;;  %v4633_v19 = vshrl.u32 %v4632_v2, 7 }
 0x6be   : > { %v4594_v59 = vadd.f32 %v4593_v53, %v4584_v22  ;;  %v4472_v34 = vadd.f32 %v4471_v42, %v4374_v52  ;;  %v4473_v37 = vpop.f32.mrb[150].mxu1  ;;  %v4631_v63 = vunpack.c.0.s8 %v4630_v15  ;;  %vm4646_vm0 = vcmp.lt.s32.totalorder %v4632_v2, 256 }
 0x6bf   : > { %v4607_v61 = vadd.f32 %v4606_v57, %v4585_v27  ;;  %vm4490_vm12 = vcmp.gt.f32.partialorder %v4470_v31, 0.0  ;;  %v4506_v10 = vmul.f32 0.2, %v4470_v31  ;;  %v4474_v29 = vadd.f32 %v4473_v37, %v4379_v28  ;;  %v4475_v3 = vpop.f32.mrb[151].mxu1 }
 0x6c0   : > { %vm4491_vm13 = vcmp.gt.f32.partialorder %v4472_v34, 0.0  ;;  %v4507_v40 = vmul.f32 0.2, %v4472_v34  ;;  %v4476_v18 = vadd.f32 %v4475_v3, %v4379_v28  ;;  %v4634_v6 = vsub.s32 %v4631_v63, %v4633_v19 }
 0x6c1   : > { %v4522_v33 = vsel %vm4490_vm12, %v4470_v31, %v4506_v10  ;;  %vm4492_vm14 = vcmp.gt.f32.partialorder %v4474_v29, 0.0  ;;  %v4508_v20 = vmul.f32 0.2, %v4474_v29 }
 0x6c2   : > { %v4586_v44 = vmul.f32 %v4567_v8, %v4522_v33  ;;  %v4523_v35 = vsel %vm4491_vm13, %v4472_v34, %v4507_v40  ;;  %vm4493_vm15 = vcmp.gt.f32.partialorder %v4476_v18, 0.0  ;;  %v4509_v36 = vmul.f32 0.2, %v4476_v18 }
 0x6c3   : > { %v4587_v45 = vmul.f32 %v4567_v8, %v4523_v35  ;;  %v4524_v24 = vsel %vm4492_vm14, %v4474_v29, %v4508_v20 }
 0x6c4   : > { %v4595_v39 = vadd.f32 %v4594_v59, %v4586_v44  ;;  %v4588_v38 = vmul.f32 %v4572_v12, %v4524_v24  ;;  %v4525_v47 = vsel %vm4493_vm15, %v4476_v18, %v4509_v36 }
 0x6c5   : > { %v4608_v48 = vadd.f32 %v4607_v61, %v4587_v45  ;;  %v4589_v26 = vmul.f32 %v4572_v12, %v4525_v47 }
 0x6c6   : > { %v4596_v41 = vadd.f32 %v4595_v39, %v4588_v38 }
 0x6c7   : > { %v4609_v17 = vadd.f32 %v4608_v48, %v4589_v26 }
 0x6c8   : > { %v4597_v49 = vrot.slane %v4596_v41, 4 }
 0x6c9   : > { %v4610_v43 = vrot.slane %v4609_v17, 4 }
 0x6ca   : > { %v4598_v21 = vadd.f32 %v4597_v49, %v4596_v41 }
 0x6cb   : > { %v4611_v52 = vadd.f32 %v4610_v43, %v4609_v17 }
 0x6cc   : > { %v4599_v46 = vrot.slane %v4598_v21, 2 }
 0x6cd   : > { %v4612_v55 = vrot.slane %v4611_v52, 2 }
 0x6ce   : > { %v4600_v23 = vadd.f32 %v4599_v46, %v4598_v21 }
 0x6cf   : > { %v4613_v50 = vadd.f32 %v4612_v55, %v4611_v52 }
 0x6d0   : > { %v4601_v7 = vrot.slane %v4600_v23, 1 }
 0x6d1   : > { %v4614_v58 = vrot.slane %v4613_v50, 1 }
 0x6d2   : > { %v4602_v11 = vadd.f32 %v4601_v7, %v4600_v23 }
 0x6d3   : > { %v4615_v62 = vadd.f32 %v4614_v58, %v4613_v50 }
 0x6d4   : > { %v4616_v1 = vsub.f32 0.0, %v4602_v11 }
 0x6d5   : > { %v4617_v54 = vsub.f32 0.0, %v4615_v62 }
 0x6d6   : > { %v4618_v51 = vmul.f32 1.442695, %v4616_v1 }
 0x6d7   : > { %v4620_v13 = vmul.f32 1.442695, %v4617_v54 }
 0x6d8   : > { %5881 = vpow2.f32 %v4618_v51 }
 0x6d9   : > { %5883 = vpow2.f32 %v4620_v13 }
 0x6e2   : > { %v5882_v56 = vpop.eup %5881 }
 0x6e3   : > { %v5884_v0 = vpop.eup %5883  ;;  %v4622_v25 = vadd.f32 1.0, %v5882_v56 }
 0x6e4   : > { %v4623_v4 = vadd.f32 1.0, %v5884_v0 }
 0x6e5   : > { %5885 = vrcp.f32 %v4622_v25 }
 0x6e6   : > { %5887 = vrcp.f32 %v4623_v4 }
 0x6ef   : > { %v5886_v5 = vpop.eup %5885 }
 0x6f0   : > { %v5888_v28 = vpop.eup %5887 }
 0x6f1   : > { %v4628_v9 = vcombine.low %v5886_v5, %v5888_v28 }
 0x6f3   : > { %v4635_v14 = vrot.slane %v4628_v9, %v4634_v6 }
 0x6f5   : > { %v4642_v16 = vrot.slane %v4635_v14, %v4634_v6 }
 0x6f7   : > { %4648 = vst.msk [vmem:[%s412_s16] sm:$0x3] %vm4646_vm0, %v4642_v16 }
 0x6f8   : > { %6016 = shalt.err (!%p6013_p0)
}
 0x6f9   : > { %s6017_s28 = scalar_lea.hbm %s6967_s19, 32  ;;  %s6021_s24 = scalar_lea.hbm %s7056_s17, 64 }
 0x6fa   : > { %p6018_p4 = scmp.ne.s32.totalorder %s6967_s19, %s6017_s28  ;;  %p6022_p12 = scmp.lt.u32.totalorder %s6967_s19, %s7056_s17 }
 0x6fb   : > { %p6023_p1 = scmp.lt.u32.totalorder %s6021_s24, %s6017_s28  ;;  %p6025_p13 = scmp.lt.u32.totalorder %s6017_s28, %s6967_s19 }
 0x6fc   : > { %p6019_p2 = pnand %p6018_p4, %p6309_p10 }
 0x6fd   : > { %p6024_p11 = por %p6023_p1, %p6022_p12 }
 0x6fe   : > { %p6020_p8 = pneg %p6019_p2 }
 0x6ff   : > { %p6026_p6 = por %p6025_p13, %p6024_p11 }
 0x701   : > { %p6027_p3 = pnand %p6026_p6, %p6020_p8 }
 0x703   : > { %6030 = shalt.err (!%p6027_p3)
}
 0x704   : > { %5380 = dma.vmem_to_hbm [thread:$0]  (%p6309_p10), %s6969_s20, 32, %s6967_s19, %s4650_s21  }
 0x705 PF: > { %s7057_s25 = sld [smem:[#allocation15_spill]]  ;;  %s7058_s26 = sld [smem:[#allocation17_spill]] }
 0x706   : > { %p7060_p7 = scmp.ge.s32.totalorder %s6093_s14, 2 }
 0x70b   : > { %s4678_s9 = sand.u32 1, %s7057_s25   ;;  %p7059_p5 = scmp.ne.s32.totalorder %s7058_s26, 0 }
 0x70c   : > { %s4679_s5 = scalar_lea.sflag [#allocation4], %s4678_s9 }
 0x70d   : > { %p5397_p9 = pnand %p7060_p7, %p7059_p5 }
 0x70f   : > { %6068 = dma.done.wait (!%p5397_p9), %s4679_s5, 32  }
 0x710   : > { %6070 = vsyncadd (!%p5397_p9), %s4679_s5, 4294967264  ;;  %s27_s14 = sadd.s32 1, %s6093_s14   ;;  %s7061_s30 = smov %s6077_s10 }
 0x711   : > { %p24_p0 = scmp.ge.s32.totalorder %s27_s14, 4   ;;  %s7062_s10 = smov %s6081_s11 }
 0x712   : > { %s7063_s11 = smov %s6321_s27  ;;  %s7064_s12 = smov %s6089_s13 }
 0x713   : > { %s7065_s13 = smov %s7067_s29  ;;  %26 = sbr.rel (!%p24_p0) target bundleno = 12 (0xc), region = 113 }
 0x71a   :  { %4684 = vsyncpa [#allocation3], 1 }
 0x71b   :  { %4686 = vsyncpa [#allocation3 + $0x1], 1 }
 0x71c   :  { %4687 = vsyncpa [#allocation6], 1 }
 0x71d   :  { %4688 = vsyncpa [#allocation9], 1 }
 0x71e   :  { %4689 = vsyncpa [#allocation4], 1 }
 0x71f   :  { %4691 = vsyncpa [#allocation4 + $0x1], 1 }

// kernel: tpu_custom_call.1
= control target key start
LH: loop header
LB: loop body
LE: loop exit
PB: predicated region body
PF: predicated region fallthrough
CT: control target
= control target key end

     0   :  { %s7016_s0 = inlined_call_operand.hbm [shape: bf16[2,512,256], index: 0, kind: input, shape index: {}]   ;;  %s7017_s1 = inlined_call_operand.hbm [shape: bf16[512,512], index: 1, kind: input, shape index: {}]   ;;  %s7018_s2 = inlined_call_operand.vmem [shape: bf16[256,512], index: 2, kind: input, shape index: {}]   ;;  %s7019_s3 = inlined_call_operand.hbm [shape: bf16[128,256], index: 3, kind: input, shape index: {}]   ;;  %s7020_s4 = inlined_call_operand.hbm [shape: bf16[64,128], index: 4, kind: input, shape index: {}]   ;;  %s7021_s5 = inlined_call_operand.vmem [shape: f32[64,1], index: 5, kind: input, shape index: {}]   ;;  %s7022_s6 = inlined_call_operand.vmem [shape: f32[256,1], index: 6, kind: input, shape index: {}]   ;;  %s7023_s7 = inlined_call_operand.vmem [shape: f32[128,1], index: 7, kind: input, shape index: {}]   ;;  %s7024_s8 = inlined_call_operand.vmem [shape: f32[64,1], index: 8, kind: input, shape index: {}]   ;;  %s7025_s9 = inlined_call_operand.hbm [shape: f32[2,1,256], index: 9, kind: output, shape index: {}]  }
   0x1   :  { %7034 = sst [smem:[#allocation18_spill]] %s7017_s1 }
   0x2   :  { %7035 = sst [smem:[#allocation19_spill]] %s7021_s5 }
   0x3   :  { %7036 = sst [smem:[#allocation20_spill]] %s7025_s9 }
   0x4   :  { %14 = vsyncpa [#allocation3], 0 }
   0x5   :  { %16 = vsyncpa [#allocation3 + $0x1], 0 }
   0x6   :  { %17 = vsyncpa [#allocation6], 0 }
   0x7   :  { %18 = vsyncpa [#allocation9], 0 }
   0x8   :  { %19 = vsyncpa [#allocation4], 0 }
   0x9   :  { %21 = vsyncpa [#allocation4 + $0x1], 0  ;;  %s6158_s30 = smov 0   ;;  %s6160_s10 = smov 0  }
   0xa   :  { %s6162_s11 = smov 0   ;;  %s6164_s12 = smov 0  }
   0xb   :  { %s6166_s13 = smov 0   ;;  %s6168_s14 = smov 0  }
   0xc LB: > { %7037 = sst [smem:[#allocation15_spill]] %s6073_s30  ;;  %s4779_s15 = sadd.s32 4294967295, %s6093_s14   ;;  %s6093_s14 = sphi %s6168_s14, %s27_s14   ;;  %s6089_s13 = sphi %s6166_s13, %s7065_s13   ;;  %s6085_s12 = sphi %s6164_s12, %s7064_s12   ;;  %s6081_s11 = sphi %s6162_s11, %s7063_s11   ;;  %s6077_s10 = sphi %s6160_s10, %s7062_s10   ;;  %s6073_s30 = sphi %s6158_s30, %s7061_s30  }
   0xd   : > { %7038 = sst [smem:[#allocation16_spill]] %s6085_s12  ;;  %s4780_s16 = sadd.s32 4294967294, %s6093_s14  }
   0xe   : > { %p61_p0 = scmp.ne.s32.totalorder %s6077_s10, %s6073_s30  ;;  %p6192_p1 = scmp.eq.s32.totalorder %s4779_s15, 0 }
   0xf   : > { %p6196_p2 = scmp.eq.s32.totalorder %s4779_s15, 1  ;;  %p261_p3 = scmp.eq.s32.totalorder %s4780_s16, 1 }
  0x10   : > { %s7039_s17 = scalar_select %p6192_p1, 1, 0 }
  0x11   : > { %s7040_s18 = scalar_select %p6196_p2, 1, 0 }
  0x12   : > { %p6202_p4 = por %p6192_p1, %p61_p0  ;;  %p4781_p5 = scmp.ge.s32.totalorder %s6093_s14, 1 }
  0x13   : > { %p6207_p6 = por %p261_p3, %p61_p0  ;;  %p268_p7 = scmp.lt.s32.totalorder %s6093_s14, 3 }
  0x14   : > { %s7041_s19 = scalar_select %p6202_p4, 1, 0 }
  0x15   : > { %s7042_s20 = scalar_select %p6207_p6, 1, 0 }
  0x16   : > { %p6212_p8 = pnand %p4781_p5, %p268_p7  ;;  %s6095_s22 = smov [#allocation5]  }
  0x17   : > { %7043 = sst [smem:[#allocation17_spill]] %s7042_s20  ;;  %s280_s23 = sshll.u32 %s6095_s22, 4  ;;  %s6216_s23 = int_to_ptr.vmem [resolvable:$true] %s280_s23 }
  0x18   : > { %s7044_s21 = scalar_select %p6212_p8, 1, 0 }
  0x19   : > { %p5382_p9 = pneg %p6212_p8  ;;  %s6096_s25 = smov [#allocation7]  }
  0x1a   : > { %s296_s26 = sshll.u32 %s6096_s25, 4  ;;  %s7046_s1 = sld [smem:[#allocation18_spill]]  ;;  %s6227_s26 = int_to_ptr.vmem [resolvable:$true] %s296_s26 }
  0x1b   : > { %p6223_p11 = pnand %p5382_p9, %p6192_p1 }
  0x1d   : > { %p6237_p13 = pneg %p6223_p11 }
  0x20   : > { %s5889_s29 = scalar_lea.hbm %s7046_s1, 16384 }
  0x21   : > { %p5890_p12 = scmp.ne.s32.totalorder %s7046_s1, %s5889_s29  ;;  %p5896_p5 = scmp.lt.u32.totalorder %s5889_s29, %s7046_s1 }
  0x23   : > { %p5892_p0 = pnand %p6237_p13, %p5890_p12 }
  0x25   : > { %p5893_p3 = pneg %p5892_p0 }
  0x27   : > { %p5898_p7 = pnand %p5896_p5, %p5893_p3 }
  0x29   : > { %5901 = shalt.err (!%p5898_p7)
}
  0x2a   : > { %s5902_s27 = scalar_lea.vmem %s6216_s23, 16384  ;;  %p5910_p1 = scmp.lt.s32.totalorder %s6216_s23, %s6216_s23 }
  0x2b   : > { %p5903_p9 = scmp.ne.s32.totalorder %s6216_s23, %s5902_s27  ;;  %p5911_p4 = scmp.lt.s32.totalorder %s5902_s27, %s5902_s27 }
  0x2d   : > { %p5905_p10 = pnand %p5903_p9, %p6237_p13  ;;  %p5912_p12 = por %p5911_p4, %p5910_p1 }
  0x2f   : > { %p5906_p6 = pneg %p5905_p10 }
  0x31   : > { %p5913_p0 = pnand %p5912_p12, %p5906_p6 }
  0x33   : > { %5916 = shalt.err (!%p5913_p0)
}
  0x34   : > { %s6097_s28 = smov 256   ;;  %s6098_s20 = smov 16  }
  0x35   : > { %5385 = dma.hbm_to_vmem [thread:$0]  (!%p6223_p11), %s7046_s1, 16384, %s6216_s23, [#allocation6], %s6097_s28, %s6097_s28, %s6098_s20  }
  0x36   : > { %s5917_s30 = scalar_lea.hbm %s7019_s3, 2048 }
  0x37   : > { %p5918_p1 = scmp.ne.s32.totalorder %s7019_s3, %s5917_s30  ;;  %p5924_p10 = scmp.lt.u32.totalorder %s5917_s30, %s7019_s3 }
  0x39   : > { %p5920_p4 = pnand %p5918_p1, %p6237_p13 }
  0x3b   : > { %p5921_p6 = pneg %p5920_p4 }
  0x3d   : > { %p5926_p3 = pnand %p5924_p10, %p5921_p6 }
  0x3f   : > { %5929 = shalt.err (!%p5926_p3)
}
  0x40   : > { %s5930_s23 = scalar_lea.vmem %s6227_s26, 2048  ;;  %p5938_p12 = scmp.lt.s32.totalorder %s6227_s26, %s6227_s26 }
  0x41   : > { %p5931_p5 = scmp.ne.s32.totalorder %s6227_s26, %s5930_s23  ;;  %p5939_p0 = scmp.lt.s32.totalorder %s5930_s23, %s5930_s23 }
  0x43   : > { %p5933_p7 = pnand %p5931_p5, %p6237_p13  ;;  %p5940_p1 = por %p5939_p0, %p5938_p12 }
  0x45   : > { %p5934_p9 = pneg %p5933_p7 }
  0x47   : > { %p5941_p4 = pnand %p5940_p1, %p5934_p9 }
  0x49   : > { %5944 = shalt.err (!%p5941_p4)
}
  0x4a   : > { %s6099_s9 = smov 128   ;;  %s6100_s5 = smov 8  }
  0x4b   : > { %5388 = dma.hbm_to_vmem [thread:$0]  (!%p6223_p11), %s7019_s3, 2048, %s6227_s26, [#allocation6], %s6099_s9, %s6099_s9, %s6100_s5  }
  0x4c   : > { %s6101_s28 = smov [#allocation8]   ;;  %s5945_s16 = scalar_lea.hbm %s7020_s4, 512 }
  0x4d   : > { %s309_s20 = sshll.u32 %s6101_s28, 4  ;;  %p5946_p6 = scmp.ne.s32.totalorder %s7020_s4, %s5945_s16  ;;  %s310_s20 = int_to_ptr.vmem [resolvable:$true] %s309_s20 }
  0x4e   : > { %p5952_p5 = scmp.lt.u32.totalorder %s5945_s16, %s7020_s4 }
  0x4f   : > { %p5948_p10 = pnand %p5946_p6, %p6237_p13 }
  0x51   : > { %p5949_p3 = pneg %p5948_p10 }
  0x53   : > { %p5954_p7 = pnand %p5952_p5, %p5949_p3 }
  0x55   : > { %5957 = shalt.err (!%p5954_p7)
}
  0x56   : > { %s5958_s26 = scalar_lea.vmem %s310_s20, 512  ;;  %p5966_p1 = scmp.lt.s32.totalorder %s310_s20, %s310_s20 }
  0x57   : > { %p5959_p9 = scmp.ne.s32.totalorder %s310_s20, %s5958_s26  ;;  %p5967_p4 = scmp.lt.s32.totalorder %s5958_s26, %s5958_s26 }
  0x59   : > { %p5961_p12 = pnand %p5959_p9, %p6237_p13  ;;  %p5968_p8 = por %p5967_p4, %p5966_p1 }
  0x5b   : > { %p5962_p0 = pneg %p5961_p12 }
  0x5d   : > { %p5969_p2 = pnand %p5968_p8, %p5962_p0 }
  0x5f   : > { %5972 = shalt.err (!%p5969_p2)
}
  0x60   : > { %s6102_s30 = smov 64   ;;  %s6103_s1 = smov 4  }
  0x61   : > { %5391 = dma.hbm_to_vmem [thread:$0]  (!%p6223_p11), %s7020_s4, 512, %s310_s20, [#allocation9], %s6102_s30, %s6102_s30, %s6103_s1  }
  0x62   : > { %s48_s28 = sadd.s32 1, %s6081_s11  ;;  %s39_s29 = sadd.s32 1, %s6089_s13 }
  0x63   : > { %p55_p2 = scmp.ne.s32.totalorder %s6081_s11, %s6077_s10  ;;  %p41_p8 = scmp.ge.s32.totalorder %s39_s29, 2 }
  0x64   : > { %p56_p13 = scmp.eq.s32.totalorder %s6093_s14, 0  ;;  %p7048_p6 = scmp.ne.s32.totalorder %s7040_s18, 0 }
  0x65   : > { %p5403_p3 = scmp.lt.s32.totalorder %s6093_s14, 2  ;;  %s7067_s29 = smov (%p41_p8, %s39_s29), 0 }
  0x66   : > { %p6309_p10 = por %p7048_p6, %p55_p2  ;;  %p57_p5 = por %p56_p13, %p55_p2 }
  0x67   : > { %s335_s24 = sand.u32 1, %s6081_s11   ;;  %s43_s16 = ssub.s32 %s6089_s13, %s7067_s29 }
  0x68   : > { %p46_p7 = scmp.eq.s32.totalorder %s43_s16, 0  ;;  %s4786_s20 = sshll.u32 %s335_s24, 9 }
  0x69   : > { %s5076_s25 = sshll.u32 %s6089_s13, 13  ;;  %s339_s30 = scalar_lea.vmem [#allocation2], %s4786_s20 }
  0x6a   : > { %s6321_s27 = scalar_select %p46_p7, %s6081_s11, %s48_s28  }
  0x6b   : > { %s6326_s18 = scalar_lea.hbm %s7016_s0, %s5076_s25  ;;  %s348_s1 = sshll.u32 %s339_s30, 4  ;;  %s6328_s1 = int_to_ptr.vmem [resolvable:$true] %s348_s1 }
  0x6c   : > { %p6332_p11 = pnand %p5403_p3, %p57_p5  ;;  %s6336_s12 = scalar_lea.sflag [#allocation3], %s335_s24 }
  0x6d   : > { %s5973_s28 = scalar_lea.hbm %s6326_s18, 8192  ;;  %s5978_s25 = scalar_lea.hbm %s7016_s0, 16384 }
  0x6e   : > { %p5974_p9 = scmp.ne.s32.totalorder %s6326_s18, %s5973_s28  ;;  %p5975_p12 = pneg %p6332_p11 }
  0x6f   : > { %p5979_p4 = scmp.lt.u32.totalorder %s6326_s18, %s7016_s0  ;;  %p5980_p2 = scmp.lt.u32.totalorder %s5978_s25, %s5973_s28 }
  0x70   : > { %p5976_p0 = pnand %p5975_p12, %p5974_p9  ;;  %p5982_p13 = scmp.lt.u32.totalorder %s5973_s28, %s6326_s18 }
  0x71   : > { %p5981_p8 = por %p5980_p2, %p5979_p4 }
  0x72   : > { %p5977_p1 = pneg %p5976_p0 }
  0x73   : > { %p5983_p6 = por %p5982_p13, %p5981_p8 }
  0x75   : > { %p5984_p3 = pnand %p5983_p6, %p5977_p1 }
  0x77   : > { %5987 = shalt.err (!%p5984_p3)
}
  0x78   : > { %s5988_s24 = scalar_lea.vmem %s6328_s1, 8192  ;;  %s6104_s30 = smov [#allocation2]  }
  0x79   : > { %p5989_p5 = scmp.ne.s32.totalorder %s6328_s1, %s5988_s24  ;;  %s5993_s16 = sshll.u32 %s6104_s30, 4  ;;  %s5994_s16 = int_to_ptr.vmem [resolvable:$false] %s5993_s16 }
  0x7a   : > { %s5995_s20 = scalar_lea.vmem %s5994_s16, 16384  ;;  %p5996_p0 = scmp.lt.s32.totalorder %s6328_s1, %s5994_s16 }
  0x7b   : > { %p5991_p7 = pnand %p5989_p5, %p5975_p12  ;;  %p5997_p4 = scmp.lt.s32.totalorder %s5995_s20, %s5988_s24 }
  0x7d   : > { %p5992_p9 = pneg %p5991_p7  ;;  %p5998_p2 = por %p5997_p4, %p5996_p0 }
  0x7f   : > { %p5999_p8 = pnand %p5998_p2, %p5992_p9 }
  0x81   : > { %6002 = shalt.err (!%p5999_p8)
}
  0x82   : > { %5395 = dma.hbm_to_vmem [thread:$0]  (!%p6332_p11), %s6326_s18, 8192, %s6328_s1, %s6336_s12, %s6099_s9, %s6099_s9, %s6100_s5  }
  0x83   : > { %p7051_p12 = scmp.ne.s32.totalorder %s7044_s21, 0 }
  0x84   : > { %s6370_s28 = sand.u32 (!%p7051_p12), 1, %s6077_s10   ;;  %p7052_p1 = scmp.ne.s32.totalorder (!%p7051_p12), %s7041_s19, 0 }
  0x85   : > { %360 = sbr.rel (%p7051_p12) target bundleno = 1797 (0x705), region = 56  ;;  %s4790_s25 = sshll.u32 (!%p7051_p12), %s6370_s28, 9 }
  0x86   : > { %s363_s23 = scalar_lea.sflag (!%p7051_p12), [#allocation3], %s6370_s28  ;;  %s6374_s26 = scalar_lea.vmem (!%p7051_p12), [#allocation2], %s4790_s25 }
  0x8c   : > { %6056 = dma.done.wait (%p7052_p1), %s363_s23, 8192  }
  0x8d   : > { %6058 = vsyncadd (%p7052_p1), %s363_s23, 4294959104  ;;  %p7053_p11 = scmp.ne.s32.totalorder %s7039_s17, 0 }
  0x8f   : > { %6060 = dma.done.wait (%p7053_p11), [#allocation6], 18432  }
  0x90   : > { %6062 = vsyncadd (%p7053_p11), [#allocation6], 4294948864 }
  0x91   : > { %6064 = dma.done.wait (%p7053_p11), [#allocation9], 512  }
  0x92   : > { %6066 = vsyncadd (%p7053_p11), [#allocation9], 4294966784  ;;  %v5469_v0 = vld [vmem:[%s6374_s26 + $0x4] ss:$8 sps:$4 sm:$0xff]   ;;  %v5471_v1 = vld [vmem:[%s6374_s26] ss:$8 sps:$4 sm:$0xff]  }
  0x93   : > { %1568 = vmatprep.subr.bf16.mxu0 %v5469_v0  ;;  %v5472_v2 = vld [vmem:[%s6374_s26 + $0x14] ss:$8 sps:$4 sm:$0xff]   ;;  %5078 = vmatprep.subr.bf16.mxu1 %v5469_v0  ;;  %v5474_v3 = vld [vmem:[%s6374_s26 + $0x10] ss:$8 sps:$4 sm:$0xff]   ;;  %v5475_v4 = vld [vmem:[%s6374_s26 + $0x24] ss:$8 sps:$4 sm:$0xff]  }
  0x94   : > { %1569 = vmatpush1.bf16.msra.mxu0 %v5471_v1  ;;  %5094 = vmatpush1.bf16.msra.mxu1 %v5471_v1  ;;  %v5477_v5 = vld [vmem:[%s6374_s26 + $0x20] ss:$8 sps:$4 sm:$0xff]   ;;  %v5478_v6 = vld [vmem:[%s6374_s26 + $0x34] ss:$8 sps:$4 sm:$0xff]   ;;  %v5480_v7 = vld [vmem:[%s6374_s26 + $0x30] ss:$8 sps:$4 sm:$0xff]  }
  0x95   : > { %1570 = vmatprep.subr.bf16.mxu0 %v5472_v2  ;;  %5079 = vmatprep.subr.bf16.mxu1 %v5472_v2  ;;  %v5481_v8 = vld [vmem:[%s6374_s26 + $0x44] ss:$8 sps:$4 sm:$0xff]   ;;  %v5483_v9 = vld [vmem:[%s6374_s26 + $0x40] ss:$8 sps:$4 sm:$0xff]   ;;  %v5484_v10 = vld [vmem:[%s6374_s26 + $0x54] ss:$8 sps:$4 sm:$0xff]  }
  0x96   : > { %v5486_v11 = vld [vmem:[%s6374_s26 + $0x50] ss:$8 sps:$4 sm:$0xff]   ;;  %v5487_v12 = vld [vmem:[%s6374_s26 + $0x64] ss:$8 sps:$4 sm:$0xff]   ;;  %v5489_v14 = vld [vmem:[%s6374_s26 + $0x60] ss:$8 sps:$4 sm:$0xff]  }
  0x97   : > { %v5519_v13 = vld [vmem:[#allocation5 + $0x4] ss:$16 sps:$4 sm:$0xff]   ;;  %v5492_v16 = vld [vmem:[%s6374_s26 + $0x70] ss:$8 sps:$4 sm:$0xff]   ;;  %v5495_v18 = vld [vmem:[%s6374_s26 + $0x80] ss:$8 sps:$4 sm:$0xff]  }
  0x98   : > { %1571 = vmatpush1.bf16.msra.mxu0 %v5474_v3  ;;  %5095 = vmatpush1.bf16.msra.mxu1 %v5474_v3  ;;  %v5490_v15 = vld [vmem:[%s6374_s26 + $0x74] ss:$8 sps:$4 sm:$0xff]   ;;  %v5493_v17 = vld [vmem:[%s6374_s26 + $0x84] ss:$8 sps:$4 sm:$0xff]   ;;  %v5498_v20 = vld [vmem:[%s6374_s26 + $0x90] ss:$8 sps:$4 sm:$0xff]  }
  0x99   : > { %1572 = vmatprep.subr.bf16.mxu0 %v5475_v4  ;;  %5080 = vmatprep.subr.bf16.mxu1 %v5475_v4  ;;  %v5496_v19 = vld [vmem:[%s6374_s26 + $0x94] ss:$8 sps:$4 sm:$0xff]   ;;  %v5499_v21 = vld [vmem:[%s6374_s26 + $0xa4] ss:$8 sps:$4 sm:$0xff]   ;;  %v5501_v22 = vld [vmem:[%s6374_s26 + $0xa0] ss:$8 sps:$4 sm:$0xff]  }
  0x9a   : > { %1600 = vmatprep.mubr.bf16.mxu0 %v5519_v13  ;;  %v5502_v23 = vld [vmem:[%s6374_s26 + $0xb4] ss:$8 sps:$4 sm:$0xff]   ;;  %v5504_v24 = vld [vmem:[%s6374_s26 + $0xb0] ss:$8 sps:$4 sm:$0xff]   ;;  %v5505_v25 = vld [vmem:[%s6374_s26 + $0xc4] ss:$8 sps:$4 sm:$0xff]  }
  0x9b   : > { %v5507_v26 = vld [vmem:[%s6374_s26 + $0xc0] ss:$8 sps:$4 sm:$0xff]   ;;  %v5508_v27 = vld [vmem:[%s6374_s26 + $0xd4] ss:$8 sps:$4 sm:$0xff]   ;;  %v5510_v28 = vld [vmem:[%s6374_s26 + $0xd0] ss:$8 sps:$4 sm:$0xff]  }
  0x9c   : > { %1573 = vmatpush1.bf16.msra.mxu0 %v5477_v5  ;;  %5096 = vmatpush1.bf16.msra.mxu1 %v5477_v5  ;;  %v5511_v29 = vld [vmem:[%s6374_s26 + $0xe4] ss:$8 sps:$4 sm:$0xff]   ;;  %v5513_v30 = vld [vmem:[%s6374_s26 + $0xe0] ss:$8 sps:$4 sm:$0xff]   ;;  %v5514_v31 = vld [vmem:[%s6374_s26 + $0xf4] ss:$8 sps:$4 sm:$0xff]  }
  0x9d   : > { %1574 = vmatprep.subr.bf16.mxu0 %v5478_v6  ;;  %5081 = vmatprep.subr.bf16.mxu1 %v5478_v6  ;;  %v5516_v32 = vld [vmem:[%s6374_s26 + $0xf0] ss:$8 sps:$4 sm:$0xff]   ;;  %v5522_v33 = vld [vmem:[%s6374_s26 + $0x104] ss:$8 sps:$4 sm:$0xff]   ;;  %v5520_v35 = vld [vmem:[%s6374_s26 + $0x100] ss:$8 sps:$4 sm:$0xff]  }
  0x9e   : > { %v5517_v34 = vld [vmem:[#allocation5] ss:$16 sps:$4 sm:$0xff]   ;;  %v5523_v36 = vld [vmem:[#allocation5 + $0x24] ss:$16 sps:$4 sm:$0xff]   ;;  %s7054_s23 = sld [smem:[#allocation19_spill]]  ;;  %s7055_s12 = sld [smem:[#allocation16_spill]] }
  0x9f   : > { %v5530_v37 = vld [vmem:[%s6374_s26 + $0x114] ss:$8 sps:$4 sm:$0xff]   ;;  %v5528_v38 = vld [vmem:[%s6374_s26 + $0x110] ss:$8 sps:$4 sm:$0xff]   ;;  %v5537_v39 = vld [vmem:[%s6374_s26 + $0x124] ss:$8 sps:$4 sm:$0xff]  }
  0xa0   : > { %1575 = vmatpush1.bf16.msra.mxu0 %v5480_v7  ;;  %5097 = vmatpush1.bf16.msra.mxu1 %v5480_v7  ;;  %v5525_v40 = vld [vmem:[#allocation5 + $0x20] ss:$16 sps:$4 sm:$0xff]   ;;  %v5526_v41 = vld [vmem:[#allocation5 + $0x44] ss:$16 sps:$4 sm:$0xff]   ;;  %s4794_s24 = sshll.u32 %s6370_s28, 1  ;;  %s7056_s17 = sld [smem:[#allocation20_spill]] }
  0xa1   : > { %1576 = vmatprep.subr.bf16.mxu0 %v5481_v8  ;;  %5082 = vmatprep.subr.bf16.mxu1 %v5481_v8  ;;  %v5535_v42 = vld [vmem:[%s6374_s26 + $0x120] ss:$8 sps:$4 sm:$0xff]   ;;  %v5543_v43 = vld [vmem:[%s6374_s26 + $0x134] ss:$8 sps:$4 sm:$0xff]   ;;  %v5541_v44 = vld [vmem:[%s6374_s26 + $0x130] ss:$8 sps:$4 sm:$0xff]  }
  0xa2   : > { %v5552_v45 = vld [vmem:[%s6374_s26 + $0x144] ss:$8 sps:$4 sm:$0xff]   ;;  %v5531_v46 = vld [vmem:[#allocation5 + $0x40] ss:$16 sps:$4 sm:$0xff]   ;;  %v5558_v49 = vld [vmem:[%s6374_s26 + $0x154] ss:$8 sps:$4 sm:$0xff]  }
  0xa3   : > { %v5532_v47 = vld [vmem:[#allocation5 + $0x64] ss:$16 sps:$4 sm:$0xff]   ;;  %v5550_v48 = vld [vmem:[%s6374_s26 + $0x140] ss:$8 sps:$4 sm:$0xff]   ;;  %v5556_v50 = vld [vmem:[%s6374_s26 + $0x150] ss:$8 sps:$4 sm:$0xff]  }
  0xa4   : > { %1577 = vmatpush1.bf16.msra.mxu0 %v5483_v9  ;;  %5098 = vmatpush1.bf16.msra.mxu1 %v5483_v9  ;;  %v5564_v51 = vld [vmem:[%s6374_s26 + $0x164] ss:$8 sps:$4 sm:$0xff]   ;;  %v5534_v52 = vld [vmem:[#allocation5 + $0x60] ss:$16 sps:$4 sm:$0xff]   ;;  %v5573_v55 = vld [vmem:[%s6374_s26 + $0x174] ss:$8 sps:$4 sm:$0xff]  }
  0xa5   : > { %1578 = vmatprep.subr.bf16.mxu0 %v5484_v10  ;;  %5083 = vmatprep.subr.bf16.mxu1 %v5484_v10  ;;  %v5538_v53 = vld [vmem:[#allocation5 + $0x84] ss:$16 sps:$4 sm:$0xff]   ;;  %v5562_v54 = vld [vmem:[%s6374_s26 + $0x160] ss:$8 sps:$4 sm:$0xff]   ;;  %v5571_v56 = vld [vmem:[%s6374_s26 + $0x170] ss:$8 sps:$4 sm:$0xff]  }
  0xa6   : > { %v5579_v57 = vld [vmem:[%s6374_s26 + $0x184] ss:$8 sps:$4 sm:$0xff]   ;;  %v5540_v58 = vld [vmem:[#allocation5 + $0x80] ss:$16 sps:$4 sm:$0xff]   ;;  %v5587_v61 = vld [vmem:[%s6374_s26 + $0x194] ss:$8 sps:$4 sm:$0xff]  }
  0xa7   : > { %v5544_v59 = vld [vmem:[#allocation5 + $0xa4] ss:$16 sps:$4 sm:$0xff]   ;;  %v5577_v60 = vld [vmem:[%s6374_s26 + $0x180] ss:$8 sps:$4 sm:$0xff]   ;;  %v5585_v62 = vld [vmem:[%s6374_s26 + $0x190] ss:$8 sps:$4 sm:$0xff]  }
  0xa8   : > { %1579 = vmatpush1.bf16.msra.mxu0 %v5486_v11  ;;  %5099 = vmatpush1.bf16.msra.mxu1 %v5486_v11  ;;  %v5594_v63 = vld [vmem:[%s6374_s26 + $0x1a4] ss:$8 sps:$4 sm:$0xff]   ;;  %v5546_v0 = vld [vmem:[#allocation5 + $0xa0] ss:$16 sps:$4 sm:$0xff]   ;;  %v5600_v3 = vld [vmem:[%s6374_s26 + $0x1b4] ss:$8 sps:$4 sm:$0xff]  }
  0xa9   : > { %1580 = vmatprep.subr.bf16.mxu0 %v5487_v12  ;;  %5084 = vmatprep.subr.bf16.mxu1 %v5487_v12  ;;  %v5547_v1 = vld [vmem:[#allocation5 + $0xc4] ss:$16 sps:$4 sm:$0xff]   ;;  %v5592_v2 = vld [vmem:[%s6374_s26 + $0x1a0] ss:$8 sps:$4 sm:$0xff]   ;;  %v5598_v4 = vld [vmem:[%s6374_s26 + $0x1b0] ss:$8 sps:$4 sm:$0xff]  }
  0xaa   : > { %v5609_v5 = vld [vmem:[%s6374_s26 + $0x1c4] ss:$8 sps:$4 sm:$0xff]   ;;  %v5549_v6 = vld [vmem:[#allocation5 + $0xc0] ss:$16 sps:$4 sm:$0xff]   ;;  %v5615_v9 = vld [vmem:[%s6374_s26 + $0x1d4] ss:$8 sps:$4 sm:$0xff]  }
  0xab   : > { %v5553_v7 = vld [vmem:[#allocation5 + $0xe4] ss:$16 sps:$4 sm:$0xff]   ;;  %v5607_v8 = vld [vmem:[%s6374_s26 + $0x1c0] ss:$8 sps:$4 sm:$0xff]   ;;  %v5613_v10 = vld [vmem:[%s6374_s26 + $0x1d0] ss:$8 sps:$4 sm:$0xff]  }
  0xac   : > { %1581 = vmatpush1.bf16.msra.mxu0 %v5489_v14  ;;  %5100 = vmatpush1.bf16.msra.mxu1 %v5489_v14  ;;  %v5621_v11 = vld [vmem:[%s6374_s26 + $0x1e4] ss:$8 sps:$4 sm:$0xff]   ;;  %v5555_v12 = vld [vmem:[#allocation5 + $0xe0] ss:$16 sps:$4 sm:$0xff]   ;;  %s5077_s30 = sshll.u32 %s7055_s12, 5  ;;  %s412_s16 = scalar_lea.vmem [#allocation10], %s4794_s24 }
  0xad   : > { %1582 = vmatprep.subr.bf16.mxu0 %v5490_v15  ;;  %5085 = vmatprep.subr.bf16.mxu1 %v5490_v15  ;;  %v5559_v13 = vld [vmem:[#allocation5 + $0x104] ss:$16 sps:$4 sm:$0xff]   ;;  %v5619_v14 = vld [vmem:[%s6374_s26 + $0x1e0] ss:$8 sps:$4 sm:$0xff]   ;;  %s4666_s20 = sshll.u32 %s412_s16, 4  ;;  %s6967_s19 = scalar_lea.hbm %s7056_s17, %s5077_s30  ;;  %s6969_s20 = int_to_ptr.vmem [resolvable:$true] %s4666_s20 }
  0xae   : > { %v5630_v15 = vld [vmem:[%s6374_s26 + $0x1f4] ss:$8 sps:$4 sm:$0xff]   ;;  %s4650_s21 = scalar_lea.sflag [#allocation4], %s6370_s28  ;;  %s6003_s9 = scalar_lea.vmem %s6969_s20, 32 }
  0xaf   : > { %p6004_p13 = scmp.ne.s32.totalorder %s6969_s20, %s6003_s9  ;;  %s6107_s5 = smov [#allocation10]  }
  0xb0   : > { %1583 = vmatpush1.bf16.msra.mxu0 %v5492_v16  ;;  %5101 = vmatpush1.bf16.msra.mxu1 %v5492_v16  ;;  %v5628_v16 = vld [vmem:[%s6374_s26 + $0x1f0] ss:$8 sps:$4 sm:$0xff]   ;;  %s6007_s18 = sshll.u32 %s6107_s5, 4  ;;  %s6008_s18 = int_to_ptr.vmem [resolvable:$false] %s6007_s18 }
  0xb1   : > { %1584 = vmatprep.subr.bf16.mxu0 %v5493_v17  ;;  %5086 = vmatprep.subr.bf16.mxu1 %v5493_v17  ;;  %v5561_v17 = vld [vmem:[#allocation5 + $0x100] ss:$16 sps:$4 sm:$0xff]   ;;  %p6005_p6 = pnand %p6004_p13, %p6309_p10  ;;  %s6009_s1 = scalar_lea.vmem %s6008_s18, 64 }
  0xb2   : > { %p6010_p5 = scmp.lt.s32.totalorder %s6969_s20, %s6008_s18  ;;  %p6011_p7 = scmp.lt.s32.totalorder %s6009_s1, %s6003_s9 }
  0xb3   : > { %p6006_p3 = pneg %p6005_p6 }
  0xb4   : > { %1585 = vmatpush1.bf16.msra.mxu0 %v5495_v18  ;;  %5102 = vmatpush1.bf16.msra.mxu1 %v5495_v18  ;;  %v5565_v18 = vld [vmem:[#allocation5 + $0x124] ss:$16 sps:$4 sm:$0xff]   ;;  %p6012_p9 = por %p6011_p7, %p6010_p5 }
  0xb5   : > { %1586 = vmatprep.subr.bf16.mxu0 %v5496_v19  ;;  %5087 = vmatprep.subr.bf16.mxu1 %v5496_v19  ;;  %v5567_v19 = vld [vmem:[#allocation5 + $0x120] ss:$16 sps:$4 sm:$0xff]  }
  0xb6   : > { %p6013_p0 = pnand %p6012_p9, %p6006_p3 }
  0xb8   : > { %1587 = vmatpush1.bf16.msra.mxu0 %v5498_v20  ;;  %5103 = vmatpush1.bf16.msra.mxu1 %v5498_v20  ;;  %v5568_v20 = vld [vmem:[#allocation5 + $0x144] ss:$16 sps:$4 sm:$0xff]  }
  0xb9   : > { %1588 = vmatprep.subr.bf16.mxu0 %v5499_v21  ;;  %5088 = vmatprep.subr.bf16.mxu1 %v5499_v21  ;;  %v5570_v21 = vld [vmem:[#allocation5 + $0x140] ss:$16 sps:$4 sm:$0xff]  }
  0xbc   : > { %1589 = vmatpush1.bf16.msra.mxu0 %v5501_v22  ;;  %5104 = vmatpush1.bf16.msra.mxu1 %v5501_v22  ;;  %v5574_v22 = vld [vmem:[#allocation5 + $0x164] ss:$16 sps:$4 sm:$0xff]  }
  0xbd   : > { %1590 = vmatprep.subr.bf16.mxu0 %v5502_v23  ;;  %5089 = vmatprep.subr.bf16.mxu1 %v5502_v23  ;;  %v5576_v23 = vld [vmem:[#allocation5 + $0x160] ss:$16 sps:$4 sm:$0xff]  }
  0xc0   : > { %1591 = vmatpush1.bf16.msra.mxu0 %v5504_v24  ;;  %5105 = vmatpush1.bf16.msra.mxu1 %v5504_v24  ;;  %v5580_v24 = vld [vmem:[#allocation5 + $0x184] ss:$16 sps:$4 sm:$0xff]  }
  0xc1   : > { %1592 = vmatprep.subr.bf16.mxu0 %v5505_v25  ;;  %5090 = vmatprep.subr.bf16.mxu1 %v5505_v25  ;;  %v5582_v25 = vld [vmem:[#allocation5 + $0x180] ss:$16 sps:$4 sm:$0xff]  }
  0xc4   : > { %1593 = vmatpush1.bf16.msra.mxu0 %v5507_v26  ;;  %5106 = vmatpush1.bf16.msra.mxu1 %v5507_v26  ;;  %v5583_v26 = vld [vmem:[#allocation5 + $0x1a4] ss:$16 sps:$4 sm:$0xff]  }
  0xc5   : > { %1594 = vmatprep.subr.bf16.mxu0 %v5508_v27  ;;  %5091 = vmatprep.subr.bf16.mxu1 %v5508_v27  ;;  %v5588_v27 = vld [vmem:[#allocation5 + $0x1a0] ss:$16 sps:$4 sm:$0xff]  }
  0xc8   : > { %1595 = vmatpush1.bf16.msra.mxu0 %v5510_v28  ;;  %5107 = vmatpush1.bf16.msra.mxu1 %v5510_v28  ;;  %v5589_v28 = vld [vmem:[#allocation5 + $0x1c4] ss:$16 sps:$4 sm:$0xff]  }
  0xc9   : > { %1596 = vmatprep.subr.bf16.mxu0 %v5511_v29  ;;  %5092 = vmatprep.subr.bf16.mxu1 %v5511_v29  ;;  %v5591_v29 = vld [vmem:[#allocation5 + $0x1c0] ss:$16 sps:$4 sm:$0xff]  }
  0xcc   : > { %1597 = vmatpush1.bf16.msra.mxu0 %v5513_v30  ;;  %5108 = vmatpush1.bf16.msra.mxu1 %v5513_v30  ;;  %v5595_v30 = vld [vmem:[#allocation5 + $0x1e4] ss:$16 sps:$4 sm:$0xff]  }
  0xcd   : > { %1598 = vmatprep.subr.bf16.mxu0 %v5514_v31  ;;  %5093 = vmatprep.subr.bf16.mxu1 %v5514_v31  ;;  %v5597_v31 = vld [vmem:[#allocation5 + $0x1e0] ss:$16 sps:$4 sm:$0xff]  }
  0xd0   : > { %1599 = vmatpush1.bf16.msra.mxu0 %v5516_v32  ;;  %5109 = vmatpush1.bf16.msra.mxu1 %v5516_v32  ;;  %v5601_v32 = vld [vmem:[#allocation5 + $0x204] ss:$16 sps:$4 sm:$0xff]  }
  0xd1   : > { %1921 = vmatprep.subr.bf16.mxu0 %v5522_v33  ;;  %v5603_v33 = vld [vmem:[#allocation5 + $0x200] ss:$16 sps:$4 sm:$0xff]  }
  0xd3   : > { %1601 = vmatmul.mubr.bf16.vlgmr.msra.gmra.mrb[0].mxu0 %v5517_v34  ;;  %v5604_v34 = vld [vmem:[#allocation5 + $0x224] ss:$16 sps:$4 sm:$0xff]  }
  0xd4   : > { %1922 = vmatpush1.bf16.msra.mxu0 %v5520_v35  ;;  %1610 = vmatprep.mubr.bf16.mxu0 %v5523_v36  ;;  %v5606_v35 = vld [vmem:[#allocation5 + $0x220] ss:$16 sps:$4 sm:$0xff]   ;;  %v5610_v36 = vld [vmem:[#allocation5 + $0x244] ss:$16 sps:$4 sm:$0xff]  }
  0xd5   : > { %1923 = vmatprep.subr.bf16.mxu0 %v5530_v37  ;;  %v5612_v37 = vld [vmem:[#allocation5 + $0x240] ss:$16 sps:$4 sm:$0xff]  }
  0xd8   : > { %1924 = vmatpush1.bf16.msra.mxu0 %v5528_v38  ;;  %v5616_v38 = vld [vmem:[#allocation5 + $0x264] ss:$16 sps:$4 sm:$0xff]  }
  0xd9   : > { %1925 = vmatprep.subr.bf16.mxu0 %v5537_v39  ;;  %v5618_v39 = vld [vmem:[#allocation5 + $0x260] ss:$16 sps:$4 sm:$0xff]  }
  0xdb   : > { %1611 = vmatmul.mubr.bf16.gmra.mrb[4].mxu0 %v5525_v40  ;;  %v5622_v40 = vld [vmem:[#allocation5 + $0x284] ss:$16 sps:$4 sm:$0xff]  }
  0xdc   : > { %1620 = vmatprep.mubr.bf16.mxu0 %v5526_v41  ;;  %1926 = vmatpush1.bf16.msra.mxu0 %v5535_v42  ;;  %v5624_v41 = vld [vmem:[#allocation5 + $0x280] ss:$16 sps:$4 sm:$0xff]   ;;  %v5625_v42 = vld [vmem:[#allocation5 + $0x2a4] ss:$16 sps:$4 sm:$0xff]  }
  0xdd   : > { %1927 = vmatprep.subr.bf16.mxu0 %v5543_v43  ;;  %v5627_v43 = vld [vmem:[#allocation5 + $0x2a0] ss:$16 sps:$4 sm:$0xff]  }
  0xe0   : > { %1928 = vmatpush1.bf16.msra.mxu0 %v5541_v44  ;;  %v5633_v44 = vld [vmem:[#allocation5 + $0xc] ss:$16 sps:$4 sm:$0xff]  }
  0xe1   : > { %1929 = vmatprep.subr.bf16.mxu0 %v5552_v45  ;;  %v5631_v45 = vld [vmem:[#allocation5 + $0x8] ss:$16 sps:$4 sm:$0xff]  }
  0xe3   : > { %1621 = vmatmul.mubr.bf16.gmra.mrb[8].mxu0 %v5531_v46  ;;  %v5634_v46 = vld [vmem:[#allocation5 + $0x2c] ss:$16 sps:$4 sm:$0xff]  }
  0xe4   : > { %1630 = vmatprep.mubr.bf16.mxu0 %v5532_v47  ;;  %1930 = vmatpush1.bf16.msra.mxu0 %v5550_v48  ;;  %v5636_v47 = vld [vmem:[#allocation5 + $0x28] ss:$16 sps:$4 sm:$0xff]   ;;  %v5637_v48 = vld [vmem:[#allocation5 + $0x4c] ss:$16 sps:$4 sm:$0xff]  }
  0xe5   : > { %1931 = vmatprep.subr.bf16.mxu0 %v5558_v49  ;;  %v5639_v49 = vld [vmem:[#allocation5 + $0x48] ss:$16 sps:$4 sm:$0xff]  }
  0xe8   : > { %1932 = vmatpush1.bf16.msra.mxu0 %v5556_v50  ;;  %v5640_v50 = vld [vmem:[#allocation5 + $0x6c] ss:$16 sps:$4 sm:$0xff]  }
  0xe9   : > { %1933 = vmatprep.subr.bf16.mxu0 %v5564_v51  ;;  %v5642_v51 = vld [vmem:[#allocation5 + $0x68] ss:$16 sps:$4 sm:$0xff]  }
  0xeb   : > { %1631 = vmatmul.mubr.bf16.gmra.mrb[12].mxu0 %v5534_v52  ;;  %v5643_v52 = vld [vmem:[#allocation5 + $0x8c] ss:$16 sps:$4 sm:$0xff]  }
  0xec   : > { %1640 = vmatprep.mubr.bf16.mxu0 %v5538_v53  ;;  %1934 = vmatpush1.bf16.msra.mxu0 %v5562_v54  ;;  %v5645_v53 = vld [vmem:[#allocation5 + $0x88] ss:$16 sps:$4 sm:$0xff]   ;;  %v5646_v54 = vld [vmem:[#allocation5 + $0xac] ss:$16 sps:$4 sm:$0xff]  }
  0xed   : > { %1935 = vmatprep.subr.bf16.mxu0 %v5573_v55  ;;  %v5648_v55 = vld [vmem:[#allocation5 + $0xa8] ss:$16 sps:$4 sm:$0xff]  }
  0xf0   : > { %1936 = vmatpush1.bf16.msra.mxu0 %v5571_v56  ;;  %v5649_v56 = vld [vmem:[#allocation5 + $0xcc] ss:$16 sps:$4 sm:$0xff]  }
  0xf1   : > { %1937 = vmatprep.subr.bf16.mxu0 %v5579_v57  ;;  %v5697_v57 = vld [vmem:[#allocation5 + $0x2c0] ss:$16 sps:$4 sm:$0xff]  }
  0xf3   : > { %1641 = vmatmul.mubr.bf16.gmra.mrb[16].mxu0 %v5540_v58  ;;  %v5699_v58 = vld [vmem:[#allocation5 + $0x2c4] ss:$16 sps:$4 sm:$0xff]  }
  0xf4   : > { %1650 = vmatprep.mubr.bf16.mxu0 %v5544_v59  ;;  %1938 = vmatpush1.bf16.msra.mxu0 %v5577_v60  ;;  %v5651_v59 = vld [vmem:[#allocation5 + $0xc8] ss:$16 sps:$4 sm:$0xff]   ;;  %v5652_v60 = vld [vmem:[#allocation5 + $0xec] ss:$16 sps:$4 sm:$0xff]  }
  0xf5   : > { %1939 = vmatprep.subr.bf16.mxu0 %v5587_v61  ;;  %1820 = vmatprep.mubr.bf16.mxu1 %v5699_v58  ;;  %v5703_v61 = vld [vmem:[#allocation5 + $0x2e4] ss:$16 sps:$4 sm:$0xff]   ;;  %v5732_v58 = vld [vmem:[#allocation5 + $0x368] ss:$16 sps:$4 sm:$0xff]  }
  0xf6   : > { %1821 = vmatmul.mubr.bf16.vlgmr.msra.gmra.mrb[0].mxu1 %v5697_v57 }
  0xf7   : > { %1830 = vmatprep.mubr.bf16.mxu1 %v5703_v61  ;;  %v5736_v61 = vld [vmem:[#allocation5 + $0x38c] ss:$16 sps:$4 sm:$0xff]  }
  0xf8   : > { %1940 = vmatpush1.bf16.msra.mxu0 %v5585_v62  ;;  %v5705_v62 = vld [vmem:[#allocation5 + $0x2e0] ss:$16 sps:$4 sm:$0xff]  }
  0xf9   : > { %1941 = vmatprep.subr.bf16.mxu0 %v5594_v63  ;;  %v5654_v63 = vld [vmem:[#allocation5 + $0xe8] ss:$16 sps:$4 sm:$0xff]  }
  0xfb   : > { %1651 = vmatmul.mubr.bf16.gmra.mrb[20].mxu0 %v5546_v0  ;;  %v5655_v0 = vld [vmem:[#allocation5 + $0x10c] ss:$16 sps:$4 sm:$0xff]  }
  0xfc   : > { %1660 = vmatprep.mubr.bf16.mxu0 %v5547_v1  ;;  %1942 = vmatpush1.bf16.msra.mxu0 %v5592_v2  ;;  %v5709_v1 = vld [vmem:[#allocation5 + $0x304] ss:$16 sps:$4 sm:$0xff]   ;;  %v5711_v2 = vld [vmem:[#allocation5 + $0x300] ss:$16 sps:$4 sm:$0xff]  }
  0xfd   : > { %1943 = vmatprep.subr.bf16.mxu0 %v5600_v3  ;;  %v5657_v3 = vld [vmem:[#allocation5 + $0x108] ss:$16 sps:$4 sm:$0xff]  }
  0xfe   : > { %1831 = vmatmul.mubr.bf16.gmra.mrb[4].mxu1 %v5705_v62 }
  0xff   : > { %1840 = vmatprep.mubr.bf16.mxu1 %v5709_v1  ;;  %v5759_v1 = vld [vmem:[%s7018_s2 + $0x4] ss:$16 sps:$4 sm:$0xff]  }
 0x100   : > { %1944 = vmatpush1.bf16.msra.mxu0 %v5598_v4  ;;  %v5658_v4 = vld [vmem:[#allocation5 + $0x12c] ss:$16 sps:$4 sm:$0xff]  }
 0x101   : > { %1945 = vmatprep.subr.bf16.mxu0 %v5609_v5  ;;  %v5715_v5 = vld [vmem:[#allocation5 + $0x324] ss:$16 sps:$4 sm:$0xff]  }
 0x103   : > { %1661 = vmatmul.mubr.bf16.gmra.mrb[24].mxu0 %v5549_v6  ;;  %v5717_v6 = vld [vmem:[#allocation5 + $0x320] ss:$16 sps:$4 sm:$0xff]  }
 0x104   : > { %1670 = vmatprep.mubr.bf16.mxu0 %v5553_v7  ;;  %1946 = vmatpush1.bf16.msra.mxu0 %v5607_v8  ;;  %v5660_v7 = vld [vmem:[#allocation5 + $0x128] ss:$16 sps:$4 sm:$0xff]   ;;  %v5661_v8 = vld [vmem:[#allocation5 + $0x14c] ss:$16 sps:$4 sm:$0xff]  }
 0x105   : > { %1947 = vmatprep.subr.bf16.mxu0 %v5615_v9  ;;  %v5721_v9 = vld [vmem:[#allocation5 + $0x344] ss:$16 sps:$4 sm:$0xff]  }
 0x106   : > { %1841 = vmatmul.mubr.bf16.gmra.mrb[8].mxu1 %v5711_v2 }
 0x107   : > { %1850 = vmatprep.mubr.bf16.mxu1 %v5715_v5 }
 0x108   : > { %1948 = vmatpush1.bf16.msra.mxu0 %v5613_v10  ;;  %v5723_v10 = vld [vmem:[#allocation5 + $0x340] ss:$16 sps:$4 sm:$0xff]  }
 0x109   : > { %1949 = vmatprep.subr.bf16.mxu0 %v5621_v11  ;;  %v5663_v11 = vld [vmem:[#allocation5 + $0x148] ss:$16 sps:$4 sm:$0xff]  }
 0x10b   : > { %1671 = vmatmul.mubr.bf16.gmra.mrb[28].mxu0 %v5555_v12  ;;  %v5664_v12 = vld [vmem:[#allocation5 + $0x16c] ss:$16 sps:$4 sm:$0xff]  }
 0x10c   : > { %1680 = vmatprep.mubr.bf16.mxu0 %v5559_v13  ;;  %1950 = vmatpush1.bf16.msra.mxu0 %v5619_v14  ;;  %v5727_v13 = vld [vmem:[#allocation5 + $0x364] ss:$16 sps:$4 sm:$0xff]   ;;  %v5729_v14 = vld [vmem:[#allocation5 + $0x360] ss:$16 sps:$4 sm:$0xff]  }
 0x10d   : > { %1951 = vmatprep.subr.bf16.mxu0 %v5630_v15  ;;  %v5666_v15 = vld [vmem:[#allocation5 + $0x168] ss:$16 sps:$4 sm:$0xff]  }
 0x10e   : > { %1851 = vmatmul.mubr.bf16.gmra.mrb[12].mxu1 %v5717_v6 }
 0x10f   : > { %1860 = vmatprep.mubr.bf16.mxu1 %v5721_v9 }
 0x110   : > { %1952 = vmatpush1.bf16.msra.mxu0 %v5628_v16  ;;  %v5667_v16 = vld [vmem:[#allocation5 + $0x18c] ss:$16 sps:$4 sm:$0xff]  }
 0x113   : > { %1681 = vmatmul.mubr.bf16.gmra.mrb[32].mxu0 %v5561_v17  ;;  %v5733_v17 = vld [vmem:[#allocation5 + $0x384] ss:$16 sps:$4 sm:$0xff]  }
 0x114   : > { %1690 = vmatprep.mubr.bf16.mxu0 %v5565_v18  ;;  %v5735_v18 = vld [vmem:[#allocation5 + $0x380] ss:$16 sps:$4 sm:$0xff]  }
 0x116   : > { %1861 = vmatmul.mubr.bf16.gmra.mrb[16].mxu1 %v5723_v10 }
 0x117   : > { %1870 = vmatprep.mubr.bf16.mxu1 %v5727_v13 }
 0x11b   : > { %1691 = vmatmul.mubr.bf16.gmra.mrb[36].mxu0 %v5567_v19  ;;  %v5669_v19 = vld [vmem:[#allocation5 + $0x188] ss:$16 sps:$4 sm:$0xff]  }
 0x11c   : > { %1700 = vmatprep.mubr.bf16.mxu0 %v5568_v20  ;;  %v5670_v20 = vld [vmem:[#allocation5 + $0x1ac] ss:$16 sps:$4 sm:$0xff]  }
 0x11e   : > { %1871 = vmatmul.mubr.bf16.gmra.mrb[20].mxu1 %v5729_v14  ;;  %v5742_v14 = vld [vmem:[#allocation5 + $0x3ac] ss:$16 sps:$4 sm:$0xff]  }
 0x11f   : > { %1880 = vmatprep.mubr.bf16.mxu1 %v5733_v17 }
 0x123   : > { %1701 = vmatmul.mubr.bf16.gmra.mrb[40].mxu0 %v5570_v21  ;;  %v5739_v21 = vld [vmem:[#allocation5 + $0x3a4] ss:$16 sps:$4 sm:$0xff]  }
 0x124   : > { %1710 = vmatprep.mubr.bf16.mxu0 %v5574_v22  ;;  %v5741_v22 = vld [vmem:[#allocation5 + $0x3a0] ss:$16 sps:$4 sm:$0xff]  }
 0x126   : > { %1881 = vmatmul.mubr.bf16.gmra.mrb[24].mxu1 %v5735_v18 }
 0x127   : > { %1890 = vmatprep.mubr.bf16.mxu1 %v5739_v21 }
 0x12b   : > { %1711 = vmatmul.mubr.bf16.gmra.mrb[44].mxu0 %v5576_v23  ;;  %v5672_v23 = vld [vmem:[#allocation5 + $0x1a8] ss:$16 sps:$4 sm:$0xff]  }
 0x12c   : > { %1720 = vmatprep.mubr.bf16.mxu0 %v5580_v24  ;;  %v5673_v24 = vld [vmem:[#allocation5 + $0x1cc] ss:$16 sps:$4 sm:$0xff]  }
 0x12e   : > { %1891 = vmatmul.mubr.bf16.gmra.mrb[28].mxu1 %v5741_v22 }
 0x133   : > { %1721 = vmatmul.mubr.bf16.gmra.mrb[48].mxu0 %v5582_v25  ;;  %v5745_v25 = vld [vmem:[#allocation5 + $0x3c4] ss:$16 sps:$4 sm:$0xff]  }
 0x134   : > { %1730 = vmatprep.mubr.bf16.mxu0 %v5583_v26  ;;  %v5747_v26 = vld [vmem:[#allocation5 + $0x3c0] ss:$16 sps:$4 sm:$0xff]   ;;  %1900 = vmatprep.mubr.bf16.mxu1 %v5745_v25 }
 0x136   : > { %1901 = vmatmul.mubr.bf16.gmra.mrb[32].mxu1 %v5747_v26 }
 0x13b   : > { %1731 = vmatmul.mubr.bf16.gmra.mrb[52].mxu0 %v5588_v27  ;;  %v5675_v27 = vld [vmem:[#allocation5 + $0x1c8] ss:$16 sps:$4 sm:$0xff]  }
 0x13c   : > { %1740 = vmatprep.mubr.bf16.mxu0 %v5589_v28  ;;  %v5676_v28 = vld [vmem:[#allocation5 + $0x1ec] ss:$16 sps:$4 sm:$0xff]  }
 0x143   : > { %1741 = vmatmul.mubr.bf16.gmra.mrb[56].mxu0 %v5591_v29  ;;  %v5751_v29 = vld [vmem:[#allocation5 + $0x3e4] ss:$16 sps:$4 sm:$0xff]  }
 0x144   : > { %1750 = vmatprep.mubr.bf16.mxu0 %v5595_v30  ;;  %v5753_v30 = vld [vmem:[#allocation5 + $0x3e0] ss:$16 sps:$4 sm:$0xff]   ;;  %1910 = vmatprep.mubr.bf16.mxu1 %v5751_v29 }
 0x145   : > { %1911 = vmatmul.mubr.bf16.gmra.mrb[36].mxu1 %v5753_v30  ;;  %v5748_v30 = vld [vmem:[#allocation5 + $0x3cc] ss:$16 sps:$4 sm:$0xff]  }
 0x146   : > { %3330 = vmatprep.mubr.bf16.mxu1 %v5759_v1 }
 0x14b   : > { %1751 = vmatmul.mubr.bf16.gmra.mrb[60].mxu0 %v5597_v31  ;;  %v5678_v31 = vld [vmem:[#allocation5 + $0x1e8] ss:$16 sps:$4 sm:$0xff]  }
 0x14c   : > { %1760 = vmatprep.mubr.bf16.mxu0 %v5601_v32  ;;  %v5679_v32 = vld [vmem:[#allocation5 + $0x20c] ss:$16 sps:$4 sm:$0xff]  }
 0x153   : > { %1761 = vmatmul.mubr.bf16.gmra.mrb[64].mxu0 %v5603_v33  ;;  %v5681_v33 = vld [vmem:[#allocation5 + $0x208] ss:$16 sps:$4 sm:$0xff]  }
 0x154   : > { %1770 = vmatprep.mubr.bf16.mxu0 %v5604_v34  ;;  %v5682_v34 = vld [vmem:[#allocation5 + $0x22c] ss:$16 sps:$4 sm:$0xff]  }
 0x15b   : > { %1771 = vmatmul.mubr.bf16.gmra.mrb[68].mxu0 %v5606_v35  ;;  %v5684_v35 = vld [vmem:[#allocation5 + $0x228] ss:$16 sps:$4 sm:$0xff]  }
 0x15c   : > { %1780 = vmatprep.mubr.bf16.mxu0 %v5610_v36  ;;  %v5685_v36 = vld [vmem:[#allocation5 + $0x24c] ss:$16 sps:$4 sm:$0xff]  }
 0x163   : > { %1781 = vmatmul.mubr.bf16.gmra.mrb[72].mxu0 %v5612_v37  ;;  %v5687_v37 = vld [vmem:[#allocation5 + $0x248] ss:$16 sps:$4 sm:$0xff]  }
 0x164   : > { %1790 = vmatprep.mubr.bf16.mxu0 %v5616_v38  ;;  %v5688_v38 = vld [vmem:[#allocation5 + $0x26c] ss:$16 sps:$4 sm:$0xff]  }
 0x16b   : > { %1791 = vmatmul.mubr.bf16.gmra.mrb[76].mxu0 %v5618_v39  ;;  %v5690_v39 = vld [vmem:[#allocation5 + $0x268] ss:$16 sps:$4 sm:$0xff]  }
 0x16c   : > { %1800 = vmatprep.mubr.bf16.mxu0 %v5622_v40  ;;  %v5691_v40 = vld [vmem:[#allocation5 + $0x28c] ss:$16 sps:$4 sm:$0xff]  }
 0x173   : > { %1801 = vmatmul.mubr.bf16.gmra.mrb[80].mxu0 %v5624_v41  ;;  %v5693_v41 = vld [vmem:[#allocation5 + $0x288] ss:$16 sps:$4 sm:$0xff]  }
 0x174   : > { %1810 = vmatprep.mubr.bf16.mxu0 %v5625_v42  ;;  %v5694_v42 = vld [vmem:[#allocation5 + $0x2ac] ss:$16 sps:$4 sm:$0xff]  }
 0x17b   : > { %1811 = vmatmul.mubr.bf16.gmra.mrb[84].mxu0 %v5627_v43  ;;  %v5696_v43 = vld [vmem:[#allocation5 + $0x2a8] ss:$16 sps:$4 sm:$0xff]  }
 0x17c   : > { %1953 = vmatprep.mubr.bf16.mxu0 %v5633_v44  ;;  %v5700_v44 = vld [vmem:[#allocation5 + $0x2cc] ss:$16 sps:$4 sm:$0xff]  }
 0x183   : > { %1954 = vmatmul.mubr.bf16.vlgmr.msra.gmra.mrb[0].mxu0 %v5631_v45  ;;  %v5702_v45 = vld [vmem:[#allocation5 + $0x2c8] ss:$16 sps:$4 sm:$0xff]  }
 0x184   : > { %1963 = vmatprep.mubr.bf16.mxu0 %v5634_v46  ;;  %v5706_v46 = vld [vmem:[#allocation5 + $0x2ec] ss:$16 sps:$4 sm:$0xff]  }
 0x18b   : > { %1964 = vmatmul.mubr.bf16.gmra.mrb[4].mxu0 %v5636_v47  ;;  %v5708_v47 = vld [vmem:[#allocation5 + $0x2e8] ss:$16 sps:$4 sm:$0xff]  }
 0x18c   : > { %1973 = vmatprep.mubr.bf16.mxu0 %v5637_v48  ;;  %v5712_v48 = vld [vmem:[#allocation5 + $0x30c] ss:$16 sps:$4 sm:$0xff]  }
 0x193   : > { %1974 = vmatmul.mubr.bf16.gmra.mrb[8].mxu0 %v5639_v49  ;;  %v5714_v49 = vld [vmem:[#allocation5 + $0x308] ss:$16 sps:$4 sm:$0xff]  }
 0x194   : > { %1983 = vmatprep.mubr.bf16.mxu0 %v5640_v50  ;;  %v5718_v50 = vld [vmem:[#allocation5 + $0x32c] ss:$16 sps:$4 sm:$0xff]  }
 0x19b   : > { %1984 = vmatmul.mubr.bf16.gmra.mrb[12].mxu0 %v5642_v51  ;;  %v5720_v51 = vld [vmem:[#allocation5 + $0x328] ss:$16 sps:$4 sm:$0xff]  }
 0x19c   : > { %1993 = vmatprep.mubr.bf16.mxu0 %v5643_v52  ;;  %v5724_v52 = vld [vmem:[#allocation5 + $0x34c] ss:$16 sps:$4 sm:$0xff]  }
 0x1a3   : > { %1994 = vmatmul.mubr.bf16.gmra.mrb[16].mxu0 %v5645_v53  ;;  %v5726_v53 = vld [vmem:[#allocation5 + $0x348] ss:$16 sps:$4 sm:$0xff]  }
 0x1a4   : > { %2003 = vmatprep.mubr.bf16.mxu0 %v5646_v54  ;;  %v5730_v54 = vld [vmem:[#allocation5 + $0x36c] ss:$16 sps:$4 sm:$0xff]  }
 0x1ab   : > { %2004 = vmatmul.mubr.bf16.gmra.mrb[20].mxu0 %v5648_v55 }
 0x1ac   : > { %2013 = vmatprep.mubr.bf16.mxu0 %v5649_v56 }
 0x1b3   : > { %2014 = vmatmul.mubr.bf16.gmra.mrb[24].mxu0 %v5651_v59 }
 0x1b4   : > { %2023 = vmatprep.mubr.bf16.mxu0 %v5652_v60 }
 0x1bb   : > { %2024 = vmatmul.mubr.bf16.gmra.mrb[28].mxu0 %v5654_v63 }
 0x1bc   : > { %2033 = vmatprep.mubr.bf16.mxu0 %v5655_v0 }
 0x1c3   : > { %2034 = vmatmul.mubr.bf16.gmra.mrb[32].mxu0 %v5657_v3 }
 0x1c4   : > { %2043 = vmatprep.mubr.bf16.mxu0 %v5658_v4 }
 0x1cb   : > { %2044 = vmatmul.mubr.bf16.gmra.mrb[36].mxu0 %v5660_v7 }
 0x1cc   : > { %2053 = vmatprep.mubr.bf16.mxu0 %v5661_v8 }
 0x1d3   : > { %2054 = vmatmul.mubr.bf16.gmra.mrb[40].mxu0 %v5663_v11  ;;  %v5738_v11 = vld [vmem:[#allocation5 + $0x388] ss:$16 sps:$4 sm:$0xff]  }
 0x1d4   : > { %2063 = vmatprep.mubr.bf16.mxu0 %v5664_v12 }
 0x1db   : > { %2064 = vmatmul.mubr.bf16.gmra.mrb[44].mxu0 %v5666_v15 }
 0x1dc   : > { %2073 = vmatprep.mubr.bf16.mxu0 %v5667_v16 }
 0x1e3   : > { %2074 = vmatmul.mubr.bf16.gmra.mrb[48].mxu0 %v5669_v19 }
 0x1e4   : > { %2083 = vmatprep.mubr.bf16.mxu0 %v5670_v20 }
 0x1eb   : > { %2084 = vmatmul.mubr.bf16.gmra.mrb[52].mxu0 %v5672_v23 }
 0x1ec   : > { %2093 = vmatprep.mubr.bf16.mxu0 %v5673_v24 }
 0x1f3   : > { %2094 = vmatmul.mubr.bf16.gmra.mrb[56].mxu0 %v5675_v27  ;;  %v5744_v27 = vld [vmem:[#allocation5 + $0x3a8] ss:$16 sps:$4 sm:$0xff]  }
 0x1f4   : > { %2103 = vmatprep.mubr.bf16.mxu0 %v5676_v28 }
 0x1fb   : > { %2104 = vmatmul.mubr.bf16.gmra.mrb[60].mxu0 %v5678_v31 }
 0x1fc   : > { %2113 = vmatprep.mubr.bf16.mxu0 %v5679_v32 }
 0x203   : > { %2114 = vmatmul.mubr.bf16.gmra.mrb[64].mxu0 %v5681_v33 }
 0x204   : > { %2123 = vmatprep.mubr.bf16.mxu0 %v5682_v34 }
 0x20b   : > { %2124 = vmatmul.mubr.bf16.gmra.mrb[68].mxu0 %v5684_v35 }
 0x20c   : > { %2133 = vmatprep.mubr.bf16.mxu0 %v5685_v36 }
 0x213   : > { %2134 = vmatmul.mubr.bf16.gmra.mrb[72].mxu0 %v5687_v37 }
 0x214   : > { %2143 = vmatprep.mubr.bf16.mxu0 %v5688_v38 }
 0x21b   : > { %2144 = vmatmul.mubr.bf16.gmra.mrb[76].mxu0 %v5690_v39 }
 0x21c   : > { %2153 = vmatprep.mubr.bf16.mxu0 %v5691_v40 }
 0x223   : > { %2154 = vmatmul.mubr.bf16.gmra.mrb[80].mxu0 %v5693_v41 }
 0x224   : > { %2163 = vmatprep.mubr.bf16.mxu0 %v5694_v42 }
 0x22b   : > { %2164 = vmatmul.mubr.bf16.gmra.mrb[84].mxu0 %v5696_v43  ;;  %v5750_v43 = vld [vmem:[#allocation5 + $0x3c8] ss:$16 sps:$4 sm:$0xff]  }
 0x22c   : > { %2173 = vmatprep.mubr.bf16.mxu0 %v5700_v44 }
 0x233   : > { %2174 = vmatmul.mubr.bf16.gmra.mrb[88].mxu0 %v5702_v45 }
 0x234   : > { %2183 = vmatprep.mubr.bf16.mxu0 %v5706_v46  ;;  %v5754_v46 = vld [vmem:[#allocation5 + $0x3ec] ss:$16 sps:$4 sm:$0xff]  }
 0x23b   : > { %2184 = vmatmul.mubr.bf16.gmra.mrb[92].mxu0 %v5708_v47 }
 0x23c   : > { %2193 = vmatprep.mubr.bf16.mxu0 %v5712_v48 }
 0x243   : > { %2194 = vmatmul.mubr.bf16.gmra.mrb[96].mxu0 %v5714_v49 }
 0x244   : > { %2203 = vmatprep.mubr.bf16.mxu0 %v5718_v50 }
 0x24b   : > { %2204 = vmatmul.mubr.bf16.gmra.mrb[100].mxu0 %v5720_v51 }
 0x24c   : > { %2213 = vmatprep.mubr.bf16.mxu0 %v5724_v52 }
 0x253   : > { %2214 = vmatmul.mubr.bf16.gmra.mrb[104].mxu0 %v5726_v53 }
 0x254   : > { %2223 = vmatprep.mubr.bf16.mxu0 %v5730_v54 }
 0x256   : > { %v1955_v55 = vpop.f32.mrb[0].mxu0 }
 0x257   : > { %v2402_v56 = vmul.f32 0.2, %v1955_v55  ;;  %v1957_v57 = vpop.f32.mrb[1].mxu0  ;;  %vm2274_vm0 = vcmp.gt.f32.partialorder %v1955_v55, 0.0 }
 0x258   : > { %v2403_v59 = vmul.f32 0.2, %v1957_v57  ;;  %v1959_v60 = vpop.f32.mrb[2].mxu0  ;;  %vm2275_vm1 = vcmp.gt.f32.partialorder %v1957_v57, 0.0 }
 0x259   : > { %vm2276_vm2 = vcmp.gt.f32.partialorder %v1959_v60, 0.0  ;;  %v2404_v62 = vmul.f32 0.2, %v1959_v60  ;;  %v1961_v63 = vpop.f32.mrb[3].mxu0  ;;  %v2530_v2 = vsel %vm2274_vm0, %v1955_v55, %v2402_v56 }
 0x25a   : > { %vm2277_vm3 = vcmp.gt.f32.partialorder %v1961_v63, 0.0  ;;  %v2405_v0 = vmul.f32 0.2, %v1961_v63  ;;  %v2531_v4 = vsel %vm2275_vm1, %v1957_v57, %v2403_v59  ;;  %v5756_v59 = vld [vmem:[#allocation5 + $0x3e8] ss:$16 sps:$4 sm:$0xff]  }
 0x25b   : > { %v2532_v3 = vsel %vm2276_vm2, %v1959_v60, %v2404_v62  ;;  %2224 = vmatmul.mubr.bf16.gmra.mrb[108].mxu0 %v5732_v58 }
 0x25c   : > { %v2722_v5 = vpack.c.bf16 %v2532_v3, %v2530_v2  ;;  %v2533_v6 = vsel %vm2277_vm3, %v1961_v63, %v2405_v0  ;;  %2233 = vmatprep.mubr.bf16.mxu0 %v5736_v61 }
 0x25d   : > { %v2723_v7 = vpack.c.bf16 %v2533_v6, %v2531_v4 }
 0x25e   : > { %v1965_v8 = vpop.f32.mrb[4].mxu0 }
 0x25f   : > { %v2406_v9 = vmul.f32 0.2, %v1965_v8  ;;  %v1967_v10 = vpop.f32.mrb[5].mxu0  ;;  %3298 = vmatprep.subr.bf16.mxu1 %v2723_v7  ;;  %vm2278_vm4 = vcmp.gt.f32.partialorder %v1965_v8, 0.0 }
 0x260   : > { %v2407_v12 = vmul.f32 0.2, %v1967_v10  ;;  %v1969_v13 = vpop.f32.mrb[6].mxu0  ;;  %3299 = vmatpush1.bf16.msra.mxu1 %v2722_v5  ;;  %vm2279_vm5 = vcmp.gt.f32.partialorder %v1967_v10, 0.0 }
 0x261   : > { %vm2280_vm6 = vcmp.gt.f32.partialorder %v1969_v13, 0.0  ;;  %v2408_v15 = vmul.f32 0.2, %v1969_v13  ;;  %v1971_v16 = vpop.f32.mrb[7].mxu0  ;;  %v2534_v18 = vsel %vm2278_vm4, %v1965_v8, %v2406_v9 }
 0x262   : > { %vm2281_vm7 = vcmp.gt.f32.partialorder %v1971_v16, 0.0  ;;  %v2409_v17 = vmul.f32 0.2, %v1971_v16  ;;  %v2535_v20 = vsel %vm2279_vm5, %v1967_v10, %v2407_v12 }
 0x263   : > { %v2536_v19 = vsel %vm2280_vm6, %v1969_v13, %v2408_v15  ;;  %2234 = vmatmul.mubr.bf16.gmra.mrb[112].mxu0 %v5738_v11 }
 0x264   : > { %v2724_v21 = vpack.c.bf16 %v2536_v19, %v2534_v18  ;;  %v2537_v22 = vsel %vm2281_vm7, %v1971_v16, %v2409_v17  ;;  %2243 = vmatprep.mubr.bf16.mxu0 %v5742_v14  ;;  %v6455_v17 = vpop.f32.mrb[0].mxu1 }
 0x265   : > { %v2725_v23 = vpack.c.bf16 %v2537_v22, %v2535_v20 }
 0x266   : > { %v1975_v24 = vpop.f32.mrb[8].mxu0 }
 0x267   : > { %v2410_v25 = vmul.f32 0.2, %v1975_v24  ;;  %v1977_v26 = vpop.f32.mrb[9].mxu0  ;;  %3300 = vmatprep.subr.bf16.mxu1 %v2725_v23  ;;  %vm2282_vm8 = vcmp.gt.f32.partialorder %v1975_v24, 0.0 }
 0x268   : > { %v2411_v28 = vmul.f32 0.2, %v1977_v26  ;;  %v1979_v29 = vpop.f32.mrb[10].mxu0  ;;  %3301 = vmatpush1.bf16.msra.mxu1 %v2724_v21  ;;  %vm2283_vm9 = vcmp.gt.f32.partialorder %v1977_v26, 0.0  ;;  %v6457_v21 = vpop.f32.mrb[1].mxu1 }
 0x269   : > { %vm2284_vm10 = vcmp.gt.f32.partialorder %v1979_v29, 0.0  ;;  %v2412_v31 = vmul.f32 0.2, %v1979_v29  ;;  %v1981_v32 = vpop.f32.mrb[11].mxu0  ;;  %v2538_v34 = vsel %vm2282_vm8, %v1975_v24, %v2410_v25  ;;  %v6459_v23 = vpop.f32.mrb[2].mxu1 }
 0x26a   : > { %vm2285_vm11 = vcmp.gt.f32.partialorder %v1981_v32, 0.0  ;;  %v2413_v33 = vmul.f32 0.2, %v1981_v32  ;;  %v2539_v36 = vsel %vm2283_vm9, %v1977_v26, %v2411_v28  ;;  %v6461_v25 = vpop.f32.mrb[3].mxu1 }
 0x26b   : > { %v2540_v35 = vsel %vm2284_vm10, %v1979_v29, %v2412_v31  ;;  %2244 = vmatmul.mubr.bf16.gmra.mrb[116].mxu0 %v5744_v27 }
 0x26c   : > { %v2726_v37 = vpack.c.bf16 %v2540_v35, %v2538_v34  ;;  %v2541_v38 = vsel %vm2285_vm11, %v1981_v32, %v2413_v33  ;;  %2253 = vmatprep.mubr.bf16.mxu0 %v5748_v30  ;;  %v6463_v35 = vpop.f32.mrb[4].mxu1 }
 0x26d   : > { %v2727_v39 = vpack.c.bf16 %v2541_v38, %v2539_v36 }
 0x26e   : > { %v1985_v40 = vpop.f32.mrb[12].mxu0 }
 0x26f   : > { %v2414_v41 = vmul.f32 0.2, %v1985_v40  ;;  %v1987_v42 = vpop.f32.mrb[13].mxu0  ;;  %3302 = vmatprep.subr.bf16.mxu1 %v2727_v39  ;;  %vm2286_vm12 = vcmp.gt.f32.partialorder %v1985_v40, 0.0  ;;  %v6465_v39 = vpop.f32.mrb[5].mxu1 }
 0x270   : > { %v2415_v44 = vmul.f32 0.2, %v1987_v42  ;;  %v1989_v45 = vpop.f32.mrb[14].mxu0  ;;  %3303 = vmatpush1.bf16.msra.mxu1 %v2726_v37  ;;  %vm2287_vm13 = vcmp.gt.f32.partialorder %v1987_v42, 0.0 }
 0x271   : > { %vm2288_vm14 = vcmp.gt.f32.partialorder %v1989_v45, 0.0  ;;  %v2416_v47 = vmul.f32 0.2, %v1989_v45  ;;  %v1991_v48 = vpop.f32.mrb[15].mxu0  ;;  %v2542_v50 = vsel %vm2286_vm12, %v1985_v40, %v2414_v41  ;;  %v6467_v41 = vpop.f32.mrb[6].mxu1 }
 0x272   : > { %vm2289_vm15 = vcmp.gt.f32.partialorder %v1991_v48, 0.0  ;;  %v2417_v49 = vmul.f32 0.2, %v1991_v48  ;;  %v2543_v52 = vsel %vm2287_vm13, %v1987_v42, %v2415_v44 }
 0x273   : > { %v2544_v51 = vsel %vm2288_vm14, %v1989_v45, %v2416_v47  ;;  %2254 = vmatmul.mubr.bf16.gmra.mrb[120].mxu0 %v5750_v43  ;;  %v6469_v43 = vpop.f32.mrb[7].mxu1 }
 0x274   : > { %v2728_v53 = vpack.c.bf16 %v2544_v51, %v2542_v50  ;;  %v2545_v54 = vsel %vm2289_vm15, %v1991_v48, %v2417_v49  ;;  %2263 = vmatprep.mubr.bf16.mxu0 %v5754_v46 }
 0x275   : > { %v2729_v55 = vpack.c.bf16 %v2545_v54, %v2543_v52 }
 0x276   : > { %v1995_v56 = vpop.f32.mrb[16].mxu0 }
 0x277   : > { %v2418_v57 = vmul.f32 0.2, %v1995_v56  ;;  %v1997_v58 = vpop.f32.mrb[17].mxu0  ;;  %3304 = vmatprep.subr.bf16.mxu1 %v2729_v55  ;;  %vm2290_vm0 = vcmp.gt.f32.partialorder %v1995_v56, 0.0 }
 0x278   : > { %v2419_v60 = vmul.f32 0.2, %v1997_v58  ;;  %v1999_v61 = vpop.f32.mrb[18].mxu0  ;;  %3305 = vmatpush1.bf16.msra.mxu1 %v2728_v53  ;;  %vm2291_vm1 = vcmp.gt.f32.partialorder %v1997_v58, 0.0  ;;  %v6471_v53 = vpop.f32.mrb[8].mxu1 }
 0x279   : > { %vm2292_vm2 = vcmp.gt.f32.partialorder %v1999_v61, 0.0  ;;  %v2420_v62 = vmul.f32 0.2, %v1999_v61  ;;  %v2001_v63 = vpop.f32.mrb[19].mxu0  ;;  %v2546_v1 = vsel %vm2290_vm0, %v1995_v56, %v2418_v57  ;;  %v6473_v57 = vpop.f32.mrb[9].mxu1 }
 0x27a   : > { %vm2293_vm3 = vcmp.gt.f32.partialorder %v2001_v63, 0.0  ;;  %v2421_v0 = vmul.f32 0.2, %v2001_v63  ;;  %v2547_v3 = vsel %vm2291_vm1, %v1997_v58, %v2419_v60 }
 0x27b   : > { %v2548_v2 = vsel %vm2292_vm2, %v1999_v61, %v2420_v62  ;;  %2264 = vmatmul.mubr.bf16.gmra.mrb[124].mxu0 %v5756_v59  ;;  %v6475_v59 = vpop.f32.mrb[10].mxu1 }
 0x27c   : > { %v2730_v4 = vpack.c.bf16 %v2548_v2, %v2546_v1  ;;  %v2549_v5 = vsel %vm2293_vm3, %v2001_v63, %v2421_v0  ;;  %v6477_v61 = vpop.f32.mrb[11].mxu1 }
 0x27d   : > { %v2731_v6 = vpack.c.bf16 %v2549_v5, %v2547_v3 }
 0x27e   : > { %v2005_v7 = vpop.f32.mrb[20].mxu0 }
 0x27f   : > { %v2422_v8 = vmul.f32 0.2, %v2005_v7  ;;  %v2007_v9 = vpop.f32.mrb[21].mxu0  ;;  %3306 = vmatprep.subr.bf16.mxu1 %v2731_v6  ;;  %vm2294_vm4 = vcmp.gt.f32.partialorder %v2005_v7, 0.0 }
 0x280   : > { %v2423_v10 = vmul.f32 0.2, %v2007_v9  ;;  %v2009_v11 = vpop.f32.mrb[22].mxu0  ;;  %3307 = vmatpush1.bf16.msra.mxu1 %v2730_v4  ;;  %vm2295_vm5 = vcmp.gt.f32.partialorder %v2007_v9, 0.0 }
 0x281   : > { %vm2296_vm6 = vcmp.gt.f32.partialorder %v2009_v11, 0.0  ;;  %v2424_v12 = vmul.f32 0.2, %v2009_v11  ;;  %v2011_v13 = vpop.f32.mrb[23].mxu0  ;;  %v2550_v15 = vsel %vm2294_vm4, %v2005_v7, %v2422_v8  ;;  %v6479_v7 = vpop.f32.mrb[12].mxu1 }
 0x282   : > { %vm2297_vm7 = vcmp.gt.f32.partialorder %v2011_v13, 0.0  ;;  %v2425_v14 = vmul.f32 0.2, %v2011_v13  ;;  %v2551_v18 = vsel %vm2295_vm5, %v2007_v9, %v2423_v10 }
 0x283   : > { %v2552_v16 = vsel %vm2296_vm6, %v2009_v11, %v2424_v12  ;;  %v6481_v11 = vpop.f32.mrb[13].mxu1 }
 0x284   : > { %v2732_v19 = vpack.c.bf16 %v2552_v16, %v2550_v15  ;;  %v2553_v20 = vsel %vm2297_vm7, %v2011_v13, %v2425_v14  ;;  %v6483_v13 = vpop.f32.mrb[14].mxu1 }
 0x285   : > { %v2733_v22 = vpack.c.bf16 %v2553_v20, %v2551_v18  ;;  %v6485_v15 = vpop.f32.mrb[15].mxu1 }
 0x286   : > { %v2015_v24 = vpop.f32.mrb[24].mxu0 }
 0x287   : > { %v2426_v26 = vmul.f32 0.2, %v2015_v24  ;;  %v2017_v27 = vpop.f32.mrb[25].mxu0  ;;  %3308 = vmatprep.subr.bf16.mxu1 %v2733_v22  ;;  %vm2298_vm8 = vcmp.gt.f32.partialorder %v2015_v24, 0.0 }
 0x288   : > { %v2427_v28 = vmul.f32 0.2, %v2017_v27  ;;  %v2019_v29 = vpop.f32.mrb[26].mxu0  ;;  %3309 = vmatpush1.bf16.msra.mxu1 %v2732_v19  ;;  %vm2299_vm9 = vcmp.gt.f32.partialorder %v2017_v27, 0.0 }
 0x289   : > { %vm2300_vm10 = vcmp.gt.f32.partialorder %v2019_v29, 0.0  ;;  %v2428_v30 = vmul.f32 0.2, %v2019_v29  ;;  %v2021_v31 = vpop.f32.mrb[27].mxu0  ;;  %v2554_v33 = vsel %vm2298_vm8, %v2015_v24, %v2426_v26 }
 0x28a   : > { %vm2301_vm11 = vcmp.gt.f32.partialorder %v2021_v31, 0.0  ;;  %v2429_v32 = vmul.f32 0.2, %v2021_v31  ;;  %v2555_v36 = vsel %vm2299_vm9, %v2017_v27, %v2427_v28 }
 0x28b   : > { %v2556_v34 = vsel %vm2300_vm10, %v2019_v29, %v2428_v30  ;;  %v6487_v29 = vpop.f32.mrb[16].mxu1 }
 0x28c   : > { %v2734_v37 = vpack.c.bf16 %v2556_v34, %v2554_v33  ;;  %v2557_v38 = vsel %vm2301_vm11, %v2021_v31, %v2429_v32  ;;  %v6489_v33 = vpop.f32.mrb[17].mxu1 }
 0x28d   : > { %v2735_v40 = vpack.c.bf16 %v2557_v38, %v2555_v36  ;;  %v6491_v36 = vpop.f32.mrb[18].mxu1 }
 0x28e   : > { %v2025_v42 = vpop.f32.mrb[28].mxu0  ;;  %v6493_v38 = vpop.f32.mrb[19].mxu1 }
 0x28f   : > { %v2430_v44 = vmul.f32 0.2, %v2025_v42  ;;  %v2027_v45 = vpop.f32.mrb[29].mxu0  ;;  %3310 = vmatprep.subr.bf16.mxu1 %v2735_v40  ;;  %vm2302_vm12 = vcmp.gt.f32.partialorder %v2025_v42, 0.0 }
 0x290   : > { %v2431_v46 = vmul.f32 0.2, %v2027_v45  ;;  %v2029_v47 = vpop.f32.mrb[30].mxu0  ;;  %3311 = vmatpush1.bf16.msra.mxu1 %v2734_v37  ;;  %vm2303_vm13 = vcmp.gt.f32.partialorder %v2027_v45, 0.0 }
 0x291   : > { %vm2304_vm14 = vcmp.gt.f32.partialorder %v2029_v47, 0.0  ;;  %v2432_v48 = vmul.f32 0.2, %v2029_v47  ;;  %v2031_v49 = vpop.f32.mrb[31].mxu0  ;;  %v2558_v51 = vsel %vm2302_vm12, %v2025_v42, %v2430_v44 }
 0x292   : > { %vm2305_vm15 = vcmp.gt.f32.partialorder %v2031_v49, 0.0  ;;  %v2433_v50 = vmul.f32 0.2, %v2031_v49  ;;  %v2559_v54 = vsel %vm2303_vm13, %v2027_v45, %v2431_v46 }
 0x293   : > { %v2560_v52 = vsel %vm2304_vm14, %v2029_v47, %v2432_v48 }
 0x294   : > { %v2736_v55 = vpack.c.bf16 %v2560_v52, %v2558_v51  ;;  %v2561_v56 = vsel %vm2305_vm15, %v2031_v49, %v2433_v50  ;;  %v6495_v51 = vpop.f32.mrb[20].mxu1 }
 0x295   : > { %v2737_v58 = vpack.c.bf16 %v2561_v56, %v2559_v54  ;;  %v6497_v56 = vpop.f32.mrb[21].mxu1 }
 0x296   : > { %v2035_v60 = vpop.f32.mrb[32].mxu0 }
 0x297   : > { %v2434_v62 = vmul.f32 0.2, %v2035_v60  ;;  %v2037_v63 = vpop.f32.mrb[33].mxu0  ;;  %3312 = vmatprep.subr.bf16.mxu1 %v2737_v58  ;;  %vm2306_vm0 = vcmp.gt.f32.partialorder %v2035_v60, 0.0 }
 0x298   : > { %v2435_v0 = vmul.f32 0.2, %v2037_v63  ;;  %v2039_v1 = vpop.f32.mrb[34].mxu0  ;;  %3313 = vmatpush1.bf16.msra.mxu1 %v2736_v55  ;;  %vm2307_vm1 = vcmp.gt.f32.partialorder %v2037_v63, 0.0 }
 0x299   : > { %vm2308_vm2 = vcmp.gt.f32.partialorder %v2039_v1, 0.0  ;;  %v2436_v2 = vmul.f32 0.2, %v2039_v1  ;;  %v2041_v3 = vpop.f32.mrb[35].mxu0  ;;  %v2562_v5 = vsel %vm2306_vm0, %v2035_v60, %v2434_v62  ;;  %v6499_v60 = vpop.f32.mrb[22].mxu1 }
 0x29a   : > { %vm2309_vm3 = vcmp.gt.f32.partialorder %v2041_v3, 0.0  ;;  %v2437_v4 = vmul.f32 0.2, %v2041_v3  ;;  %v2563_v8 = vsel %vm2307_vm1, %v2037_v63, %v2435_v0  ;;  %v6501_v63 = vpop.f32.mrb[23].mxu1 }
 0x29b   : > { %v2564_v6 = vsel %vm2308_vm2, %v2039_v1, %v2436_v2 }
 0x29c   : > { %v2738_v9 = vpack.c.bf16 %v2564_v6, %v2562_v5  ;;  %v2565_v10 = vsel %vm2309_vm3, %v2041_v3, %v2437_v4 }
 0x29d   : > { %v2739_v12 = vpack.c.bf16 %v2565_v10, %v2563_v8  ;;  %v6503_v10 = vpop.f32.mrb[24].mxu1 }
 0x29e   : > { %v2045_v14 = vpop.f32.mrb[36].mxu0 }
 0x29f   : > { %v2438_v16 = vmul.f32 0.2, %v2045_v14  ;;  %v2047_v18 = vpop.f32.mrb[37].mxu0  ;;  %3314 = vmatprep.subr.bf16.mxu1 %v2739_v12  ;;  %vm2310_vm4 = vcmp.gt.f32.partialorder %v2045_v14, 0.0 }
 0x2a0   : > { %v2439_v19 = vmul.f32 0.2, %v2047_v18  ;;  %v2049_v20 = vpop.f32.mrb[38].mxu0  ;;  %3315 = vmatpush1.bf16.msra.mxu1 %v2738_v9  ;;  %vm2311_vm5 = vcmp.gt.f32.partialorder %v2047_v18, 0.0 }
 0x2a1   : > { %vm2312_vm6 = vcmp.gt.f32.partialorder %v2049_v20, 0.0  ;;  %v2440_v22 = vmul.f32 0.2, %v2049_v20  ;;  %v2051_v24 = vpop.f32.mrb[39].mxu0  ;;  %v2566_v27 = vsel %vm2310_vm4, %v2045_v14, %v2438_v16 }
 0x2a2   : > { %vm2313_vm7 = vcmp.gt.f32.partialorder %v2051_v24, 0.0  ;;  %v2441_v26 = vmul.f32 0.2, %v2051_v24  ;;  %v2567_v30 = vsel %vm2311_vm5, %v2047_v18, %v2439_v19  ;;  %v6505_v18 = vpop.f32.mrb[25].mxu1 }
 0x2a3   : > { %v2568_v28 = vsel %vm2312_vm6, %v2049_v20, %v2440_v22  ;;  %v6507_v20 = vpop.f32.mrb[26].mxu1 }
 0x2a4   : > { %v2740_v31 = vpack.c.bf16 %v2568_v28, %v2566_v27  ;;  %v2569_v32 = vsel %vm2313_vm7, %v2051_v24, %v2441_v26  ;;  %v2786_v24 = vld [vmem:[%s7022_s6] sm:$0xff]  ;;  %v6512_v26 = vpop.f32.mrb[27].mxu1 }
 0x2a5   : > { %v2741_v34 = vpack.c.bf16 %v2569_v32, %v2567_v30  ;;  %v6105_v30 = vmov 0  }
 0x2a6   : > { %v2055_v37 = vpop.f32.mrb[40].mxu0  ;;  %5467 = vset.pattern.permute.xlu0 %v6105_v30  ;;  %5468 = vset.pattern.permute.xlu1 %v6105_v30 }
 0x2a7   : > { %v2442_v40 = vmul.f32 0.2, %v2055_v37  ;;  %v2057_v42 = vpop.f32.mrb[41].mxu0  ;;  %3316 = vmatprep.subr.bf16.mxu1 %v2741_v34  ;;  %vm2314_vm8 = vcmp.gt.f32.partialorder %v2055_v37, 0.0  ;;  %2820 = vperm.xlu0 %5467, %v2786_v24  }
 0x2a8   : > { %v2443_v44 = vmul.f32 0.2, %v2057_v42  ;;  %v2059_v45 = vpop.f32.mrb[42].mxu0  ;;  %3317 = vmatpush1.bf16.msra.mxu1 %v2740_v31  ;;  %vm2315_vm9 = vcmp.gt.f32.partialorder %v2057_v42, 0.0 }
 0x2a9   : > { %vm2316_vm10 = vcmp.gt.f32.partialorder %v2059_v45, 0.0  ;;  %v2444_v46 = vmul.f32 0.2, %v2059_v45  ;;  %v2061_v47 = vpop.f32.mrb[43].mxu0  ;;  %v2570_v49 = vsel %vm2314_vm8, %v2055_v37, %v2442_v40 }
 0x2aa   : > { %vm2317_vm11 = vcmp.gt.f32.partialorder %v2061_v47, 0.0  ;;  %v2445_v48 = vmul.f32 0.2, %v2061_v47  ;;  %v2571_v52 = vsel %vm2315_vm9, %v2057_v42, %v2443_v44 }
 0x2ab   : > { %v2572_v50 = vsel %vm2316_vm10, %v2059_v45, %v2444_v46  ;;  %v2787_v45 = vld [vmem:[%s7022_s6 + $0x8] sm:$0xff]  ;;  %v6519_v46 = vpop.f32.mrb[28].mxu1 }
 0x2ac   : > { %v2742_v54 = vpack.c.bf16 %v2572_v50, %v2570_v49  ;;  %v2573_v55 = vsel %vm2317_vm11, %v2061_v47, %v2445_v48  ;;  %2825 = vperm.xlu0 %5467, %v2787_v45   ;;  %v6521_v50 = vpop.f32.mrb[29].mxu1 }
 0x2ad   : > { %v2743_v58 = vpack.c.bf16 %v2573_v55, %v2571_v52 }
 0x2ae   : > { %v2065_v62 = vpop.f32.mrb[44].mxu0 }
 0x2af   : > { %v2446_v0 = vmul.f32 0.2, %v2065_v62  ;;  %v2067_v1 = vpop.f32.mrb[45].mxu0  ;;  %3318 = vmatprep.subr.bf16.mxu1 %v2743_v58  ;;  %vm2318_vm12 = vcmp.gt.f32.partialorder %v2065_v62, 0.0  ;;  %v2788_v58 = vld [vmem:[%s7022_s6 + $0x10] sm:$0xff] }
 0x2b0   : > { %v2447_v2 = vmul.f32 0.2, %v2067_v1  ;;  %v2069_v3 = vpop.f32.mrb[46].mxu0  ;;  %3319 = vmatpush1.bf16.msra.mxu1 %v2742_v54  ;;  %vm2319_vm13 = vcmp.gt.f32.partialorder %v2067_v1, 0.0  ;;  %v6523_v54 = vpop.f32.mrb[30].mxu1  ;;  %2830 = vperm.xlu1 %5468, %v2788_v58  }
 0x2b1   : > { %vm2320_vm14 = vcmp.gt.f32.partialorder %v2069_v3, 0.0  ;;  %v2448_v4 = vmul.f32 0.2, %v2069_v3  ;;  %v2071_v5 = vpop.f32.mrb[47].mxu0  ;;  %v2574_v8 = vsel %vm2318_vm12, %v2065_v62, %v2446_v0  ;;  %v2790_v62 = vld [vmem:[%s7022_s6 + $0x20] sm:$0xff]  ;;  %v6531_v0 = vpop.f32.mrb[31].mxu1 }
 0x2b2   : > { %vm2321_vm15 = vcmp.gt.f32.partialorder %v2071_v5, 0.0  ;;  %v2449_v6 = vmul.f32 0.2, %v2071_v5  ;;  %v2575_v12 = vsel %vm2319_vm13, %v2067_v1, %v2447_v2  ;;  %2840 = vperm.xlu0 %5467, %v2790_v62  }
 0x2b3   : > { %v2576_v9 = vsel %vm2320_vm14, %v2069_v3, %v2448_v4 }
 0x2b4   : > { %v2744_v14 = vpack.c.bf16 %v2576_v9, %v2574_v8  ;;  %v2577_v16 = vsel %vm2321_vm15, %v2071_v5, %v2449_v6 }
 0x2b5   : > { %v2745_v19 = vpack.c.bf16 %v2577_v16, %v2575_v12  ;;  %v2792_v16 = vld [vmem:[%s7022_s6 + $0x30] sm:$0xff] }
 0x2b6   : > { %v2075_v22 = vpop.f32.mrb[48].mxu0  ;;  %2850 = vperm.xlu0 %5467, %v2792_v16   ;;  %v2795_v16 = vld [vmem:[%s7022_s6 + $0x48] sm:$0xff] }
 0x2b7   : > { %v2450_v27 = vmul.f32 0.2, %v2075_v22  ;;  %v2077_v28 = vpop.f32.mrb[49].mxu0  ;;  %3320 = vmatprep.subr.bf16.mxu1 %v2745_v19  ;;  %vm2322_vm0 = vcmp.gt.f32.partialorder %v2075_v22, 0.0  ;;  %v6539_v19 = vpop.f32.mrb[32].mxu1 }
 0x2b8   : > { %v2451_v31 = vmul.f32 0.2, %v2077_v28  ;;  %v2079_v32 = vpop.f32.mrb[50].mxu0  ;;  %3321 = vmatpush1.bf16.msra.mxu1 %v2744_v14  ;;  %vm2323_vm1 = vcmp.gt.f32.partialorder %v2077_v28, 0.0  ;;  %v2789_v14 = vld [vmem:[%s7022_s6 + $0x18] sm:$0xff] }
 0x2b9   : > { %vm2324_vm2 = vcmp.gt.f32.partialorder %v2079_v32, 0.0  ;;  %v2452_v34 = vmul.f32 0.2, %v2079_v32  ;;  %v2081_v37 = vpop.f32.mrb[51].mxu0  ;;  %v2578_v42 = vsel %vm2322_vm0, %v2075_v22, %v2450_v27  ;;  %2835 = vperm.xlu1 %5468, %v2789_v14  }
 0x2ba   : > { %vm2325_vm3 = vcmp.gt.f32.partialorder %v2081_v37, 0.0  ;;  %v2453_v40 = vmul.f32 0.2, %v2081_v37  ;;  %v2579_v47 = vsel %vm2323_vm1, %v2077_v28, %v2451_v31  ;;  %v6541_v28 = vpop.f32.mrb[33].mxu1 }
 0x2bb   : > { %v2580_v44 = vsel %vm2324_vm2, %v2079_v32, %v2452_v34  ;;  %v6543_v32 = vpop.f32.mrb[34].mxu1 }
 0x2bc   : > { %v2746_v48 = vpack.c.bf16 %v2580_v44, %v2578_v42  ;;  %v2581_v49 = vsel %vm2325_vm3, %v2081_v37, %v2453_v40  ;;  %v2791_v37 = vld [vmem:[%s7022_s6 + $0x28] sm:$0xff]  ;;  %v2794_v40 = vld [vmem:[%s7022_s6 + $0x40] sm:$0xff]  ;;  %v6551_v42 = vpop.f32.mrb[35].mxu1 }
 0x2bd   : > { %v2747_v52 = vpack.c.bf16 %v2581_v49, %v2579_v47  ;;  %2845 = vperm.xlu1 %5468, %v2791_v37   ;;  %2860 = vperm.xlu0 %5467, %v2794_v40  }
 0x2be   : > { %v2085_v55 = vpop.f32.mrb[52].mxu0 }
 0x2bf   : > { %v2454_v1 = vmul.f32 0.2, %v2085_v55  ;;  %v2087_v2 = vpop.f32.mrb[53].mxu0  ;;  %3322 = vmatprep.subr.bf16.mxu1 %v2747_v52  ;;  %vm2326_vm4 = vcmp.gt.f32.partialorder %v2085_v55, 0.0 }
 0x2c0   : > { %v2455_v3 = vmul.f32 0.2, %v2087_v2  ;;  %v2089_v4 = vpop.f32.mrb[54].mxu0  ;;  %3323 = vmatpush1.bf16.msra.mxu1 %v2746_v48  ;;  %vm2327_vm5 = vcmp.gt.f32.partialorder %v2087_v2, 0.0 }
 0x2c1   : > { %vm2328_vm6 = vcmp.gt.f32.partialorder %v2089_v4, 0.0  ;;  %v2456_v5 = vmul.f32 0.2, %v2089_v4  ;;  %v2091_v6 = vpop.f32.mrb[55].mxu0  ;;  %v2582_v9 = vsel %vm2326_vm4, %v2085_v55, %v2454_v1  ;;  %v2793_v1 = vld [vmem:[%s7022_s6 + $0x38] sm:$0xff] }
 0x2c2   : > { %vm2329_vm7 = vcmp.gt.f32.partialorder %v2091_v6, 0.0  ;;  %v2457_v8 = vmul.f32 0.2, %v2091_v6  ;;  %v2583_v22 = vsel %vm2327_vm5, %v2087_v2, %v2455_v3  ;;  %v2796_v2 = vld [vmem:[%s7022_s6 + $0x50] sm:$0xff]  ;;  %v6559_v3 = vpop.f32.mrb[36].mxu1  ;;  %2855 = vperm.xlu1 %5468, %v2793_v1  }
 0x2c3   : > { %v2584_v12 = vsel %vm2328_vm6, %v2089_v4, %v2456_v5  ;;  %2870 = vperm.xlu0 %5467, %v2796_v2  }
 0x2c4   : > { %v2748_v24 = vpack.c.bf16 %v2584_v12, %v2582_v9  ;;  %v2585_v27 = vsel %vm2329_vm7, %v2091_v6, %v2457_v8  ;;  %v6561_v8 = vpop.f32.mrb[37].mxu1 }
 0x2c5   : > { %v2749_v31 = vpack.c.bf16 %v2585_v27, %v2583_v22  ;;  %v6563_v12 = vpop.f32.mrb[38].mxu1  ;;  %v2798_v22 = vld [vmem:[%s7022_s6 + $0x60] sm:$0xff] }
 0x2c6   : > { %v2095_v34 = vpop.f32.mrb[56].mxu0  ;;  %2865 = vperm.xlu1 %5468, %v2795_v16  }
 0x2c7   : > { %v2458_v44 = vmul.f32 0.2, %v2095_v34  ;;  %v2097_v45 = vpop.f32.mrb[57].mxu0  ;;  %3324 = vmatprep.subr.bf16.mxu1 %v2749_v31  ;;  %vm2330_vm8 = vcmp.gt.f32.partialorder %v2095_v34, 0.0  ;;  %2880 = vperm.xlu0 %5467, %v2798_v22  }
 0x2c8   : > { %v2459_v47 = vmul.f32 0.2, %v2097_v45  ;;  %v2099_v48 = vpop.f32.mrb[58].mxu0  ;;  %3325 = vmatpush1.bf16.msra.mxu1 %v2748_v24  ;;  %vm2331_vm9 = vcmp.gt.f32.partialorder %v2097_v45, 0.0  ;;  %v6571_v24 = vpop.f32.mrb[39].mxu1 }
 0x2c9   : > { %vm2332_vm10 = vcmp.gt.f32.partialorder %v2099_v48, 0.0  ;;  %v2460_v49 = vmul.f32 0.2, %v2099_v48  ;;  %v2101_v52 = vpop.f32.mrb[59].mxu0  ;;  %v2586_v58 = vsel %vm2330_vm8, %v2095_v34, %v2458_v44 }
 0x2ca   : > { %vm2333_vm11 = vcmp.gt.f32.partialorder %v2101_v52, 0.0  ;;  %v2461_v55 = vmul.f32 0.2, %v2101_v52  ;;  %v2587_v4 = vsel %vm2331_vm9, %v2097_v45, %v2459_v47 }
 0x2cb   : > { %v2588_v62 = vsel %vm2332_vm10, %v2099_v48, %v2460_v49  ;;  %v2797_v49 = vld [vmem:[%s7022_s6 + $0x58] sm:$0xff] }
 0x2cc   : > { %v2750_v5 = vpack.c.bf16 %v2588_v62, %v2586_v58  ;;  %v2589_v6 = vsel %vm2333_vm11, %v2101_v52, %v2461_v55  ;;  %v2800_v52 = vld [vmem:[%s7022_s6 + $0x70] sm:$0xff]  ;;  %2875 = vperm.xlu1 %5468, %v2797_v49  }
 0x2cd   : > { %v2751_v9 = vpack.c.bf16 %v2589_v6, %v2587_v4  ;;  %2890 = vperm.xlu0 %5467, %v2800_v52   ;;  %v2799_v4 = vld [vmem:[%s7022_s6 + $0x68] sm:$0xff] }
 0x2ce   : > { %v2105_v14 = vpop.f32.mrb[60].mxu0 }
 0x2cf   : > { %v2462_v27 = vmul.f32 0.2, %v2105_v14  ;;  %v2107_v31 = vpop.f32.mrb[61].mxu0  ;;  %3326 = vmatprep.subr.bf16.mxu1 %v2751_v9  ;;  %vm2334_vm12 = vcmp.gt.f32.partialorder %v2105_v14, 0.0 }
 0x2d0   : > { %v2463_v34 = vmul.f32 0.2, %v2107_v31  ;;  %v2109_v37 = vpop.f32.mrb[62].mxu0  ;;  %3327 = vmatpush1.bf16.msra.mxu1 %v2750_v5  ;;  %vm2335_vm13 = vcmp.gt.f32.partialorder %v2107_v31, 0.0  ;;  %v2802_v5 = vld [vmem:[%s7022_s6 + $0x80] sm:$0xff]  ;;  %2885 = vperm.xlu1 %5468, %v2799_v4  }
 0x2d1   : > { %vm2336_vm14 = vcmp.gt.f32.partialorder %v2109_v37, 0.0  ;;  %v2464_v40 = vmul.f32 0.2, %v2109_v37  ;;  %v2111_v44 = vpop.f32.mrb[63].mxu0  ;;  %v2590_v47 = vsel %vm2334_vm12, %v2105_v14, %v2462_v27  ;;  %v5757_v14 = vld [vmem:[%s7018_s2] ss:$16 sps:$4 sm:$0xff]   ;;  %2900 = vperm.xlu0 %5467, %v2802_v5  }
 0x2d2   : > { %vm2337_vm15 = vcmp.gt.f32.partialorder %v2111_v44, 0.0  ;;  %v2465_v45 = vmul.f32 0.2, %v2111_v44  ;;  %v2591_v55 = vsel %vm2335_vm13, %v2107_v31, %v2463_v34  ;;  %v5760_v27 = vld [vmem:[%s7018_s2 + $0x24] ss:$16 sps:$4 sm:$0xff]  }
 0x2d3   : > { %v2592_v48 = vsel %vm2336_vm14, %v2109_v37, %v2464_v40  ;;  %v2801_v37 = vld [vmem:[%s7022_s6 + $0x78] sm:$0xff]  ;;  %v5762_v5 = vld [vmem:[%s7018_s2 + $0x20] ss:$16 sps:$4 sm:$0xff]  }
 0x2d4   : > { %v2752_v58 = vpack.c.bf16 %v2592_v48, %v2590_v47  ;;  %v2593_v62 = vsel %vm2337_vm15, %v2111_v44, %v2465_v45  ;;  %v2804_v44 = vld [vmem:[%s7022_s6 + $0x90] sm:$0xff]  ;;  %2895 = vperm.xlu1 %5468, %v2801_v37  }
 0x2d5   : > { %v2753_v1 = vpack.c.bf16 %v2593_v62, %v2591_v55  ;;  %2910 = vperm.xlu0 %5467, %v2804_v44  }
 0x2d6   : > { %v2115_v2 = vpop.f32.mrb[64].mxu0 }
 0x2d7   : > { %v2466_v6 = vmul.f32 0.2, %v2115_v2  ;;  %v2117_v9 = vpop.f32.mrb[65].mxu0  ;;  %3328 = vmatprep.subr.bf16.mxu1 %v2753_v1  ;;  %vm2338_vm0 = vcmp.gt.f32.partialorder %v2115_v2, 0.0  ;;  %v2806_v1 = vld [vmem:[%s7022_s6 + $0xa0] sm:$0xff] }
 0x2d8   : > { %v2467_v16 = vmul.f32 0.2, %v2117_v9  ;;  %v2119_v22 = vpop.f32.mrb[66].mxu0  ;;  %3329 = vmatpush1.bf16.msra.mxu1 %v2752_v58  ;;  %vm2339_vm1 = vcmp.gt.f32.partialorder %v2117_v9, 0.0  ;;  %v2803_v58 = vld [vmem:[%s7022_s6 + $0x88] sm:$0xff] }
 0x2d9   : > { %vm2340_vm2 = vcmp.gt.f32.partialorder %v2119_v22, 0.0  ;;  %v2468_v31 = vmul.f32 0.2, %v2119_v22  ;;  %v2121_v34 = vpop.f32.mrb[67].mxu0  ;;  %v2594_v45 = vsel %vm2338_vm0, %v2115_v2, %v2466_v6  ;;  %2905 = vperm.xlu1 %5468, %v2803_v58   ;;  %2920 = vperm.xlu0 %5467, %v2806_v1   ;;  %v5765_v1 = vld [vmem:[%s7018_s2 + $0x40] ss:$16 sps:$4 sm:$0xff]  }
 0x2da   : > { %vm2341_vm3 = vcmp.gt.f32.partialorder %v2121_v34, 0.0  ;;  %v2469_v40 = vmul.f32 0.2, %v2121_v34  ;;  %v2595_v48 = vsel %vm2339_vm1, %v2117_v9, %v2467_v16 }
 0x2db   : > { %v2596_v47 = vsel %vm2340_vm2, %v2119_v22, %v2468_v31  ;;  %3331 = vmatmul.mubr.bf16.vlgmr.msra.gmra.mrb[40].mxu1 %v5757_v14  ;;  %v5763_v14 = vld [vmem:[%s7018_s2 + $0x44] ss:$16 sps:$4 sm:$0xff]  }
 0x2dc   : > { %v2754_v49 = vpack.c.bf16 %v2596_v47, %v2594_v45  ;;  %v2597_v52 = vsel %vm2341_vm3, %v2121_v34, %v2469_v40  ;;  %3340 = vmatprep.mubr.bf16.mxu1 %v5760_v27  ;;  %v2805_v27 = vld [vmem:[%s7022_s6 + $0x98] sm:$0xff]  ;;  %v2808_v34 = vld [vmem:[%s7022_s6 + $0xb0] sm:$0xff] }
 0x2dd   : > { %v2755_v55 = vpack.c.bf16 %v2597_v52, %v2595_v48  ;;  %2915 = vperm.xlu1 %5468, %v2805_v27   ;;  %2930 = vperm.xlu0 %5467, %v2808_v34  }
 0x2de   : > { %v2125_v62 = vpop.f32.mrb[68].mxu0 }
 0x2df   : > { %v2470_v4 = vmul.f32 0.2, %v2125_v62  ;;  %v2127_v2 = vpop.f32.mrb[69].mxu0  ;;  %3491 = vmatprep.subr.bf16.mxu1 %v2755_v55  ;;  %vm2342_vm4 = vcmp.gt.f32.partialorder %v2125_v62, 0.0  ;;  %v2810_v55 = vld [vmem:[%s7022_s6 + $0xc0] sm:$0xff] }
 0x2e0   : > { %v2471_v6 = vmul.f32 0.2, %v2127_v2  ;;  %v2129_v9 = vpop.f32.mrb[70].mxu0  ;;  %3492 = vmatpush1.bf16.msra.mxu1 %v2754_v49  ;;  %vm2343_vm5 = vcmp.gt.f32.partialorder %v2127_v2, 0.0  ;;  %v2807_v49 = vld [vmem:[%s7022_s6 + $0xa8] sm:$0xff] }
 0x2e1   : > { %vm2344_vm6 = vcmp.gt.f32.partialorder %v2129_v9, 0.0  ;;  %v2472_v16 = vmul.f32 0.2, %v2129_v9  ;;  %v2131_v22 = vpop.f32.mrb[71].mxu0  ;;  %v2598_v37 = vsel %vm2342_vm4, %v2125_v62, %v2470_v4  ;;  %2925 = vperm.xlu1 %5468, %v2807_v49   ;;  %2940 = vperm.xlu0 %5467, %v2810_v55   ;;  %v5768_v55 = vld [vmem:[%s7018_s2 + $0x60] ss:$16 sps:$4 sm:$0xff]  }
 0x2e2   : > { %vm2345_vm7 = vcmp.gt.f32.partialorder %v2131_v22, 0.0  ;;  %v2473_v31 = vmul.f32 0.2, %v2131_v22  ;;  %v2599_v44 = vsel %vm2343_vm5, %v2127_v2, %v2471_v6 }
 0x2e3   : > { %v2600_v40 = vsel %vm2344_vm6, %v2129_v9, %v2472_v16  ;;  %3341 = vmatmul.mubr.bf16.gmra.mrb[44].mxu1 %v5762_v5  ;;  %v5766_v5 = vld [vmem:[%s7018_s2 + $0x64] ss:$16 sps:$4 sm:$0xff]  }
 0x2e4   : > { %v2756_v45 = vpack.c.bf16 %v2600_v40, %v2598_v37  ;;  %v2601_v47 = vsel %vm2345_vm7, %v2131_v22, %v2473_v31  ;;  %3350 = vmatprep.mubr.bf16.mxu1 %v5763_v14  ;;  %v2809_v14 = vld [vmem:[%s7022_s6 + $0xb8] sm:$0xff]  ;;  %v2812_v22 = vld [vmem:[%s7022_s6 + $0xd0] sm:$0xff] }
 0x2e5   : > { %v2757_v48 = vpack.c.bf16 %v2601_v47, %v2599_v44  ;;  %2935 = vperm.xlu1 %5468, %v2809_v14   ;;  %2950 = vperm.xlu0 %5467, %v2812_v22  }
 0x2e6   : > { %v2135_v52 = vpop.f32.mrb[72].mxu0 }
 0x2e7   : > { %v2474_v58 = vmul.f32 0.2, %v2135_v52  ;;  %v2137_v62 = vpop.f32.mrb[73].mxu0  ;;  %3493 = vmatprep.subr.bf16.mxu1 %v2757_v48  ;;  %vm2346_vm8 = vcmp.gt.f32.partialorder %v2135_v52, 0.0  ;;  %v2814_v48 = vld [vmem:[%s7022_s6 + $0xe0] sm:$0xff] }
 0x2e8   : > { %v2475_v4 = vmul.f32 0.2, %v2137_v62  ;;  %v2139_v2 = vpop.f32.mrb[74].mxu0  ;;  %3494 = vmatpush1.bf16.msra.mxu1 %v2756_v45  ;;  %vm2347_vm9 = vcmp.gt.f32.partialorder %v2137_v62, 0.0  ;;  %v2811_v45 = vld [vmem:[%s7022_s6 + $0xc8] sm:$0xff] }
 0x2e9   : > { %vm2348_vm10 = vcmp.gt.f32.partialorder %v2139_v2, 0.0  ;;  %v2476_v6 = vmul.f32 0.2, %v2139_v2  ;;  %v2141_v9 = vpop.f32.mrb[75].mxu0  ;;  %v2602_v27 = vsel %vm2346_vm8, %v2135_v52, %v2474_v58  ;;  %2945 = vperm.xlu1 %5468, %v2811_v45   ;;  %2960 = vperm.xlu0 %5467, %v2814_v48   ;;  %v5771_v48 = vld [vmem:[%s7018_s2 + $0x80] ss:$16 sps:$4 sm:$0xff]  }
 0x2ea   : > { %vm2349_vm11 = vcmp.gt.f32.partialorder %v2141_v9, 0.0  ;;  %v2477_v16 = vmul.f32 0.2, %v2141_v9  ;;  %v2603_v34 = vsel %vm2347_vm9, %v2137_v62, %v2475_v4 }
 0x2eb   : > { %v2604_v31 = vsel %vm2348_vm10, %v2139_v2, %v2476_v6  ;;  %3351 = vmatmul.mubr.bf16.gmra.mrb[48].mxu1 %v5765_v1  ;;  %v5769_v1 = vld [vmem:[%s7018_s2 + $0x84] ss:$16 sps:$4 sm:$0xff]  }
 0x2ec   : > { %v2758_v37 = vpack.c.bf16 %v2604_v31, %v2602_v27  ;;  %v2605_v40 = vsel %vm2349_vm11, %v2141_v9, %v2477_v16  ;;  %3360 = vmatprep.mubr.bf16.mxu1 %v5766_v5  ;;  %v2813_v5 = vld [vmem:[%s7022_s6 + $0xd8] sm:$0xff]  ;;  %v2816_v9 = vld [vmem:[%s7022_s6 + $0xf0] sm:$0xff] }
 0x2ed   : > { %v2759_v44 = vpack.c.bf16 %v2605_v40, %v2603_v34  ;;  %2955 = vperm.xlu1 %5468, %v2813_v5   ;;  %2970 = vperm.xlu0 %5467, %v2816_v9  }
 0x2ee   : > { %v2145_v47 = vpop.f32.mrb[76].mxu0 }
 0x2ef   : > { %v2478_v49 = vmul.f32 0.2, %v2145_v47  ;;  %v2147_v52 = vpop.f32.mrb[77].mxu0  ;;  %3495 = vmatprep.subr.bf16.mxu1 %v2759_v44  ;;  %vm2350_vm12 = vcmp.gt.f32.partialorder %v2145_v47, 0.0  ;;  %v3924_v44 = vld [vmem:[%s7023_s7] sm:$0xff] }
 0x2f0   : > { %v2479_v58 = vmul.f32 0.2, %v2147_v52  ;;  %v2149_v62 = vpop.f32.mrb[78].mxu0  ;;  %3496 = vmatpush1.bf16.msra.mxu1 %v2758_v37  ;;  %vm2351_vm13 = vcmp.gt.f32.partialorder %v2147_v52, 0.0  ;;  %v2815_v37 = vld [vmem:[%s7022_s6 + $0xe8] sm:$0xff] }
 0x2f1   : > { %vm2352_vm14 = vcmp.gt.f32.partialorder %v2149_v62, 0.0  ;;  %v2480_v4 = vmul.f32 0.2, %v2149_v62  ;;  %v2151_v2 = vpop.f32.mrb[79].mxu0  ;;  %v2606_v14 = vsel %vm2350_vm12, %v2145_v47, %v2478_v49  ;;  %2965 = vperm.xlu1 %5468, %v2815_v37   ;;  %3942 = vperm.xlu0 %5467, %v3924_v44   ;;  %v5774_v44 = vld [vmem:[%s7018_s2 + $0xa0] ss:$16 sps:$4 sm:$0xff]  }
 0x2f2   : > { %vm2353_vm15 = vcmp.gt.f32.partialorder %v2151_v2, 0.0  ;;  %v2481_v6 = vmul.f32 0.2, %v2151_v2  ;;  %v2607_v22 = vsel %vm2351_vm13, %v2147_v52, %v2479_v58 }
 0x2f3   : > { %v2608_v16 = vsel %vm2352_vm14, %v2149_v62, %v2480_v4  ;;  %3361 = vmatmul.mubr.bf16.gmra.mrb[52].mxu1 %v5768_v55  ;;  %v5772_v55 = vld [vmem:[%s7018_s2 + $0xa4] ss:$16 sps:$4 sm:$0xff]  }
 0x2f4   : > { %v2760_v27 = vpack.c.bf16 %v2608_v16, %v2606_v14  ;;  %v2609_v31 = vsel %vm2353_vm15, %v2151_v2, %v2481_v6  ;;  %3370 = vmatprep.mubr.bf16.mxu1 %v5769_v1  ;;  %v2817_v1 = vld [vmem:[%s7022_s6 + $0xf8] sm:$0xff]  ;;  %v3926_v2 = vld [vmem:[%s7023_s7 + $0x10] sm:$0xff] }
 0x2f5   : > { %v2761_v34 = vpack.c.bf16 %v2609_v31, %v2607_v22  ;;  %2975 = vperm.xlu1 %5468, %v2817_v1   ;;  %3952 = vperm.xlu0 %5467, %v3926_v2  }
 0x2f6   : > { %v2155_v40 = vpop.f32.mrb[80].mxu0 }
 0x2f7   : > { %v2482_v45 = vmul.f32 0.2, %v2155_v40  ;;  %v2157_v47 = vpop.f32.mrb[81].mxu0  ;;  %3497 = vmatprep.subr.bf16.mxu1 %v2761_v34  ;;  %vm2354_vm0 = vcmp.gt.f32.partialorder %v2155_v40, 0.0  ;;  %v3928_v34 = vld [vmem:[%s7023_s7 + $0x20] sm:$0xff] }
 0x2f8   : > { %v2483_v49 = vmul.f32 0.2, %v2157_v47  ;;  %v2159_v52 = vpop.f32.mrb[82].mxu0  ;;  %3498 = vmatpush1.bf16.msra.mxu1 %v2760_v27  ;;  %vm2355_vm1 = vcmp.gt.f32.partialorder %v2157_v47, 0.0  ;;  %v3925_v27 = vld [vmem:[%s7023_s7 + $0x8] sm:$0xff] }
 0x2f9   : > { %vm2356_vm2 = vcmp.gt.f32.partialorder %v2159_v52, 0.0  ;;  %v2484_v58 = vmul.f32 0.2, %v2159_v52  ;;  %v2161_v62 = vpop.f32.mrb[83].mxu0  ;;  %v2610_v5 = vsel %vm2354_vm0, %v2155_v40, %v2482_v45  ;;  %3947 = vperm.xlu1 %5468, %v3925_v27   ;;  %3962 = vperm.xlu0 %5467, %v3928_v34   ;;  %v5777_v34 = vld [vmem:[%s7018_s2 + $0xc0] ss:$16 sps:$4 sm:$0xff]  }
 0x2fa   : > { %vm2357_vm3 = vcmp.gt.f32.partialorder %v2161_v62, 0.0  ;;  %v2485_v4 = vmul.f32 0.2, %v2161_v62  ;;  %v2611_v9 = vsel %vm2355_vm1, %v2157_v47, %v2483_v49 }
 0x2fb   : > { %v2612_v6 = vsel %vm2356_vm2, %v2159_v52, %v2484_v58  ;;  %3371 = vmatmul.mubr.bf16.gmra.mrb[56].mxu1 %v5771_v48  ;;  %v5775_v48 = vld [vmem:[%s7018_s2 + $0xc4] ss:$16 sps:$4 sm:$0xff]  }
 0x2fc   : > { %v2762_v14 = vpack.c.bf16 %v2612_v6, %v2610_v5  ;;  %v2613_v16 = vsel %vm2357_vm3, %v2161_v62, %v2485_v4  ;;  %3380 = vmatprep.mubr.bf16.mxu1 %v5772_v55  ;;  %v3927_v55 = vld [vmem:[%s7023_s7 + $0x18] sm:$0xff]  ;;  %v3930_v62 = vld [vmem:[%s7023_s7 + $0x30] sm:$0xff] }
 0x2fd   : > { %v2763_v22 = vpack.c.bf16 %v2613_v16, %v2611_v9  ;;  %3957 = vperm.xlu1 %5468, %v3927_v55   ;;  %3972 = vperm.xlu0 %5467, %v3930_v62  }
 0x2fe   : > { %v2165_v31 = vpop.f32.mrb[84].mxu0 }
 0x2ff   : > { %v2486_v37 = vmul.f32 0.2, %v2165_v31  ;;  %v2167_v40 = vpop.f32.mrb[85].mxu0  ;;  %3499 = vmatprep.subr.bf16.mxu1 %v2763_v22  ;;  %vm2358_vm4 = vcmp.gt.f32.partialorder %v2165_v31, 0.0  ;;  %v3932_v22 = vld [vmem:[%s7023_s7 + $0x40] sm:$0xff] }
 0x300   : > { %v2487_v45 = vmul.f32 0.2, %v2167_v40  ;;  %v2169_v47 = vpop.f32.mrb[86].mxu0  ;;  %3500 = vmatpush1.bf16.msra.mxu1 %v2762_v14  ;;  %vm2359_vm5 = vcmp.gt.f32.partialorder %v2167_v40, 0.0  ;;  %v3929_v14 = vld [vmem:[%s7023_s7 + $0x28] sm:$0xff] }
 0x301   : > { %vm2360_vm6 = vcmp.gt.f32.partialorder %v2169_v47, 0.0  ;;  %v2488_v49 = vmul.f32 0.2, %v2169_v47  ;;  %v2171_v52 = vpop.f32.mrb[87].mxu0  ;;  %v2614_v1 = vsel %vm2358_vm4, %v2165_v31, %v2486_v37  ;;  %3967 = vperm.xlu1 %5468, %v3929_v14   ;;  %3982 = vperm.xlu0 %5467, %v3932_v22   ;;  %v5780_v22 = vld [vmem:[%s7018_s2 + $0xe0] ss:$16 sps:$4 sm:$0xff]  }
 0x302   : > { %vm2361_vm7 = vcmp.gt.f32.partialorder %v2171_v52, 0.0  ;;  %v2489_v58 = vmul.f32 0.2, %v2171_v52  ;;  %v2615_v2 = vsel %vm2359_vm5, %v2167_v40, %v2487_v45 }
 0x303   : > { %v2616_v4 = vsel %vm2360_vm6, %v2169_v47, %v2488_v49  ;;  %3381 = vmatmul.mubr.bf16.gmra.mrb[60].mxu1 %v5774_v44  ;;  %v5778_v44 = vld [vmem:[%s7018_s2 + $0xe4] ss:$16 sps:$4 sm:$0xff]  }
 0x304   : > { %v2764_v5 = vpack.c.bf16 %v2616_v4, %v2614_v1  ;;  %v2617_v6 = vsel %vm2361_vm7, %v2171_v52, %v2489_v58  ;;  %3390 = vmatprep.mubr.bf16.mxu1 %v5775_v48  ;;  %v3934_v52 = vld [vmem:[%s7023_s7 + $0x50] sm:$0xff]  ;;  %v3933_v1 = vld [vmem:[%s7023_s7 + $0x48] sm:$0xff] }
 0x305   : > { %v2765_v9 = vpack.c.bf16 %v2617_v6, %v2615_v2  ;;  %3992 = vperm.xlu0 %5467, %v3934_v52   ;;  %v3936_v6 = vld [vmem:[%s7023_s7 + $0x60] sm:$0xff] }
 0x306   : > { %v2175_v16 = vpop.f32.mrb[88].mxu0 }
 0x307   : > { %v2176_v27 = vadd.f32 %v2175_v16, %v6455_v17  ;;  %v2177_v31 = vpop.f32.mrb[89].mxu0  ;;  %3501 = vmatprep.subr.bf16.mxu1 %v2765_v9  ;;  %v3931_v17 = vld [vmem:[%s7023_s7 + $0x38] sm:$0xff] }
 0x308   : > { %v2178_v37 = vadd.f32 %v2177_v31, %v6457_v21  ;;  %v2179_v40 = vpop.f32.mrb[90].mxu0  ;;  %3502 = vmatpush1.bf16.msra.mxu1 %v2764_v5  ;;  %3977 = vperm.xlu1 %5468, %v3931_v17  }
 0x309   : > { %v2490_v45 = vmul.f32 0.2, %v2176_v27  ;;  %v2180_v47 = vadd.f32 %v2179_v40, %v6459_v23  ;;  %v2181_v48 = vpop.f32.mrb[91].mxu0  ;;  %vm2362_vm8 = vcmp.gt.f32.partialorder %v2176_v27, 0.0  ;;  %4002 = vperm.xlu0 %5467, %v3936_v6   ;;  %v5784_v6 = vld [vmem:[%s7018_s2 + $0x124] ss:$16 sps:$4 sm:$0xff]  }
 0x30a   : > { %v2491_v49 = vmul.f32 0.2, %v2178_v37  ;;  %v2182_v21 = vadd.f32 %v2181_v48, %v6461_v25  ;;  %vm2363_vm9 = vcmp.gt.f32.partialorder %v2178_v37, 0.0 }
 0x30b   : > { %vm2364_vm10 = vcmp.gt.f32.partialorder %v2180_v47, 0.0  ;;  %v2492_v55 = vmul.f32 0.2, %v2180_v47  ;;  %3391 = vmatmul.mubr.bf16.gmra.mrb[64].mxu1 %v5777_v34  ;;  %v2618_v58 = vsel %vm2362_vm8, %v2176_v27, %v2490_v45  ;;  %v5781_v34 = vld [vmem:[%s7018_s2 + $0x104] ss:$16 sps:$4 sm:$0xff]  }
 0x30c   : > { %vm2365_vm11 = vcmp.gt.f32.partialorder %v2182_v21, 0.0  ;;  %v2493_v23 = vmul.f32 0.2, %v2182_v21  ;;  %3400 = vmatprep.mubr.bf16.mxu1 %v5778_v44  ;;  %v2619_v2 = vsel %vm2363_vm9, %v2178_v37, %v2491_v49  ;;  %3987 = vperm.xlu1 %5468, %v3933_v1  }
 0x30d   : > { %v2620_v62 = vsel %vm2364_vm10, %v2180_v47, %v2492_v55  ;;  %v3938_v47 = vld [vmem:[%s7023_s7 + $0x70] sm:$0xff] }
 0x30e   : > { %v2766_v25 = vpack.c.bf16 %v2620_v62, %v2618_v58  ;;  %v2185_v4 = vpop.f32.mrb[92].mxu0  ;;  %v2621_v5 = vsel %vm2365_vm11, %v2182_v21, %v2493_v23  ;;  %4012 = vperm.xlu0 %5467, %v3938_v47   ;;  %v4333_v58 = vld [vmem:[%s7024_s8] sm:$0xff] }
 0x30f   : > { %v2186_v9 = vadd.f32 %v2185_v4, %v6463_v35  ;;  %v2187_v14 = vpop.f32.mrb[93].mxu0  ;;  %v2767_v16 = vpack.c.bf16 %v2621_v5, %v2619_v2  ;;  %v3935_v35 = vld [vmem:[%s7023_s7 + $0x58] sm:$0xff]  ;;  %v5783_v4 = vld [vmem:[%s7018_s2 + $0x100] ss:$16 sps:$4 sm:$0xff]  }
 0x310   : > { %v2188_v27 = vadd.f32 %v2187_v14, %v6465_v39  ;;  %v2189_v31 = vpop.f32.mrb[94].mxu0  ;;  %3997 = vperm.xlu1 %5468, %v3935_v35  }
 0x311   : > { %v2494_v37 = vmul.f32 0.2, %v2186_v9  ;;  %v2190_v40 = vadd.f32 %v2189_v31, %v6467_v41  ;;  %v2191_v44 = vpop.f32.mrb[95].mxu0  ;;  %3503 = vmatprep.subr.bf16.mxu1 %v2767_v16  ;;  %vm2366_vm12 = vcmp.gt.f32.partialorder %v2186_v9, 0.0 }
 0x312   : > { %v2495_v45 = vmul.f32 0.2, %v2188_v27  ;;  %v2192_v39 = vadd.f32 %v2191_v44, %v6469_v43  ;;  %3504 = vmatpush1.bf16.msra.mxu1 %v2766_v25  ;;  %vm2367_vm13 = vcmp.gt.f32.partialorder %v2188_v27, 0.0  ;;  %v3937_v43 = vld [vmem:[%s7023_s7 + $0x68] sm:$0xff]  ;;  %4343 = vperm.xlu0 %5467, %v4333_v58  }
 0x313   : > { %vm2368_vm14 = vcmp.gt.f32.partialorder %v2190_v40, 0.0  ;;  %v2496_v48 = vmul.f32 0.2, %v2190_v40  ;;  %3401 = vmatmul.mubr.bf16.gmra.mrb[68].mxu1 %v5780_v22  ;;  %v2622_v17 = vsel %vm2366_vm12, %v2186_v9, %v2494_v37 }
 0x314   : > { %vm2369_vm15 = vcmp.gt.f32.partialorder %v2192_v39, 0.0  ;;  %v2497_v41 = vmul.f32 0.2, %v2192_v39  ;;  %3410 = vmatprep.mubr.bf16.mxu1 %v5781_v34  ;;  %v2623_v55 = vsel %vm2367_vm13, %v2188_v27, %v2495_v45  ;;  %4007 = vperm.xlu1 %5468, %v3937_v43   ;;  %v4335_v27 = vld [vmem:[%s7024_s8 + $0x10] sm:$0xff] }
 0x315   : > { %v2624_v49 = vsel %vm2368_vm14, %v2190_v40, %v2496_v48 }
 0x316   : > { %v2768_v21 = vpack.c.bf16 %v2624_v49, %v2622_v17  ;;  %v2195_v52 = vpop.f32.mrb[96].mxu0  ;;  %v2625_v23 = vsel %vm2369_vm15, %v2192_v39, %v2497_v41  ;;  %4353 = vperm.xlu0 %5467, %v4335_v27   ;;  %v4526_v39 = vld [vmem:[%s7054_s23] sm:$0xff] }
 0x317   : > { %v2196_v62 = vadd.f32 %v2195_v52, %v6471_v53  ;;  %v2197_v1 = vpop.f32.mrb[97].mxu0  ;;  %v2769_v25 = vpack.c.bf16 %v2625_v23, %v2623_v55  ;;  %v3939_v53 = vld [vmem:[%s7023_s7 + $0x78] sm:$0xff]  ;;  %v5786_v17 = vld [vmem:[%s7018_s2 + $0x120] ss:$16 sps:$4 sm:$0xff]  }
 0x318   : > { %v2198_v2 = vadd.f32 %v2197_v1, %v6473_v57  ;;  %v2199_v5 = vpop.f32.mrb[98].mxu0  ;;  %4017 = vperm.xlu1 %5468, %v3939_v53  }
 0x319   : > { %v2498_v9 = vmul.f32 0.2, %v2196_v62  ;;  %v2200_v14 = vadd.f32 %v2199_v5, %v6475_v59  ;;  %v2201_v16 = vpop.f32.mrb[99].mxu0  ;;  %3505 = vmatprep.subr.bf16.mxu1 %v2769_v25  ;;  %vm2370_vm0 = vcmp.gt.f32.partialorder %v2196_v62, 0.0 }
 0x31a   : > { %v2499_v22 = vmul.f32 0.2, %v2198_v2  ;;  %v2202_v57 = vadd.f32 %v2201_v16, %v6477_v61  ;;  %3506 = vmatpush1.bf16.msra.mxu1 %v2768_v21  ;;  %vm2371_vm1 = vcmp.gt.f32.partialorder %v2198_v2, 0.0  ;;  %v4334_v61 = vld [vmem:[%s7024_s8 + $0x8] sm:$0xff]  ;;  %v5787_v21 = vld [vmem:[%s7018_s2 + $0x144] ss:$16 sps:$4 sm:$0xff]   ;;  %4536 = vperm.xlu0 %5467, %v4526_v39  }
 0x31b   : > { %vm2372_vm2 = vcmp.gt.f32.partialorder %v2200_v14, 0.0  ;;  %v2500_v31 = vmul.f32 0.2, %v2200_v14  ;;  %3411 = vmatmul.mubr.bf16.gmra.mrb[72].mxu1 %v5783_v4  ;;  %v2626_v34 = vsel %vm2370_vm0, %v2196_v62, %v2498_v9  ;;  %v4337_v62 = vld [vmem:[%s7024_s8 + $0x20] sm:$0xff] }
 0x31c   : > { %vm2373_vm3 = vcmp.gt.f32.partialorder %v2202_v57, 0.0  ;;  %v2501_v59 = vmul.f32 0.2, %v2202_v57  ;;  %3420 = vmatprep.mubr.bf16.mxu1 %v5784_v6  ;;  %v2627_v35 = vsel %vm2371_vm1, %v2198_v2, %v2499_v22  ;;  %4348 = vperm.xlu1 %5468, %v4334_v61  }
 0x31d   : > { %v2628_v37 = vsel %vm2372_vm2, %v2200_v14, %v2500_v31  ;;  %v4338_v14 = vld [vmem:[%s7024_s8 + $0x28] sm:$0xff] }
 0x31e   : > { %v2770_v40 = vpack.c.bf16 %v2628_v37, %v2626_v34  ;;  %v2205_v44 = vpop.f32.mrb[100].mxu0  ;;  %v2629_v45 = vsel %vm2373_vm3, %v2202_v57, %v2501_v59  ;;  %4363 = vperm.xlu0 %5467, %v4337_v62   ;;  %v5789_v57 = vld [vmem:[%s7018_s2 + $0x140] ss:$16 sps:$4 sm:$0xff]   ;;  %v5790_v59 = vld [vmem:[%s7018_s2 + $0x164] ss:$16 sps:$4 sm:$0xff]  }
 0x31f   : > { %v2206_v47 = vadd.f32 %v2205_v44, %v6479_v7  ;;  %v2207_v48 = vpop.f32.mrb[101].mxu0  ;;  %v2771_v41 = vpack.c.bf16 %v2629_v45, %v2627_v35  ;;  %v4336_v7 = vld [vmem:[%s7024_s8 + $0x18] sm:$0xff]  ;;  %v4339_v44 = vld [vmem:[%s7024_s8 + $0x30] sm:$0xff] }
 0x320   : > { %v2208_v49 = vadd.f32 %v2207_v48, %v6481_v11  ;;  %v2209_v43 = vpop.f32.mrb[102].mxu0  ;;  %4358 = vperm.xlu1 %5468, %v4336_v7  }
 0x321   : > { %v2502_v52 = vmul.f32 0.2, %v2206_v47  ;;  %v2210_v55 = vadd.f32 %v2209_v43, %v6483_v13  ;;  %v2211_v23 = vpop.f32.mrb[103].mxu0  ;;  %3507 = vmatprep.subr.bf16.mxu1 %v2771_v41  ;;  %vm2374_vm4 = vcmp.gt.f32.partialorder %v2206_v47, 0.0 }
 0x322   : > { %v2503_v58 = vmul.f32 0.2, %v2208_v49  ;;  %v2212_v11 = vadd.f32 %v2211_v23, %v6485_v15  ;;  %3508 = vmatpush1.bf16.msra.mxu1 %v2770_v40  ;;  %vm2375_vm5 = vcmp.gt.f32.partialorder %v2208_v49, 0.0  ;;  %v4527_v15 = vld [vmem:[%s7054_s23 + $0x8] sm:$0xff]  ;;  %4368 = vperm.xlu0 %5467, %v4338_v14  }
 0x323   : > { %vm2376_vm6 = vcmp.gt.f32.partialorder %v2210_v55, 0.0  ;;  %v2504_v1 = vmul.f32 0.2, %v2210_v55  ;;  %3421 = vmatmul.mubr.bf16.gmra.mrb[76].mxu1 %v5786_v17  ;;  %v2630_v25 = vsel %vm2374_vm4, %v2206_v47, %v2502_v52 }
 0x324   : > { %vm2377_vm7 = vcmp.gt.f32.partialorder %v2212_v11, 0.0  ;;  %v2505_v13 = vmul.f32 0.2, %v2212_v11  ;;  %3430 = vmatprep.mubr.bf16.mxu1 %v5787_v21  ;;  %v2631_v6 = vsel %vm2375_vm5, %v2208_v49, %v2503_v58  ;;  %4541 = vperm.xlu1 %5468, %v4527_v15   ;;  %v4340_v49 = vld [vmem:[%s7024_s8 + $0x38] sm:$0xff]  ;;  %v5793_v58 = vld [vmem:[%s7018_s2 + $0x184] ss:$16 sps:$4 sm:$0xff]  }
 0x325   : > { %v2632_v4 = vsel %vm2376_vm6, %v2210_v55, %v2504_v1  ;;  %v5792_v55 = vld [vmem:[%s7018_s2 + $0x160] ss:$16 sps:$4 sm:$0xff]  }
 0x326   : > { %v2772_v2 = vpack.c.bf16 %v2632_v4, %v2630_v25  ;;  %v2215_v5 = vpop.f32.mrb[104].mxu0  ;;  %v2633_v9 = vsel %vm2377_vm7, %v2212_v11, %v2505_v13  ;;  %4373 = vperm.xlu0 %5467, %v4339_v44   ;;  %v4532_v25 = vld [vmem:[%s7054_s23 + $0x30] sm:$0xff] }
 0x327   : > { %v2216_v16 = vadd.f32 %v2215_v5, %v6487_v29  ;;  %v2217_v53 = vpop.f32.mrb[105].mxu0  ;;  %v2773_v22 = vpack.c.bf16 %v2633_v9, %v2631_v6  ;;  %v4528_v29 = vld [vmem:[%s7054_s23 + $0x10] sm:$0xff] }
 0x328   : > { %v2218_v27 = vadd.f32 %v2217_v53, %v6489_v33  ;;  %v2219_v31 = vpop.f32.mrb[106].mxu0  ;;  %4546 = vperm.xlu1 %5468, %v4528_v29  }
 0x329   : > { %v2506_v34 = vmul.f32 0.2, %v2216_v16  ;;  %v2220_v37 = vadd.f32 %v2219_v31, %v6491_v36  ;;  %v2221_v61 = vpop.f32.mrb[107].mxu0  ;;  %3509 = vmatprep.subr.bf16.mxu1 %v2773_v22  ;;  %vm2378_vm8 = vcmp.gt.f32.partialorder %v2216_v16, 0.0 }
 0x32a   : > { %v2507_v40 = vmul.f32 0.2, %v2218_v27  ;;  %v2222_v33 = vadd.f32 %v2221_v61, %v6493_v38  ;;  %3510 = vmatpush1.bf16.msra.mxu1 %v2772_v2  ;;  %vm2379_vm9 = vcmp.gt.f32.partialorder %v2218_v27, 0.0  ;;  %v4529_v38 = vld [vmem:[%s7054_s23 + $0x18] sm:$0xff]  ;;  %4378 = vperm.xlu0 %5467, %v4340_v49   ;;  %v5799_v49 = vld [vmem:[%s7018_s2 + $0x1c4] ss:$16 sps:$4 sm:$0xff]  }
 0x32b   : > { %vm2380_vm10 = vcmp.gt.f32.partialorder %v2220_v37, 0.0  ;;  %v2508_v35 = vmul.f32 0.2, %v2220_v37  ;;  %3431 = vmatmul.mubr.bf16.gmra.mrb[80].mxu1 %v5789_v57  ;;  %v2634_v45 = vsel %vm2378_vm8, %v2216_v16, %v2506_v34  ;;  %v5795_v57 = vld [vmem:[%s7018_s2 + $0x180] ss:$16 sps:$4 sm:$0xff]  }
 0x32c   : > { %vm2381_vm11 = vcmp.gt.f32.partialorder %v2222_v33, 0.0  ;;  %v2509_v36 = vmul.f32 0.2, %v2222_v33  ;;  %3440 = vmatprep.mubr.bf16.mxu1 %v5790_v59  ;;  %v2635_v41 = vsel %vm2379_vm9, %v2218_v27, %v2507_v40  ;;  %4551 = vperm.xlu1 %5468, %v4529_v38   ;;  %v5796_v59 = vld [vmem:[%s7018_s2 + $0x1a4] ss:$16 sps:$4 sm:$0xff]  }
 0x32d   : > { %v2636_v39 = vsel %vm2380_vm10, %v2220_v37, %v2508_v35 }
 0x32e   : > { %v2774_v47 = vpack.c.bf16 %v2636_v39, %v2634_v45  ;;  %v2225_v48 = vpop.f32.mrb[108].mxu0  ;;  %v2637_v17 = vsel %vm2381_vm11, %v2222_v33, %v2509_v36  ;;  %4566 = vperm.xlu0 %5467, %v4532_v25  }
 0x32f   : > { %v2226_v43 = vadd.f32 %v2225_v48, %v6495_v51  ;;  %v2227_v21 = vpop.f32.mrb[109].mxu0  ;;  %v2775_v52 = vpack.c.bf16 %v2637_v17, %v2635_v41  ;;  %v4530_v51 = vld [vmem:[%s7054_s23 + $0x20] sm:$0xff] }
 0x330   : > { %v2228_v23 = vadd.f32 %v2227_v21, %v6497_v56  ;;  %v2229_v7 = vpop.f32.mrb[110].mxu0  ;;  %4556 = vperm.xlu1 %5468, %v4530_v51  }
 0x331   : > { %v2510_v11 = vmul.f32 0.2, %v2226_v43  ;;  %v2230_v62 = vadd.f32 %v2229_v7, %v6499_v60  ;;  %v2231_v1 = vpop.f32.mrb[111].mxu0  ;;  %3511 = vmatprep.subr.bf16.mxu1 %v2775_v52  ;;  %vm2382_vm12 = vcmp.gt.f32.partialorder %v2226_v43, 0.0 }
 0x332   : > { %v2511_v13 = vmul.f32 0.2, %v2228_v23  ;;  %v2232_v56 = vadd.f32 %v2231_v1, %v6501_v63  ;;  %3512 = vmatpush1.bf16.msra.mxu1 %v2774_v47  ;;  %vm2383_vm13 = vcmp.gt.f32.partialorder %v2228_v23, 0.0  ;;  %v4531_v63 = vld [vmem:[%s7054_s23 + $0x28] sm:$0xff] }
 0x333   : > { %vm2384_vm14 = vcmp.gt.f32.partialorder %v2230_v62, 0.0  ;;  %v2512_v4 = vmul.f32 0.2, %v2230_v62  ;;  %3441 = vmatmul.mubr.bf16.gmra.mrb[84].mxu1 %v5792_v55  ;;  %v2638_v15 = vsel %vm2382_vm12, %v2226_v43, %v2510_v11 }
 0x334   : > { %vm2385_vm15 = vcmp.gt.f32.partialorder %v2232_v56, 0.0  ;;  %v2513_v60 = vmul.f32 0.2, %v2232_v56  ;;  %3450 = vmatprep.mubr.bf16.mxu1 %v5793_v58  ;;  %v2639_v9 = vsel %vm2383_vm13, %v2228_v23, %v2511_v13  ;;  %4561 = vperm.xlu1 %5468, %v4531_v63  }
 0x335   : > { %v2640_v2 = vsel %vm2384_vm14, %v2230_v62, %v2512_v4 }
 0x336   : > { %v2776_v5 = vpack.c.bf16 %v2640_v2, %v2638_v15  ;;  %v2235_v6 = vpop.f32.mrb[112].mxu0  ;;  %v2641_v14 = vsel %vm2385_vm15, %v2232_v56, %v2513_v60  ;;  %v5802_v60 = vld [vmem:[%s7018_s2 + $0x1e4] ss:$16 sps:$4 sm:$0xff]  }
 0x337   : > { %v2236_v16 = vadd.f32 %v2235_v6, %v6503_v10  ;;  %v2237_v53 = vpop.f32.mrb[113].mxu0  ;;  %v2777_v22 = vpack.c.bf16 %v2641_v14, %v2639_v9  ;;  %v4533_v10 = vld [vmem:[%s7054_s23 + $0x38] sm:$0xff] }
 0x338   : > { %v2238_v27 = vadd.f32 %v2237_v53, %v6505_v18  ;;  %v2239_v31 = vpop.f32.mrb[114].mxu0  ;;  %4571 = vperm.xlu1 %5468, %v4533_v10  }
 0x339   : > { %v2514_v34 = vmul.f32 0.2, %v2236_v16  ;;  %v2240_v37 = vadd.f32 %v2239_v31, %v6507_v20  ;;  %v2241_v61 = vpop.f32.mrb[115].mxu0  ;;  %3513 = vmatprep.subr.bf16.mxu1 %v2777_v22  ;;  %vm2386_vm0 = vcmp.gt.f32.partialorder %v2236_v16, 0.0 }
 0x33a   : > { %v2515_v29 = vmul.f32 0.2, %v2238_v27  ;;  %v2242_v40 = vadd.f32 %v2241_v61, %v6512_v26  ;;  %3514 = vmatpush1.bf16.msra.mxu1 %v2776_v5  ;;  %vm2387_vm1 = vcmp.gt.f32.partialorder %v2238_v27, 0.0  ;;  %v5798_v26 = vld [vmem:[%s7018_s2 + $0x1a0] ss:$16 sps:$4 sm:$0xff]  }
 0x33b   : > { %vm2388_vm2 = vcmp.gt.f32.partialorder %v2240_v37, 0.0  ;;  %v2516_v18 = vmul.f32 0.2, %v2240_v37  ;;  %3451 = vmatmul.mubr.bf16.gmra.mrb[88].mxu1 %v5795_v57  ;;  %v2642_v20 = vsel %vm2386_vm0, %v2236_v16, %v2514_v34 }
 0x33c   : > { %vm2389_vm3 = vcmp.gt.f32.partialorder %v2242_v40, 0.0  ;;  %v2517_v33 = vmul.f32 0.2, %v2242_v40  ;;  %3460 = vmatprep.mubr.bf16.mxu1 %v5796_v59  ;;  %v2643_v45 = vsel %vm2387_vm1, %v2238_v27, %v2515_v29 }
 0x33d   : > { %v2644_v44 = vsel %vm2388_vm2, %v2240_v37, %v2516_v18  ;;  %v5807_v37 = vld [vmem:[%s7018_s2 + $0xc] ss:$16 sps:$4 sm:$0xff]  }
 0x33e   : > { %v2778_v35 = vpack.c.bf16 %v2644_v44, %v2642_v20  ;;  %v2245_v36 = vpop.f32.mrb[116].mxu0  ;;  %v2645_v39 = vsel %vm2389_vm3, %v2242_v40, %v2517_v33 }
 0x33f   : > { %v2246_v38 = vadd.f32 %v2245_v36, %v6519_v46  ;;  %v2247_v47 = vpop.f32.mrb[117].mxu0  ;;  %v2779_v48 = vpack.c.bf16 %v2645_v39, %v2643_v45  ;;  %v5805_v45 = vld [vmem:[%s7018_s2 + $0x8] ss:$16 sps:$4 sm:$0xff]  }
 0x340   : > { %v2248_v41 = vadd.f32 %v2247_v47, %v6521_v50  ;;  %v2249_v17 = vpop.f32.mrb[118].mxu0  ;;  %v5810_v39 = vld [vmem:[%s7018_s2 + $0x28] ss:$16 sps:$4 sm:$0xff]  }
 0x341   : > { %v2518_v43 = vmul.f32 0.2, %v2246_v38  ;;  %v2250_v21 = vadd.f32 %v2249_v17, %v6523_v54  ;;  %v2251_v52 = vpop.f32.mrb[119].mxu0  ;;  %3515 = vmatprep.subr.bf16.mxu1 %v2779_v48  ;;  %vm2390_vm4 = vcmp.gt.f32.partialorder %v2246_v38, 0.0  ;;  %v5813_v47 = vld [vmem:[%s7018_s2 + $0x48] ss:$16 sps:$4 sm:$0xff]  }
 0x342   : > { %v2519_v46 = vmul.f32 0.2, %v2248_v41  ;;  %v2252_v55 = vadd.f32 %v2251_v52, %v6531_v0  ;;  %3516 = vmatpush1.bf16.msra.mxu1 %v2778_v35  ;;  %vm2391_vm5 = vcmp.gt.f32.partialorder %v2248_v41, 0.0  ;;  %v5801_v0 = vld [vmem:[%s7018_s2 + $0x1c0] ss:$16 sps:$4 sm:$0xff]  }
 0x343   : > { %vm2392_vm6 = vcmp.gt.f32.partialorder %v2250_v21, 0.0  ;;  %v2520_v23 = vmul.f32 0.2, %v2250_v21  ;;  %3461 = vmatmul.mubr.bf16.gmra.mrb[92].mxu1 %v5798_v26  ;;  %v2646_v7 = vsel %vm2390_vm4, %v2246_v38, %v2518_v43  ;;  %v5811_v38 = vld [vmem:[%s7018_s2 + $0x4c] ss:$16 sps:$4 sm:$0xff]  }
 0x344   : > { %vm2393_vm7 = vcmp.gt.f32.partialorder %v2252_v55, 0.0  ;;  %v2521_v50 = vmul.f32 0.2, %v2252_v55  ;;  %3470 = vmatprep.mubr.bf16.mxu1 %v5799_v49  ;;  %v2647_v1 = vsel %vm2391_vm5, %v2248_v41, %v2519_v46  ;;  %v5814_v48 = vld [vmem:[%s7018_s2 + $0x6c] ss:$16 sps:$4 sm:$0xff]  }
 0x345   : > { %v2648_v58 = vsel %vm2392_vm6, %v2250_v21, %v2520_v23  ;;  %v5816_v26 = vld [vmem:[%s7018_s2 + $0x68] ss:$16 sps:$4 sm:$0xff]   ;;  %v5817_v41 = vld [vmem:[%s7018_s2 + $0x8c] ss:$16 sps:$4 sm:$0xff]  }
 0x346   : > { %v2780_v11 = vpack.c.bf16 %v2648_v58, %v2646_v7  ;;  %v2255_v62 = vpop.f32.mrb[120].mxu0  ;;  %v2649_v54 = vsel %vm2393_vm7, %v2252_v55, %v2521_v50  ;;  %v5819_v17 = vld [vmem:[%s7018_s2 + $0x88] ss:$16 sps:$4 sm:$0xff]   ;;  %v5820_v49 = vld [vmem:[%s7018_s2 + $0xac] ss:$16 sps:$4 sm:$0xff]  }
 0x347   : > { %v2256_v51 = vadd.f32 %v2255_v62, %v6539_v19  ;;  %v2257_v13 = vpop.f32.mrb[121].mxu0  ;;  %v2781_v56 = vpack.c.bf16 %v2649_v54, %v2647_v1  ;;  %v5822_v43 = vld [vmem:[%s7018_s2 + $0xa8] ss:$16 sps:$4 sm:$0xff]   ;;  %v5823_v21 = vld [vmem:[%s7018_s2 + $0xcc] ss:$16 sps:$4 sm:$0xff]  }
 0x348   : > { %v2258_v25 = vadd.f32 %v2257_v13, %v6541_v28  ;;  %v2259_v4 = vpop.f32.mrb[122].mxu0  ;;  %v5825_v52 = vld [vmem:[%s7018_s2 + $0xc8] ss:$16 sps:$4 sm:$0xff]   ;;  %v5826_v46 = vld [vmem:[%s7018_s2 + $0xec] ss:$16 sps:$4 sm:$0xff]  }
 0x349   : > { %v2522_v15 = vmul.f32 0.2, %v2256_v51  ;;  %v2260_v2 = vadd.f32 %v2259_v4, %v6543_v32  ;;  %v2261_v63 = vpop.f32.mrb[123].mxu0  ;;  %3517 = vmatprep.subr.bf16.mxu1 %v2781_v56  ;;  %vm2394_vm8 = vcmp.gt.f32.partialorder %v2256_v51, 0.0  ;;  %v5828_v55 = vld [vmem:[%s7018_s2 + $0xe8] ss:$16 sps:$4 sm:$0xff]  }
 0x34a   : > { %v2523_v19 = vmul.f32 0.2, %v2258_v25  ;;  %v2262_v5 = vadd.f32 %v2261_v63, %v6551_v42  ;;  %3518 = vmatpush1.bf16.msra.mxu1 %v2780_v11  ;;  %vm2395_vm9 = vcmp.gt.f32.partialorder %v2258_v25, 0.0  ;;  %v5804_v42 = vld [vmem:[%s7018_s2 + $0x1e0] ss:$16 sps:$4 sm:$0xff]  }
 0x34b   : > { %vm2396_vm10 = vcmp.gt.f32.partialorder %v2260_v2, 0.0  ;;  %v2524_v6 = vmul.f32 0.2, %v2260_v2  ;;  %3471 = vmatmul.mubr.bf16.gmra.mrb[96].mxu1 %v5801_v0  ;;  %v2650_v9 = vsel %vm2394_vm8, %v2256_v51, %v2522_v15  ;;  %v5829_v23 = vld [vmem:[%s7018_s2 + $0x10c] ss:$16 sps:$4 sm:$0xff]  }
 0x34c   : > { %vm2397_vm11 = vcmp.gt.f32.partialorder %v2262_v5, 0.0  ;;  %v2525_v28 = vmul.f32 0.2, %v2262_v5  ;;  %3480 = vmatprep.mubr.bf16.mxu1 %v5802_v60  ;;  %v2651_v22 = vsel %vm2395_vm9, %v2258_v25, %v2523_v19  ;;  %v5831_v50 = vld [vmem:[%s7018_s2 + $0x108] ss:$16 sps:$4 sm:$0xff]  }
 0x34d   : > { %v2652_v14 = vsel %vm2396_vm10, %v2260_v2, %v2524_v6  ;;  %v5832_v7 = vld [vmem:[%s7018_s2 + $0x12c] ss:$16 sps:$4 sm:$0xff]   ;;  %v5834_v58 = vld [vmem:[%s7018_s2 + $0x128] ss:$16 sps:$4 sm:$0xff]   ;;  %v2821_v2 = vpop.permute.xlu0 %2820 }
 0x34e   : > { %v2782_v16 = vpack.c.bf16 %v2652_v14, %v2650_v9  ;;  %v2265_v53 = vpop.f32.mrb[124].mxu0  ;;  %v2653_v32 = vsel %vm2397_vm11, %v2262_v5, %v2525_v28  ;;  %v5835_v11 = vld [vmem:[%s7018_s2 + $0x14c] ss:$16 sps:$4 sm:$0xff]   ;;  %v5837_v62 = vld [vmem:[%s7018_s2 + $0x148] ss:$16 sps:$4 sm:$0xff]  }
 0x34f   : > { %v2266_v57 = vadd.f32 %v2265_v53, %v6559_v3  ;;  %v2267_v27 = vpop.f32.mrb[125].mxu0  ;;  %v2783_v31 = vpack.c.bf16 %v2653_v32, %v2651_v22  ;;  %v5838_v1 = vld [vmem:[%s7018_s2 + $0x16c] ss:$16 sps:$4 sm:$0xff]   ;;  %v5840_v54 = vld [vmem:[%s7018_s2 + $0x168] ss:$16 sps:$4 sm:$0xff]   ;;  %v2831_v22 = vpop.permute.xlu1 %2830 }
 0x350   : > { %v2268_v59 = vadd.f32 %v2267_v27, %v6561_v8  ;;  %v2269_v34 = vpop.f32.mrb[126].mxu0  ;;  %v5841_v51 = vld [vmem:[%s7018_s2 + $0x18c] ss:$16 sps:$4 sm:$0xff]   ;;  %v5843_v13 = vld [vmem:[%s7018_s2 + $0x188] ss:$16 sps:$4 sm:$0xff]  }
 0x351   : > { %v2526_v61 = vmul.f32 0.2, %v2266_v57  ;;  %v2270_v10 = vadd.f32 %v2269_v34, %v6563_v12  ;;  %v2271_v29 = vpop.f32.mrb[127].mxu0  ;;  %3519 = vmatprep.subr.bf16.mxu1 %v2783_v31  ;;  %vm2398_vm12 = vcmp.gt.f32.partialorder %v2266_v57, 0.0  ;;  %v5844_v56 = vld [vmem:[%s7018_s2 + $0x1ac] ss:$16 sps:$4 sm:$0xff]   ;;  %v2826_v6 = vpop.permute.xlu0 %2825 }
 0x352   : > { %v2527_v3 = vmul.f32 0.2, %v2268_v59  ;;  %v2272_v40 = vadd.f32 %v2271_v29, %v6571_v24  ;;  %3520 = vmatpush1.bf16.msra.mxu1 %v2782_v16  ;;  %vm2399_vm13 = vcmp.gt.f32.partialorder %v2268_v59, 0.0  ;;  %v5808_v24 = vld [vmem:[%s7018_s2 + $0x2c] ss:$16 sps:$4 sm:$0xff]  }
 0x353   : > { %vm2400_vm14 = vcmp.gt.f32.partialorder %v2270_v10, 0.0  ;;  %v2528_v18 = vmul.f32 0.2, %v2270_v10  ;;  %3481 = vmatmul.mubr.bf16.gmra.mrb[100].mxu1 %v5804_v42  ;;  %v2654_v33 = vsel %vm2398_vm12, %v2266_v57, %v2526_v61  ;;  %v5846_v0 = vld [vmem:[%s7018_s2 + $0x1a8] ss:$16 sps:$4 sm:$0xff]  }
 0x354   : > { %vm2401_vm15 = vcmp.gt.f32.partialorder %v2272_v40, 0.0  ;;  %v2529_v8 = vmul.f32 0.2, %v2272_v40  ;;  %3523 = vmatprep.mubr.bf16.mxu1 %v5807_v37  ;;  %v2655_v35 = vsel %vm2399_vm13, %v2268_v59, %v2527_v3  ;;  %v5847_v25 = vld [vmem:[%s7018_s2 + $0x1cc] ss:$16 sps:$4 sm:$0xff]  }
 0x355   : > { %v2656_v20 = vsel %vm2400_vm14, %v2270_v10, %v2528_v18  ;;  %v5849_v4 = vld [vmem:[%s7018_s2 + $0x1c8] ss:$16 sps:$4 sm:$0xff]   ;;  %v5850_v60 = vld [vmem:[%s7018_s2 + $0x1ec] ss:$16 sps:$4 sm:$0xff]  }
 0x356   : > { %v2784_v44 = vpack.c.bf16 %v2656_v20, %v2654_v33  ;;  %v2657_v36 = vsel %vm2401_vm15, %v2272_v40, %v2529_v8  ;;  %v5852_v15 = vld [vmem:[%s7018_s2 + $0x1e8] ss:$16 sps:$4 sm:$0xff]   ;;  %v5855_v31 = vld [vmem:[#allocation7 + $0x4] ss:$8 sps:$4 sm:$0xff]   ;;  %v2836_v8 = vpop.permute.xlu1 %2835 }
 0x357   : > { %v2785_v12 = vpack.c.bf16 %v2657_v36, %v2655_v35 }
 0x359   : > { %3521 = vmatprep.subr.bf16.mxu1 %v2785_v12 }
 0x35a   : > { %3522 = vmatpush1.bf16.msra.mxu1 %v2784_v44 }
 0x35d   : > { %3524 = vmatmul.mubr.bf16.vlgmr.msra.gmra.mrb[40].mxu1 %v5805_v45 }
 0x35e   : > { %3533 = vmatprep.mubr.bf16.mxu1 %v5808_v24 }
 0x365   : > { %3534 = vmatmul.mubr.bf16.gmra.mrb[44].mxu1 %v5810_v39 }
 0x366   : > { %3543 = vmatprep.mubr.bf16.mxu1 %v5811_v38 }
 0x36d   : > { %3544 = vmatmul.mubr.bf16.gmra.mrb[48].mxu1 %v5813_v47 }
 0x36e   : > { %3553 = vmatprep.mubr.bf16.mxu1 %v5814_v48  ;;  %v2841_v48 = vpop.permute.xlu0 %2840 }
 0x375   : > { %3554 = vmatmul.mubr.bf16.gmra.mrb[52].mxu1 %v5816_v26 }
 0x376   : > { %3563 = vmatprep.mubr.bf16.mxu1 %v5817_v41 }
 0x37d   : > { %3564 = vmatmul.mubr.bf16.gmra.mrb[56].mxu1 %v5819_v17 }
 0x37e   : > { %3573 = vmatprep.mubr.bf16.mxu1 %v5820_v49 }
 0x385   : > { %3574 = vmatmul.mubr.bf16.gmra.mrb[60].mxu1 %v5822_v43 }
 0x386   : > { %3583 = vmatprep.mubr.bf16.mxu1 %v5823_v21 }
 0x38d   : > { %3584 = vmatmul.mubr.bf16.gmra.mrb[64].mxu1 %v5825_v52 }
 0x38e   : > { %3593 = vmatprep.mubr.bf16.mxu1 %v5826_v46  ;;  %v2846_v46 = vpop.permute.xlu1 %2845 }
 0x395   : > { %3594 = vmatmul.mubr.bf16.gmra.mrb[68].mxu1 %v5828_v55 }
 0x396   : > { %3603 = vmatprep.mubr.bf16.mxu1 %v5829_v23 }
 0x39d   : > { %3604 = vmatmul.mubr.bf16.gmra.mrb[72].mxu1 %v5831_v50 }
 0x39e   : > { %3613 = vmatprep.mubr.bf16.mxu1 %v5832_v7 }
 0x3a5   : > { %3614 = vmatmul.mubr.bf16.gmra.mrb[76].mxu1 %v5834_v58 }
 0x3a6   : > { %3623 = vmatprep.mubr.bf16.mxu1 %v5835_v11 }
 0x3ad   : > { %3624 = vmatmul.mubr.bf16.gmra.mrb[80].mxu1 %v5837_v62 }
 0x3ae   : > { %3633 = vmatprep.mubr.bf16.mxu1 %v5838_v1 }
 0x3b5   : > { %3634 = vmatmul.mubr.bf16.gmra.mrb[84].mxu1 %v5840_v54 }
 0x3b6   : > { %3643 = vmatprep.mubr.bf16.mxu1 %v5841_v51 }
 0x3bd   : > { %3644 = vmatmul.mubr.bf16.gmra.mrb[88].mxu1 %v5843_v13 }
 0x3be   : > { %3653 = vmatprep.mubr.bf16.mxu1 %v5844_v56  ;;  %v2851_v56 = vpop.permute.xlu0 %2850 }
 0x3c5   : > { %3654 = vmatmul.mubr.bf16.gmra.mrb[92].mxu1 %v5846_v0 }
 0x3c6   : > { %3663 = vmatprep.mubr.bf16.mxu1 %v5847_v25 }
 0x3cd   : > { %3664 = vmatmul.mubr.bf16.gmra.mrb[96].mxu1 %v5849_v4 }
 0x3ce   : > { %3673 = vmatprep.mubr.bf16.mxu1 %v5850_v60 }
 0x3d5   : > { %3674 = vmatmul.mubr.bf16.gmra.mrb[100].mxu1 %v5852_v15 }
 0x3d6   : > { %4132 = vmatprep.mubr.bf16.mxu1 %v5855_v31  ;;  %v2861_v31 = vpop.permute.xlu0 %2860 }
 0x430   : > { %v3525_v63 = vpop.f32.mrb[40].mxu1 }
 0x431   : > { %v5150_v19 = vadd.f32 %v3525_v63, %v2821_v2  ;;  %v3527_v5 = vpop.f32.mrb[41].mxu1 }
 0x432   : > { %v5151_v28 = vadd.f32 %v3527_v5, %v2821_v2  ;;  %v3529_v9 = vpop.f32.mrb[42].mxu1 }
 0x433   : > { %v3748_v14 = vmul.f32 0.2, %v5150_v19  ;;  %v5152_v16 = vadd.f32 %v3529_v9, %v2826_v6  ;;  %v3531_v53 = vpop.f32.mrb[43].mxu1  ;;  %vm3684_vm0 = vcmp.gt.f32.partialorder %v5150_v19, 0.0 }
 0x434   : > { %v3749_v32 = vmul.f32 0.2, %v5151_v28  ;;  %v5153_v57 = vadd.f32 %v3531_v53, %v2826_v6  ;;  %vm3685_vm1 = vcmp.gt.f32.partialorder %v5151_v28, 0.0 }
 0x435   : > { %vm3686_vm2 = vcmp.gt.f32.partialorder %v5152_v16, 0.0  ;;  %v3750_v27 = vmul.f32 0.2, %v5152_v16  ;;  %v3812_v59 = vsel %vm3684_vm0, %v5150_v19, %v3748_v14  ;;  %v2856_v19 = vpop.permute.xlu1 %2855 }
 0x436   : > { %vm3687_vm3 = vcmp.gt.f32.partialorder %v5153_v57, 0.0  ;;  %v3751_v42 = vmul.f32 0.2, %v5153_v57  ;;  %v3813_v10 = vsel %vm3685_vm1, %v5151_v28, %v3749_v32 }
 0x437   : > { %v3814_v34 = vsel %vm3686_vm2, %v5152_v16, %v3750_v27 }
 0x438   : > { %v3892_v37 = vpack.c.bf16 %v3814_v34, %v3812_v59  ;;  %v3535_v61 = vpop.f32.mrb[44].mxu1  ;;  %v3815_v29 = vsel %vm3687_vm3, %v5153_v57, %v3751_v42 }
 0x439   : > { %v5154_v3 = vadd.f32 %v3535_v61, %v2831_v22  ;;  %v3537_v40 = vpop.f32.mrb[45].mxu1  ;;  %v3893_v18 = vpack.c.bf16 %v3815_v29, %v3813_v10 }
 0x43a   : > { %v5155_v33 = vadd.f32 %v3537_v40, %v2831_v22  ;;  %v3539_v20 = vpop.f32.mrb[46].mxu1 }
 0x43b   : > { %v3752_v44 = vmul.f32 0.2, %v5154_v3  ;;  %v5156_v35 = vadd.f32 %v3539_v20, %v2836_v8  ;;  %v3541_v36 = vpop.f32.mrb[47].mxu1  ;;  %4100 = vmatprep.subr.bf16.mxu1 %v3893_v18  ;;  %vm3688_vm4 = vcmp.gt.f32.partialorder %v5154_v3, 0.0 }
 0x43c   : > { %v3753_v12 = vmul.f32 0.2, %v5155_v33  ;;  %v5157_v45 = vadd.f32 %v3541_v36, %v2836_v8  ;;  %4101 = vmatpush1.bf16.msra.mxu1 %v3892_v37  ;;  %vm3689_vm5 = vcmp.gt.f32.partialorder %v5155_v33, 0.0 }
 0x43d   : > { %vm3690_vm6 = vcmp.gt.f32.partialorder %v5156_v35, 0.0  ;;  %v3754_v24 = vmul.f32 0.2, %v5156_v35  ;;  %v3816_v38 = vsel %vm3688_vm4, %v5154_v3, %v3752_v44  ;;  %v2866_v3 = vpop.permute.xlu1 %2865 }
 0x43e   : > { %vm3691_vm7 = vcmp.gt.f32.partialorder %v5157_v45, 0.0  ;;  %v3755_v39 = vmul.f32 0.2, %v5157_v45  ;;  %v3817_v17 = vsel %vm3689_vm5, %v5155_v33, %v3753_v12 }
 0x43f   : > { %v3818_v47 = vsel %vm3690_vm6, %v5156_v35, %v3754_v24 }
 0x440   : > { %v3894_v26 = vpack.c.bf16 %v3818_v47, %v3816_v38  ;;  %v3545_v41 = vpop.f32.mrb[48].mxu1  ;;  %v3819_v49 = vsel %vm3691_vm7, %v5157_v45, %v3755_v39  ;;  %v2871_v39 = vpop.permute.xlu0 %2870 }
 0x441   : > { %v5158_v43 = vadd.f32 %v3545_v41, %v2841_v48  ;;  %v3547_v21 = vpop.f32.mrb[49].mxu1  ;;  %v3895_v52 = vpack.c.bf16 %v3819_v49, %v3817_v17 }
 0x442   : > { %v5159_v55 = vadd.f32 %v3547_v21, %v2841_v48  ;;  %v3549_v23 = vpop.f32.mrb[50].mxu1 }
 0x443   : > { %v3756_v50 = vmul.f32 0.2, %v5158_v43  ;;  %v5160_v7 = vadd.f32 %v3549_v23, %v2846_v46  ;;  %v3551_v58 = vpop.f32.mrb[51].mxu1  ;;  %4102 = vmatprep.subr.bf16.mxu1 %v3895_v52  ;;  %vm3692_vm8 = vcmp.gt.f32.partialorder %v5158_v43, 0.0 }
 0x444   : > { %v3757_v11 = vmul.f32 0.2, %v5159_v55  ;;  %v5161_v62 = vadd.f32 %v3551_v58, %v2846_v46  ;;  %4103 = vmatpush1.bf16.msra.mxu1 %v3894_v26  ;;  %vm3693_vm9 = vcmp.gt.f32.partialorder %v5159_v55, 0.0 }
 0x445   : > { %vm3694_vm10 = vcmp.gt.f32.partialorder %v5160_v7, 0.0  ;;  %v3758_v1 = vmul.f32 0.2, %v5160_v7  ;;  %v3820_v51 = vsel %vm3692_vm8, %v5158_v43, %v3756_v50  ;;  %v2876_v43 = vpop.permute.xlu1 %2875 }
 0x446   : > { %vm3695_vm11 = vcmp.gt.f32.partialorder %v5161_v62, 0.0  ;;  %v3759_v54 = vmul.f32 0.2, %v5161_v62  ;;  %v3821_v4 = vsel %vm3693_vm9, %v5159_v55, %v3757_v11 }
 0x447   : > { %v3822_v13 = vsel %vm3694_vm10, %v5160_v7, %v3758_v1 }
 0x448   : > { %v3896_v0 = vpack.c.bf16 %v3822_v13, %v3820_v51  ;;  %v3555_v25 = vpop.f32.mrb[52].mxu1  ;;  %v3823_v60 = vsel %vm3695_vm11, %v5161_v62, %v3759_v54  ;;  %v2881_v54 = vpop.permute.xlu0 %2880 }
 0x449   : > { %v5162_v15 = vadd.f32 %v3555_v25, %v2851_v56  ;;  %v3557_v2 = vpop.f32.mrb[53].mxu1  ;;  %v3897_v63 = vpack.c.bf16 %v3823_v60, %v3821_v4 }
 0x44a   : > { %v5163_v5 = vadd.f32 %v3557_v2, %v2851_v56  ;;  %v3559_v6 = vpop.f32.mrb[54].mxu1 }
 0x44b   : > { %v3760_v28 = vmul.f32 0.2, %v5162_v15  ;;  %v5164_v9 = vadd.f32 %v3559_v6, %v2856_v19  ;;  %v3561_v14 = vpop.f32.mrb[55].mxu1  ;;  %4104 = vmatprep.subr.bf16.mxu1 %v3897_v63  ;;  %vm3696_vm12 = vcmp.gt.f32.partialorder %v5162_v15, 0.0 }
 0x44c   : > { %v3761_v16 = vmul.f32 0.2, %v5163_v5  ;;  %v5165_v53 = vadd.f32 %v3561_v14, %v2856_v19  ;;  %4105 = vmatpush1.bf16.msra.mxu1 %v3896_v0  ;;  %vm3697_vm13 = vcmp.gt.f32.partialorder %v5163_v5, 0.0 }
 0x44d   : > { %vm3698_vm14 = vcmp.gt.f32.partialorder %v5164_v9, 0.0  ;;  %v3762_v22 = vmul.f32 0.2, %v5164_v9  ;;  %v3824_v57 = vsel %vm3696_vm12, %v5162_v15, %v3760_v28  ;;  %v2886_v15 = vpop.permute.xlu1 %2885 }
 0x44e   : > { %vm3699_vm15 = vcmp.gt.f32.partialorder %v5165_v53, 0.0  ;;  %v3763_v32 = vmul.f32 0.2, %v5165_v53  ;;  %v3825_v34 = vsel %vm3697_vm13, %v5163_v5, %v3761_v16 }
 0x44f   : > { %v3826_v27 = vsel %vm3698_vm14, %v5164_v9, %v3762_v22 }
 0x450   : > { %v3898_v42 = vpack.c.bf16 %v3826_v27, %v3824_v57  ;;  %v3565_v59 = vpop.f32.mrb[56].mxu1  ;;  %v3827_v37 = vsel %vm3699_vm15, %v5165_v53, %v3763_v32  ;;  %v2891_v32 = vpop.permute.xlu0 %2890 }
 0x451   : > { %v5166_v61 = vadd.f32 %v3565_v59, %v2861_v31  ;;  %v3567_v10 = vpop.f32.mrb[57].mxu1  ;;  %v3899_v29 = vpack.c.bf16 %v3827_v37, %v3825_v34 }
 0x452   : > { %v5167_v40 = vadd.f32 %v3567_v10, %v2861_v31  ;;  %v3569_v18 = vpop.f32.mrb[58].mxu1 }
 0x453   : > { %v3764_v8 = vmul.f32 0.2, %v5166_v61  ;;  %v5168_v33 = vadd.f32 %v3569_v18, %v2866_v3  ;;  %v3571_v20 = vpop.f32.mrb[59].mxu1  ;;  %4106 = vmatprep.subr.bf16.mxu1 %v3899_v29  ;;  %vm3700_vm0 = vcmp.gt.f32.partialorder %v5166_v61, 0.0 }
 0x454   : > { %v3765_v44 = vmul.f32 0.2, %v5167_v40  ;;  %v5169_v35 = vadd.f32 %v3571_v20, %v2866_v3  ;;  %4107 = vmatpush1.bf16.msra.mxu1 %v3898_v42  ;;  %vm3701_vm1 = vcmp.gt.f32.partialorder %v5167_v40, 0.0 }
 0x455   : > { %vm3702_vm2 = vcmp.gt.f32.partialorder %v5168_v33, 0.0  ;;  %v3766_v36 = vmul.f32 0.2, %v5168_v33  ;;  %v3828_v45 = vsel %vm3700_vm0, %v5166_v61, %v3764_v8  ;;  %v2896_v61 = vpop.permute.xlu1 %2895 }
 0x456   : > { %vm3703_vm3 = vcmp.gt.f32.partialorder %v5169_v35, 0.0  ;;  %v3767_v12 = vmul.f32 0.2, %v5169_v35  ;;  %v3829_v48 = vsel %vm3701_vm1, %v5167_v40, %v3765_v44 }
 0x457   : > { %v3830_v24 = vsel %vm3702_vm2, %v5168_v33, %v3766_v36 }
 0x458   : > { %v3900_v38 = vpack.c.bf16 %v3830_v24, %v3828_v45  ;;  %v3575_v47 = vpop.f32.mrb[60].mxu1  ;;  %v3831_v26 = vsel %vm3703_vm3, %v5169_v35, %v3767_v12  ;;  %v2901_v12 = vpop.permute.xlu0 %2900 }
 0x459   : > { %v5170_v41 = vadd.f32 %v3575_v47, %v2871_v39  ;;  %v3577_v17 = vpop.f32.mrb[61].mxu1  ;;  %v3901_v49 = vpack.c.bf16 %v3831_v26, %v3829_v48 }
 0x45a   : > { %v5171_v21 = vadd.f32 %v3577_v17, %v2871_v39  ;;  %v3579_v52 = vpop.f32.mrb[62].mxu1 }
 0x45b   : > { %v3768_v46 = vmul.f32 0.2, %v5170_v41  ;;  %v5172_v55 = vadd.f32 %v3579_v52, %v2876_v43  ;;  %v3581_v23 = vpop.f32.mrb[63].mxu1  ;;  %4108 = vmatprep.subr.bf16.mxu1 %v3901_v49  ;;  %vm3704_vm4 = vcmp.gt.f32.partialorder %v5170_v41, 0.0 }
 0x45c   : > { %v3769_v50 = vmul.f32 0.2, %v5171_v21  ;;  %v5173_v7 = vadd.f32 %v3581_v23, %v2876_v43  ;;  %4109 = vmatpush1.bf16.msra.mxu1 %v3900_v38  ;;  %vm3705_vm5 = vcmp.gt.f32.partialorder %v5171_v21, 0.0 }
 0x45d   : > { %vm3706_vm6 = vcmp.gt.f32.partialorder %v5172_v55, 0.0  ;;  %v3770_v58 = vmul.f32 0.2, %v5172_v55  ;;  %v3832_v62 = vsel %vm3704_vm4, %v5170_v41, %v3768_v46  ;;  %v2906_v41 = vpop.permute.xlu1 %2905 }
 0x45e   : > { %vm3707_vm7 = vcmp.gt.f32.partialorder %v5173_v7, 0.0  ;;  %v3771_v11 = vmul.f32 0.2, %v5173_v7  ;;  %v3833_v56 = vsel %vm3705_vm5, %v5171_v21, %v3769_v50 }
 0x45f   : > { %v3834_v1 = vsel %vm3706_vm6, %v5172_v55, %v3770_v58 }
 0x460   : > { %v3902_v51 = vpack.c.bf16 %v3834_v1, %v3832_v62  ;;  %v3585_v13 = vpop.f32.mrb[64].mxu1  ;;  %v3835_v0 = vsel %vm3707_vm7, %v5173_v7, %v3771_v11  ;;  %v2911_v11 = vpop.permute.xlu0 %2910 }
 0x461   : > { %v5174_v25 = vadd.f32 %v3585_v13, %v2881_v54  ;;  %v3587_v4 = vpop.f32.mrb[65].mxu1  ;;  %v3903_v60 = vpack.c.bf16 %v3835_v0, %v3833_v56 }
 0x462   : > { %v5175_v2 = vadd.f32 %v3587_v4, %v2881_v54  ;;  %v3589_v63 = vpop.f32.mrb[66].mxu1 }
 0x463   : > { %v3772_v19 = vmul.f32 0.2, %v5174_v25  ;;  %v5176_v5 = vadd.f32 %v3589_v63, %v2886_v15  ;;  %v3591_v6 = vpop.f32.mrb[67].mxu1  ;;  %4110 = vmatprep.subr.bf16.mxu1 %v3903_v60  ;;  %vm3708_vm8 = vcmp.gt.f32.partialorder %v5174_v25, 0.0 }
 0x464   : > { %v3773_v28 = vmul.f32 0.2, %v5175_v2  ;;  %v5177_v9 = vadd.f32 %v3591_v6, %v2886_v15  ;;  %4111 = vmatpush1.bf16.msra.mxu1 %v3902_v51  ;;  %vm3709_vm9 = vcmp.gt.f32.partialorder %v5175_v2, 0.0 }
 0x465   : > { %vm3710_vm10 = vcmp.gt.f32.partialorder %v5176_v5, 0.0  ;;  %v3774_v14 = vmul.f32 0.2, %v5176_v5  ;;  %v3836_v53 = vsel %vm3708_vm8, %v5174_v25, %v3772_v19  ;;  %v2916_v25 = vpop.permute.xlu1 %2915 }
 0x466   : > { %vm3711_vm11 = vcmp.gt.f32.partialorder %v5177_v9, 0.0  ;;  %v3775_v16 = vmul.f32 0.2, %v5177_v9  ;;  %v3837_v31 = vsel %vm3709_vm9, %v5175_v2, %v3773_v28 }
 0x467   : > { %v3838_v22 = vsel %vm3710_vm10, %v5176_v5, %v3774_v14 }
 0x468   : > { %v3904_v57 = vpack.c.bf16 %v3838_v22, %v3836_v53  ;;  %v3595_v27 = vpop.f32.mrb[68].mxu1  ;;  %v3839_v42 = vsel %vm3711_vm11, %v5177_v9, %v3775_v16  ;;  %v2921_v16 = vpop.permute.xlu0 %2920 }
 0x469   : > { %v5178_v59 = vadd.f32 %v3595_v27, %v2891_v32  ;;  %v3597_v34 = vpop.f32.mrb[69].mxu1  ;;  %v3905_v37 = vpack.c.bf16 %v3839_v42, %v3837_v31 }
 0x46a   : > { %v5179_v10 = vadd.f32 %v3597_v34, %v2891_v32  ;;  %v3599_v29 = vpop.f32.mrb[70].mxu1 }
 0x46b   : > { %v3776_v3 = vmul.f32 0.2, %v5178_v59  ;;  %v5180_v40 = vadd.f32 %v3599_v29, %v2896_v61  ;;  %v3601_v18 = vpop.f32.mrb[71].mxu1  ;;  %4112 = vmatprep.subr.bf16.mxu1 %v3905_v37  ;;  %vm3712_vm12 = vcmp.gt.f32.partialorder %v5178_v59, 0.0 }
 0x46c   : > { %v3777_v8 = vmul.f32 0.2, %v5179_v10  ;;  %v5181_v33 = vadd.f32 %v3601_v18, %v2896_v61  ;;  %4113 = vmatpush1.bf16.msra.mxu1 %v3904_v57  ;;  %vm3713_vm13 = vcmp.gt.f32.partialorder %v5179_v10, 0.0 }
 0x46d   : > { %vm3714_vm14 = vcmp.gt.f32.partialorder %v5180_v40, 0.0  ;;  %v3778_v20 = vmul.f32 0.2, %v5180_v40  ;;  %v3840_v35 = vsel %vm3712_vm12, %v5178_v59, %v3776_v3  ;;  %v2926_v59 = vpop.permute.xlu1 %2925 }
 0x46e   : > { %vm3715_vm15 = vcmp.gt.f32.partialorder %v5181_v33, 0.0  ;;  %v3779_v44 = vmul.f32 0.2, %v5181_v33  ;;  %v3841_v39 = vsel %vm3713_vm13, %v5179_v10, %v3777_v8 }
 0x46f   : > { %v3842_v36 = vsel %vm3714_vm14, %v5180_v40, %v3778_v20 }
 0x470   : > { %v3906_v45 = vpack.c.bf16 %v3842_v36, %v3840_v35  ;;  %v3605_v24 = vpop.f32.mrb[72].mxu1  ;;  %v3843_v38 = vsel %vm3715_vm15, %v5181_v33, %v3779_v44  ;;  %v2931_v44 = vpop.permute.xlu0 %2930 }
 0x471   : > { %v5182_v47 = vadd.f32 %v3605_v24, %v2901_v12  ;;  %v3607_v48 = vpop.f32.mrb[73].mxu1  ;;  %v3907_v26 = vpack.c.bf16 %v3843_v38, %v3841_v39 }
 0x472   : > { %v5183_v17 = vadd.f32 %v3607_v48, %v2901_v12  ;;  %v3609_v49 = vpop.f32.mrb[74].mxu1 }
 0x473   : > { %v3780_v43 = vmul.f32 0.2, %v5182_v47  ;;  %v5184_v21 = vadd.f32 %v3609_v49, %v2906_v41  ;;  %v3611_v52 = vpop.f32.mrb[75].mxu1  ;;  %4114 = vmatprep.subr.bf16.mxu1 %v3907_v26  ;;  %vm3716_vm0 = vcmp.gt.f32.partialorder %v5182_v47, 0.0 }
 0x474   : > { %v3781_v46 = vmul.f32 0.2, %v5183_v17  ;;  %v5185_v55 = vadd.f32 %v3611_v52, %v2906_v41  ;;  %4115 = vmatpush1.bf16.msra.mxu1 %v3906_v45  ;;  %vm3717_vm1 = vcmp.gt.f32.partialorder %v5183_v17, 0.0 }
 0x475   : > { %vm3718_vm2 = vcmp.gt.f32.partialorder %v5184_v21, 0.0  ;;  %v3782_v23 = vmul.f32 0.2, %v5184_v21  ;;  %v3844_v7 = vsel %vm3716_vm0, %v5182_v47, %v3780_v43  ;;  %v2936_v47 = vpop.permute.xlu1 %2935 }
 0x476   : > { %vm3719_vm3 = vcmp.gt.f32.partialorder %v5185_v55, 0.0  ;;  %v3783_v50 = vmul.f32 0.2, %v5185_v55  ;;  %v3845_v54 = vsel %vm3717_vm1, %v5183_v17, %v3781_v46 }
 0x477   : > { %v3846_v58 = vsel %vm3718_vm2, %v5184_v21, %v3782_v23 }
 0x478   : > { %v3908_v62 = vpack.c.bf16 %v3846_v58, %v3844_v7  ;;  %v3615_v1 = vpop.f32.mrb[76].mxu1  ;;  %v3847_v51 = vsel %vm3719_vm3, %v5185_v55, %v3783_v50  ;;  %v2941_v50 = vpop.permute.xlu0 %2940 }
 0x479   : > { %v5186_v13 = vadd.f32 %v3615_v1, %v2911_v11  ;;  %v3617_v56 = vpop.f32.mrb[77].mxu1  ;;  %v3909_v0 = vpack.c.bf16 %v3847_v51, %v3845_v54 }
 0x47a   : > { %v5187_v4 = vadd.f32 %v3617_v56, %v2911_v11  ;;  %v3619_v60 = vpop.f32.mrb[78].mxu1 }
 0x47b   : > { %v3784_v15 = vmul.f32 0.2, %v5186_v13  ;;  %v5188_v2 = vadd.f32 %v3619_v60, %v2916_v25  ;;  %v3621_v63 = vpop.f32.mrb[79].mxu1  ;;  %4116 = vmatprep.subr.bf16.mxu1 %v3909_v0  ;;  %vm3720_vm4 = vcmp.gt.f32.partialorder %v5186_v13, 0.0 }
 0x47c   : > { %v3785_v19 = vmul.f32 0.2, %v5187_v4  ;;  %v5189_v5 = vadd.f32 %v3621_v63, %v2916_v25  ;;  %4117 = vmatpush1.bf16.msra.mxu1 %v3908_v62  ;;  %vm3721_vm5 = vcmp.gt.f32.partialorder %v5187_v4, 0.0 }
 0x47d   : > { %vm3722_vm6 = vcmp.gt.f32.partialorder %v5188_v2, 0.0  ;;  %v3786_v6 = vmul.f32 0.2, %v5188_v2  ;;  %v3848_v9 = vsel %vm3720_vm4, %v5186_v13, %v3784_v15  ;;  %v2946_v13 = vpop.permute.xlu1 %2945 }
 0x47e   : > { %vm3723_vm7 = vcmp.gt.f32.partialorder %v5189_v5, 0.0  ;;  %v3787_v28 = vmul.f32 0.2, %v5189_v5  ;;  %v3849_v32 = vsel %vm3721_vm5, %v5187_v4, %v3785_v19 }
 0x47f   : > { %v3850_v14 = vsel %vm3722_vm6, %v5188_v2, %v3786_v6 }
 0x480   : > { %v3910_v53 = vpack.c.bf16 %v3850_v14, %v3848_v9  ;;  %v3625_v22 = vpop.f32.mrb[80].mxu1  ;;  %v3851_v57 = vsel %vm3723_vm7, %v5189_v5, %v3787_v28  ;;  %v2951_v28 = vpop.permute.xlu0 %2950 }
 0x481   : > { %v5190_v27 = vadd.f32 %v3625_v22, %v2921_v16  ;;  %v3627_v31 = vpop.f32.mrb[81].mxu1  ;;  %v3911_v42 = vpack.c.bf16 %v3851_v57, %v3849_v32 }
 0x482   : > { %v5191_v34 = vadd.f32 %v3627_v31, %v2921_v16  ;;  %v3629_v37 = vpop.f32.mrb[82].mxu1 }
 0x483   : > { %v3788_v61 = vmul.f32 0.2, %v5190_v27  ;;  %v5192_v10 = vadd.f32 %v3629_v37, %v2926_v59  ;;  %v3631_v29 = vpop.f32.mrb[83].mxu1  ;;  %4118 = vmatprep.subr.bf16.mxu1 %v3911_v42  ;;  %vm3724_vm8 = vcmp.gt.f32.partialorder %v5190_v27, 0.0 }
 0x484   : > { %v3789_v3 = vmul.f32 0.2, %v5191_v34  ;;  %v5193_v40 = vadd.f32 %v3631_v29, %v2926_v59  ;;  %4119 = vmatpush1.bf16.msra.mxu1 %v3910_v53  ;;  %vm3725_vm9 = vcmp.gt.f32.partialorder %v5191_v34, 0.0 }
 0x485   : > { %vm3726_vm10 = vcmp.gt.f32.partialorder %v5192_v10, 0.0  ;;  %v3790_v18 = vmul.f32 0.2, %v5192_v10  ;;  %v3852_v33 = vsel %vm3724_vm8, %v5190_v27, %v3788_v61  ;;  %v2956_v27 = vpop.permute.xlu1 %2955 }
 0x486   : > { %vm3727_vm11 = vcmp.gt.f32.partialorder %v5193_v40, 0.0  ;;  %v3791_v8 = vmul.f32 0.2, %v5193_v40  ;;  %v3853_v12 = vsel %vm3725_vm9, %v5191_v34, %v3789_v3 }
 0x487   : > { %v3854_v20 = vsel %vm3726_vm10, %v5192_v10, %v3790_v18 }
 0x488   : > { %v3912_v35 = vpack.c.bf16 %v3854_v20, %v3852_v33  ;;  %v3635_v36 = vpop.f32.mrb[84].mxu1  ;;  %v3855_v45 = vsel %vm3727_vm11, %v5193_v40, %v3791_v8  ;;  %v2961_v8 = vpop.permute.xlu0 %2960 }
 0x489   : > { %v5194_v24 = vadd.f32 %v3635_v36, %v2931_v44  ;;  %v3637_v39 = vpop.f32.mrb[85].mxu1  ;;  %v3913_v38 = vpack.c.bf16 %v3855_v45, %v3853_v12 }
 0x48a   : > { %v5195_v48 = vadd.f32 %v3637_v39, %v2931_v44  ;;  %v3639_v26 = vpop.f32.mrb[86].mxu1 }
 0x48b   : > { %v3792_v41 = vmul.f32 0.2, %v5194_v24  ;;  %v5196_v17 = vadd.f32 %v3639_v26, %v2936_v47  ;;  %v3641_v49 = vpop.f32.mrb[87].mxu1  ;;  %4120 = vmatprep.subr.bf16.mxu1 %v3913_v38  ;;  %vm3728_vm12 = vcmp.gt.f32.partialorder %v5194_v24, 0.0 }
 0x48c   : > { %v3793_v43 = vmul.f32 0.2, %v5195_v48  ;;  %v5197_v21 = vadd.f32 %v3641_v49, %v2936_v47  ;;  %4121 = vmatpush1.bf16.msra.mxu1 %v3912_v35  ;;  %vm3729_vm13 = vcmp.gt.f32.partialorder %v5195_v48, 0.0 }
 0x48d   : > { %vm3730_vm14 = vcmp.gt.f32.partialorder %v5196_v17, 0.0  ;;  %v3794_v52 = vmul.f32 0.2, %v5196_v17  ;;  %v3856_v55 = vsel %vm3728_vm12, %v5194_v24, %v3792_v41  ;;  %v2966_v24 = vpop.permute.xlu1 %2965 }
 0x48e   : > { %vm3731_vm15 = vcmp.gt.f32.partialorder %v5197_v21, 0.0  ;;  %v3795_v46 = vmul.f32 0.2, %v5197_v21  ;;  %v3857_v11 = vsel %vm3729_vm13, %v5195_v48, %v3793_v43 }
 0x48f   : > { %v3858_v23 = vsel %vm3730_vm14, %v5196_v17, %v3794_v52 }
 0x490   : > { %v3914_v7 = vpack.c.bf16 %v3858_v23, %v3856_v55  ;;  %v3645_v58 = vpop.f32.mrb[88].mxu1  ;;  %v3859_v62 = vsel %vm3731_vm15, %v5197_v21, %v3795_v46  ;;  %v2971_v46 = vpop.permute.xlu0 %2970 }
 0x491   : > { %v5198_v1 = vadd.f32 %v3645_v58, %v2941_v50  ;;  %v3647_v54 = vpop.f32.mrb[89].mxu1  ;;  %v3915_v51 = vpack.c.bf16 %v3859_v62, %v3857_v11 }
 0x492   : > { %v5199_v56 = vadd.f32 %v3647_v54, %v2941_v50  ;;  %v3649_v0 = vpop.f32.mrb[90].mxu1 }
 0x493   : > { %v3796_v25 = vmul.f32 0.2, %v5198_v1  ;;  %v5200_v4 = vadd.f32 %v3649_v0, %v2946_v13  ;;  %v3651_v60 = vpop.f32.mrb[91].mxu1  ;;  %4122 = vmatprep.subr.bf16.mxu1 %v3915_v51  ;;  %vm3732_vm0 = vcmp.gt.f32.partialorder %v5198_v1, 0.0 }
 0x494   : > { %v3797_v15 = vmul.f32 0.2, %v5199_v56  ;;  %v5201_v2 = vadd.f32 %v3651_v60, %v2946_v13  ;;  %4123 = vmatpush1.bf16.msra.mxu1 %v3914_v7  ;;  %vm3733_vm1 = vcmp.gt.f32.partialorder %v5199_v56, 0.0 }
 0x495   : > { %vm3734_vm2 = vcmp.gt.f32.partialorder %v5200_v4, 0.0  ;;  %v3798_v63 = vmul.f32 0.2, %v5200_v4  ;;  %v3860_v5 = vsel %vm3732_vm0, %v5198_v1, %v3796_v25  ;;  %v2976_v1 = vpop.permute.xlu1 %2975 }
 0x496   : > { %vm3735_vm3 = vcmp.gt.f32.partialorder %v5201_v2, 0.0  ;;  %v3799_v19 = vmul.f32 0.2, %v5201_v2  ;;  %v3861_v16 = vsel %vm3733_vm1, %v5199_v56, %v3797_v15 }
 0x497   : > { %v3862_v6 = vsel %vm3734_vm2, %v5200_v4, %v3798_v63 }
 0x498   : > { %v3916_v9 = vpack.c.bf16 %v3862_v6, %v3860_v5  ;;  %v3655_v14 = vpop.f32.mrb[92].mxu1  ;;  %v3863_v53 = vsel %vm3735_vm3, %v5201_v2, %v3799_v19 }
 0x499   : > { %v5202_v22 = vadd.f32 %v3655_v14, %v2951_v28  ;;  %v3657_v32 = vpop.f32.mrb[93].mxu1  ;;  %v3917_v57 = vpack.c.bf16 %v3863_v53, %v3861_v16  ;;  %v5856_v14 = vld [vmem:[#allocation7 + $0x14] ss:$8 sps:$4 sm:$0xff]   ;;  %v5858_v16 = vld [vmem:[#allocation7 + $0x10] ss:$8 sps:$4 sm:$0xff]  }
 0x49a   : > { %v5203_v31 = vadd.f32 %v3657_v32, %v2951_v28  ;;  %v3659_v42 = vpop.f32.mrb[94].mxu1  ;;  %v5859_v53 = vld [vmem:[#allocation7 + $0x24] ss:$8 sps:$4 sm:$0xff]   ;;  %v5862_v32 = vld [vmem:[#allocation7 + $0x34] ss:$8 sps:$4 sm:$0xff]  }
 0x49b   : > { %v3800_v59 = vmul.f32 0.2, %v5202_v22  ;;  %v5204_v34 = vadd.f32 %v3659_v42, %v2956_v27  ;;  %v3661_v37 = vpop.f32.mrb[95].mxu1  ;;  %4124 = vmatprep.subr.bf16.mxu1 %v3917_v57  ;;  %vm3736_vm4 = vcmp.gt.f32.partialorder %v5202_v22, 0.0  ;;  %v5864_v57 = vld [vmem:[#allocation7 + $0x30] ss:$8 sps:$4 sm:$0xff]  }
 0x49c   : > { %v3801_v61 = vmul.f32 0.2, %v5203_v31  ;;  %v5205_v10 = vadd.f32 %v3661_v37, %v2956_v27  ;;  %4125 = vmatpush1.bf16.msra.mxu1 %v3916_v9  ;;  %vm3737_vm5 = vcmp.gt.f32.partialorder %v5203_v31, 0.0  ;;  %v5853_v9 = vld [vmem:[#allocation7] ss:$8 sps:$4 sm:$0xff]  }
 0x49d   : > { %vm3738_vm6 = vcmp.gt.f32.partialorder %v5204_v34, 0.0  ;;  %v3802_v29 = vmul.f32 0.2, %v5204_v34  ;;  %v3864_v40 = vsel %vm3736_vm4, %v5202_v22, %v3800_v59  ;;  %v5861_v22 = vld [vmem:[#allocation7 + $0x20] ss:$8 sps:$4 sm:$0xff]  }
 0x49e   : > { %vm3739_vm7 = vcmp.gt.f32.partialorder %v5205_v10, 0.0  ;;  %v3803_v3 = vmul.f32 0.2, %v5205_v10  ;;  %v3865_v44 = vsel %vm3737_vm5, %v5203_v31, %v3801_v61  ;;  %v5865_v27 = vld [vmem:[#allocation7 + $0x44] ss:$8 sps:$4 sm:$0xff]  }
 0x49f   : > { %v3866_v18 = vsel %vm3738_vm6, %v5204_v34, %v3802_v29  ;;  %v5867_v31 = vld [vmem:[#allocation7 + $0x40] ss:$8 sps:$4 sm:$0xff]   ;;  %v5868_v42 = vld [vmem:[#allocation7 + $0x54] ss:$8 sps:$4 sm:$0xff]   ;;  %v5870_v59 = vld [vmem:[#allocation7 + $0x50] ss:$8 sps:$4 sm:$0xff]   ;;  %v3943_v29 = vpop.permute.xlu0 %3942 }
 0x4a0   : > { %v3918_v33 = vpack.c.bf16 %v3866_v18, %v3864_v40  ;;  %v3665_v20 = vpop.f32.mrb[96].mxu1  ;;  %v3867_v35 = vsel %vm3739_vm7, %v5205_v10, %v3803_v3  ;;  %v5871_v34 = vld [vmem:[#allocation7 + $0x64] ss:$8 sps:$4 sm:$0xff]   ;;  %v5873_v37 = vld [vmem:[#allocation7 + $0x60] ss:$8 sps:$4 sm:$0xff]  }
 0x4a1   : > { %v5206_v36 = vadd.f32 %v3665_v20, %v2961_v8  ;;  %v3667_v12 = vpop.f32.mrb[97].mxu1  ;;  %v3919_v45 = vpack.c.bf16 %v3867_v35, %v3865_v44  ;;  %v5874_v61 = vld [vmem:[#allocation7 + $0x74] ss:$8 sps:$4 sm:$0xff]   ;;  %v5876_v10 = vld [vmem:[#allocation7 + $0x70] ss:$8 sps:$4 sm:$0xff]  }
 0x4a2   : > { %v5207_v39 = vadd.f32 %v3667_v12, %v2961_v8  ;;  %v3669_v38 = vpop.f32.mrb[98].mxu1  ;;  %v3948_v8 = vpop.permute.xlu1 %3947 }
 0x4a3   : > { %v3804_v47 = vmul.f32 0.2, %v5206_v36  ;;  %v5208_v48 = vadd.f32 %v3669_v38, %v2966_v24  ;;  %v3671_v26 = vpop.f32.mrb[99].mxu1  ;;  %4126 = vmatprep.subr.bf16.mxu1 %v3919_v45  ;;  %vm3740_vm8 = vcmp.gt.f32.partialorder %v5206_v36, 0.0 }
 0x4a4   : > { %v3805_v41 = vmul.f32 0.2, %v5207_v39  ;;  %v5209_v17 = vadd.f32 %v3671_v26, %v2966_v24  ;;  %4127 = vmatpush1.bf16.msra.mxu1 %v3918_v33  ;;  %vm3741_vm9 = vcmp.gt.f32.partialorder %v5207_v39, 0.0 }
 0x4a5   : > { %vm3742_vm10 = vcmp.gt.f32.partialorder %v5208_v48, 0.0  ;;  %v3806_v49 = vmul.f32 0.2, %v5208_v48  ;;  %v3868_v21 = vsel %vm3740_vm8, %v5206_v36, %v3804_v47 }
 0x4a6   : > { %vm3743_vm11 = vcmp.gt.f32.partialorder %v5209_v17, 0.0  ;;  %v3807_v43 = vmul.f32 0.2, %v5209_v17  ;;  %v3869_v50 = vsel %vm3741_vm9, %v5207_v39, %v3805_v41 }
 0x4a7   : > { %v3870_v52 = vsel %vm3742_vm10, %v5208_v48, %v3806_v49  ;;  %v3953_v48 = vpop.permute.xlu0 %3952 }
 0x4a8   : > { %v3920_v55 = vpack.c.bf16 %v3870_v52, %v3868_v21  ;;  %v3675_v23 = vpop.f32.mrb[100].mxu1  ;;  %v3871_v7 = vsel %vm3743_vm11, %v5209_v17, %v3807_v43 }
 0x4a9   : > { %v5210_v58 = vadd.f32 %v3675_v23, %v2971_v46  ;;  %v3677_v11 = vpop.f32.mrb[101].mxu1  ;;  %v3921_v62 = vpack.c.bf16 %v3871_v7, %v3869_v50 }
 0x4aa   : > { %v5211_v54 = vadd.f32 %v3677_v11, %v2971_v46  ;;  %v3679_v51 = vpop.f32.mrb[102].mxu1  ;;  %v3958_v46 = vpop.permute.xlu1 %3957 }
 0x4ab   : > { %v3808_v13 = vmul.f32 0.2, %v5210_v58  ;;  %v5212_v56 = vadd.f32 %v3679_v51, %v2976_v1  ;;  %v3681_v0 = vpop.f32.mrb[103].mxu1  ;;  %4128 = vmatprep.subr.bf16.mxu1 %v3921_v62  ;;  %vm3744_vm12 = vcmp.gt.f32.partialorder %v5210_v58, 0.0 }
 0x4ac   : > { %v3809_v25 = vmul.f32 0.2, %v5211_v54  ;;  %v5213_v4 = vadd.f32 %v3681_v0, %v2976_v1  ;;  %4129 = vmatpush1.bf16.msra.mxu1 %v3920_v55  ;;  %vm3745_vm13 = vcmp.gt.f32.partialorder %v5211_v54, 0.0 }
 0x4ad   : > { %vm3746_vm14 = vcmp.gt.f32.partialorder %v5212_v56, 0.0  ;;  %v3810_v60 = vmul.f32 0.2, %v5212_v56  ;;  %v3872_v2 = vsel %vm3744_vm12, %v5210_v58, %v3808_v13 }
 0x4ae   : > { %vm3747_vm15 = vcmp.gt.f32.partialorder %v5213_v4, 0.0  ;;  %v3811_v15 = vmul.f32 0.2, %v5213_v4  ;;  %v3873_v5 = vsel %vm3745_vm13, %v5211_v54, %v3809_v25 }
 0x4af   : > { %v3874_v63 = vsel %vm3746_vm14, %v5212_v56, %v3810_v60  ;;  %v3963_v56 = vpop.permute.xlu0 %3962 }
 0x4b0   : > { %v3922_v19 = vpack.c.bf16 %v3874_v63, %v3872_v2  ;;  %v3875_v6 = vsel %vm3747_vm15, %v5213_v4, %v3811_v15 }
 0x4b1   : > { %v3923_v28 = vpack.c.bf16 %v3875_v6, %v3873_v5 }
 0x4b3   : > { %4130 = vmatprep.subr.bf16.mxu1 %v3923_v28 }
 0x4b4   : > { %4131 = vmatpush1.bf16.msra.mxu1 %v3922_v19  ;;  %v3968_v19 = vpop.permute.xlu1 %3967 }
 0x4b7   : > { %4133 = vmatmul.mubr.bf16.vlgmr.msra.gmra.mrb[104].mxu1 %v5853_v9 }
 0x4b8   : > { %4142 = vmatprep.mubr.bf16.mxu1 %v5856_v14 }
 0x4bf   : > { %4143 = vmatmul.mubr.bf16.gmra.mrb[108].mxu1 %v5858_v16 }
 0x4c0   : > { %4152 = vmatprep.mubr.bf16.mxu1 %v5859_v53 }
 0x4c7   : > { %4153 = vmatmul.mubr.bf16.gmra.mrb[112].mxu1 %v5861_v22 }
 0x4c8   : > { %4162 = vmatprep.mubr.bf16.mxu1 %v5862_v32 }
 0x4cf   : > { %4163 = vmatmul.mubr.bf16.gmra.mrb[116].mxu1 %v5864_v57 }
 0x4d0   : > { %4172 = vmatprep.mubr.bf16.mxu1 %v5865_v27 }
 0x4d7   : > { %4173 = vmatmul.mubr.bf16.gmra.mrb[120].mxu1 %v5867_v31  ;;  %v3973_v31 = vpop.permute.xlu0 %3972 }
 0x4d8   : > { %4182 = vmatprep.mubr.bf16.mxu1 %v5868_v42 }
 0x4df   : > { %4183 = vmatmul.mubr.bf16.gmra.mrb[124].mxu1 %v5870_v59 }
 0x4e0   : > { %4192 = vmatprep.mubr.bf16.mxu1 %v5871_v34 }
 0x4e7   : > { %4193 = vmatmul.mubr.bf16.gmra.mrb[128].mxu1 %v5873_v37 }
 0x4e8   : > { %4202 = vmatprep.mubr.bf16.mxu1 %v5874_v61 }
 0x4ef   : > { %4203 = vmatmul.mubr.bf16.gmra.mrb[132].mxu1 %v5876_v10 }
 0x4f0   : > { %4437 = vmatprep.mubr.bf16.mxu1 %v6105_v30 }
 0x58a   : > { %v4134_v3 = vpop.f32.mrb[104].mxu1 }
 0x58b   : > { %v4135_v40 = vadd.f32 %v4134_v3, %v3943_v29  ;;  %v4136_v18 = vpop.f32.mrb[105].mxu1  ;;  %v3978_v3 = vpop.permute.xlu1 %3977 }
 0x58c   : > { %v4137_v33 = vadd.f32 %v4136_v18, %v3943_v29  ;;  %v4138_v20 = vpop.f32.mrb[106].mxu1 }
 0x58d   : > { %v4245_v44 = vmul.f32 0.2, %v4135_v40  ;;  %v4139_v35 = vadd.f32 %v4138_v20, %v3948_v8  ;;  %v4140_v36 = vpop.f32.mrb[107].mxu1  ;;  %vm4213_vm0 = vcmp.gt.f32.partialorder %v4135_v40, 0.0 }
 0x58e   : > { %v4246_v12 = vmul.f32 0.2, %v4137_v33  ;;  %v4141_v45 = vadd.f32 %v4140_v36, %v3948_v8  ;;  %vm4214_vm1 = vcmp.gt.f32.partialorder %v4137_v33, 0.0 }
 0x58f   : > { %vm4215_vm2 = vcmp.gt.f32.partialorder %v4139_v35, 0.0  ;;  %v4247_v24 = vmul.f32 0.2, %v4139_v35  ;;  %v4277_v38 = vsel %vm4213_vm0, %v4135_v40, %v4245_v44 }
 0x590   : > { %vm4216_vm3 = vcmp.gt.f32.partialorder %v4141_v45, 0.0  ;;  %v4248_v39 = vmul.f32 0.2, %v4141_v45  ;;  %v4278_v17 = vsel %vm4214_vm1, %v4137_v33, %v4246_v12 }
 0x591   : > { %v4279_v47 = vsel %vm4215_vm2, %v4139_v35, %v4247_v24 }
 0x592   : > { %v4317_v26 = vpack.c.bf16 %v4279_v47, %v4277_v38  ;;  %v4144_v41 = vpop.f32.mrb[108].mxu1  ;;  %v4280_v49 = vsel %vm4216_vm3, %v4141_v45, %v4248_v39  ;;  %v3983_v39 = vpop.permute.xlu0 %3982 }
 0x593   : > { %v4145_v43 = vadd.f32 %v4144_v41, %v3953_v48  ;;  %v4146_v21 = vpop.f32.mrb[109].mxu1  ;;  %v4318_v52 = vpack.c.bf16 %v4280_v49, %v4278_v17 }
 0x594   : > { %v4147_v55 = vadd.f32 %v4146_v21, %v3953_v48  ;;  %v4148_v23 = vpop.f32.mrb[110].mxu1 }
 0x595   : > { %v4249_v50 = vmul.f32 0.2, %v4145_v43  ;;  %v4149_v7 = vadd.f32 %v4148_v23, %v3958_v46  ;;  %v4150_v58 = vpop.f32.mrb[111].mxu1  ;;  %4405 = vmatprep.subr.bf16.mxu1 %v4318_v52  ;;  %vm4217_vm4 = vcmp.gt.f32.partialorder %v4145_v43, 0.0 }
 0x596   : > { %v4250_v11 = vmul.f32 0.2, %v4147_v55  ;;  %v4151_v62 = vadd.f32 %v4150_v58, %v3958_v46  ;;  %4406 = vmatpush1.bf16.msra.mxu1 %v4317_v26  ;;  %vm4218_vm5 = vcmp.gt.f32.partialorder %v4147_v55, 0.0 }
 0x597   : > { %vm4219_vm6 = vcmp.gt.f32.partialorder %v4149_v7, 0.0  ;;  %v4251_v1 = vmul.f32 0.2, %v4149_v7  ;;  %v4281_v51 = vsel %vm4217_vm4, %v4145_v43, %v4249_v50  ;;  %v3988_v43 = vpop.permute.xlu1 %3987 }
 0x598   : > { %vm4220_vm7 = vcmp.gt.f32.partialorder %v4151_v62, 0.0  ;;  %v4252_v54 = vmul.f32 0.2, %v4151_v62  ;;  %v4282_v4 = vsel %vm4218_vm5, %v4147_v55, %v4250_v11 }
 0x599   : > { %v4283_v13 = vsel %vm4219_vm6, %v4149_v7, %v4251_v1 }
 0x59a   : > { %v4319_v0 = vpack.c.bf16 %v4283_v13, %v4281_v51  ;;  %v4154_v25 = vpop.f32.mrb[112].mxu1  ;;  %v4284_v60 = vsel %vm4220_vm7, %v4151_v62, %v4252_v54  ;;  %v3993_v54 = vpop.permute.xlu0 %3992 }
 0x59b   : > { %v4155_v15 = vadd.f32 %v4154_v25, %v3963_v56  ;;  %v4156_v2 = vpop.f32.mrb[113].mxu1  ;;  %v4320_v63 = vpack.c.bf16 %v4284_v60, %v4282_v4 }
 0x59c   : > { %v4157_v5 = vadd.f32 %v4156_v2, %v3963_v56  ;;  %v4158_v6 = vpop.f32.mrb[114].mxu1 }
 0x59d   : > { %v4253_v28 = vmul.f32 0.2, %v4155_v15  ;;  %v4159_v9 = vadd.f32 %v4158_v6, %v3968_v19  ;;  %v4160_v14 = vpop.f32.mrb[115].mxu1  ;;  %4407 = vmatprep.subr.bf16.mxu1 %v4320_v63  ;;  %vm4221_vm8 = vcmp.gt.f32.partialorder %v4155_v15, 0.0 }
 0x59e   : > { %v4254_v16 = vmul.f32 0.2, %v4157_v5  ;;  %v4161_v53 = vadd.f32 %v4160_v14, %v3968_v19  ;;  %4408 = vmatpush1.bf16.msra.mxu1 %v4319_v0  ;;  %vm4222_vm9 = vcmp.gt.f32.partialorder %v4157_v5, 0.0 }
 0x59f   : > { %vm4223_vm10 = vcmp.gt.f32.partialorder %v4159_v9, 0.0  ;;  %v4255_v22 = vmul.f32 0.2, %v4159_v9  ;;  %v4285_v57 = vsel %vm4221_vm8, %v4155_v15, %v4253_v28  ;;  %v3998_v15 = vpop.permute.xlu1 %3997 }
 0x5a0   : > { %vm4224_vm11 = vcmp.gt.f32.partialorder %v4161_v53, 0.0  ;;  %v4256_v32 = vmul.f32 0.2, %v4161_v53  ;;  %v4286_v34 = vsel %vm4222_vm9, %v4157_v5, %v4254_v16 }
 0x5a1   : > { %v4287_v27 = vsel %vm4223_vm10, %v4159_v9, %v4255_v22 }
 0x5a2   : > { %v4321_v42 = vpack.c.bf16 %v4287_v27, %v4285_v57  ;;  %v4164_v59 = vpop.f32.mrb[116].mxu1  ;;  %v4288_v37 = vsel %vm4224_vm11, %v4161_v53, %v4256_v32  ;;  %v4003_v32 = vpop.permute.xlu0 %4002 }
 0x5a3   : > { %v4165_v61 = vadd.f32 %v4164_v59, %v3973_v31  ;;  %v4166_v10 = vpop.f32.mrb[117].mxu1  ;;  %v4322_v29 = vpack.c.bf16 %v4288_v37, %v4286_v34 }
 0x5a4   : > { %v4167_v40 = vadd.f32 %v4166_v10, %v3973_v31  ;;  %v4168_v18 = vpop.f32.mrb[118].mxu1 }
 0x5a5   : > { %v4257_v8 = vmul.f32 0.2, %v4165_v61  ;;  %v4169_v33 = vadd.f32 %v4168_v18, %v3978_v3  ;;  %v4170_v20 = vpop.f32.mrb[119].mxu1  ;;  %4409 = vmatprep.subr.bf16.mxu1 %v4322_v29  ;;  %vm4225_vm12 = vcmp.gt.f32.partialorder %v4165_v61, 0.0 }
 0x5a6   : > { %v4258_v44 = vmul.f32 0.2, %v4167_v40  ;;  %v4171_v35 = vadd.f32 %v4170_v20, %v3978_v3  ;;  %4410 = vmatpush1.bf16.msra.mxu1 %v4321_v42  ;;  %vm4226_vm13 = vcmp.gt.f32.partialorder %v4167_v40, 0.0 }
 0x5a7   : > { %vm4227_vm14 = vcmp.gt.f32.partialorder %v4169_v33, 0.0  ;;  %v4259_v36 = vmul.f32 0.2, %v4169_v33  ;;  %v4289_v45 = vsel %vm4225_vm12, %v4165_v61, %v4257_v8  ;;  %v4008_v61 = vpop.permute.xlu1 %4007 }
 0x5a8   : > { %vm4228_vm15 = vcmp.gt.f32.partialorder %v4171_v35, 0.0  ;;  %v4260_v12 = vmul.f32 0.2, %v4171_v35  ;;  %v4290_v48 = vsel %vm4226_vm13, %v4167_v40, %v4258_v44 }
 0x5a9   : > { %v4291_v24 = vsel %vm4227_vm14, %v4169_v33, %v4259_v36 }
 0x5aa   : > { %v4323_v38 = vpack.c.bf16 %v4291_v24, %v4289_v45  ;;  %v4174_v47 = vpop.f32.mrb[120].mxu1  ;;  %v4292_v26 = vsel %vm4228_vm15, %v4171_v35, %v4260_v12  ;;  %v4013_v12 = vpop.permute.xlu0 %4012 }
 0x5ab   : > { %v4175_v41 = vadd.f32 %v4174_v47, %v3983_v39  ;;  %v4176_v17 = vpop.f32.mrb[121].mxu1  ;;  %v4324_v49 = vpack.c.bf16 %v4292_v26, %v4290_v48 }
 0x5ac   : > { %v4177_v21 = vadd.f32 %v4176_v17, %v3983_v39  ;;  %v4178_v52 = vpop.f32.mrb[122].mxu1 }
 0x5ad   : > { %v4261_v46 = vmul.f32 0.2, %v4175_v41  ;;  %v4179_v55 = vadd.f32 %v4178_v52, %v3988_v43  ;;  %v4180_v23 = vpop.f32.mrb[123].mxu1  ;;  %4411 = vmatprep.subr.bf16.mxu1 %v4324_v49  ;;  %vm4229_vm0 = vcmp.gt.f32.partialorder %v4175_v41, 0.0 }
 0x5ae   : > { %v4262_v50 = vmul.f32 0.2, %v4177_v21  ;;  %v4181_v7 = vadd.f32 %v4180_v23, %v3988_v43  ;;  %4412 = vmatpush1.bf16.msra.mxu1 %v4323_v38  ;;  %vm4230_vm1 = vcmp.gt.f32.partialorder %v4177_v21, 0.0 }
 0x5af   : > { %vm4231_vm2 = vcmp.gt.f32.partialorder %v4179_v55, 0.0  ;;  %v4263_v58 = vmul.f32 0.2, %v4179_v55  ;;  %v4293_v62 = vsel %vm4229_vm0, %v4175_v41, %v4261_v46  ;;  %v4018_v41 = vpop.permute.xlu1 %4017 }
 0x5b0   : > { %vm4232_vm3 = vcmp.gt.f32.partialorder %v4181_v7, 0.0  ;;  %v4264_v11 = vmul.f32 0.2, %v4181_v7  ;;  %v4294_v56 = vsel %vm4230_vm1, %v4177_v21, %v4262_v50 }
 0x5b1   : > { %v4295_v1 = vsel %vm4231_vm2, %v4179_v55, %v4263_v58 }
 0x5b2   : > { %v4325_v51 = vpack.c.bf16 %v4295_v1, %v4293_v62  ;;  %v4184_v13 = vpop.f32.mrb[124].mxu1  ;;  %v4296_v0 = vsel %vm4232_vm3, %v4181_v7, %v4264_v11 }
 0x5b3   : > { %v4185_v25 = vadd.f32 %v4184_v13, %v3993_v54  ;;  %v4186_v4 = vpop.f32.mrb[125].mxu1  ;;  %v4326_v60 = vpack.c.bf16 %v4296_v0, %v4294_v56  ;;  %v5878_v13 = vld [vmem:[#allocation8 + $0x8] sm:$0xff]   ;;  %v5879_v56 = vld [vmem:[#allocation8 + $0x10] sm:$0xff]   ;;  %v5880_v0 = vld [vmem:[#allocation8 + $0x18] sm:$0xff]  }
 0x5b4   : > { %v4187_v2 = vadd.f32 %v4186_v4, %v3993_v54  ;;  %v4188_v63 = vpop.f32.mrb[126].mxu1  ;;  %v4349_v4 = vpop.permute.xlu1 %4348 }
 0x5b5   : > { %v4265_v19 = vmul.f32 0.2, %v4185_v25  ;;  %v4189_v5 = vadd.f32 %v4188_v63, %v3998_v15  ;;  %v4190_v6 = vpop.f32.mrb[127].mxu1  ;;  %4413 = vmatprep.subr.bf16.mxu1 %v4326_v60  ;;  %vm4233_vm4 = vcmp.gt.f32.partialorder %v4185_v25, 0.0 }
 0x5b6   : > { %v4266_v28 = vmul.f32 0.2, %v4187_v2  ;;  %v4191_v9 = vadd.f32 %v4190_v6, %v3998_v15  ;;  %4414 = vmatpush1.bf16.msra.mxu1 %v4325_v51  ;;  %vm4234_vm5 = vcmp.gt.f32.partialorder %v4187_v2, 0.0  ;;  %v5877_v51 = vld [vmem:[#allocation8] sm:$0xff]  }
 0x5b7   : > { %vm4235_vm6 = vcmp.gt.f32.partialorder %v4189_v5, 0.0  ;;  %v4267_v14 = vmul.f32 0.2, %v4189_v5  ;;  %v4297_v53 = vsel %vm4233_vm4, %v4185_v25, %v4265_v19  ;;  %v4344_v25 = vpop.permute.xlu0 %4343 }
 0x5b8   : > { %vm4236_vm7 = vcmp.gt.f32.partialorder %v4191_v9, 0.0  ;;  %v4268_v16 = vmul.f32 0.2, %v4191_v9  ;;  %v4298_v31 = vsel %vm4234_vm5, %v4187_v2, %v4266_v28  ;;  %v4359_v15 = vpop.permute.xlu1 %4358 }
 0x5b9   : > { %v4299_v22 = vsel %vm4235_vm6, %v4189_v5, %v4267_v14 }
 0x5ba   : > { %v4327_v57 = vpack.c.bf16 %v4299_v22, %v4297_v53  ;;  %v4194_v27 = vpop.f32.mrb[128].mxu1  ;;  %v4300_v42 = vsel %vm4236_vm7, %v4191_v9, %v4268_v16 }
 0x5bb   : > { %v4195_v59 = vadd.f32 %v4194_v27, %v4003_v32  ;;  %v4196_v34 = vpop.f32.mrb[129].mxu1  ;;  %v4328_v37 = vpack.c.bf16 %v4300_v42, %v4298_v31  ;;  %v4354_v60 = vpop.permute.xlu0 %4353 }
 0x5bc   : > { %v4197_v10 = vadd.f32 %v4196_v34, %v4003_v32  ;;  %v4198_v29 = vpop.f32.mrb[130].mxu1  ;;  %v4542_v63 = vpop.permute.xlu1 %4541 }
 0x5bd   : > { %v4269_v3 = vmul.f32 0.2, %v4195_v59  ;;  %v4199_v40 = vadd.f32 %v4198_v29, %v4008_v61  ;;  %v4200_v18 = vpop.f32.mrb[131].mxu1  ;;  %4415 = vmatprep.subr.bf16.mxu1 %v4328_v37  ;;  %vm4237_vm8 = vcmp.gt.f32.partialorder %v4195_v59, 0.0 }
 0x5be   : > { %v4270_v8 = vmul.f32 0.2, %v4197_v10  ;;  %v4201_v33 = vadd.f32 %v4200_v18, %v4008_v61  ;;  %4416 = vmatpush1.bf16.msra.mxu1 %v4327_v57  ;;  %vm4238_vm9 = vcmp.gt.f32.partialorder %v4197_v10, 0.0 }
 0x5bf   : > { %vm4239_vm10 = vcmp.gt.f32.partialorder %v4199_v40, 0.0  ;;  %v4271_v20 = vmul.f32 0.2, %v4199_v40  ;;  %v4301_v35 = vsel %vm4237_vm8, %v4195_v59, %v4269_v3  ;;  %v4537_v2 = vpop.permute.xlu0 %4536 }
 0x5c0   : > { %vm4240_vm11 = vcmp.gt.f32.partialorder %v4201_v33, 0.0  ;;  %v4272_v44 = vmul.f32 0.2, %v4201_v33  ;;  %v4302_v39 = vsel %vm4238_vm9, %v4197_v10, %v4270_v8  ;;  %v4547_v57 = vpop.permute.xlu1 %4546 }
 0x5c1   : > { %v4303_v36 = vsel %vm4239_vm10, %v4199_v40, %v4271_v20 }
 0x5c2   : > { %v4329_v45 = vpack.c.bf16 %v4303_v36, %v4301_v35  ;;  %v4204_v24 = vpop.f32.mrb[132].mxu1  ;;  %v4304_v38 = vsel %vm4240_vm11, %v4201_v33, %v4272_v44 }
 0x5c3   : > { %v4205_v47 = vadd.f32 %v4204_v24, %v4013_v12  ;;  %v4206_v48 = vpop.f32.mrb[133].mxu1  ;;  %v4330_v26 = vpack.c.bf16 %v4304_v38, %v4302_v39  ;;  %v4364_v22 = vpop.permute.xlu0 %4363 }
 0x5c4   : > { %v4207_v17 = vadd.f32 %v4206_v48, %v4013_v12  ;;  %v4208_v49 = vpop.f32.mrb[134].mxu1  ;;  %v4552_v36 = vpop.permute.xlu1 %4551 }
 0x5c5   : > { %v4273_v43 = vmul.f32 0.2, %v4205_v47  ;;  %v4209_v21 = vadd.f32 %v4208_v49, %v4018_v41  ;;  %v4210_v52 = vpop.f32.mrb[135].mxu1  ;;  %4417 = vmatprep.subr.bf16.mxu1 %v4330_v26  ;;  %vm4241_vm12 = vcmp.gt.f32.partialorder %v4205_v47, 0.0 }
 0x5c6   : > { %v4274_v46 = vmul.f32 0.2, %v4207_v17  ;;  %v4211_v55 = vadd.f32 %v4210_v52, %v4018_v41  ;;  %4418 = vmatpush1.bf16.msra.mxu1 %v4329_v45  ;;  %vm4242_vm13 = vcmp.gt.f32.partialorder %v4207_v17, 0.0 }
 0x5c7   : > { %vm4243_vm14 = vcmp.gt.f32.partialorder %v4209_v21, 0.0  ;;  %v4275_v23 = vmul.f32 0.2, %v4209_v21  ;;  %v4305_v7 = vsel %vm4241_vm12, %v4205_v47, %v4273_v43  ;;  %v4369_v33 = vpop.permute.xlu0 %4368 }
 0x5c8   : > { %vm4244_vm15 = vcmp.gt.f32.partialorder %v4211_v55, 0.0  ;;  %v4276_v50 = vmul.f32 0.2, %v4211_v55  ;;  %v4306_v62 = vsel %vm4242_vm13, %v4207_v17, %v4274_v46 }
 0x5c9   : > { %v4307_v58 = vsel %vm4243_vm14, %v4209_v21, %v4275_v23 }
 0x5ca   : > { %v4331_v11 = vpack.c.bf16 %v4307_v58, %v4305_v7  ;;  %v4308_v1 = vsel %vm4244_vm15, %v4211_v55, %v4276_v50  ;;  %v4557_v7 = vpop.permute.xlu1 %4556 }
 0x5cb   : > { %v4332_v54 = vpack.c.bf16 %v4308_v1, %v4306_v62  ;;  %v4374_v52 = vpop.permute.xlu0 %4373 }
 0x5cd   : > { %4419 = vmatprep.subr.bf16.mxu1 %v4332_v54 }
 0x5ce   : > { %4420 = vmatpush1.bf16.msra.mxu1 %v4331_v11 }
 0x5d1   : > { %4438 = vmatmul.mubr.bf16.vlgmr.msra.gmra.mrb[136].mxu1 %v5877_v51 }
 0x5d2   : > { %4447 = vmatprep.mubr.bf16.mxu1 %v6105_v30 }
 0x5d9   : > { %4448 = vmatmul.mubr.bf16.gmra.mrb[140].mxu1 %v5878_v13 }
 0x5da   : > { %4457 = vmatprep.mubr.bf16.mxu1 %v6105_v30 }
 0x5e1   : > { %4458 = vmatmul.mubr.bf16.gmra.mrb[144].mxu1 %v5879_v56 }
 0x5e2   : > { %4467 = vmatprep.mubr.bf16.mxu1 %v6105_v30 }
 0x5e9   : > { %4468 = vmatmul.mubr.bf16.gmra.mrb[148].mxu1 %v5880_v0 }
 0x6a4   : > { %v4439_v19 = vpop.f32.mrb[136].mxu1 }
 0x6a5   : > { %v4440_v5 = vadd.f32 %v4439_v19, %v4344_v25  ;;  %v4441_v6 = vpop.f32.mrb[137].mxu1 }
 0x6a6   : > { %v4442_v28 = vadd.f32 %v4441_v6, %v4344_v25  ;;  %v4443_v9 = vpop.f32.mrb[138].mxu1 }
 0x6a7   : > { %vm4478_vm0 = vcmp.gt.f32.partialorder %v4440_v5, 0.0  ;;  %v4494_v14 = vmul.f32 0.2, %v4440_v5  ;;  %v4444_v16 = vadd.f32 %v4443_v9, %v4349_v4  ;;  %v4445_v53 = vpop.f32.mrb[139].mxu1  ;;  %v4562_v9 = vpop.permute.xlu1 %4561 }
 0x6a8   : > { %vm4479_vm1 = vcmp.gt.f32.partialorder %v4442_v28, 0.0  ;;  %v4495_v30 = vmul.f32 0.2, %v4442_v28  ;;  %v4446_v32 = vadd.f32 %v4445_v53, %v4349_v4 }
 0x6a9   : > { %v4510_v27 = vsel %vm4478_vm0, %v4440_v5, %v4494_v14  ;;  %vm4480_vm2 = vcmp.gt.f32.partialorder %v4444_v16, 0.0  ;;  %v4496_v31 = vmul.f32 0.2, %v4444_v16 }
 0x6aa   : > { %v4511_v42 = vsel %vm4479_vm1, %v4442_v28, %v4495_v30  ;;  %vm4481_vm3 = vcmp.gt.f32.partialorder %v4446_v32, 0.0  ;;  %v4497_v59 = vmul.f32 0.2, %v4446_v32  ;;  %v4574_v37 = vmul.f32 %v4537_v2, %v4510_v27  ;;  %v4379_v28 = vpop.permute.xlu0 %4378 }
 0x6ab   : > { %v4512_v34 = vsel %vm4480_vm2, %v4444_v16, %v4496_v31  ;;  %v4575_v3 = vmul.f32 %v4537_v2, %v4511_v42 }
 0x6ac   : > { %v4576_v61 = vmul.f32 %v4542_v63, %v4512_v34  ;;  %v4513_v10 = vsel %vm4481_vm3, %v4446_v32, %v4497_v59  ;;  %v4449_v29 = vpop.f32.mrb[140].mxu1 }
 0x6ad   : > { %v4577_v40 = vmul.f32 %v4542_v63, %v4513_v10  ;;  %v4450_v18 = vadd.f32 %v4449_v29, %v4354_v60  ;;  %v4451_v8 = vpop.f32.mrb[141].mxu1 }
 0x6ae   : > { %v4590_v20 = vadd.f32 %v4576_v61, %v4574_v37  ;;  %v4452_v44 = vadd.f32 %v4451_v8, %v4354_v60  ;;  %v4453_v35 = vpop.f32.mrb[142].mxu1  ;;  %v4567_v8 = vpop.permute.xlu0 %4566 }
 0x6af   : > { %v4603_v12 = vadd.f32 %v4577_v40, %v4575_v3  ;;  %vm4482_vm4 = vcmp.gt.f32.partialorder %v4450_v18, 0.0  ;;  %v4498_v45 = vmul.f32 0.2, %v4450_v18  ;;  %v4454_v24 = vadd.f32 %v4453_v35, %v4359_v15  ;;  %v4455_v39 = vpop.f32.mrb[143].mxu1 }
 0x6b0   : > { %vm4483_vm5 = vcmp.gt.f32.partialorder %v4452_v44, 0.0  ;;  %v4499_v38 = vmul.f32 0.2, %v4452_v44  ;;  %v4456_v47 = vadd.f32 %v4455_v39, %v4359_v15 }
 0x6b1   : > { %v4514_v48 = vsel %vm4482_vm4, %v4450_v18, %v4498_v45  ;;  %vm4484_vm6 = vcmp.gt.f32.partialorder %v4454_v24, 0.0  ;;  %v4500_v26 = vmul.f32 0.2, %v4454_v24 }
 0x6b2   : > { %v4578_v41 = vmul.f32 %v4547_v57, %v4514_v48  ;;  %v4515_v17 = vsel %vm4483_vm5, %v4452_v44, %v4499_v38  ;;  %vm4485_vm7 = vcmp.gt.f32.partialorder %v4456_v47, 0.0  ;;  %v4501_v49 = vmul.f32 0.2, %v4456_v47 }
 0x6b3   : > { %v4579_v43 = vmul.f32 %v4547_v57, %v4515_v17  ;;  %v4516_v21 = vsel %vm4484_vm6, %v4454_v24, %v4500_v26 }
 0x6b4   : > { %v4591_v46 = vadd.f32 %v4590_v20, %v4578_v41  ;;  %v4580_v55 = vmul.f32 %v4552_v36, %v4516_v21  ;;  %v4517_v23 = vsel %vm4485_vm7, %v4456_v47, %v4501_v49  ;;  %v4459_v50 = vpop.f32.mrb[144].mxu1 }
 0x6b5   : > { %v4604_v58 = vadd.f32 %v4603_v12, %v4579_v43  ;;  %v4581_v11 = vmul.f32 %v4552_v36, %v4517_v23  ;;  %v4460_v62 = vadd.f32 %v4459_v50, %v4364_v22  ;;  %v4461_v1 = vpop.f32.mrb[145].mxu1  ;;  %v4572_v12 = vpop.permute.xlu1 %4571 }
 0x6b6   : > { %v4592_v54 = vadd.f32 %v4591_v46, %v4580_v55  ;;  %v4462_v51 = vadd.f32 %v4461_v1, %v4364_v22  ;;  %v4463_v13 = vpop.f32.mrb[146].mxu1 }
 0x6b7   : > { %v4605_v56 = vadd.f32 %v4604_v58, %v4581_v11  ;;  %vm4486_vm8 = vcmp.gt.f32.partialorder %v4460_v62, 0.0  ;;  %v4502_v0 = vmul.f32 0.2, %v4460_v62  ;;  %v4464_v25 = vadd.f32 %v4463_v13, %v4369_v33  ;;  %v4465_v4 = vpop.f32.mrb[147].mxu1 }
 0x6b8   : > { %vm4487_vm9 = vcmp.gt.f32.partialorder %v4462_v51, 0.0  ;;  %v4503_v60 = vmul.f32 0.2, %v4462_v51  ;;  %v4466_v15 = vadd.f32 %v4465_v4, %v4369_v33 }
 0x6b9   : > { %v4518_v2 = vsel %vm4486_vm8, %v4460_v62, %v4502_v0  ;;  %vm4488_vm10 = vcmp.gt.f32.partialorder %v4464_v25, 0.0  ;;  %v4504_v63 = vmul.f32 0.2, %v4464_v25 }
 0x6ba   : > { %v4582_v19 = vmul.f32 %v4557_v7, %v4518_v2  ;;  %v4519_v5 = vsel %vm4487_vm9, %v4462_v51, %v4503_v60  ;;  %vm4489_vm11 = vcmp.gt.f32.partialorder %v4466_v15, 0.0  ;;  %v4505_v6 = vmul.f32 0.2, %v4466_v15 }
 0x6bb   : > { %v4583_v14 = vmul.f32 %v4557_v7, %v4519_v5  ;;  %v4520_v16 = vsel %vm4488_vm10, %v4464_v25, %v4504_v63  ;;  %v6106_v60 = vmov 1966171168   ;;  %v4632_v2 = vlaneseq }
 0x6bc   : > { %v4593_v53 = vadd.f32 %v4592_v54, %v4582_v19  ;;  %v4584_v22 = vmul.f32 %v4562_v9, %v4520_v16  ;;  %v4521_v30 = vsel %vm4489_vm11, %v4466_v15, %v4505_v6  ;;  %v4469_v32 = vpop.f32.mrb[148].mxu1  ;;  %v4630_v15 = vunpack.c.l.s4 %v6106_v60 }
 0x6bd   : > { %v4606_v57 = vadd.f32 %v4605_v56, %v4583_v14  ;;  %v4585_v27 = vmul.f32 %v4562_v9, %v4521_v30  ;;  %v4470_v31 = vadd.f32 %v4469_v32, %v4374_v52  ;;  %v4471_v42 = vpop.f32.mrb[149].mxu1  ;;  %v4633_v19 = vshrl.u32 %v4632_v2, 7 }
 0x6be   : > { %v4594_v59 = vadd.f32 %v4593_v53, %v4584_v22  ;;  %v4472_v34 = vadd.f32 %v4471_v42, %v4374_v52  ;;  %v4473_v37 = vpop.f32.mrb[150].mxu1  ;;  %v4631_v63 = vunpack.c.0.s8 %v4630_v15  ;;  %vm4646_vm0 = vcmp.lt.s32.totalorder %v4632_v2, 256 }
 0x6bf   : > { %v4607_v61 = vadd.f32 %v4606_v57, %v4585_v27  ;;  %vm4490_vm12 = vcmp.gt.f32.partialorder %v4470_v31, 0.0  ;;  %v4506_v10 = vmul.f32 0.2, %v4470_v31  ;;  %v4474_v29 = vadd.f32 %v4473_v37, %v4379_v28  ;;  %v4475_v3 = vpop.f32.mrb[151].mxu1 }
 0x6c0   : > { %vm4491_vm13 = vcmp.gt.f32.partialorder %v4472_v34, 0.0  ;;  %v4507_v40 = vmul.f32 0.2, %v4472_v34  ;;  %v4476_v18 = vadd.f32 %v4475_v3, %v4379_v28  ;;  %v4634_v6 = vsub.s32 %v4631_v63, %v4633_v19 }
 0x6c1   : > { %v4522_v33 = vsel %vm4490_vm12, %v4470_v31, %v4506_v10  ;;  %vm4492_vm14 = vcmp.gt.f32.partialorder %v4474_v29, 0.0  ;;  %v4508_v20 = vmul.f32 0.2, %v4474_v29 }
 0x6c2   : > { %v4586_v44 = vmul.f32 %v4567_v8, %v4522_v33  ;;  %v4523_v35 = vsel %vm4491_vm13, %v4472_v34, %v4507_v40  ;;  %vm4493_vm15 = vcmp.gt.f32.partialorder %v4476_v18, 0.0  ;;  %v4509_v36 = vmul.f32 0.2, %v4476_v18 }
 0x6c3   : > { %v4587_v45 = vmul.f32 %v4567_v8, %v4523_v35  ;;  %v4524_v24 = vsel %vm4492_vm14, %v4474_v29, %v4508_v20 }
 0x6c4   : > { %v4595_v39 = vadd.f32 %v4594_v59, %v4586_v44  ;;  %v4588_v38 = vmul.f32 %v4572_v12, %v4524_v24  ;;  %v4525_v47 = vsel %vm4493_vm15, %v4476_v18, %v4509_v36 }
 0x6c5   : > { %v4608_v48 = vadd.f32 %v4607_v61, %v4587_v45  ;;  %v4589_v26 = vmul.f32 %v4572_v12, %v4525_v47 }
 0x6c6   : > { %v4596_v41 = vadd.f32 %v4595_v39, %v4588_v38 }
 0x6c7   : > { %v4609_v17 = vadd.f32 %v4608_v48, %v4589_v26 }
 0x6c8   : > { %v4597_v49 = vrot.slane %v4596_v41, 4 }
 0x6c9   : > { %v4610_v43 = vrot.slane %v4609_v17, 4 }
 0x6ca   : > { %v4598_v21 = vadd.f32 %v4597_v49, %v4596_v41 }
 0x6cb   : > { %v4611_v52 = vadd.f32 %v4610_v43, %v4609_v17 }
 0x6cc   : > { %v4599_v46 = vrot.slane %v4598_v21, 2 }
 0x6cd   : > { %v4612_v55 = vrot.slane %v4611_v52, 2 }
 0x6ce   : > { %v4600_v23 = vadd.f32 %v4599_v46, %v4598_v21 }
 0x6cf   : > { %v4613_v50 = vadd.f32 %v4612_v55, %v4611_v52 }
 0x6d0   : > { %v4601_v7 = vrot.slane %v4600_v23, 1 }
 0x6d1   : > { %v4614_v58 = vrot.slane %v4613_v50, 1 }
 0x6d2   : > { %v4602_v11 = vadd.f32 %v4601_v7, %v4600_v23 }
 0x6d3   : > { %v4615_v62 = vadd.f32 %v4614_v58, %v4613_v50 }
 0x6d4   : > { %v4616_v1 = vsub.f32 0.0, %v4602_v11 }
 0x6d5   : > { %v4617_v54 = vsub.f32 0.0, %v4615_v62 }
 0x6d6   : > { %v4618_v51 = vmul.f32 1.442695, %v4616_v1 }
 0x6d7   : > { %v4620_v13 = vmul.f32 1.442695, %v4617_v54 }
 0x6d8   : > { %5881 = vpow2.f32 %v4618_v51 }
 0x6d9   : > { %5883 = vpow2.f32 %v4620_v13 }
 0x6e2   : > { %v5882_v56 = vpop.eup %5881 }
 0x6e3   : > { %v5884_v0 = vpop.eup %5883  ;;  %v4622_v25 = vadd.f32 1.0, %v5882_v56 }
 0x6e4   : > { %v4623_v4 = vadd.f32 1.0, %v5884_v0 }
 0x6e5   : > { %5885 = vrcp.f32 %v4622_v25 }
 0x6e6   : > { %5887 = vrcp.f32 %v4623_v4 }
 0x6ef   : > { %v5886_v5 = vpop.eup %5885 }
 0x6f0   : > { %v5888_v28 = vpop.eup %5887 }
 0x6f1   : > { %v4628_v9 = vcombine.low %v5886_v5, %v5888_v28 }
 0x6f3   : > { %v4635_v14 = vrot.slane %v4628_v9, %v4634_v6 }
 0x6f5   : > { %v4642_v16 = vrot.slane %v4635_v14, %v4634_v6 }
 0x6f7   : > { %4648 = vst.msk [vmem:[%s412_s16] sm:$0x3] %vm4646_vm0, %v4642_v16 }
 0x6f8   : > { %6016 = shalt.err (!%p6013_p0)
}
 0x6f9   : > { %s6017_s28 = scalar_lea.hbm %s6967_s19, 32  ;;  %s6021_s24 = scalar_lea.hbm %s7056_s17, 64 }
 0x6fa   : > { %p6018_p4 = scmp.ne.s32.totalorder %s6967_s19, %s6017_s28  ;;  %p6022_p12 = scmp.lt.u32.totalorder %s6967_s19, %s7056_s17 }
 0x6fb   : > { %p6023_p1 = scmp.lt.u32.totalorder %s6021_s24, %s6017_s28  ;;  %p6025_p13 = scmp.lt.u32.totalorder %s6017_s28, %s6967_s19 }
 0x6fc   : > { %p6019_p2 = pnand %p6018_p4, %p6309_p10 }
 0x6fd   : > { %p6024_p11 = por %p6023_p1, %p6022_p12 }
 0x6fe   : > { %p6020_p8 = pneg %p6019_p2 }
 0x6ff   : > { %p6026_p6 = por %p6025_p13, %p6024_p11 }
 0x701   : > { %p6027_p3 = pnand %p6026_p6, %p6020_p8 }
 0x703   : > { %6030 = shalt.err (!%p6027_p3)
}
 0x704   : > { %5380 = dma.vmem_to_hbm [thread:$0]  (%p6309_p10), %s6969_s20, 32, %s6967_s19, %s4650_s21  }
 0x705 PF: > { %s7057_s25 = sld [smem:[#allocation15_spill]]  ;;  %s7058_s26 = sld [smem:[#allocation17_spill]] }
 0x706   : > { %p7060_p7 = scmp.ge.s32.totalorder %s6093_s14, 2 }
 0x70b   : > { %s4678_s9 = sand.u32 1, %s7057_s25   ;;  %p7059_p5 = scmp.ne.s32.totalorder %s7058_s26, 0 }
 0x70c   : > { %s4679_s5 = scalar_lea.sflag [#allocation4], %s4678_s9 }
 0x70d   : > { %p5397_p9 = pnand %p7060_p7, %p7059_p5 }
 0x70f   : > { %6068 = dma.done.wait (!%p5397_p9), %s4679_s5, 32  }
 0x710   : > { %6070 = vsyncadd (!%p5397_p9), %s4679_s5, 4294967264  ;;  %s27_s14 = sadd.s32 1, %s6093_s14   ;;  %s7061_s30 = smov %s6077_s10 }
 0x711   : > { %p24_p0 = scmp.ge.s32.totalorder %s27_s14, 4   ;;  %s7062_s10 = smov %s6081_s11 }
 0x712   : > { %s7063_s11 = smov %s6321_s27  ;;  %s7064_s12 = smov %s6089_s13 }
 0x713   : > { %s7065_s13 = smov %s7067_s29  ;;  %26 = sbr.rel (!%p24_p0) target bundleno = 12 (0xc), region = 113 }
 0x71a   :  { %4684 = vsyncpa [#allocation3], 1 }
 0x71b   :  { %4686 = vsyncpa [#allocation3 + $0x1], 1 }
 0x71c   :  { %4687 = vsyncpa [#allocation6], 1 }
 0x71d   :  { %4688 = vsyncpa [#allocation9], 1 }
 0x71e   :  { %4689 = vsyncpa [#allocation4], 1 }
 0x71f   :  { %4691 = vsyncpa [#allocation4 + $0x1], 1 }

</bundles_post_ra>
